<compile_context>
chip_gen: v7x
topology: tpu7x:2x2x1
jax: 0.10.0
libtpu: 0.0.40
codegen_flags: <defaults>
</compile_context>

<pallas_src>
import jax
import jax.numpy as jnp
from jax import lax
from jax.experimental import pallas as pl
from jax.experimental.pallas import tpu as pltpu

KSIZE = 5      # nn.Conv1d kernel_size
PAD = 1        # nn.Conv1d padding
BN_EPS = 1e-5  # nn.BatchNorm1d default eps
LANE = 128


def _round_up(x, m):
    return (x + m - 1) // m * m


def _pick_batch_tile(n):
    # One TensorCore processes a whole batch tile per grid step.  Bigger tiles
    # fill the MXU M dimension and amortise the ~0.35us per-step overhead
    # (v5e/v6e are single-TC, extra steps are pure serial overhead); large
    # batches still produce >=2 steps so both v7x TensorCores get work.
    return max(1, min(8, n))


# ----------------------------------------------------------------------------
# Fused conv stack: Conv1d + folded bias/BN + activation + MaxPool, x5 layers
# ----------------------------------------------------------------------------
def _make_convstack_kernel(B_t, cfg):
    n_layers = len(cfg)

    def kernel(x_ref, *rest):
        # rest = (w0, sh0, ..., w4, sh4, o_ref, bufA, bufB)
        o_ref = rest[2 * n_layers]
        bufs = (rest[2 * n_layers + 1], rest[2 * n_layers + 2])

        for li, lc in enumerate(cfg):
            w_ref = rest[2 * li]          # (KSIZE, C_in, C_out) bf16
            sh_ref = rest[2 * li + 1]     # (1, C_out) f32 (bias + folded BN)
            L, C = lc["L_in"], lc["C_in"]
            Lo, Co = lc["L_out"], lc["C_out"]
            pool = lc["pool"]
            rows_out = Lo // 2 if pool else Lo
            in_ref = x_ref if li == 0 else bufs[(li + 1) % 2]
            sh = sh_ref[...]

            if pool:
                # Row-selection matrices picking even / odd conv output rows.
                # 1.0/0.0 entries in f32 make the selection matmul exact; it
                # runs on the MXU (which has plenty of slack), so MaxPool1d
                # needs no reshapes or strided loads.
                m = rows_out
                r = lax.broadcasted_iota(jnp.int32, (m, Lo), 0)
                c = lax.broadcasted_iota(jnp.int32, (m, Lo), 1)
                sel_e = jnp.where(2 * r == c, 1.0, 0.0)
                sel_o = jnp.where(2 * r + 1 == c, 1.0, 0.0)

            outs = []
            for b in range(B_t):
                # Conv1d(kernel=5, padding=1) as 5 shifted bf16 matmuls
                # accumulated in f32; the +-1 halo rows are zeros written by
                # the previous layer (or by the wrapper pad for layer 0).
                z = None
                for t in range(KSIZE):
                    lhs = in_ref[b, t:t + Lo, :C].astype(jnp.bfloat16)
                    part = jnp.dot(lhs, w_ref[t],
                                   preferred_element_type=jnp.float32)
                    z = part if z is None else z + part
                if pool:
                    # MaxPool1d(2, 2) (floor, drops an odd tail row).
                    z = jnp.maximum(
                        jnp.dot(sel_e, z, preferred_element_type=jnp.float32),
                        jnp.dot(sel_o, z, preferred_element_type=jnp.float32))
                z = z + sh
                y = jnp.maximum(z, 0.0) if lc["act"] == "relu" else jnp.tanh(z)
                outs.append(y)            # (rows_out, Co) f32

            if li < n_layers - 1:
                # Write next layer's input (zero halo rows + interior) into
                # the ping-pong VMEM scratch read by layer li+1.
                dst = bufs[li % 2]
                zrow = jnp.zeros((1, Co), jnp.float32)
                for b in range(B_t):
                    dst[b, 0:1, :Co] = zrow
                    dst[b, 1:rows_out + 1, :Co] = outs[b]
                    dst[b, rows_out + 1:rows_out + 2, :Co] = zrow
            else:
                for b in range(B_t):
                    o_ref[b] = outs[b].astype(o_ref.dtype)

    return kernel


def conv_stack(x_pad_nlc, conv_ws, conv_shifts, act_mid, act_last):
    """Fused 5-layer Conv1d stack.

    x_pad_nlc: (N, L0 + 2, C0) float32, already zero-padded along L for the
    first conv's halo.  Returns (N, L5, C5) bf16 features (position-major)."""
    N, Lp0, C0 = x_pad_nlc.shape
    L0 = Lp0 - 2 * PAD
    pools = (True, True, False, False, False)

    cfg = []
    L, C_prev = L0, C0
    for i, w in enumerate(conv_ws):
        _, C_in, Co = w.shape
        assert C_in == C_prev
        Lo = L + 2 * PAD - KSIZE + 1          # = L - 2
        cfg.append(dict(L_in=L, C_in=C_in, C_out=Co, L_out=Lo, pool=pools[i],
                        act=(act_mid if i < len(conv_ws) - 1 else act_last)))
        L = Lo // 2 if pools[i] else Lo
        C_prev = Co
    L5, C5 = L, conv_ws[-1].shape[2]

    B_t = _pick_batch_tile(N)
    Np = pl.cdiv(N, B_t) * B_t
    xp = x_pad_nlc if Np == N else jnp.pad(x_pad_nlc,
                                           ((0, Np - N), (0, 0), (0, 0)))

    in_specs = [pl.BlockSpec((B_t, Lp0, C0), lambda i: (i, 0, 0))]
    args = [xp]
    for w, sh in zip(conv_ws, conv_shifts):
        in_specs.append(pl.BlockSpec(w.shape, lambda i: (0, 0, 0)))
        in_specs.append(pl.BlockSpec(sh.shape, lambda i: (0, 0)))
        args += [w, sh]

    # Ping-pong VMEM buffers holding the halo-padded intermediate activations
    # between the fused conv layers (nothing goes back to HBM).
    lp_max = max(lc["L_in"] + 2 * PAD for lc in cfg[1:])
    c_max = max(lc["C_in"] for lc in cfg[1:])

    out = pl.pallas_call(
        _make_convstack_kernel(B_t, cfg),
        out_shape=jax.ShapeDtypeStruct((Np, L5, C5), jnp.bfloat16),
        grid=(Np // B_t,),
        in_specs=in_specs,
        out_specs=pl.BlockSpec((B_t, L5, C5), lambda i: (i, 0, 0)),
        scratch_shapes=[pltpu.VMEM((B_t, lp_max, c_max), jnp.float32),
                        pltpu.VMEM((B_t, lp_max, c_max), jnp.float32)],
        compiler_params=pltpu.CompilerParams(
            dimension_semantics=("parallel",),
            vmem_limit_bytes=32 * 1024 * 1024),
    )(*args)
    return out[:N] if Np != N else out


# ----------------------------------------------------------------------------
# Fused fc1 + fc2: one pallas_call, fc1 activation kept in a VMEM scratch
# ----------------------------------------------------------------------------
def _make_fc_kernel(gl, C5):
    def kernel(x_ref, w1_ref, b1_ref, w2_ref, b2_ref, o_ref, h_ref):
        k = pl.program_id(1)

        @pl.when(k == 0)
        def _():
            h_ref[...] = jnp.zeros_like(h_ref)

        # fc1 K-reduction over `gl` conv positions per grid step.  The PyTorch
        # (C, L)-major Flatten order is folded into fc1's weight row
        # permutation, so no flatten / transpose of activations is needed.
        acc = h_ref[...]
        for l in range(gl):
            acc = acc + jnp.dot(x_ref[:, l, :].astype(jnp.bfloat16),
                                w1_ref[l * C5:(l + 1) * C5, :],
                                preferred_element_type=jnp.float32)
        h_ref[...] = acc

        @pl.when(k == pl.num_programs(1) - 1)
        def _():
            h = h_ref[...] + b1_ref[...]
            o_ref[...] = (jnp.dot(h.astype(jnp.bfloat16), w2_ref[...],
                                  preferred_element_type=jnp.float32)
                          + b2_ref[...]).astype(o_ref.dtype)

    return kernel


def _pick_pos_group(L5, C5, H):
    """Conv positions folded into one fc1 K-step.  gl must equal L5 or be a
    multiple of 8 dividing L5 (BlockSpec (8,128) rule on the feats block)."""
    limit = 4 * 1024 * 1024          # ~4 MiB of bf16 fc1 weight per K step
    if L5 * C5 * H * 2 <= limit:
        return L5
    g = (L5 // 8) * 8
    while g >= 8:
        if L5 % g == 0 and g * C5 * H * 2 <= limit:
            return g
        g -= 8
    return L5


def fc_fused(feats, prep):
    """feats: (N, L5, C5) bf16 conv features.  Returns (N, 256) f32."""
    w1, b1 = prep["fc1_w"], prep["fc1_b"]
    w2, b2 = prep["fc2_w"], prep["fc2_b"]
    N, L5, C5 = feats.shape
    assert w1.shape[0] == L5 * C5
    H, D = w1.shape[1], w2.shape[1]

    if N <= 128:
        tm, Np, xp = N, N, feats
    else:
        tm = 128
        Np = _round_up(N, tm)
        xp = jnp.pad(feats, ((0, Np - N), (0, 0), (0, 0)))
    gl = _pick_pos_group(L5, C5, H)

    out = pl.pallas_call(
        _make_fc_kernel(gl, C5),
        out_shape=jax.ShapeDtypeStruct((Np, D), jnp.float32),
        grid=(Np // tm, L5 // gl),
        in_specs=[
            pl.BlockSpec((tm, gl, C5), lambda i, k: (i, k, 0)),
            pl.BlockSpec((gl * C5, H), lambda i, k: (k, 0)),
            pl.BlockSpec((1, H), lambda i, k: (0, 0)),
            pl.BlockSpec((H, D), lambda i, k: (0, 0)),
            pl.BlockSpec((1, D), lambda i, k: (0, 0)),
        ],
        out_specs=pl.BlockSpec((tm, D), lambda i, k: (i, 0)),
        scratch_shapes=[pltpu.VMEM((tm, H), jnp.float32)],
        compiler_params=pltpu.CompilerParams(
            dimension_semantics=("parallel", "arbitrary"),
            vmem_limit_bytes=32 * 1024 * 1024),
    )(xp, w1, b1, w2, b2)
    return out[:N] if Np != N else out


# ----------------------------------------------------------------------------
# Parameter initialization (deterministic, shapes per module __init__)
# ----------------------------------------------------------------------------
def init_params(key, input_dim, num_channels, nf):
    chans = [num_channels, nf, nf * 2, nf * 4, nf * 8, nf * 16]
    params = {"conv": [], "bn": []}
    for i in range(5):
        key, kw, kb = jax.random.split(key, 3)
        c_in, c_out = chans[i], chans[i + 1]
        bound = 1.0 / (c_in * KSIZE) ** 0.5
        w = jax.random.uniform(kw, (c_out, c_in, KSIZE), jnp.float32,
                               -bound, bound)
        b = jax.random.uniform(kb, (c_out,), jnp.float32, -bound, bound)
        params["conv"].append((w, b))
        if i >= 1:  # BatchNorm1d after conv layers 2..5 (inference stats)
            key, kg, kbe = jax.random.split(key, 3)
            gamma = 1.0 + 0.1 * jax.random.normal(kg, (c_out,), jnp.float32)
            beta = 0.1 * jax.random.normal(kbe, (c_out,), jnp.float32)
            mean = jnp.zeros((c_out,), jnp.float32)   # running_mean
            var = jnp.ones((c_out,), jnp.float32)     # running_var
            params["bn"].append((gamma, beta, mean, var))
        else:
            params["bn"].append(None)

    # Mirror the dummy-forward feature count computation of __init__.
    L = input_dim
    L = (L - 2) // 2   # conv1 + pool
    L = (L - 2) // 2   # conv2 + pool
    L = L - 2          # conv3
    L = L - 2          # conv4
    L = L - 2          # conv5
    num_features = chans[-1] * L

    fcs = []
    for d_in, d_out in [(num_features, 2048), (2048, 256)]:
        key, kw, kb = jax.random.split(key, 3)
        bound = 1.0 / d_in ** 0.5
        w = jax.random.uniform(kw, (d_out, d_in), jnp.float32, -bound, bound)
        b = jax.random.uniform(kb, (d_out,), jnp.float32, -bound, bound)
        fcs.append((w, b))
    params["fc"] = fcs
    return params


# ----------------------------------------------------------------------------
# One-time parameter preparation (outside jit): BN fold, transposes, bf16 cast
# ----------------------------------------------------------------------------
def prepare_params(params):
    prep = {"conv_w": [], "conv_shift": []}
    for i, (w, b) in enumerate(params["conv"]):
        c_out, c_in, _ = w.shape
        bn = params["bn"][i]
        if bn is None:
            scale = jnp.ones((c_out,), jnp.float32)
            shift = b
        else:
            gamma, beta, mean, var = bn
            s = gamma / jnp.sqrt(var + BN_EPS)   # inference BN folded into conv
            scale = s
            shift = s * (b - mean) + beta
        # Tap-major weight (KSIZE, C_in, C_out), BN scale folded, bf16 for MXU.
        wk = jnp.transpose(w, (2, 1, 0)) * scale[None, None, :]
        prep["conv_w"].append(wk.astype(jnp.bfloat16))
        prep["conv_shift"].append(shift.reshape(1, c_out).astype(jnp.float32))

    (w1, b1), (w2, b2) = params["fc"]
    c5 = params["conv"][-1][0].shape[0]
    f = w1.shape[1]
    l5 = f // c5
    # Fold PyTorch's (C, L)-major Flatten into a row permutation of the
    # pre-transposed fc1 weight: row (l*C5 + c) <- torch column (c*L5 + l).
    w1p = jnp.transpose(w1.reshape(w1.shape[0], c5, l5), (2, 1, 0))
    prep["fc1_w"] = w1p.reshape(f, w1.shape[0]).astype(jnp.bfloat16)
    prep["fc1_b"] = b1.reshape(1, -1).astype(jnp.float32)
    prep["fc2_w"] = w2.T.astype(jnp.bfloat16)
    prep["fc2_b"] = b2.reshape(1, -1).astype(jnp.float32)
    return prep


# ----------------------------------------------------------------------------
# Forward pass
# ----------------------------------------------------------------------------
def forward(prep, x_ncl,
            index_activation_middle_layer=0, index_activation_last_layer=0):
    # TODO(synk): nn.Dropout is identity in eval mode; not applied.
    acts = ("relu", "tanh")  # mirrors Activation_list = [ReLU, Tanh]
    act_mid = acts[index_activation_middle_layer]
    act_last = acts[index_activation_last_layer]

    # NCL -> NLC once on the tiny raw input + the first conv's zero halo.
    x = jnp.transpose(x_ncl, (0, 2, 1)).astype(jnp.float32)
    x = jnp.pad(x, ((0, 0), (PAD, PAD), (0, 0)))
    feats = conv_stack(x, prep["conv_w"], prep["conv_shift"],
                       act_mid, act_last)           # (N, L5, C5) bf16
    return fc_fused(feats, prep)                    # (N, 256) f32


# ----------------------------------------------------------------------------
if __name__ == "__main__":
    key = jax.random.PRNGKey(0)
    batch, num_channels, input_dim, nf = 2, 4, 64, 4
    kparams, kx = jax.random.split(key)
    params = init_params(kparams, input_dim, num_channels, nf)
    prep = prepare_params(params)   # one-time weight folding / transposes
    x = jax.random.normal(kx, (batch, num_channels, input_dim), jnp.float32)

    fwd = jax.jit(lambda p, xx: forward(p, xx, 0, 0))
    out = jax.block_until_ready(fwd(prep, x))
    assert out.shape == (batch, 256), out.shape
    assert bool(jnp.all(jnp.isfinite(out)))
    print("KERNEL_OK")
</pallas_src>

<mosaic_0001>
module attributes {stable_mosaic.version = 11 : i64} {
  func.func @kernel(%arg0: i32, %arg1: memref<2x66x4xf32, #tpu.memory_space<vmem>>, %arg2: memref<5x4x4xbf16, #tpu.memory_space<vmem>>, %arg3: memref<1x4xf32, #tpu.memory_space<vmem>>, %arg4: memref<5x4x8xbf16, #tpu.memory_space<vmem>>, %arg5: memref<1x8xf32, #tpu.memory_space<vmem>>, %arg6: memref<5x8x16xbf16, #tpu.memory_space<vmem>>, %arg7: memref<1x16xf32, #tpu.memory_space<vmem>>, %arg8: memref<5x16x32xbf16, #tpu.memory_space<vmem>>, %arg9: memref<1x32xf32, #tpu.memory_space<vmem>>, %arg10: memref<5x32x64xbf16, #tpu.memory_space<vmem>>, %arg11: memref<1x64xf32, #tpu.memory_space<vmem>>, %arg12: memref<2x8x64xbf16, #tpu.memory_space<vmem>>, %arg13: memref<2x33x32xf32, #tpu.memory_space<vmem>>, %arg14: memref<2x33x32xf32, #tpu.memory_space<vmem>>) attributes {dimension_semantics = [#tpu.dimension_semantics<parallel>], iteration_bounds = array<i64: 1>, scalar_prefetch = 0 : i64, scratch_operands = 2 : i64, tpu.core_type = #tpu.core_type<tc>, window_params = [{transform_indices = @transform_0, window_bounds = array<i64: 2, 66, 4>}, {pipeline_mode = #tpu.pipeline_mode<synchronous>, transform_indices = @transform_1, window_bounds = array<i64: 5, 4, 4>}, {pipeline_mode = #tpu.pipeline_mode<synchronous>, transform_indices = @transform_2, window_bounds = array<i64: 1, 4>}, {pipeline_mode = #tpu.pipeline_mode<synchronous>, transform_indices = @transform_3, window_bounds = array<i64: 5, 4, 8>}, {pipeline_mode = #tpu.pipeline_mode<synchronous>, transform_indices = @transform_4, window_bounds = array<i64: 1, 8>}, {pipeline_mode = #tpu.pipeline_mode<synchronous>, transform_indices = @transform_5, window_bounds = array<i64: 5, 8, 16>}, {pipeline_mode = #tpu.pipeline_mode<synchronous>, transform_indices = @transform_6, window_bounds = array<i64: 1, 16>}, {pipeline_mode = #tpu.pipeline_mode<synchronous>, transform_indices = @transform_7, window_bounds = array<i64: 5, 16, 32>}, {pipeline_mode = #tpu.pipeline_mode<synchronous>, transform_indices = @transform_8, window_bounds = array<i64: 1, 32>}, {pipeline_mode = #tpu.pipeline_mode<synchronous>, transform_indices = @transform_9, window_bounds = array<i64: 5, 32, 64>}, {pipeline_mode = #tpu.pipeline_mode<synchronous>, transform_indices = @transform_10, window_bounds = array<i64: 1, 64>}, {transform_indices = @transform_11, window_bounds = array<i64: 2, 8, 64>}]} {
    %c0 = arith.constant 0 : index
    %c0_0 = arith.constant 0 : index
    %0 = vector.load %arg3[%c0, %c0_0] : memref<1x4xf32, #tpu.memory_space<vmem>>, vector<1x4xf32>
    %1 = tpu.iota {dimensions = array<i32: 0>} : vector<31x62xi32>
    %2 = tpu.iota {dimensions = array<i32: 1>} : vector<31x62xi32>
    %c2_i32 = arith.constant 2 : i32
    %3 = vector.broadcast %c2_i32 : i32 to vector<31x62xi32>
    %4 = arith.muli %3, %1 : vector<31x62xi32>
    %5 = arith.cmpi eq, %4, %2 : vector<31x62xi32>
    %cst = arith.constant 1.000000e+00 : f32
    %cst_1 = arith.constant 0.000000e+00 : f32
    %6 = vector.broadcast %cst : f32 to vector<31x62xf32>
    %7 = vector.broadcast %cst_1 : f32 to vector<31x62xf32>
    %8 = arith.select %5, %6, %7 : vector<31x62xi1>, vector<31x62xf32>
    %c2_i32_2 = arith.constant 2 : i32
    %9 = vector.broadcast %c2_i32_2 : i32 to vector<31x62xi32>
    %10 = arith.muli %9, %1 : vector<31x62xi32>
    %c1_i32 = arith.constant 1 : i32
    %11 = vector.broadcast %c1_i32 : i32 to vector<31x62xi32>
    %12 = arith.addi %10, %11 : vector<31x62xi32>
    %13 = arith.cmpi eq, %12, %2 : vector<31x62xi32>
    %cst_3 = arith.constant 1.000000e+00 : f32
    %cst_4 = arith.constant 0.000000e+00 : f32
    %14 = vector.broadcast %cst_3 : f32 to vector<31x62xf32>
    %15 = vector.broadcast %cst_4 : f32 to vector<31x62xf32>
    %16 = arith.select %13, %14, %15 : vector<31x62xi1>, vector<31x62xf32>
    %c0_5 = arith.constant 0 : index
    %c0_6 = arith.constant 0 : index
    %c0_7 = arith.constant 0 : index
    %17 = vector.load %arg1[%c0_5, %c0_6, %c0_7] : memref<2x66x4xf32, #tpu.memory_space<vmem>>, vector<1x62x4xf32>
    %18 = vector.shape_cast %17 : vector<1x62x4xf32> to vector<62x4xf32>
    %19 = arith.truncf %18 : vector<62x4xf32> to vector<62x4xbf16>
    %c0_8 = arith.constant 0 : index
    %c0_9 = arith.constant 0 : index
    %c0_10 = arith.constant 0 : index
    %20 = vector.load %arg2[%c0_8, %c0_9, %c0_10] : memref<5x4x4xbf16, #tpu.memory_space<vmem>>, vector<1x4x4xbf16>
    %21 = vector.shape_cast %20 : vector<1x4x4xbf16> to vector<4x4xbf16>
    %cst_11 = arith.constant dense<0.000000e+00> : vector<62x4xf32>
    %22 = tpu.matmul %19, %21, %cst_11 {dimension_numbers = #tpu.dot_dimension_numbers<[1], [0], [0], [1], [0, 0, 1, 1], [], []>} : vector<62x4xbf16>, vector<4x4xbf16>, vector<62x4xf32> -> vector<62x4xf32>
    %c0_12 = arith.constant 0 : index
    %c1 = arith.constant 1 : index
    %c0_13 = arith.constant 0 : index
    %23 = vector.load %arg1[%c0_12, %c1, %c0_13] : memref<2x66x4xf32, #tpu.memory_space<vmem>>, vector<1x62x4xf32>
    %24 = vector.shape_cast %23 : vector<1x62x4xf32> to vector<62x4xf32>
    %25 = arith.truncf %24 : vector<62x4xf32> to vector<62x4xbf16>
    %c1_14 = arith.constant 1 : index
    %c0_15 = arith.constant 0 : index
    %c0_16 = arith.constant 0 : index
    %26 = vector.load %arg2[%c1_14, %c0_15, %c0_16] : memref<5x4x4xbf16, #tpu.memory_space<vmem>>, vector<1x4x4xbf16>
    %27 = vector.shape_cast %26 : vector<1x4x4xbf16> to vector<4x4xbf16>
    %cst_17 = arith.constant dense<0.000000e+00> : vector<62x4xf32>
    %28 = tpu.matmul %25, %27, %cst_17 {dimension_numbers = #tpu.dot_dimension_numbers<[1], [0], [0], [1], [0, 0, 1, 1], [], []>} : vector<62x4xbf16>, vector<4x4xbf16>, vector<62x4xf32> -> vector<62x4xf32>
    %29 = arith.addf %22, %28 : vector<62x4xf32>
    %c0_18 = arith.constant 0 : index
    %c2 = arith.constant 2 : index
    %c0_19 = arith.constant 0 : index
    %30 = vector.load %arg1[%c0_18, %c2, %c0_19] : memref<2x66x4xf32, #tpu.memory_space<vmem>>, vector<1x62x4xf32>
    %31 = vector.shape_cast %30 : vector<1x62x4xf32> to vector<62x4xf32>
    %32 = arith.truncf %31 : vector<62x4xf32> to vector<62x4xbf16>
    %c2_20 = arith.constant 2 : index
    %c0_21 = arith.constant 0 : index
    %c0_22 = arith.constant 0 : index
    %33 = vector.load %arg2[%c2_20, %c0_21, %c0_22] : memref<5x4x4xbf16, #tpu.memory_space<vmem>>, vector<1x4x4xbf16>
    %34 = vector.shape_cast %33 : vector<1x4x4xbf16> to vector<4x4xbf16>
    %cst_23 = arith.constant dense<0.000000e+00> : vector<62x4xf32>
    %35 = tpu.matmul %32, %34, %cst_23 {dimension_numbers = #tpu.dot_dimension_numbers<[1], [0], [0], [1], [0, 0, 1, 1], [], []>} : vector<62x4xbf16>, vector<4x4xbf16>, vector<62x4xf32> -> vector<62x4xf32>
    %36 = arith.addf %29, %35 : vector<62x4xf32>
    %c0_24 = arith.constant 0 : index
    %c3 = arith.constant 3 : index
    %c0_25 = arith.constant 0 : index
    %37 = vector.load %arg1[%c0_24, %c3, %c0_25] : memref<2x66x4xf32, #tpu.memory_space<vmem>>, vector<1x62x4xf32>
    %38 = vector.shape_cast %37 : vector<1x62x4xf32> to vector<62x4xf32>
    %39 = arith.truncf %38 : vector<62x4xf32> to vector<62x4xbf16>
    %c3_26 = arith.constant 3 : index
    %c0_27 = arith.constant 0 : index
    %c0_28 = arith.constant 0 : index
    %40 = vector.load %arg2[%c3_26, %c0_27, %c0_28] : memref<5x4x4xbf16, #tpu.memory_space<vmem>>, vector<1x4x4xbf16>
    %41 = vector.shape_cast %40 : vector<1x4x4xbf16> to vector<4x4xbf16>
    %cst_29 = arith.constant dense<0.000000e+00> : vector<62x4xf32>
    %42 = tpu.matmul %39, %41, %cst_29 {dimension_numbers = #tpu.dot_dimension_numbers<[1], [0], [0], [1], [0, 0, 1, 1], [], []>} : vector<62x4xbf16>, vector<4x4xbf16>, vector<62x4xf32> -> vector<62x4xf32>
    %43 = arith.addf %36, %42 : vector<62x4xf32>
    %c0_30 = arith.constant 0 : index
    %c4 = arith.constant 4 : index
    %c0_31 = arith.constant 0 : index
    %44 = vector.load %arg1[%c0_30, %c4, %c0_31] : memref<2x66x4xf32, #tpu.memory_space<vmem>>, vector<1x62x4xf32>
    %45 = vector.shape_cast %44 : vector<1x62x4xf32> to vector<62x4xf32>
    %46 = arith.truncf %45 : vector<62x4xf32> to vector<62x4xbf16>
    %c4_32 = arith.constant 4 : index
    %c0_33 = arith.constant 0 : index
    %c0_34 = arith.constant 0 : index
    %47 = vector.load %arg2[%c4_32, %c0_33, %c0_34] : memref<5x4x4xbf16, #tpu.memory_space<vmem>>, vector<1x4x4xbf16>
    %48 = vector.shape_cast %47 : vector<1x4x4xbf16> to vector<4x4xbf16>
    %cst_35 = arith.constant dense<0.000000e+00> : vector<62x4xf32>
    %49 = tpu.matmul %46, %48, %cst_35 {dimension_numbers = #tpu.dot_dimension_numbers<[1], [0], [0], [1], [0, 0, 1, 1], [], []>} : vector<62x4xbf16>, vector<4x4xbf16>, vector<62x4xf32> -> vector<62x4xf32>
    %50 = arith.addf %43, %49 : vector<62x4xf32>
    %cst_36 = arith.constant dense<0.000000e+00> : vector<31x4xf32>
    %51 = tpu.matmul %8, %50, %cst_36 {dimension_numbers = #tpu.dot_dimension_numbers<[1], [0], [0], [1], [0, 0, 1, 1], [], []>} : vector<31x62xf32>, vector<62x4xf32>, vector<31x4xf32> -> vector<31x4xf32>
    %cst_37 = arith.constant dense<0.000000e+00> : vector<31x4xf32>
    %52 = tpu.matmul %16, %50, %cst_37 {dimension_numbers = #tpu.dot_dimension_numbers<[1], [0], [0], [1], [0, 0, 1, 1], [], []>} : vector<31x62xf32>, vector<62x4xf32>, vector<31x4xf32> -> vector<31x4xf32>
    %53 = arith.maximumf %51, %52 : vector<31x4xf32>
    %54 = vector.broadcast %0 : vector<1x4xf32> to vector<31x4xf32>
    %55 = arith.addf %53, %54 : vector<31x4xf32>
    %cst_38 = arith.constant 0.000000e+00 : f32
    %56 = vector.broadcast %cst_38 : f32 to vector<31x4xf32>
    %57 = arith.maximumf %55, %56 : vector<31x4xf32>
    %c1_39 = arith.constant 1 : index
    %c0_40 = arith.constant 0 : index
    %c0_41 = arith.constant 0 : index
    %58 = vector.load %arg1[%c1_39, %c0_40, %c0_41] : memref<2x66x4xf32, #tpu.memory_space<vmem>>, vector<1x62x4xf32>
    %59 = vector.shape_cast %58 : vector<1x62x4xf32> to vector<62x4xf32>
    %60 = arith.truncf %59 : vector<62x4xf32> to vector<62x4xbf16>
    %c0_42 = arith.constant 0 : index
    %c0_43 = arith.constant 0 : index
    %c0_44 = arith.constant 0 : index
    %61 = vector.load %arg2[%c0_42, %c0_43, %c0_44] : memref<5x4x4xbf16, #tpu.memory_space<vmem>>, vector<1x4x4xbf16>
    %62 = vector.shape_cast %61 : vector<1x4x4xbf16> to vector<4x4xbf16>
    %cst_45 = arith.constant dense<0.000000e+00> : vector<62x4xf32>
    %63 = tpu.matmul %60, %62, %cst_45 {dimension_numbers = #tpu.dot_dimension_numbers<[1], [0], [0], [1], [0, 0, 1, 1], [], []>} : vector<62x4xbf16>, vector<4x4xbf16>, vector<62x4xf32> -> vector<62x4xf32>
    %c1_46 = arith.constant 1 : index
    %c1_47 = arith.constant 1 : index
    %c0_48 = arith.constant 0 : index
    %64 = vector.load %arg1[%c1_46, %c1_47, %c0_48] : memref<2x66x4xf32, #tpu.memory_space<vmem>>, vector<1x62x4xf32>
    %65 = vector.shape_cast %64 : vector<1x62x4xf32> to vector<62x4xf32>
    %66 = arith.truncf %65 : vector<62x4xf32> to vector<62x4xbf16>
    %c1_49 = arith.constant 1 : index
    %c0_50 = arith.constant 0 : index
    %c0_51 = arith.constant 0 : index
    %67 = vector.load %arg2[%c1_49, %c0_50, %c0_51] : memref<5x4x4xbf16, #tpu.memory_space<vmem>>, vector<1x4x4xbf16>
    %68 = vector.shape_cast %67 : vector<1x4x4xbf16> to vector<4x4xbf16>
    %cst_52 = arith.constant dense<0.000000e+00> : vector<62x4xf32>
    %69 = tpu.matmul %66, %68, %cst_52 {dimension_numbers = #tpu.dot_dimension_numbers<[1], [0], [0], [1], [0, 0, 1, 1], [], []>} : vector<62x4xbf16>, vector<4x4xbf16>, vector<62x4xf32> -> vector<62x4xf32>
    %70 = arith.addf %63, %69 : vector<62x4xf32>
    %c1_53 = arith.constant 1 : index
    %c2_54 = arith.constant 2 : index
    %c0_55 = arith.constant 0 : index
    %71 = vector.load %arg1[%c1_53, %c2_54, %c0_55] : memref<2x66x4xf32, #tpu.memory_space<vmem>>, vector<1x62x4xf32>
    %72 = vector.shape_cast %71 : vector<1x62x4xf32> to vector<62x4xf32>
    %73 = arith.truncf %72 : vector<62x4xf32> to vector<62x4xbf16>
    %c2_56 = arith.constant 2 : index
    %c0_57 = arith.constant 0 : index
    %c0_58 = arith.constant 0 : index
    %74 = vector.load %arg2[%c2_56, %c0_57, %c0_58] : memref<5x4x4xbf16, #tpu.memory_space<vmem>>, vector<1x4x4xbf16>
    %75 = vector.shape_cast %74 : vector<1x4x4xbf16> to vector<4x4xbf16>
    %cst_59 = arith.constant dense<0.000000e+00> : vector<62x4xf32>
    %76 = tpu.matmul %73, %75, %cst_59 {dimension_numbers = #tpu.dot_dimension_numbers<[1], [0], [0], [1], [0, 0, 1, 1], [], []>} : vector<62x4xbf16>, vector<4x4xbf16>, vector<62x4xf32> -> vector<62x4xf32>
    %77 = arith.addf %70, %76 : vector<62x4xf32>
    %c1_60 = arith.constant 1 : index
    %c3_61 = arith.constant 3 : index
    %c0_62 = arith.constant 0 : index
    %78 = vector.load %arg1[%c1_60, %c3_61, %c0_62] : memref<2x66x4xf32, #tpu.memory_space<vmem>>, vector<1x62x4xf32>
    %79 = vector.shape_cast %78 : vector<1x62x4xf32> to vector<62x4xf32>
    %80 = arith.truncf %79 : vector<62x4xf32> to vector<62x4xbf16>
    %c3_63 = arith.constant 3 : index
    %c0_64 = arith.constant 0 : index
    %c0_65 = arith.constant 0 : index
    %81 = vector.load %arg2[%c3_63, %c0_64, %c0_65] : memref<5x4x4xbf16, #tpu.memory_space<vmem>>, vector<1x4x4xbf16>
    %82 = vector.shape_cast %81 : vector<1x4x4xbf16> to vector<4x4xbf16>
    %cst_66 = arith.constant dense<0.000000e+00> : vector<62x4xf32>
    %83 = tpu.matmul %80, %82, %cst_66 {dimension_numbers = #tpu.dot_dimension_numbers<[1], [0], [0], [1], [0, 0, 1, 1], [], []>} : vector<62x4xbf16>, vector<4x4xbf16>, vector<62x4xf32> -> vector<62x4xf32>
    %84 = arith.addf %77, %83 : vector<62x4xf32>
    %c1_67 = arith.constant 1 : index
    %c4_68 = arith.constant 4 : index
    %c0_69 = arith.constant 0 : index
    %85 = vector.load %arg1[%c1_67, %c4_68, %c0_69] : memref<2x66x4xf32, #tpu.memory_space<vmem>>, vector<1x62x4xf32>
    %86 = vector.shape_cast %85 : vector<1x62x4xf32> to vector<62x4xf32>
    %87 = arith.truncf %86 : vector<62x4xf32> to vector<62x4xbf16>
    %c4_70 = arith.constant 4 : index
    %c0_71 = arith.constant 0 : index
    %c0_72 = arith.constant 0 : index
    %88 = vector.load %arg2[%c4_70, %c0_71, %c0_72] : memref<5x4x4xbf16, #tpu.memory_space<vmem>>, vector<1x4x4xbf16>
    %89 = vector.shape_cast %88 : vector<1x4x4xbf16> to vector<4x4xbf16>
    %cst_73 = arith.constant dense<0.000000e+00> : vector<62x4xf32>
    %90 = tpu.matmul %87, %89, %cst_73 {dimension_numbers = #tpu.dot_dimension_numbers<[1], [0], [0], [1], [0, 0, 1, 1], [], []>} : vector<62x4xbf16>, vector<4x4xbf16>, vector<62x4xf32> -> vector<62x4xf32>
    %91 = arith.addf %84, %90 : vector<62x4xf32>
    %cst_74 = arith.constant dense<0.000000e+00> : vector<31x4xf32>
    %92 = tpu.matmul %8, %91, %cst_74 {dimension_numbers = #tpu.dot_dimension_numbers<[1], [0], [0], [1], [0, 0, 1, 1], [], []>} : vector<31x62xf32>, vector<62x4xf32>, vector<31x4xf32> -> vector<31x4xf32>
    %cst_75 = arith.constant dense<0.000000e+00> : vector<31x4xf32>
    %93 = tpu.matmul %16, %91, %cst_75 {dimension_numbers = #tpu.dot_dimension_numbers<[1], [0], [0], [1], [0, 0, 1, 1], [], []>} : vector<31x62xf32>, vector<62x4xf32>, vector<31x4xf32> -> vector<31x4xf32>
    %94 = arith.maximumf %92, %93 : vector<31x4xf32>
    %95 = vector.broadcast %0 : vector<1x4xf32> to vector<31x4xf32>
    %96 = arith.addf %94, %95 : vector<31x4xf32>
    %cst_76 = arith.constant 0.000000e+00 : f32
    %97 = vector.broadcast %cst_76 : f32 to vector<31x4xf32>
    %98 = arith.maximumf %96, %97 : vector<31x4xf32>
    %cst_77 = arith.constant 0.000000e+00 : f32
    %99 = vector.broadcast %cst_77 : f32 to vector<1x4xf32>
    %c0_78 = arith.constant 0 : index
    %c0_79 = arith.constant 0 : index
    %c0_80 = arith.constant 0 : index
    %100 = vector.load %arg13[%c0_78, %c0_79, %c0_80] : memref<2x33x32xf32, #tpu.memory_space<vmem>>, vector<1x1x4xf32>
    %101 = vector.shape_cast %100 : vector<1x1x4xf32> to vector<1x4xf32>
    %102 = vector.shape_cast %99 : vector<1x4xf32> to vector<1x1x4xf32>
    tpu.vector_store %arg13[%c0_78, %c0_79, %c0_80], %102 {strides = array<i32>} : memref<2x33x32xf32, #tpu.memory_space<vmem>>, vector<1x1x4xf32>,
    %c0_81 = arith.constant 0 : index
    %c1_82 = arith.constant 1 : index
    %c0_83 = arith.constant 0 : index
    %103 = vector.load %arg13[%c0_81, %c1_82, %c0_83] : memref<2x33x32xf32, #tpu.memory_space<vmem>>, vector<1x31x4xf32>
    %104 = vector.shape_cast %103 : vector<1x31x4xf32> to vector<31x4xf32>
    %105 = vector.shape_cast %57 : vector<31x4xf32> to vector<1x31x4xf32>
    tpu.vector_store %arg13[%c0_81, %c1_82, %c0_83], %105 {strides = array<i32>} : memref<2x33x32xf32, #tpu.memory_space<vmem>>, vector<1x31x4xf32>,
    %c0_84 = arith.constant 0 : index
    %c32 = arith.constant 32 : index
    %c0_85 = arith.constant 0 : index
    %106 = vector.load %arg13[%c0_84, %c32, %c0_85] : memref<2x33x32xf32, #tpu.memory_space<vmem>>, vector<1x1x4xf32>
    %107 = vector.shape_cast %106 : vector<1x1x4xf32> to vector<1x4xf32>
    %108 = vector.shape_cast %99 : vector<1x4xf32> to vector<1x1x4xf32>
    tpu.vector_store %arg13[%c0_84, %c32, %c0_85], %108 {strides = array<i32>} : memref<2x33x32xf32, #tpu.memory_space<vmem>>, vector<1x1x4xf32>,
    %c1_86 = arith.constant 1 : index
    %c0_87 = arith.constant 0 : index
    %c0_88 = arith.constant 0 : index
    %109 = vector.load %arg13[%c1_86, %c0_87, %c0_88] : memref<2x33x32xf32, #tpu.memory_space<vmem>>, vector<1x1x4xf32>
    %110 = vector.shape_cast %109 : vector<1x1x4xf32> to vector<1x4xf32>
    %111 = vector.shape_cast %99 : vector<1x4xf32> to vector<1x1x4xf32>
    tpu.vector_store %arg13[%c1_86, %c0_87, %c0_88], %111 {strides = array<i32>} : memref<2x33x32xf32, #tpu.memory_space<vmem>>, vector<1x1x4xf32>,
    %c1_89 = arith.constant 1 : index
    %c1_90 = arith.constant 1 : index
    %c0_91 = arith.constant 0 : index
    %112 = vector.load %arg13[%c1_89, %c1_90, %c0_91] : memref<2x33x32xf32, #tpu.memory_space<vmem>>, vector<1x31x4xf32>
    %113 = vector.shape_cast %112 : vector<1x31x4xf32> to vector<31x4xf32>
    %114 = vector.shape_cast %98 : vector<31x4xf32> to vector<1x31x4xf32>
    tpu.vector_store %arg13[%c1_89, %c1_90, %c0_91], %114 {strides = array<i32>} : memref<2x33x32xf32, #tpu.memory_space<vmem>>, vector<1x31x4xf32>,
    %c1_92 = arith.constant 1 : index
    %c32_93 = arith.constant 32 : index
    %c0_94 = arith.constant 0 : index
    %115 = vector.load %arg13[%c1_92, %c32_93, %c0_94] : memref<2x33x32xf32, #tpu.memory_space<vmem>>, vector<1x1x4xf32>
    %116 = vector.shape_cast %115 : vector<1x1x4xf32> to vector<1x4xf32>
    %117 = vector.shape_cast %99 : vector<1x4xf32> to vector<1x1x4xf32>
    tpu.vector_store %arg13[%c1_92, %c32_93, %c0_94], %117 {strides = array<i32>} : memref<2x33x32xf32, #tpu.memory_space<vmem>>, vector<1x1x4xf32>,
    %c0_95 = arith.constant 0 : index
    %c0_96 = arith.constant 0 : index
    %118 = vector.load %arg5[%c0_95, %c0_96] : memref<1x8xf32, #tpu.memory_space<vmem>>, vector<1x8xf32>
    %119 = tpu.iota {dimensions = array<i32: 0>} : vector<14x29xi32>
    %120 = tpu.iota {dimensions = array<i32: 1>} : vector<14x29xi32>
    %c2_i32_97 = arith.constant 2 : i32
    %121 = vector.broadcast %c2_i32_97 : i32 to vector<14x29xi32>
    %122 = arith.muli %121, %119 : vector<14x29xi32>
    %123 = arith.cmpi eq, %122, %120 : vector<14x29xi32>
    %cst_98 = arith.constant 1.000000e+00 : f32
    %cst_99 = arith.constant 0.000000e+00 : f32
    %124 = vector.broadcast %cst_98 : f32 to vector<14x29xf32>
    %125 = vector.broadcast %cst_99 : f32 to vector<14x29xf32>
    %126 = arith.select %123, %124, %125 : vector<14x29xi1>, vector<14x29xf32>
    %c2_i32_100 = arith.constant 2 : i32
    %127 = vector.broadcast %c2_i32_100 : i32 to vector<14x29xi32>
    %128 = arith.muli %127, %119 : vector<14x29xi32>
    %c1_i32_101 = arith.constant 1 : i32
    %129 = vector.broadcast %c1_i32_101 : i32 to vector<14x29xi32>
    %130 = arith.addi %128, %129 : vector<14x29xi32>
    %131 = arith.cmpi eq, %130, %120 : vector<14x29xi32>
    %cst_102 = arith.constant 1.000000e+00 : f32
    %cst_103 = arith.constant 0.000000e+00 : f32
    %132 = vector.broadcast %cst_102 : f32 to vector<14x29xf32>
    %133 = vector.broadcast %cst_103 : f32 to vector<14x29xf32>
    %134 = arith.select %131, %132, %133 : vector<14x29xi1>, vector<14x29xf32>
    %c0_104 = arith.constant 0 : index
    %c0_105 = arith.constant 0 : index
    %c0_106 = arith.constant 0 : index
    %135 = vector.load %arg13[%c0_104, %c0_105, %c0_106] : memref<2x33x32xf32, #tpu.memory_space<vmem>>, vector<1x29x4xf32>
    %136 = vector.shape_cast %135 : vector<1x29x4xf32> to vector<29x4xf32>
    %137 = arith.truncf %136 : vector<29x4xf32> to vector<29x4xbf16>
    %c0_107 = arith.constant 0 : index
    %c0_108 = arith.constant 0 : index
    %c0_109 = arith.constant 0 : index
    %138 = vector.load %arg4[%c0_107, %c0_108, %c0_109] : memref<5x4x8xbf16, #tpu.memory_space<vmem>>, vector<1x4x8xbf16>
    %139 = vector.shape_cast %138 : vector<1x4x8xbf16> to vector<4x8xbf16>
    %cst_110 = arith.constant dense<0.000000e+00> : vector<29x8xf32>
    %140 = tpu.matmul %137, %139, %cst_110 {dimension_numbers = #tpu.dot_dimension_numbers<[1], [0], [0], [1], [0, 0, 1, 1], [], []>} : vector<29x4xbf16>, vector<4x8xbf16>, vector<29x8xf32> -> vector<29x8xf32>
    %c0_111 = arith.constant 0 : index
    %c1_112 = arith.constant 1 : index
    %c0_113 = arith.constant 0 : index
    %141 = vector.load %arg13[%c0_111, %c1_112, %c0_113] : memref<2x33x32xf32, #tpu.memory_space<vmem>>, vector<1x29x4xf32>
    %142 = vector.shape_cast %141 : vector<1x29x4xf32> to vector<29x4xf32>
    %143 = arith.truncf %142 : vector<29x4xf32> to vector<29x4xbf16>
    %c1_114 = arith.constant 1 : index
    %c0_115 = arith.constant 0 : index
    %c0_116 = arith.constant 0 : index
    %144 = vector.load %arg4[%c1_114, %c0_115, %c0_116] : memref<5x4x8xbf16, #tpu.memory_space<vmem>>, vector<1x4x8xbf16>
    %145 = vector.shape_cast %144 : vector<1x4x8xbf16> to vector<4x8xbf16>
    %cst_117 = arith.constant dense<0.000000e+00> : vector<29x8xf32>
    %146 = tpu.matmul %143, %145, %cst_117 {dimension_numbers = #tpu.dot_dimension_numbers<[1], [0], [0], [1], [0, 0, 1, 1], [], []>} : vector<29x4xbf16>, vector<4x8xbf16>, vector<29x8xf32> -> vector<29x8xf32>
    %147 = arith.addf %140, %146 : vector<29x8xf32>
    %c0_118 = arith.constant 0 : index
    %c2_119 = arith.constant 2 : index
    %c0_120 = arith.constant 0 : index
    %148 = vector.load %arg13[%c0_118, %c2_119, %c0_120] : memref<2x33x32xf32, #tpu.memory_space<vmem>>, vector<1x29x4xf32>
    %149 = vector.shape_cast %148 : vector<1x29x4xf32> to vector<29x4xf32>
    %150 = arith.truncf %149 : vector<29x4xf32> to vector<29x4xbf16>
    %c2_121 = arith.constant 2 : index
    %c0_122 = arith.constant 0 : index
    %c0_123 = arith.constant 0 : index
    %151 = vector.load %arg4[%c2_121, %c0_122, %c0_123] : memref<5x4x8xbf16, #tpu.memory_space<vmem>>, vector<1x4x8xbf16>
    %152 = vector.shape_cast %151 : vector<1x4x8xbf16> to vector<4x8xbf16>
    %cst_124 = arith.constant dense<0.000000e+00> : vector<29x8xf32>
    %153 = tpu.matmul %150, %152, %cst_124 {dimension_numbers = #tpu.dot_dimension_numbers<[1], [0], [0], [1], [0, 0, 1, 1], [], []>} : vector<29x4xbf16>, vector<4x8xbf16>, vector<29x8xf32> -> vector<29x8xf32>
    %154 = arith.addf %147, %153 : vector<29x8xf32>
    %c0_125 = arith.constant 0 : index
    %c3_126 = arith.constant 3 : index
    %c0_127 = arith.constant 0 : index
    %155 = vector.load %arg13[%c0_125, %c3_126, %c0_127] : memref<2x33x32xf32, #tpu.memory_space<vmem>>, vector<1x29x4xf32>
    %156 = vector.shape_cast %155 : vector<1x29x4xf32> to vector<29x4xf32>
    %157 = arith.truncf %156 : vector<29x4xf32> to vector<29x4xbf16>
    %c3_128 = arith.constant 3 : index
    %c0_129 = arith.constant 0 : index
    %c0_130 = arith.constant 0 : index
    %158 = vector.load %arg4[%c3_128, %c0_129, %c0_130] : memref<5x4x8xbf16, #tpu.memory_space<vmem>>, vector<1x4x8xbf16>
    %159 = vector.shape_cast %158 : vector<1x4x8xbf16> to vector<4x8xbf16>
    %cst_131 = arith.constant dense<0.000000e+00> : vector<29x8xf32>
    %160 = tpu.matmul %157, %159, %cst_131 {dimension_numbers = #tpu.dot_dimension_numbers<[1], [0], [0], [1], [0, 0, 1, 1], [], []>} : vector<29x4xbf16>, vector<4x8xbf16>, vector<29x8xf32> -> vector<29x8xf32>
    %161 = arith.addf %154, %160 : vector<29x8xf32>
    %c0_132 = arith.constant 0 : index
    %c4_133 = arith.constant 4 : index
    %c0_134 = arith.constant 0 : index
    %162 = vector.load %arg13[%c0_132, %c4_133, %c0_134] : memref<2x33x32xf32, #tpu.memory_space<vmem>>, vector<1x29x4xf32>
    %163 = vector.shape_cast %162 : vector<1x29x4xf32> to vector<29x4xf32>
    %164 = arith.truncf %163 : vector<29x4xf32> to vector<29x4xbf16>
    %c4_135 = arith.constant 4 : index
    %c0_136 = arith.constant 0 : index
    %c0_137 = arith.constant 0 : index
    %165 = vector.load %arg4[%c4_135, %c0_136, %c0_137] : memref<5x4x8xbf16, #tpu.memory_space<vmem>>, vector<1x4x8xbf16>
    %166 = vector.shape_cast %165 : vector<1x4x8xbf16> to vector<4x8xbf16>
    %cst_138 = arith.constant dense<0.000000e+00> : vector<29x8xf32>
    %167 = tpu.matmul %164, %166, %cst_138 {dimension_numbers = #tpu.dot_dimension_numbers<[1], [0], [0], [1], [0, 0, 1, 1], [], []>} : vector<29x4xbf16>, vector<4x8xbf16>, vector<29x8xf32> -> vector<29x8xf32>
    %168 = arith.addf %161, %167 : vector<29x8xf32>
    %cst_139 = arith.constant dense<0.000000e+00> : vector<14x8xf32>
    %169 = tpu.matmul %126, %168, %cst_139 {dimension_numbers = #tpu.dot_dimension_numbers<[1], [0], [0], [1], [0, 0, 1, 1], [], []>} : vector<14x29xf32>, vector<29x8xf32>, vector<14x8xf32> -> vector<14x8xf32>
    %cst_140 = arith.constant dense<0.000000e+00> : vector<14x8xf32>
    %170 = tpu.matmul %134, %168, %cst_140 {dimension_numbers = #tpu.dot_dimension_numbers<[1], [0], [0], [1], [0, 0, 1, 1], [], []>} : vector<14x29xf32>, vector<29x8xf32>, vector<14x8xf32> -> vector<14x8xf32>
    %171 = arith.maximumf %169, %170 : vector<14x8xf32>
    %172 = vector.broadcast %118 : vector<1x8xf32> to vector<14x8xf32>
    %173 = arith.addf %171, %172 : vector<14x8xf32>
    %cst_141 = arith.constant 0.000000e+00 : f32
    %174 = vector.broadcast %cst_141 : f32 to vector<14x8xf32>
    %175 = arith.maximumf %173, %174 : vector<14x8xf32>
    %c1_142 = arith.constant 1 : index
    %c0_143 = arith.constant 0 : index
    %c0_144 = arith.constant 0 : index
    %176 = vector.load %arg13[%c1_142, %c0_143, %c0_144] : memref<2x33x32xf32, #tpu.memory_space<vmem>>, vector<1x29x4xf32>
    %177 = vector.shape_cast %176 : vector<1x29x4xf32> to vector<29x4xf32>
    %178 = arith.truncf %177 : vector<29x4xf32> to vector<29x4xbf16>
    %c0_145 = arith.constant 0 : index
    %c0_146 = arith.constant 0 : index
    %c0_147 = arith.constant 0 : index
    %179 = vector.load %arg4[%c0_145, %c0_146, %c0_147] : memref<5x4x8xbf16, #tpu.memory_space<vmem>>, vector<1x4x8xbf16>
    %180 = vector.shape_cast %179 : vector<1x4x8xbf16> to vector<4x8xbf16>
    %cst_148 = arith.constant dense<0.000000e+00> : vector<29x8xf32>
    %181 = tpu.matmul %178, %180, %cst_148 {dimension_numbers = #tpu.dot_dimension_numbers<[1], [0], [0], [1], [0, 0, 1, 1], [], []>} : vector<29x4xbf16>, vector<4x8xbf16>, vector<29x8xf32> -> vector<29x8xf32>
    %c1_149 = arith.constant 1 : index
    %c1_150 = arith.constant 1 : index
    %c0_151 = arith.constant 0 : index
    %182 = vector.load %arg13[%c1_149, %c1_150, %c0_151] : memref<2x33x32xf32, #tpu.memory_space<vmem>>, vector<1x29x4xf32>
    %183 = vector.shape_cast %182 : vector<1x29x4xf32> to vector<29x4xf32>
    %184 = arith.truncf %183 : vector<29x4xf32> to vector<29x4xbf16>
    %c1_152 = arith.constant 1 : index
    %c0_153 = arith.constant 0 : index
    %c0_154 = arith.constant 0 : index
    %185 = vector.load %arg4[%c1_152, %c0_153, %c0_154] : memref<5x4x8xbf16, #tpu.memory_space<vmem>>, vector<1x4x8xbf16>
    %186 = vector.shape_cast %185 : vector<1x4x8xbf16> to vector<4x8xbf16>
    %cst_155 = arith.constant dense<0.000000e+00> : vector<29x8xf32>
    %187 = tpu.matmul %184, %186, %cst_155 {dimension_numbers = #tpu.dot_dimension_numbers<[1], [0], [0], [1], [0, 0, 1, 1], [], []>} : vector<29x4xbf16>, vector<4x8xbf16>, vector<29x8xf32> -> vector<29x8xf32>
    %188 = arith.addf %181, %187 : vector<29x8xf32>
    %c1_156 = arith.constant 1 : index
    %c2_157 = arith.constant 2 : index
    %c0_158 = arith.constant 0 : index
    %189 = vector.load %arg13[%c1_156, %c2_157, %c0_158] : memref<2x33x32xf32, #tpu.memory_space<vmem>>, vector<1x29x4xf32>
    %190 = vector.shape_cast %189 : vector<1x29x4xf32> to vector<29x4xf32>
    %191 = arith.truncf %190 : vector<29x4xf32> to vector<29x4xbf16>
    %c2_159 = arith.constant 2 : index
    %c0_160 = arith.constant 0 : index
    %c0_161 = arith.constant 0 : index
    %192 = vector.load %arg4[%c2_159, %c0_160, %c0_161] : memref<5x4x8xbf16, #tpu.memory_space<vmem>>, vector<1x4x8xbf16>
    %193 = vector.shape_cast %192 : vector<1x4x8xbf16> to vector<4x8xbf16>
    %cst_162 = arith.constant dense<0.000000e+00> : vector<29x8xf32>
    %194 = tpu.matmul %191, %193, %cst_162 {dimension_numbers = #tpu.dot_dimension_numbers<[1], [0], [0], [1], [0, 0, 1, 1], [], []>} : vector<29x4xbf16>, vector<4x8xbf16>, vector<29x8xf32> -> vector<29x8xf32>
    %195 = arith.addf %188, %194 : vector<29x8xf32>
    %c1_163 = arith.constant 1 : index
    %c3_164 = arith.constant 3 : index
    %c0_165 = arith.constant 0 : index
    %196 = vector.load %arg13[%c1_163, %c3_164, %c0_165] : memref<2x33x32xf32, #tpu.memory_space<vmem>>, vector<1x29x4xf32>
    %197 = vector.shape_cast %196 : vector<1x29x4xf32> to vector<29x4xf32>
    %198 = arith.truncf %197 : vector<29x4xf32> to vector<29x4xbf16>
    %c3_166 = arith.constant 3 : index
    %c0_167 = arith.constant 0 : index
    %c0_168 = arith.constant 0 : index
    %199 = vector.load %arg4[%c3_166, %c0_167, %c0_168] : memref<5x4x8xbf16, #tpu.memory_space<vmem>>, vector<1x4x8xbf16>
    %200 = vector.shape_cast %199 : vector<1x4x8xbf16> to vector<4x8xbf16>
    %cst_169 = arith.constant dense<0.000000e+00> : vector<29x8xf32>
    %201 = tpu.matmul %198, %200, %cst_169 {dimension_numbers = #tpu.dot_dimension_numbers<[1], [0], [0], [1], [0, 0, 1, 1], [], []>} : vector<29x4xbf16>, vector<4x8xbf16>, vector<29x8xf32> -> vector<29x8xf32>
    %202 = arith.addf %195, %201 : vector<29x8xf32>
    %c1_170 = arith.constant 1 : index
    %c4_171 = arith.constant 4 : index
    %c0_172 = arith.constant 0 : index
    %203 = vector.load %arg13[%c1_170, %c4_171, %c0_172] : memref<2x33x32xf32, #tpu.memory_space<vmem>>, vector<1x29x4xf32>
    %204 = vector.shape_cast %203 : vector<1x29x4xf32> to vector<29x4xf32>
    %205 = arith.truncf %204 : vector<29x4xf32> to vector<29x4xbf16>
    %c4_173 = arith.constant 4 : index
    %c0_174 = arith.constant 0 : index
    %c0_175 = arith.constant 0 : index
    %206 = vector.load %arg4[%c4_173, %c0_174, %c0_175] : memref<5x4x8xbf16, #tpu.memory_space<vmem>>, vector<1x4x8xbf16>
    %207 = vector.shape_cast %206 : vector<1x4x8xbf16> to vector<4x8xbf16>
    %cst_176 = arith.constant dense<0.000000e+00> : vector<29x8xf32>
    %208 = tpu.matmul %205, %207, %cst_176 {dimension_numbers = #tpu.dot_dimension_numbers<[1], [0], [0], [1], [0, 0, 1, 1], [], []>} : vector<29x4xbf16>, vector<4x8xbf16>, vector<29x8xf32> -> vector<29x8xf32>
    %209 = arith.addf %202, %208 : vector<29x8xf32>
    %cst_177 = arith.constant dense<0.000000e+00> : vector<14x8xf32>
    %210 = tpu.matmul %126, %209, %cst_177 {dimension_numbers = #tpu.dot_dimension_numbers<[1], [0], [0], [1], [0, 0, 1, 1], [], []>} : vector<14x29xf32>, vector<29x8xf32>, vector<14x8xf32> -> vector<14x8xf32>
    %cst_178 = arith.constant dense<0.000000e+00> : vector<14x8xf32>
    %211 = tpu.matmul %134, %209, %cst_178 {dimension_numbers = #tpu.dot_dimension_numbers<[1], [0], [0], [1], [0, 0, 1, 1], [], []>} : vector<14x29xf32>, vector<29x8xf32>, vector<14x8xf32> -> vector<14x8xf32>
    %212 = arith.maximumf %210, %211 : vector<14x8xf32>
    %213 = vector.broadcast %118 : vector<1x8xf32> to vector<14x8xf32>
    %214 = arith.addf %212, %213 : vector<14x8xf32>
    %cst_179 = arith.constant 0.000000e+00 : f32
    %215 = vector.broadcast %cst_179 : f32 to vector<14x8xf32>
    %216 = arith.maximumf %214, %215 : vector<14x8xf32>
    %cst_180 = arith.constant 0.000000e+00 : f32
    %217 = vector.broadcast %cst_180 : f32 to vector<1x8xf32>
    %c0_181 = arith.constant 0 : index
    %c0_182 = arith.constant 0 : index
    %c0_183 = arith.constant 0 : index
    %218 = vector.load %arg14[%c0_181, %c0_182, %c0_183] : memref<2x33x32xf32, #tpu.memory_space<vmem>>, vector<1x1x8xf32>
    %219 = vector.shape_cast %218 : vector<1x1x8xf32> to vector<1x8xf32>
    %220 = vector.shape_cast %217 : vector<1x8xf32> to vector<1x1x8xf32>
    tpu.vector_store %arg14[%c0_181, %c0_182, %c0_183], %220 {strides = array<i32>} : memref<2x33x32xf32, #tpu.memory_space<vmem>>, vector<1x1x8xf32>,
    %c0_184 = arith.constant 0 : index
    %c1_185 = arith.constant 1 : index
    %c0_186 = arith.constant 0 : index
    %221 = vector.load %arg14[%c0_184, %c1_185, %c0_186] : memref<2x33x32xf32, #tpu.memory_space<vmem>>, vector<1x14x8xf32>
    %222 = vector.shape_cast %221 : vector<1x14x8xf32> to vector<14x8xf32>
    %223 = vector.shape_cast %175 : vector<14x8xf32> to vector<1x14x8xf32>
    tpu.vector_store %arg14[%c0_184, %c1_185, %c0_186], %223 {strides = array<i32>} : memref<2x33x32xf32, #tpu.memory_space<vmem>>, vector<1x14x8xf32>,
    %c0_187 = arith.constant 0 : index
    %c15 = arith.constant 15 : index
    %c0_188 = arith.constant 0 : index
    %224 = vector.load %arg14[%c0_187, %c15, %c0_188] : memref<2x33x32xf32, #tpu.memory_space<vmem>>, vector<1x1x8xf32>
    %225 = vector.shape_cast %224 : vector<1x1x8xf32> to vector<1x8xf32>
    %226 = vector.shape_cast %217 : vector<1x8xf32> to vector<1x1x8xf32>
    tpu.vector_store %arg14[%c0_187, %c15, %c0_188], %226 {strides = array<i32>} : memref<2x33x32xf32, #tpu.memory_space<vmem>>, vector<1x1x8xf32>,
    %c1_189 = arith.constant 1 : index
    %c0_190 = arith.constant 0 : index
    %c0_191 = arith.constant 0 : index
    %227 = vector.load %arg14[%c1_189, %c0_190, %c0_191] : memref<2x33x32xf32, #tpu.memory_space<vmem>>, vector<1x1x8xf32>
    %228 = vector.shape_cast %227 : vector<1x1x8xf32> to vector<1x8xf32>
    %229 = vector.shape_cast %217 : vector<1x8xf32> to vector<1x1x8xf32>
    tpu.vector_store %arg14[%c1_189, %c0_190, %c0_191], %229 {strides = array<i32>} : memref<2x33x32xf32, #tpu.memory_space<vmem>>, vector<1x1x8xf32>,
    %c1_192 = arith.constant 1 : index
    %c1_193 = arith.constant 1 : index
    %c0_194 = arith.constant 0 : index
    %230 = vector.load %arg14[%c1_192, %c1_193, %c0_194] : memref<2x33x32xf32, #tpu.memory_space<vmem>>, vector<1x14x8xf32>
    %231 = vector.shape_cast %230 : vector<1x14x8xf32> to vector<14x8xf32>
    %232 = vector.shape_cast %216 : vector<14x8xf32> to vector<1x14x8xf32>
    tpu.vector_store %arg14[%c1_192, %c1_193, %c0_194], %232 {strides = array<i32>} : memref<2x33x32xf32, #tpu.memory_space<vmem>>, vector<1x14x8xf32>,
    %c1_195 = arith.constant 1 : index
    %c15_196 = arith.constant 15 : index
    %c0_197 = arith.constant 0 : index
    %233 = vector.load %arg14[%c1_195, %c15_196, %c0_197] : memref<2x33x32xf32, #tpu.memory_space<vmem>>, vector<1x1x8xf32>
    %234 = vector.shape_cast %233 : vector<1x1x8xf32> to vector<1x8xf32>
    %235 = vector.shape_cast %217 : vector<1x8xf32> to vector<1x1x8xf32>
    tpu.vector_store %arg14[%c1_195, %c15_196, %c0_197], %235 {strides = array<i32>} : memref<2x33x32xf32, #tpu.memory_space<vmem>>, vector<1x1x8xf32>,
    %c0_198 = arith.constant 0 : index
    %c0_199 = arith.constant 0 : index
    %236 = vector.load %arg7[%c0_198, %c0_199] : memref<1x16xf32, #tpu.memory_space<vmem>>, vector<1x16xf32>
    %c0_200 = arith.constant 0 : index
    %c0_201 = arith.constant 0 : index
    %c0_202 = arith.constant 0 : index
    %237 = vector.load %arg14[%c0_200, %c0_201, %c0_202] : memref<2x33x32xf32, #tpu.memory_space<vmem>>, vector<1x12x8xf32>
    %238 = vector.shape_cast %237 : vector<1x12x8xf32> to vector<12x8xf32>
    %239 = arith.truncf %238 : vector<12x8xf32> to vector<12x8xbf16>
    %c0_203 = arith.constant 0 : index
    %c0_204 = arith.constant 0 : index
    %c0_205 = arith.constant 0 : index
    %240 = vector.load %arg6[%c0_203, %c0_204, %c0_205] : memref<5x8x16xbf16, #tpu.memory_space<vmem>>, vector<1x8x16xbf16>
    %241 = vector.shape_cast %240 : vector<1x8x16xbf16> to vector<8x16xbf16>
    %cst_206 = arith.constant dense<0.000000e+00> : vector<12x16xf32>
    %242 = tpu.matmul %239, %241, %cst_206 {dimension_numbers = #tpu.dot_dimension_numbers<[1], [0], [0], [1], [0, 0, 1, 1], [], []>} : vector<12x8xbf16>, vector<8x16xbf16>, vector<12x16xf32> -> vector<12x16xf32>
    %c0_207 = arith.constant 0 : index
    %c1_208 = arith.constant 1 : index
    %c0_209 = arith.constant 0 : index
    %243 = vector.load %arg14[%c0_207, %c1_208, %c0_209] : memref<2x33x32xf32, #tpu.memory_space<vmem>>, vector<1x12x8xf32>
    %244 = vector.shape_cast %243 : vector<1x12x8xf32> to vector<12x8xf32>
    %245 = arith.truncf %244 : vector<12x8xf32> to vector<12x8xbf16>
    %c1_210 = arith.constant 1 : index
    %c0_211 = arith.constant 0 : index
    %c0_212 = arith.constant 0 : index
    %246 = vector.load %arg6[%c1_210, %c0_211, %c0_212] : memref<5x8x16xbf16, #tpu.memory_space<vmem>>, vector<1x8x16xbf16>
    %247 = vector.shape_cast %246 : vector<1x8x16xbf16> to vector<8x16xbf16>
    %cst_213 = arith.constant dense<0.000000e+00> : vector<12x16xf32>
    %248 = tpu.matmul %245, %247, %cst_213 {dimension_numbers = #tpu.dot_dimension_numbers<[1], [0], [0], [1], [0, 0, 1, 1], [], []>} : vector<12x8xbf16>, vector<8x16xbf16>, vector<12x16xf32> -> vector<12x16xf32>
    %249 = arith.addf %242, %248 : vector<12x16xf32>
    %c0_214 = arith.constant 0 : index
    %c2_215 = arith.constant 2 : index
    %c0_216 = arith.constant 0 : index
    %250 = vector.load %arg14[%c0_214, %c2_215, %c0_216] : memref<2x33x32xf32, #tpu.memory_space<vmem>>, vector<1x12x8xf32>
    %251 = vector.shape_cast %250 : vector<1x12x8xf32> to vector<12x8xf32>
    %252 = arith.truncf %251 : vector<12x8xf32> to vector<12x8xbf16>
    %c2_217 = arith.constant 2 : index
    %c0_218 = arith.constant 0 : index
    %c0_219 = arith.constant 0 : index
    %253 = vector.load %arg6[%c2_217, %c0_218, %c0_219] : memref<5x8x16xbf16, #tpu.memory_space<vmem>>, vector<1x8x16xbf16>
    %254 = vector.shape_cast %253 : vector<1x8x16xbf16> to vector<8x16xbf16>
    %cst_220 = arith.constant dense<0.000000e+00> : vector<12x16xf32>
    %255 = tpu.matmul %252, %254, %cst_220 {dimension_numbers = #tpu.dot_dimension_numbers<[1], [0], [0], [1], [0, 0, 1, 1], [], []>} : vector<12x8xbf16>, vector<8x16xbf16>, vector<12x16xf32> -> vector<12x16xf32>
    %256 = arith.addf %249, %255 : vector<12x16xf32>
    %c0_221 = arith.constant 0 : index
    %c3_222 = arith.constant 3 : index
    %c0_223 = arith.constant 0 : index
    %257 = vector.load %arg14[%c0_221, %c3_222, %c0_223] : memref<2x33x32xf32, #tpu.memory_space<vmem>>, vector<1x12x8xf32>
    %258 = vector.shape_cast %257 : vector<1x12x8xf32> to vector<12x8xf32>
    %259 = arith.truncf %258 : vector<12x8xf32> to vector<12x8xbf16>
    %c3_224 = arith.constant 3 : index
    %c0_225 = arith.constant 0 : index
    %c0_226 = arith.constant 0 : index
    %260 = vector.load %arg6[%c3_224, %c0_225, %c0_226] : memref<5x8x16xbf16, #tpu.memory_space<vmem>>, vector<1x8x16xbf16>
    %261 = vector.shape_cast %260 : vector<1x8x16xbf16> to vector<8x16xbf16>
    %cst_227 = arith.constant dense<0.000000e+00> : vector<12x16xf32>
    %262 = tpu.matmul %259, %261, %cst_227 {dimension_numbers = #tpu.dot_dimension_numbers<[1], [0], [0], [1], [0, 0, 1, 1], [], []>} : vector<12x8xbf16>, vector<8x16xbf16>, vector<12x16xf32> -> vector<12x16xf32>
    %263 = arith.addf %256, %262 : vector<12x16xf32>
    %c0_228 = arith.constant 0 : index
    %c4_229 = arith.constant 4 : index
    %c0_230 = arith.constant 0 : index
    %264 = vector.load %arg14[%c0_228, %c4_229, %c0_230] : memref<2x33x32xf32, #tpu.memory_space<vmem>>, vector<1x12x8xf32>
    %265 = vector.shape_cast %264 : vector<1x12x8xf32> to vector<12x8xf32>
    %266 = arith.truncf %265 : vector<12x8xf32> to vector<12x8xbf16>
    %c4_231 = arith.constant 4 : index
    %c0_232 = arith.constant 0 : index
    %c0_233 = arith.constant 0 : index
    %267 = vector.load %arg6[%c4_231, %c0_232, %c0_233] : memref<5x8x16xbf16, #tpu.memory_space<vmem>>, vector<1x8x16xbf16>
    %268 = vector.shape_cast %267 : vector<1x8x16xbf16> to vector<8x16xbf16>
    %cst_234 = arith.constant dense<0.000000e+00> : vector<12x16xf32>
    %269 = tpu.matmul %266, %268, %cst_234 {dimension_numbers = #tpu.dot_dimension_numbers<[1], [0], [0], [1], [0, 0, 1, 1], [], []>} : vector<12x8xbf16>, vector<8x16xbf16>, vector<12x16xf32> -> vector<12x16xf32>
    %270 = arith.addf %263, %269 : vector<12x16xf32>
    %271 = vector.broadcast %236 : vector<1x16xf32> to vector<12x16xf32>
    %272 = arith.addf %270, %271 : vector<12x16xf32>
    %cst_235 = arith.constant 0.000000e+00 : f32
    %273 = vector.broadcast %cst_235 : f32 to vector<12x16xf32>
    %274 = arith.maximumf %272, %273 : vector<12x16xf32>
    %c1_236 = arith.constant 1 : index
    %c0_237 = arith.constant 0 : index
    %c0_238 = arith.constant 0 : index
    %275 = vector.load %arg14[%c1_236, %c0_237, %c0_238] : memref<2x33x32xf32, #tpu.memory_space<vmem>>, vector<1x12x8xf32>
    %276 = vector.shape_cast %275 : vector<1x12x8xf32> to vector<12x8xf32>
    %277 = arith.truncf %276 : vector<12x8xf32> to vector<12x8xbf16>
    %c0_239 = arith.constant 0 : index
    %c0_240 = arith.constant 0 : index
    %c0_241 = arith.constant 0 : index
    %278 = vector.load %arg6[%c0_239, %c0_240, %c0_241] : memref<5x8x16xbf16, #tpu.memory_space<vmem>>, vector<1x8x16xbf16>
    %279 = vector.shape_cast %278 : vector<1x8x16xbf16> to vector<8x16xbf16>
    %cst_242 = arith.constant dense<0.000000e+00> : vector<12x16xf32>
    %280 = tpu.matmul %277, %279, %cst_242 {dimension_numbers = #tpu.dot_dimension_numbers<[1], [0], [0], [1], [0, 0, 1, 1], [], []>} : vector<12x8xbf16>, vector<8x16xbf16>, vector<12x16xf32> -> vector<12x16xf32>
    %c1_243 = arith.constant 1 : index
    %c1_244 = arith.constant 1 : index
    %c0_245 = arith.constant 0 : index
    %281 = vector.load %arg14[%c1_243, %c1_244, %c0_245] : memref<2x33x32xf32, #tpu.memory_space<vmem>>, vector<1x12x8xf32>
    %282 = vector.shape_cast %281 : vector<1x12x8xf32> to vector<12x8xf32>
    %283 = arith.truncf %282 : vector<12x8xf32> to vector<12x8xbf16>
    %c1_246 = arith.constant 1 : index
    %c0_247 = arith.constant 0 : index
    %c0_248 = arith.constant 0 : index
    %284 = vector.load %arg6[%c1_246, %c0_247, %c0_248] : memref<5x8x16xbf16, #tpu.memory_space<vmem>>, vector<1x8x16xbf16>
    %285 = vector.shape_cast %284 : vector<1x8x16xbf16> to vector<8x16xbf16>
    %cst_249 = arith.constant dense<0.000000e+00> : vector<12x16xf32>
    %286 = tpu.matmul %283, %285, %cst_249 {dimension_numbers = #tpu.dot_dimension_numbers<[1], [0], [0], [1], [0, 0, 1, 1], [], []>} : vector<12x8xbf16>, vector<8x16xbf16>, vector<12x16xf32> -> vector<12x16xf32>
    %287 = arith.addf %280, %286 : vector<12x16xf32>
    %c1_250 = arith.constant 1 : index
    %c2_251 = arith.constant 2 : index
    %c0_252 = arith.constant 0 : index
    %288 = vector.load %arg14[%c1_250, %c2_251, %c0_252] : memref<2x33x32xf32, #tpu.memory_space<vmem>>, vector<1x12x8xf32>
    %289 = vector.shape_cast %288 : vector<1x12x8xf32> to vector<12x8xf32>
    %290 = arith.truncf %289 : vector<12x8xf32> to vector<12x8xbf16>
    %c2_253 = arith.constant 2 : index
    %c0_254 = arith.constant 0 : index
    %c0_255 = arith.constant 0 : index
    %291 = vector.load %arg6[%c2_253, %c0_254, %c0_255] : memref<5x8x16xbf16, #tpu.memory_space<vmem>>, vector<1x8x16xbf16>
    %292 = vector.shape_cast %291 : vector<1x8x16xbf16> to vector<8x16xbf16>
    %cst_256 = arith.constant dense<0.000000e+00> : vector<12x16xf32>
    %293 = tpu.matmul %290, %292, %cst_256 {dimension_numbers = #tpu.dot_dimension_numbers<[1], [0], [0], [1], [0, 0, 1, 1], [], []>} : vector<12x8xbf16>, vector<8x16xbf16>, vector<12x16xf32> -> vector<12x16xf32>
    %294 = arith.addf %287, %293 : vector<12x16xf32>
    %c1_257 = arith.constant 1 : index
    %c3_258 = arith.constant 3 : index
    %c0_259 = arith.constant 0 : index
    %295 = vector.load %arg14[%c1_257, %c3_258, %c0_259] : memref<2x33x32xf32, #tpu.memory_space<vmem>>, vector<1x12x8xf32>
    %296 = vector.shape_cast %295 : vector<1x12x8xf32> to vector<12x8xf32>
    %297 = arith.truncf %296 : vector<12x8xf32> to vector<12x8xbf16>
    %c3_260 = arith.constant 3 : index
    %c0_261 = arith.constant 0 : index
    %c0_262 = arith.constant 0 : index
    %298 = vector.load %arg6[%c3_260, %c0_261, %c0_262] : memref<5x8x16xbf16, #tpu.memory_space<vmem>>, vector<1x8x16xbf16>
    %299 = vector.shape_cast %298 : vector<1x8x16xbf16> to vector<8x16xbf16>
    %cst_263 = arith.constant dense<0.000000e+00> : vector<12x16xf32>
    %300 = tpu.matmul %297, %299, %cst_263 {dimension_numbers = #tpu.dot_dimension_numbers<[1], [0], [0], [1], [0, 0, 1, 1], [], []>} : vector<12x8xbf16>, vector<8x16xbf16>, vector<12x16xf32> -> vector<12x16xf32>
    %301 = arith.addf %294, %300 : vector<12x16xf32>
    %c1_264 = arith.constant 1 : index
    %c4_265 = arith.constant 4 : index
    %c0_266 = arith.constant 0 : index
    %302 = vector.load %arg14[%c1_264, %c4_265, %c0_266] : memref<2x33x32xf32, #tpu.memory_space<vmem>>, vector<1x12x8xf32>
    %303 = vector.shape_cast %302 : vector<1x12x8xf32> to vector<12x8xf32>
    %304 = arith.truncf %303 : vector<12x8xf32> to vector<12x8xbf16>
    %c4_267 = arith.constant 4 : index
    %c0_268 = arith.constant 0 : index
    %c0_269 = arith.constant 0 : index
    %305 = vector.load %arg6[%c4_267, %c0_268, %c0_269] : memref<5x8x16xbf16, #tpu.memory_space<vmem>>, vector<1x8x16xbf16>
    %306 = vector.shape_cast %305 : vector<1x8x16xbf16> to vector<8x16xbf16>
    %cst_270 = arith.constant dense<0.000000e+00> : vector<12x16xf32>
    %307 = tpu.matmul %304, %306, %cst_270 {dimension_numbers = #tpu.dot_dimension_numbers<[1], [0], [0], [1], [0, 0, 1, 1], [], []>} : vector<12x8xbf16>, vector<8x16xbf16>, vector<12x16xf32> -> vector<12x16xf32>
    %308 = arith.addf %301, %307 : vector<12x16xf32>
    %309 = vector.broadcast %236 : vector<1x16xf32> to vector<12x16xf32>
    %310 = arith.addf %308, %309 : vector<12x16xf32>
    %cst_271 = arith.constant 0.000000e+00 : f32
    %311 = vector.broadcast %cst_271 : f32 to vector<12x16xf32>
    %312 = arith.maximumf %310, %311 : vector<12x16xf32>
    %cst_272 = arith.constant 0.000000e+00 : f32
    %313 = vector.broadcast %cst_272 : f32 to vector<1x16xf32>
    %c0_273 = arith.constant 0 : index
    %c0_274 = arith.constant 0 : index
    %c0_275 = arith.constant 0 : index
    %314 = vector.load %arg13[%c0_273, %c0_274, %c0_275] : memref<2x33x32xf32, #tpu.memory_space<vmem>>, vector<1x1x16xf32>
    %315 = vector.shape_cast %314 : vector<1x1x16xf32> to vector<1x16xf32>
    %316 = vector.shape_cast %313 : vector<1x16xf32> to vector<1x1x16xf32>
    tpu.vector_store %arg13[%c0_273, %c0_274, %c0_275], %316 {strides = array<i32>} : memref<2x33x32xf32, #tpu.memory_space<vmem>>, vector<1x1x16xf32>,
    %c0_276 = arith.constant 0 : index
    %c1_277 = arith.constant 1 : index
    %c0_278 = arith.constant 0 : index
    %317 = vector.load %arg13[%c0_276, %c1_277, %c0_278] : memref<2x33x32xf32, #tpu.memory_space<vmem>>, vector<1x12x16xf32>
    %318 = vector.shape_cast %317 : vector<1x12x16xf32> to vector<12x16xf32>
    %319 = vector.shape_cast %274 : vector<12x16xf32> to vector<1x12x16xf32>
    tpu.vector_store %arg13[%c0_276, %c1_277, %c0_278], %319 {strides = array<i32>} : memref<2x33x32xf32, #tpu.memory_space<vmem>>, vector<1x12x16xf32>,
    %c0_279 = arith.constant 0 : index
    %c13 = arith.constant 13 : index
    %c0_280 = arith.constant 0 : index
    %320 = vector.load %arg13[%c0_279, %c13, %c0_280] : memref<2x33x32xf32, #tpu.memory_space<vmem>>, vector<1x1x16xf32>
    %321 = vector.shape_cast %320 : vector<1x1x16xf32> to vector<1x16xf32>
    %322 = vector.shape_cast %313 : vector<1x16xf32> to vector<1x1x16xf32>
    tpu.vector_store %arg13[%c0_279, %c13, %c0_280], %322 {strides = array<i32>} : memref<2x33x32xf32, #tpu.memory_space<vmem>>, vector<1x1x16xf32>,
    %c1_281 = arith.constant 1 : index
    %c0_282 = arith.constant 0 : index
    %c0_283 = arith.constant 0 : index
    %323 = vector.load %arg13[%c1_281, %c0_282, %c0_283] : memref<2x33x32xf32, #tpu.memory_space<vmem>>, vector<1x1x16xf32>
    %324 = vector.shape_cast %323 : vector<1x1x16xf32> to vector<1x16xf32>
    %325 = vector.shape_cast %313 : vector<1x16xf32> to vector<1x1x16xf32>
    tpu.vector_store %arg13[%c1_281, %c0_282, %c0_283], %325 {strides = array<i32>} : memref<2x33x32xf32, #tpu.memory_space<vmem>>, vector<1x1x16xf32>,
    %c1_284 = arith.constant 1 : index
    %c1_285 = arith.constant 1 : index
    %c0_286 = arith.constant 0 : index
    %326 = vector.load %arg13[%c1_284, %c1_285, %c0_286] : memref<2x33x32xf32, #tpu.memory_space<vmem>>, vector<1x12x16xf32>
    %327 = vector.shape_cast %326 : vector<1x12x16xf32> to vector<12x16xf32>
    %328 = vector.shape_cast %312 : vector<12x16xf32> to vector<1x12x16xf32>
    tpu.vector_store %arg13[%c1_284, %c1_285, %c0_286], %328 {strides = array<i32>} : memref<2x33x32xf32, #tpu.memory_space<vmem>>, vector<1x12x16xf32>,
    %c1_287 = arith.constant 1 : index
    %c13_288 = arith.constant 13 : index
    %c0_289 = arith.constant 0 : index
    %329 = vector.load %arg13[%c1_287, %c13_288, %c0_289] : memref<2x33x32xf32, #tpu.memory_space<vmem>>, vector<1x1x16xf32>
    %330 = vector.shape_cast %329 : vector<1x1x16xf32> to vector<1x16xf32>
    %331 = vector.shape_cast %313 : vector<1x16xf32> to vector<1x1x16xf32>
    tpu.vector_store %arg13[%c1_287, %c13_288, %c0_289], %331 {strides = array<i32>} : memref<2x33x32xf32, #tpu.memory_space<vmem>>, vector<1x1x16xf32>,
    %c0_290 = arith.constant 0 : index
    %c0_291 = arith.constant 0 : index
    %332 = vector.load %arg9[%c0_290, %c0_291] : memref<1x32xf32, #tpu.memory_space<vmem>>, vector<1x32xf32>
    %c0_292 = arith.constant 0 : index
    %c0_293 = arith.constant 0 : index
    %c0_294 = arith.constant 0 : index
    %333 = vector.load %arg13[%c0_292, %c0_293, %c0_294] : memref<2x33x32xf32, #tpu.memory_space<vmem>>, vector<1x10x16xf32>
    %334 = vector.shape_cast %333 : vector<1x10x16xf32> to vector<10x16xf32>
    %335 = arith.truncf %334 : vector<10x16xf32> to vector<10x16xbf16>
    %c0_295 = arith.constant 0 : index
    %c0_296 = arith.constant 0 : index
    %c0_297 = arith.constant 0 : index
    %336 = vector.load %arg8[%c0_295, %c0_296, %c0_297] : memref<5x16x32xbf16, #tpu.memory_space<vmem>>, vector<1x16x32xbf16>
    %337 = vector.shape_cast %336 : vector<1x16x32xbf16> to vector<16x32xbf16>
    %cst_298 = arith.constant dense<0.000000e+00> : vector<10x32xf32>
    %338 = tpu.matmul %335, %337, %cst_298 {dimension_numbers = #tpu.dot_dimension_numbers<[1], [0], [0], [1], [0, 0, 1, 1], [], []>} : vector<10x16xbf16>, vector<16x32xbf16>, vector<10x32xf32> -> vector<10x32xf32>
    %c0_299 = arith.constant 0 : index
    %c1_300 = arith.constant 1 : index
    %c0_301 = arith.constant 0 : index
    %339 = vector.load %arg13[%c0_299, %c1_300, %c0_301] : memref<2x33x32xf32, #tpu.memory_space<vmem>>, vector<1x10x16xf32>
    %340 = vector.shape_cast %339 : vector<1x10x16xf32> to vector<10x16xf32>
    %341 = arith.truncf %340 : vector<10x16xf32> to vector<10x16xbf16>
    %c1_302 = arith.constant 1 : index
    %c0_303 = arith.constant 0 : index
    %c0_304 = arith.constant 0 : index
    %342 = vector.load %arg8[%c1_302, %c0_303, %c0_304] : memref<5x16x32xbf16, #tpu.memory_space<vmem>>, vector<1x16x32xbf16>
    %343 = vector.shape_cast %342 : vector<1x16x32xbf16> to vector<16x32xbf16>
    %cst_305 = arith.constant dense<0.000000e+00> : vector<10x32xf32>
    %344 = tpu.matmul %341, %343, %cst_305 {dimension_numbers = #tpu.dot_dimension_numbers<[1], [0], [0], [1], [0, 0, 1, 1], [], []>} : vector<10x16xbf16>, vector<16x32xbf16>, vector<10x32xf32> -> vector<10x32xf32>
    %345 = arith.addf %338, %344 : vector<10x32xf32>
    %c0_306 = arith.constant 0 : index
    %c2_307 = arith.constant 2 : index
    %c0_308 = arith.constant 0 : index
    %346 = vector.load %arg13[%c0_306, %c2_307, %c0_308] : memref<2x33x32xf32, #tpu.memory_space<vmem>>, vector<1x10x16xf32>
    %347 = vector.shape_cast %346 : vector<1x10x16xf32> to vector<10x16xf32>
    %348 = arith.truncf %347 : vector<10x16xf32> to vector<10x16xbf16>
    %c2_309 = arith.constant 2 : index
    %c0_310 = arith.constant 0 : index
    %c0_311 = arith.constant 0 : index
    %349 = vector.load %arg8[%c2_309, %c0_310, %c0_311] : memref<5x16x32xbf16, #tpu.memory_space<vmem>>, vector<1x16x32xbf16>
    %350 = vector.shape_cast %349 : vector<1x16x32xbf16> to vector<16x32xbf16>
    %cst_312 = arith.constant dense<0.000000e+00> : vector<10x32xf32>
    %351 = tpu.matmul %348, %350, %cst_312 {dimension_numbers = #tpu.dot_dimension_numbers<[1], [0], [0], [1], [0, 0, 1, 1], [], []>} : vector<10x16xbf16>, vector<16x32xbf16>, vector<10x32xf32> -> vector<10x32xf32>
    %352 = arith.addf %345, %351 : vector<10x32xf32>
    %c0_313 = arith.constant 0 : index
    %c3_314 = arith.constant 3 : index
    %c0_315 = arith.constant 0 : index
    %353 = vector.load %arg13[%c0_313, %c3_314, %c0_315] : memref<2x33x32xf32, #tpu.memory_space<vmem>>, vector<1x10x16xf32>
    %354 = vector.shape_cast %353 : vector<1x10x16xf32> to vector<10x16xf32>
    %355 = arith.truncf %354 : vector<10x16xf32> to vector<10x16xbf16>
    %c3_316 = arith.constant 3 : index
    %c0_317 = arith.constant 0 : index
    %c0_318 = arith.constant 0 : index
    %356 = vector.load %arg8[%c3_316, %c0_317, %c0_318] : memref<5x16x32xbf16, #tpu.memory_space<vmem>>, vector<1x16x32xbf16>
    %357 = vector.shape_cast %356 : vector<1x16x32xbf16> to vector<16x32xbf16>
    %cst_319 = arith.constant dense<0.000000e+00> : vector<10x32xf32>
    %358 = tpu.matmul %355, %357, %cst_319 {dimension_numbers = #tpu.dot_dimension_numbers<[1], [0], [0], [1], [0, 0, 1, 1], [], []>} : vector<10x16xbf16>, vector<16x32xbf16>, vector<10x32xf32> -> vector<10x32xf32>
    %359 = arith.addf %352, %358 : vector<10x32xf32>
    %c0_320 = arith.constant 0 : index
    %c4_321 = arith.constant 4 : index
    %c0_322 = arith.constant 0 : index
    %360 = vector.load %arg13[%c0_320, %c4_321, %c0_322] : memref<2x33x32xf32, #tpu.memory_space<vmem>>, vector<1x10x16xf32>
    %361 = vector.shape_cast %360 : vector<1x10x16xf32> to vector<10x16xf32>
    %362 = arith.truncf %361 : vector<10x16xf32> to vector<10x16xbf16>
    %c4_323 = arith.constant 4 : index
    %c0_324 = arith.constant 0 : index
    %c0_325 = arith.constant 0 : index
    %363 = vector.load %arg8[%c4_323, %c0_324, %c0_325] : memref<5x16x32xbf16, #tpu.memory_space<vmem>>, vector<1x16x32xbf16>
    %364 = vector.shape_cast %363 : vector<1x16x32xbf16> to vector<16x32xbf16>
    %cst_326 = arith.constant dense<0.000000e+00> : vector<10x32xf32>
    %365 = tpu.matmul %362, %364, %cst_326 {dimension_numbers = #tpu.dot_dimension_numbers<[1], [0], [0], [1], [0, 0, 1, 1], [], []>} : vector<10x16xbf16>, vector<16x32xbf16>, vector<10x32xf32> -> vector<10x32xf32>
    %366 = arith.addf %359, %365 : vector<10x32xf32>
    %367 = vector.broadcast %332 : vector<1x32xf32> to vector<10x32xf32>
    %368 = arith.addf %366, %367 : vector<10x32xf32>
    %cst_327 = arith.constant 0.000000e+00 : f32
    %369 = vector.broadcast %cst_327 : f32 to vector<10x32xf32>
    %370 = arith.maximumf %368, %369 : vector<10x32xf32>
    %c1_328 = arith.constant 1 : index
    %c0_329 = arith.constant 0 : index
    %c0_330 = arith.constant 0 : index
    %371 = vector.load %arg13[%c1_328, %c0_329, %c0_330] : memref<2x33x32xf32, #tpu.memory_space<vmem>>, vector<1x10x16xf32>
    %372 = vector.shape_cast %371 : vector<1x10x16xf32> to vector<10x16xf32>
    %373 = arith.truncf %372 : vector<10x16xf32> to vector<10x16xbf16>
    %c0_331 = arith.constant 0 : index
    %c0_332 = arith.constant 0 : index
    %c0_333 = arith.constant 0 : index
    %374 = vector.load %arg8[%c0_331, %c0_332, %c0_333] : memref<5x16x32xbf16, #tpu.memory_space<vmem>>, vector<1x16x32xbf16>
    %375 = vector.shape_cast %374 : vector<1x16x32xbf16> to vector<16x32xbf16>
    %cst_334 = arith.constant dense<0.000000e+00> : vector<10x32xf32>
    %376 = tpu.matmul %373, %375, %cst_334 {dimension_numbers = #tpu.dot_dimension_numbers<[1], [0], [0], [1], [0, 0, 1, 1], [], []>} : vector<10x16xbf16>, vector<16x32xbf16>, vector<10x32xf32> -> vector<10x32xf32>
    %c1_335 = arith.constant 1 : index
    %c1_336 = arith.constant 1 : index
    %c0_337 = arith.constant 0 : index
    %377 = vector.load %arg13[%c1_335, %c1_336, %c0_337] : memref<2x33x32xf32, #tpu.memory_space<vmem>>, vector<1x10x16xf32>
    %378 = vector.shape_cast %377 : vector<1x10x16xf32> to vector<10x16xf32>
    %379 = arith.truncf %378 : vector<10x16xf32> to vector<10x16xbf16>
    %c1_338 = arith.constant 1 : index
    %c0_339 = arith.constant 0 : index
    %c0_340 = arith.constant 0 : index
    %380 = vector.load %arg8[%c1_338, %c0_339, %c0_340] : memref<5x16x32xbf16, #tpu.memory_space<vmem>>, vector<1x16x32xbf16>
    %381 = vector.shape_cast %380 : vector<1x16x32xbf16> to vector<16x32xbf16>
    %cst_341 = arith.constant dense<0.000000e+00> : vector<10x32xf32>
    %382 = tpu.matmul %379, %381, %cst_341 {dimension_numbers = #tpu.dot_dimension_numbers<[1], [0], [0], [1], [0, 0, 1, 1], [], []>} : vector<10x16xbf16>, vector<16x32xbf16>, vector<10x32xf32> -> vector<10x32xf32>
    %383 = arith.addf %376, %382 : vector<10x32xf32>
    %c1_342 = arith.constant 1 : index
    %c2_343 = arith.constant 2 : index
    %c0_344 = arith.constant 0 : index
    %384 = vector.load %arg13[%c1_342, %c2_343, %c0_344] : memref<2x33x32xf32, #tpu.memory_space<vmem>>, vector<1x10x16xf32>
    %385 = vector.shape_cast %384 : vector<1x10x16xf32> to vector<10x16xf32>
    %386 = arith.truncf %385 : vector<10x16xf32> to vector<10x16xbf16>
    %c2_345 = arith.constant 2 : index
    %c0_346 = arith.constant 0 : index
    %c0_347 = arith.constant 0 : index
    %387 = vector.load %arg8[%c2_345, %c0_346, %c0_347] : memref<5x16x32xbf16, #tpu.memory_space<vmem>>, vector<1x16x32xbf16>
    %388 = vector.shape_cast %387 : vector<1x16x32xbf16> to vector<16x32xbf16>
    %cst_348 = arith.constant dense<0.000000e+00> : vector<10x32xf32>
    %389 = tpu.matmul %386, %388, %cst_348 {dimension_numbers = #tpu.dot_dimension_numbers<[1], [0], [0], [1], [0, 0, 1, 1], [], []>} : vector<10x16xbf16>, vector<16x32xbf16>, vector<10x32xf32> -> vector<10x32xf32>
    %390 = arith.addf %383, %389 : vector<10x32xf32>
    %c1_349 = arith.constant 1 : index
    %c3_350 = arith.constant 3 : index
    %c0_351 = arith.constant 0 : index
    %391 = vector.load %arg13[%c1_349, %c3_350, %c0_351] : memref<2x33x32xf32, #tpu.memory_space<vmem>>, vector<1x10x16xf32>
    %392 = vector.shape_cast %391 : vector<1x10x16xf32> to vector<10x16xf32>
    %393 = arith.truncf %392 : vector<10x16xf32> to vector<10x16xbf16>
    %c3_352 = arith.constant 3 : index
    %c0_353 = arith.constant 0 : index
    %c0_354 = arith.constant 0 : index
    %394 = vector.load %arg8[%c3_352, %c0_353, %c0_354] : memref<5x16x32xbf16, #tpu.memory_space<vmem>>, vector<1x16x32xbf16>
    %395 = vector.shape_cast %394 : vector<1x16x32xbf16> to vector<16x32xbf16>
    %cst_355 = arith.constant dense<0.000000e+00> : vector<10x32xf32>
    %396 = tpu.matmul %393, %395, %cst_355 {dimension_numbers = #tpu.dot_dimension_numbers<[1], [0], [0], [1], [0, 0, 1, 1], [], []>} : vector<10x16xbf16>, vector<16x32xbf16>, vector<10x32xf32> -> vector<10x32xf32>
    %397 = arith.addf %390, %396 : vector<10x32xf32>
    %c1_356 = arith.constant 1 : index
    %c4_357 = arith.constant 4 : index
    %c0_358 = arith.constant 0 : index
    %398 = vector.load %arg13[%c1_356, %c4_357, %c0_358] : memref<2x33x32xf32, #tpu.memory_space<vmem>>, vector<1x10x16xf32>
    %399 = vector.shape_cast %398 : vector<1x10x16xf32> to vector<10x16xf32>
    %400 = arith.truncf %399 : vector<10x16xf32> to vector<10x16xbf16>
    %c4_359 = arith.constant 4 : index
    %c0_360 = arith.constant 0 : index
    %c0_361 = arith.constant 0 : index
    %401 = vector.load %arg8[%c4_359, %c0_360, %c0_361] : memref<5x16x32xbf16, #tpu.memory_space<vmem>>, vector<1x16x32xbf16>
    %402 = vector.shape_cast %401 : vector<1x16x32xbf16> to vector<16x32xbf16>
    %cst_362 = arith.constant dense<0.000000e+00> : vector<10x32xf32>
    %403 = tpu.matmul %400, %402, %cst_362 {dimension_numbers = #tpu.dot_dimension_numbers<[1], [0], [0], [1], [0, 0, 1, 1], [], []>} : vector<10x16xbf16>, vector<16x32xbf16>, vector<10x32xf32> -> vector<10x32xf32>
    %404 = arith.addf %397, %403 : vector<10x32xf32>
    %405 = vector.broadcast %332 : vector<1x32xf32> to vector<10x32xf32>
    %406 = arith.addf %404, %405 : vector<10x32xf32>
    %cst_363 = arith.constant 0.000000e+00 : f32
    %407 = vector.broadcast %cst_363 : f32 to vector<10x32xf32>
    %408 = arith.maximumf %406, %407 : vector<10x32xf32>
    %cst_364 = arith.constant 0.000000e+00 : f32
    %409 = vector.broadcast %cst_364 : f32 to vector<1x32xf32>
    %c0_365 = arith.constant 0 : index
    %c0_366 = arith.constant 0 : index
    %c0_367 = arith.constant 0 : index
    %410 = vector.load %arg14[%c0_365, %c0_366, %c0_367] : memref<2x33x32xf32, #tpu.memory_space<vmem>>, vector<1x1x32xf32>
    %411 = vector.shape_cast %410 : vector<1x1x32xf32> to vector<1x32xf32>
    %412 = vector.shape_cast %409 : vector<1x32xf32> to vector<1x1x32xf32>
    tpu.vector_store %arg14[%c0_365, %c0_366, %c0_367], %412 {strides = array<i32>} : memref<2x33x32xf32, #tpu.memory_space<vmem>>, vector<1x1x32xf32>,
    %c0_368 = arith.constant 0 : index
    %c1_369 = arith.constant 1 : index
    %c0_370 = arith.constant 0 : index
    %413 = vector.load %arg14[%c0_368, %c1_369, %c0_370] : memref<2x33x32xf32, #tpu.memory_space<vmem>>, vector<1x10x32xf32>
    %414 = vector.shape_cast %413 : vector<1x10x32xf32> to vector<10x32xf32>
    %415 = vector.shape_cast %370 : vector<10x32xf32> to vector<1x10x32xf32>
    tpu.vector_store %arg14[%c0_368, %c1_369, %c0_370], %415 {strides = array<i32>} : memref<2x33x32xf32, #tpu.memory_space<vmem>>, vector<1x10x32xf32>,
    %c0_371 = arith.constant 0 : index
    %c11 = arith.constant 11 : index
    %c0_372 = arith.constant 0 : index
    %416 = vector.load %arg14[%c0_371, %c11, %c0_372] : memref<2x33x32xf32, #tpu.memory_space<vmem>>, vector<1x1x32xf32>
    %417 = vector.shape_cast %416 : vector<1x1x32xf32> to vector<1x32xf32>
    %418 = vector.shape_cast %409 : vector<1x32xf32> to vector<1x1x32xf32>
    tpu.vector_store %arg14[%c0_371, %c11, %c0_372], %418 {strides = array<i32>} : memref<2x33x32xf32, #tpu.memory_space<vmem>>, vector<1x1x32xf32>,
    %c1_373 = arith.constant 1 : index
    %c0_374 = arith.constant 0 : index
    %c0_375 = arith.constant 0 : index
    %419 = vector.load %arg14[%c1_373, %c0_374, %c0_375] : memref<2x33x32xf32, #tpu.memory_space<vmem>>, vector<1x1x32xf32>
    %420 = vector.shape_cast %419 : vector<1x1x32xf32> to vector<1x32xf32>
    %421 = vector.shape_cast %409 : vector<1x32xf32> to vector<1x1x32xf32>
    tpu.vector_store %arg14[%c1_373, %c0_374, %c0_375], %421 {strides = array<i32>} : memref<2x33x32xf32, #tpu.memory_space<vmem>>, vector<1x1x32xf32>,
    %c1_376 = arith.constant 1 : index
    %c1_377 = arith.constant 1 : index
    %c0_378 = arith.constant 0 : index
    %422 = vector.load %arg14[%c1_376, %c1_377, %c0_378] : memref<2x33x32xf32, #tpu.memory_space<vmem>>, vector<1x10x32xf32>
    %423 = vector.shape_cast %422 : vector<1x10x32xf32> to vector<10x32xf32>
    %424 = vector.shape_cast %408 : vector<10x32xf32> to vector<1x10x32xf32>
    tpu.vector_store %arg14[%c1_376, %c1_377, %c0_378], %424 {strides = array<i32>} : memref<2x33x32xf32, #tpu.memory_space<vmem>>, vector<1x10x32xf32>,
    %c1_379 = arith.constant 1 : index
    %c11_380 = arith.constant 11 : index
    %c0_381 = arith.constant 0 : index
    %425 = vector.load %arg14[%c1_379, %c11_380, %c0_381] : memref<2x33x32xf32, #tpu.memory_space<vmem>>, vector<1x1x32xf32>
    %426 = vector.shape_cast %425 : vector<1x1x32xf32> to vector<1x32xf32>
    %427 = vector.shape_cast %409 : vector<1x32xf32> to vector<1x1x32xf32>
    tpu.vector_store %arg14[%c1_379, %c11_380, %c0_381], %427 {strides = array<i32>} : memref<2x33x32xf32, #tpu.memory_space<vmem>>, vector<1x1x32xf32>,
    %c0_382 = arith.constant 0 : index
    %c0_383 = arith.constant 0 : index
    %428 = vector.load %arg11[%c0_382, %c0_383] : memref<1x64xf32, #tpu.memory_space<vmem>>, vector<1x64xf32>
    %c0_384 = arith.constant 0 : index
    %c0_385 = arith.constant 0 : index
    %c0_386 = arith.constant 0 : index
    %429 = vector.load %arg14[%c0_384, %c0_385, %c0_386] : memref<2x33x32xf32, #tpu.memory_space<vmem>>, vector<1x8x32xf32>
    %430 = vector.shape_cast %429 : vector<1x8x32xf32> to vector<8x32xf32>
    %431 = arith.truncf %430 : vector<8x32xf32> to vector<8x32xbf16>
    %c0_387 = arith.constant 0 : index
    %c0_388 = arith.constant 0 : index
    %c0_389 = arith.constant 0 : index
    %432 = vector.load %arg10[%c0_387, %c0_388, %c0_389] : memref<5x32x64xbf16, #tpu.memory_space<vmem>>, vector<1x32x64xbf16>
    %433 = vector.shape_cast %432 : vector<1x32x64xbf16> to vector<32x64xbf16>
    %cst_390 = arith.constant dense<0.000000e+00> : vector<8x64xf32>
    %434 = tpu.matmul %431, %433, %cst_390 {dimension_numbers = #tpu.dot_dimension_numbers<[1], [0], [0], [1], [0, 0, 1, 1], [], []>} : vector<8x32xbf16>, vector<32x64xbf16>, vector<8x64xf32> -> vector<8x64xf32>
    %c0_391 = arith.constant 0 : index
    %c1_392 = arith.constant 1 : index
    %c0_393 = arith.constant 0 : index
    %435 = vector.load %arg14[%c0_391, %c1_392, %c0_393] : memref<2x33x32xf32, #tpu.memory_space<vmem>>, vector<1x8x32xf32>
    %436 = vector.shape_cast %435 : vector<1x8x32xf32> to vector<8x32xf32>
    %437 = arith.truncf %436 : vector<8x32xf32> to vector<8x32xbf16>
    %c1_394 = arith.constant 1 : index
    %c0_395 = arith.constant 0 : index
    %c0_396 = arith.constant 0 : index
    %438 = vector.load %arg10[%c1_394, %c0_395, %c0_396] : memref<5x32x64xbf16, #tpu.memory_space<vmem>>, vector<1x32x64xbf16>
    %439 = vector.shape_cast %438 : vector<1x32x64xbf16> to vector<32x64xbf16>
    %cst_397 = arith.constant dense<0.000000e+00> : vector<8x64xf32>
    %440 = tpu.matmul %437, %439, %cst_397 {dimension_numbers = #tpu.dot_dimension_numbers<[1], [0], [0], [1], [0, 0, 1, 1], [], []>} : vector<8x32xbf16>, vector<32x64xbf16>, vector<8x64xf32> -> vector<8x64xf32>
    %441 = arith.addf %434, %440 : vector<8x64xf32>
    %c0_398 = arith.constant 0 : index
    %c2_399 = arith.constant 2 : index
    %c0_400 = arith.constant 0 : index
    %442 = vector.load %arg14[%c0_398, %c2_399, %c0_400] : memref<2x33x32xf32, #tpu.memory_space<vmem>>, vector<1x8x32xf32>
    %443 = vector.shape_cast %442 : vector<1x8x32xf32> to vector<8x32xf32>
    %444 = arith.truncf %443 : vector<8x32xf32> to vector<8x32xbf16>
    %c2_401 = arith.constant 2 : index
    %c0_402 = arith.constant 0 : index
    %c0_403 = arith.constant 0 : index
    %445 = vector.load %arg10[%c2_401, %c0_402, %c0_403] : memref<5x32x64xbf16, #tpu.memory_space<vmem>>, vector<1x32x64xbf16>
    %446 = vector.shape_cast %445 : vector<1x32x64xbf16> to vector<32x64xbf16>
    %cst_404 = arith.constant dense<0.000000e+00> : vector<8x64xf32>
    %447 = tpu.matmul %444, %446, %cst_404 {dimension_numbers = #tpu.dot_dimension_numbers<[1], [0], [0], [1], [0, 0, 1, 1], [], []>} : vector<8x32xbf16>, vector<32x64xbf16>, vector<8x64xf32> -> vector<8x64xf32>
    %448 = arith.addf %441, %447 : vector<8x64xf32>
    %c0_405 = arith.constant 0 : index
    %c3_406 = arith.constant 3 : index
    %c0_407 = arith.constant 0 : index
    %449 = vector.load %arg14[%c0_405, %c3_406, %c0_407] : memref<2x33x32xf32, #tpu.memory_space<vmem>>, vector<1x8x32xf32>
    %450 = vector.shape_cast %449 : vector<1x8x32xf32> to vector<8x32xf32>
    %451 = arith.truncf %450 : vector<8x32xf32> to vector<8x32xbf16>
    %c3_408 = arith.constant 3 : index
    %c0_409 = arith.constant 0 : index
    %c0_410 = arith.constant 0 : index
    %452 = vector.load %arg10[%c3_408, %c0_409, %c0_410] : memref<5x32x64xbf16, #tpu.memory_space<vmem>>, vector<1x32x64xbf16>
    %453 = vector.shape_cast %452 : vector<1x32x64xbf16> to vector<32x64xbf16>
    %cst_411 = arith.constant dense<0.000000e+00> : vector<8x64xf32>
    %454 = tpu.matmul %451, %453, %cst_411 {dimension_numbers = #tpu.dot_dimension_numbers<[1], [0], [0], [1], [0, 0, 1, 1], [], []>} : vector<8x32xbf16>, vector<32x64xbf16>, vector<8x64xf32> -> vector<8x64xf32>
    %455 = arith.addf %448, %454 : vector<8x64xf32>
    %c0_412 = arith.constant 0 : index
    %c4_413 = arith.constant 4 : index
    %c0_414 = arith.constant 0 : index
    %456 = vector.load %arg14[%c0_412, %c4_413, %c0_414] : memref<2x33x32xf32, #tpu.memory_space<vmem>>, vector<1x8x32xf32>
    %457 = vector.shape_cast %456 : vector<1x8x32xf32> to vector<8x32xf32>
    %458 = arith.truncf %457 : vector<8x32xf32> to vector<8x32xbf16>
    %c4_415 = arith.constant 4 : index
    %c0_416 = arith.constant 0 : index
    %c0_417 = arith.constant 0 : index
    %459 = vector.load %arg10[%c4_415, %c0_416, %c0_417] : memref<5x32x64xbf16, #tpu.memory_space<vmem>>, vector<1x32x64xbf16>
    %460 = vector.shape_cast %459 : vector<1x32x64xbf16> to vector<32x64xbf16>
    %cst_418 = arith.constant dense<0.000000e+00> : vector<8x64xf32>
    %461 = tpu.matmul %458, %460, %cst_418 {dimension_numbers = #tpu.dot_dimension_numbers<[1], [0], [0], [1], [0, 0, 1, 1], [], []>} : vector<8x32xbf16>, vector<32x64xbf16>, vector<8x64xf32> -> vector<8x64xf32>
    %462 = arith.addf %455, %461 : vector<8x64xf32>
    %463 = vector.broadcast %428 : vector<1x64xf32> to vector<8x64xf32>
    %464 = arith.addf %462, %463 : vector<8x64xf32>
    %cst_419 = arith.constant 0.000000e+00 : f32
    %465 = vector.broadcast %cst_419 : f32 to vector<8x64xf32>
    %466 = arith.maximumf %464, %465 : vector<8x64xf32>
    %c1_420 = arith.constant 1 : index
    %c0_421 = arith.constant 0 : index
    %c0_422 = arith.constant 0 : index
    %467 = vector.load %arg14[%c1_420, %c0_421, %c0_422] : memref<2x33x32xf32, #tpu.memory_space<vmem>>, vector<1x8x32xf32>
    %468 = vector.shape_cast %467 : vector<1x8x32xf32> to vector<8x32xf32>
    %469 = arith.truncf %468 : vector<8x32xf32> to vector<8x32xbf16>
    %c0_423 = arith.constant 0 : index
    %c0_424 = arith.constant 0 : index
    %c0_425 = arith.constant 0 : index
    %470 = vector.load %arg10[%c0_423, %c0_424, %c0_425] : memref<5x32x64xbf16, #tpu.memory_space<vmem>>, vector<1x32x64xbf16>
    %471 = vector.shape_cast %470 : vector<1x32x64xbf16> to vector<32x64xbf16>
    %cst_426 = arith.constant dense<0.000000e+00> : vector<8x64xf32>
    %472 = tpu.matmul %469, %471, %cst_426 {dimension_numbers = #tpu.dot_dimension_numbers<[1], [0], [0], [1], [0, 0, 1, 1], [], []>} : vector<8x32xbf16>, vector<32x64xbf16>, vector<8x64xf32> -> vector<8x64xf32>
    %c1_427 = arith.constant 1 : index
    %c1_428 = arith.constant 1 : index
    %c0_429 = arith.constant 0 : index
    %473 = vector.load %arg14[%c1_427, %c1_428, %c0_429] : memref<2x33x32xf32, #tpu.memory_space<vmem>>, vector<1x8x32xf32>
    %474 = vector.shape_cast %473 : vector<1x8x32xf32> to vector<8x32xf32>
    %475 = arith.truncf %474 : vector<8x32xf32> to vector<8x32xbf16>
    %c1_430 = arith.constant 1 : index
    %c0_431 = arith.constant 0 : index
    %c0_432 = arith.constant 0 : index
    %476 = vector.load %arg10[%c1_430, %c0_431, %c0_432] : memref<5x32x64xbf16, #tpu.memory_space<vmem>>, vector<1x32x64xbf16>
    %477 = vector.shape_cast %476 : vector<1x32x64xbf16> to vector<32x64xbf16>
    %cst_433 = arith.constant dense<0.000000e+00> : vector<8x64xf32>
    %478 = tpu.matmul %475, %477, %cst_433 {dimension_numbers = #tpu.dot_dimension_numbers<[1], [0], [0], [1], [0, 0, 1, 1], [], []>} : vector<8x32xbf16>, vector<32x64xbf16>, vector<8x64xf32> -> vector<8x64xf32>
    %479 = arith.addf %472, %478 : vector<8x64xf32>
    %c1_434 = arith.constant 1 : index
    %c2_435 = arith.constant 2 : index
    %c0_436 = arith.constant 0 : index
    %480 = vector.load %arg14[%c1_434, %c2_435, %c0_436] : memref<2x33x32xf32, #tpu.memory_space<vmem>>, vector<1x8x32xf32>
    %481 = vector.shape_cast %480 : vector<1x8x32xf32> to vector<8x32xf32>
    %482 = arith.truncf %481 : vector<8x32xf32> to vector<8x32xbf16>
    %c2_437 = arith.constant 2 : index
    %c0_438 = arith.constant 0 : index
    %c0_439 = arith.constant 0 : index
    %483 = vector.load %arg10[%c2_437, %c0_438, %c0_439] : memref<5x32x64xbf16, #tpu.memory_space<vmem>>, vector<1x32x64xbf16>
    %484 = vector.shape_cast %483 : vector<1x32x64xbf16> to vector<32x64xbf16>
    %cst_440 = arith.constant dense<0.000000e+00> : vector<8x64xf32>
    %485 = tpu.matmul %482, %484, %cst_440 {dimension_numbers = #tpu.dot_dimension_numbers<[1], [0], [0], [1], [0, 0, 1, 1], [], []>} : vector<8x32xbf16>, vector<32x64xbf16>, vector<8x64xf32> -> vector<8x64xf32>
    %486 = arith.addf %479, %485 : vector<8x64xf32>
    %c1_441 = arith.constant 1 : index
    %c3_442 = arith.constant 3 : index
    %c0_443 = arith.constant 0 : index
    %487 = vector.load %arg14[%c1_441, %c3_442, %c0_443] : memref<2x33x32xf32, #tpu.memory_space<vmem>>, vector<1x8x32xf32>
    %488 = vector.shape_cast %487 : vector<1x8x32xf32> to vector<8x32xf32>
    %489 = arith.truncf %488 : vector<8x32xf32> to vector<8x32xbf16>
    %c3_444 = arith.constant 3 : index
    %c0_445 = arith.constant 0 : index
    %c0_446 = arith.constant 0 : index
    %490 = vector.load %arg10[%c3_444, %c0_445, %c0_446] : memref<5x32x64xbf16, #tpu.memory_space<vmem>>, vector<1x32x64xbf16>
    %491 = vector.shape_cast %490 : vector<1x32x64xbf16> to vector<32x64xbf16>
    %cst_447 = arith.constant dense<0.000000e+00> : vector<8x64xf32>
    %492 = tpu.matmul %489, %491, %cst_447 {dimension_numbers = #tpu.dot_dimension_numbers<[1], [0], [0], [1], [0, 0, 1, 1], [], []>} : vector<8x32xbf16>, vector<32x64xbf16>, vector<8x64xf32> -> vector<8x64xf32>
    %493 = arith.addf %486, %492 : vector<8x64xf32>
    %c1_448 = arith.constant 1 : index
    %c4_449 = arith.constant 4 : index
    %c0_450 = arith.constant 0 : index
    %494 = vector.load %arg14[%c1_448, %c4_449, %c0_450] : memref<2x33x32xf32, #tpu.memory_space<vmem>>, vector<1x8x32xf32>
    %495 = vector.shape_cast %494 : vector<1x8x32xf32> to vector<8x32xf32>
    %496 = arith.truncf %495 : vector<8x32xf32> to vector<8x32xbf16>
    %c4_451 = arith.constant 4 : index
    %c0_452 = arith.constant 0 : index
    %c0_453 = arith.constant 0 : index
    %497 = vector.load %arg10[%c4_451, %c0_452, %c0_453] : memref<5x32x64xbf16, #tpu.memory_space<vmem>>, vector<1x32x64xbf16>
    %498 = vector.shape_cast %497 : vector<1x32x64xbf16> to vector<32x64xbf16>
    %cst_454 = arith.constant dense<0.000000e+00> : vector<8x64xf32>
    %499 = tpu.matmul %496, %498, %cst_454 {dimension_numbers = #tpu.dot_dimension_numbers<[1], [0], [0], [1], [0, 0, 1, 1], [], []>} : vector<8x32xbf16>, vector<32x64xbf16>, vector<8x64xf32> -> vector<8x64xf32>
    %500 = arith.addf %493, %499 : vector<8x64xf32>
    %501 = vector.broadcast %428 : vector<1x64xf32> to vector<8x64xf32>
    %502 = arith.addf %500, %501 : vector<8x64xf32>
    %cst_455 = arith.constant 0.000000e+00 : f32
    %503 = vector.broadcast %cst_455 : f32 to vector<8x64xf32>
    %504 = arith.maximumf %502, %503 : vector<8x64xf32>
    %505 = arith.truncf %466 : vector<8x64xf32> to vector<8x64xbf16>
    %c0_456 = arith.constant 0 : index
    %c0_457 = arith.constant 0 : index
    %c0_458 = arith.constant 0 : index
    %506 = vector.load %arg12[%c0_456, %c0_457, %c0_458] : memref<2x8x64xbf16, #tpu.memory_space<vmem>>, vector<1x8x64xbf16>
    %507 = vector.shape_cast %506 : vector<1x8x64xbf16> to vector<8x64xbf16>
    %508 = vector.shape_cast %505 : vector<8x64xbf16> to vector<1x8x64xbf16>
    tpu.vector_store %arg12[%c0_456, %c0_457, %c0_458], %508 {strides = array<i32>} : memref<2x8x64xbf16, #tpu.memory_space<vmem>>, vector<1x8x64xbf16>,
    %509 = arith.truncf %504 : vector<8x64xf32> to vector<8x64xbf16>
    %c1_459 = arith.constant 1 : index
    %c0_460 = arith.constant 0 : index
    %c0_461 = arith.constant 0 : index
    %510 = vector.load %arg12[%c1_459, %c0_460, %c0_461] : memref<2x8x64xbf16, #tpu.memory_space<vmem>>, vector<1x8x64xbf16>
    %511 = vector.shape_cast %510 : vector<1x8x64xbf16> to vector<8x64xbf16>
    %512 = vector.shape_cast %509 : vector<8x64xbf16> to vector<1x8x64xbf16>
    tpu.vector_store %arg12[%c1_459, %c0_460, %c0_461], %512 {strides = array<i32>} : memref<2x8x64xbf16, #tpu.memory_space<vmem>>, vector<1x8x64xbf16>,
    return
  }
  func.func @transform_0(%arg0: i32) -> (i32, i32, i32) {
    %c0_i32 = arith.constant 0 : i32
    %c0_i32_0 = arith.constant 0 : i32
    %c0_i32_1 = arith.constant 0 : i32
    return %arg0, %c0_i32, %c0_i32_0 : i32, i32, i32
  }
  func.func @transform_1(%arg0: i32) -> (i32, i32, i32) {
    %c0_i32 = arith.constant 0 : i32
    %c0_i32_0 = arith.constant 0 : i32
    %c0_i32_1 = arith.constant 0 : i32
    %c0_i32_2 = arith.constant 0 : i32
    return %c0_i32, %c0_i32_0, %c0_i32_1 : i32, i32, i32
  }
  func.func @transform_2(%arg0: i32) -> (i32, i32) {
    %c0_i32 = arith.constant 0 : i32
    %c0_i32_0 = arith.constant 0 : i32
    %c0_i32_1 = arith.constant 0 : i32
    return %c0_i32, %c0_i32_0 : i32, i32
  }
  func.func @transform_3(%arg0: i32) -> (i32, i32, i32) {
    %c0_i32 = arith.constant 0 : i32
    %c0_i32_0 = arith.constant 0 : i32
    %c0_i32_1 = arith.constant 0 : i32
    %c0_i32_2 = arith.constant 0 : i32
    return %c0_i32, %c0_i32_0, %c0_i32_1 : i32, i32, i32
  }
  func.func @transform_4(%arg0: i32) -> (i32, i32) {
    %c0_i32 = arith.constant 0 : i32
    %c0_i32_0 = arith.constant 0 : i32
    %c0_i32_1 = arith.constant 0 : i32
    return %c0_i32, %c0_i32_0 : i32, i32
  }
  func.func @transform_5(%arg0: i32) -> (i32, i32, i32) {
    %c0_i32 = arith.constant 0 : i32
    %c0_i32_0 = arith.constant 0 : i32
    %c0_i32_1 = arith.constant 0 : i32
    %c0_i32_2 = arith.constant 0 : i32
    return %c0_i32, %c0_i32_0, %c0_i32_1 : i32, i32, i32
  }
  func.func @transform_6(%arg0: i32) -> (i32, i32) {
    %c0_i32 = arith.constant 0 : i32
    %c0_i32_0 = arith.constant 0 : i32
    %c0_i32_1 = arith.constant 0 : i32
    return %c0_i32, %c0_i32_0 : i32, i32
  }
  func.func @transform_7(%arg0: i32) -> (i32, i32, i32) {
    %c0_i32 = arith.constant 0 : i32
    %c0_i32_0 = arith.constant 0 : i32
    %c0_i32_1 = arith.constant 0 : i32
    %c0_i32_2 = arith.constant 0 : i32
    return %c0_i32, %c0_i32_0, %c0_i32_1 : i32, i32, i32
  }
  func.func @transform_8(%arg0: i32) -> (i32, i32) {
    %c0_i32 = arith.constant 0 : i32
    %c0_i32_0 = arith.constant 0 : i32
    %c0_i32_1 = arith.constant 0 : i32
    return %c0_i32, %c0_i32_0 : i32, i32
  }
  func.func @transform_9(%arg0: i32) -> (i32, i32, i32) {
    %c0_i32 = arith.constant 0 : i32
    %c0_i32_0 = arith.constant 0 : i32
    %c0_i32_1 = arith.constant 0 : i32
    %c0_i32_2 = arith.constant 0 : i32
    return %c0_i32, %c0_i32_0, %c0_i32_1 : i32, i32, i32
  }
  func.func @transform_10(%arg0: i32) -> (i32, i32) {
    %c0_i32 = arith.constant 0 : i32
    %c0_i32_0 = arith.constant 0 : i32
    %c0_i32_1 = arith.constant 0 : i32
    return %c0_i32, %c0_i32_0 : i32, i32
  }
  func.func @transform_11(%arg0: i32) -> (i32, i32, i32) {
    %c0_i32 = arith.constant 0 : i32
    %c0_i32_0 = arith.constant 0 : i32
    %c0_i32_1 = arith.constant 0 : i32
    return %arg0, %c0_i32, %c0_i32_0 : i32, i32, i32
  }
}

module attributes {stable_mosaic.version = 11 : i64} {
  func.func @kernel(%arg0: i32, %arg1: i32, %arg2: memref<2x8x64xbf16, #tpu.memory_space<vmem>>, %arg3: memref<512x2048xbf16, #tpu.memory_space<vmem>>, %arg4: memref<1x2048xf32, #tpu.memory_space<vmem>>, %arg5: memref<2048x256xbf16, #tpu.memory_space<vmem>>, %arg6: memref<1x256xf32, #tpu.memory_space<vmem>>, %arg7: memref<2x256xf32, #tpu.memory_space<vmem>>, %arg8: memref<2x2048xf32, #tpu.memory_space<vmem>>) attributes {dimension_semantics = [#tpu.dimension_semantics<parallel>, #tpu.dimension_semantics<arbitrary>], iteration_bounds = array<i64: 1, 1>, scalar_prefetch = 0 : i64, scratch_operands = 1 : i64, tpu.core_type = #tpu.core_type<tc>, window_params = [{transform_indices = @transform_0, window_bounds = array<i64: 2, 8, 64>}, {transform_indices = @transform_1, window_bounds = array<i64: 512, 2048>}, {pipeline_mode = #tpu.pipeline_mode<synchronous>, transform_indices = @transform_2, window_bounds = array<i64: 1, 2048>}, {pipeline_mode = #tpu.pipeline_mode<synchronous>, transform_indices = @transform_3, window_bounds = array<i64: 2048, 256>}, {pipeline_mode = #tpu.pipeline_mode<synchronous>, transform_indices = @transform_4, window_bounds = array<i64: 1, 256>}, {transform_indices = @transform_5, window_bounds = array<i64: 2, 256>}]} {
    %c0_i32 = arith.constant 0 : i32
    %0 = arith.cmpi eq, %arg1, %c0_i32 : i32
    %1 = arith.extui %0 : i1 to i32
    %c0_i32_0 = arith.constant 0 : i32
    %2 = arith.cmpi ne, %1, %c0_i32_0 : i32
    scf.if %2 {
      %cst_39 = arith.constant 0.000000e+00 : f32
      %48 = vector.broadcast %cst_39 : f32 to vector<2x2048xf32>
      %c0_40 = arith.constant 0 : index
      %c0_41 = arith.constant 0 : index
      %49 = vector.load %arg8[%c0_40, %c0_41] : memref<2x2048xf32, #tpu.memory_space<vmem>>, vector<2x2048xf32>
      tpu.vector_store %arg8[%c0_40, %c0_41], %48 {strides = array<i32>} : memref<2x2048xf32, #tpu.memory_space<vmem>>, vector<2x2048xf32>,
    } else {
    }
    %c0 = arith.constant 0 : index
    %c0_1 = arith.constant 0 : index
    %3 = vector.load %arg8[%c0, %c0_1] : memref<2x2048xf32, #tpu.memory_space<vmem>>, vector<2x2048xf32>
    %c0_2 = arith.constant 0 : index
    %c0_3 = arith.constant 0 : index
    %c0_4 = arith.constant 0 : index
    %4 = vector.load %arg2[%c0_2, %c0_3, %c0_4] : memref<2x8x64xbf16, #tpu.memory_space<vmem>>, vector<2x1x64xbf16>
    %5 = vector.shape_cast %4 : vector<2x1x64xbf16> to vector<2x64xbf16>
    %c0_5 = arith.constant 0 : index
    %c0_6 = arith.constant 0 : index
    %6 = vector.load %arg3[%c0_5, %c0_6] : memref<512x2048xbf16, #tpu.memory_space<vmem>>, vector<64x2048xbf16>
    %cst = arith.constant dense<0.000000e+00> : vector<2x2048xf32>
    %7 = tpu.matmul %5, %6, %cst {dimension_numbers = #tpu.dot_dimension_numbers<[1], [0], [0], [1], [0, 0, 1, 1], [], []>} : vector<2x64xbf16>, vector<64x2048xbf16>, vector<2x2048xf32> -> vector<2x2048xf32>
    %8 = arith.addf %3, %7 : vector<2x2048xf32>
    %c0_7 = arith.constant 0 : index
    %c1 = arith.constant 1 : index
    %c0_8 = arith.constant 0 : index
    %9 = vector.load %arg2[%c0_7, %c1, %c0_8] : memref<2x8x64xbf16, #tpu.memory_space<vmem>>, vector<2x1x64xbf16>
    %10 = vector.shape_cast %9 : vector<2x1x64xbf16> to vector<2x64xbf16>
    %c64 = arith.constant 64 : index
    %c0_9 = arith.constant 0 : index
    %11 = vector.load %arg3[%c64, %c0_9] : memref<512x2048xbf16, #tpu.memory_space<vmem>>, vector<64x2048xbf16>
    %cst_10 = arith.constant dense<0.000000e+00> : vector<2x2048xf32>
    %12 = tpu.matmul %10, %11, %cst_10 {dimension_numbers = #tpu.dot_dimension_numbers<[1], [0], [0], [1], [0, 0, 1, 1], [], []>} : vector<2x64xbf16>, vector<64x2048xbf16>, vector<2x2048xf32> -> vector<2x2048xf32>
    %13 = arith.addf %8, %12 : vector<2x2048xf32>
    %c0_11 = arith.constant 0 : index
    %c2 = arith.constant 2 : index
    %c0_12 = arith.constant 0 : index
    %14 = vector.load %arg2[%c0_11, %c2, %c0_12] : memref<2x8x64xbf16, #tpu.memory_space<vmem>>, vector<2x1x64xbf16>
    %15 = vector.shape_cast %14 : vector<2x1x64xbf16> to vector<2x64xbf16>
    %c128 = arith.constant 128 : index
    %c0_13 = arith.constant 0 : index
    %16 = vector.load %arg3[%c128, %c0_13] : memref<512x2048xbf16, #tpu.memory_space<vmem>>, vector<64x2048xbf16>
    %cst_14 = arith.constant dense<0.000000e+00> : vector<2x2048xf32>
    %17 = tpu.matmul %15, %16, %cst_14 {dimension_numbers = #tpu.dot_dimension_numbers<[1], [0], [0], [1], [0, 0, 1, 1], [], []>} : vector<2x64xbf16>, vector<64x2048xbf16>, vector<2x2048xf32> -> vector<2x2048xf32>
    %18 = arith.addf %13, %17 : vector<2x2048xf32>
    %c0_15 = arith.constant 0 : index
    %c3 = arith.constant 3 : index
    %c0_16 = arith.constant 0 : index
    %19 = vector.load %arg2[%c0_15, %c3, %c0_16] : memref<2x8x64xbf16, #tpu.memory_space<vmem>>, vector<2x1x64xbf16>
    %20 = vector.shape_cast %19 : vector<2x1x64xbf16> to vector<2x64xbf16>
    %c192 = arith.constant 192 : index
    %c0_17 = arith.constant 0 : index
    %21 = vector.load %arg3[%c192, %c0_17] : memref<512x2048xbf16, #tpu.memory_space<vmem>>, vector<64x2048xbf16>
    %cst_18 = arith.constant dense<0.000000e+00> : vector<2x2048xf32>
    %22 = tpu.matmul %20, %21, %cst_18 {dimension_numbers = #tpu.dot_dimension_numbers<[1], [0], [0], [1], [0, 0, 1, 1], [], []>} : vector<2x64xbf16>, vector<64x2048xbf16>, vector<2x2048xf32> -> vector<2x2048xf32>
    %23 = arith.addf %18, %22 : vector<2x2048xf32>
    %c0_19 = arith.constant 0 : index
    %c4 = arith.constant 4 : index
    %c0_20 = arith.constant 0 : index
    %24 = vector.load %arg2[%c0_19, %c4, %c0_20] : memref<2x8x64xbf16, #tpu.memory_space<vmem>>, vector<2x1x64xbf16>
    %25 = vector.shape_cast %24 : vector<2x1x64xbf16> to vector<2x64xbf16>
    %c256 = arith.constant 256 : index
    %c0_21 = arith.constant 0 : index
    %26 = vector.load %arg3[%c256, %c0_21] : memref<512x2048xbf16, #tpu.memory_space<vmem>>, vector<64x2048xbf16>
    %cst_22 = arith.constant dense<0.000000e+00> : vector<2x2048xf32>
    %27 = tpu.matmul %25, %26, %cst_22 {dimension_numbers = #tpu.dot_dimension_numbers<[1], [0], [0], [1], [0, 0, 1, 1], [], []>} : vector<2x64xbf16>, vector<64x2048xbf16>, vector<2x2048xf32> -> vector<2x2048xf32>
    %28 = arith.addf %23, %27 : vector<2x2048xf32>
    %c0_23 = arith.constant 0 : index
    %c5 = arith.constant 5 : index
    %c0_24 = arith.constant 0 : index
    %29 = vector.load %arg2[%c0_23, %c5, %c0_24] : memref<2x8x64xbf16, #tpu.memory_space<vmem>>, vector<2x1x64xbf16>
    %30 = vector.shape_cast %29 : vector<2x1x64xbf16> to vector<2x64xbf16>
    %c320 = arith.constant 320 : index
    %c0_25 = arith.constant 0 : index
    %31 = vector.load %arg3[%c320, %c0_25] : memref<512x2048xbf16, #tpu.memory_space<vmem>>, vector<64x2048xbf16>
    %cst_26 = arith.constant dense<0.000000e+00> : vector<2x2048xf32>
    %32 = tpu.matmul %30, %31, %cst_26 {dimension_numbers = #tpu.dot_dimension_numbers<[1], [0], [0], [1], [0, 0, 1, 1], [], []>} : vector<2x64xbf16>, vector<64x2048xbf16>, vector<2x2048xf32> -> vector<2x2048xf32>
    %33 = arith.addf %28, %32 : vector<2x2048xf32>
    %c0_27 = arith.constant 0 : index
    %c6 = arith.constant 6 : index
    %c0_28 = arith.constant 0 : index
    %34 = vector.load %arg2[%c0_27, %c6, %c0_28] : memref<2x8x64xbf16, #tpu.memory_space<vmem>>, vector<2x1x64xbf16>
    %35 = vector.shape_cast %34 : vector<2x1x64xbf16> to vector<2x64xbf16>
    %c384 = arith.constant 384 : index
    %c0_29 = arith.constant 0 : index
    %36 = vector.load %arg3[%c384, %c0_29] : memref<512x2048xbf16, #tpu.memory_space<vmem>>, vector<64x2048xbf16>
    %cst_30 = arith.constant dense<0.000000e+00> : vector<2x2048xf32>
    %37 = tpu.matmul %35, %36, %cst_30 {dimension_numbers = #tpu.dot_dimension_numbers<[1], [0], [0], [1], [0, 0, 1, 1], [], []>} : vector<2x64xbf16>, vector<64x2048xbf16>, vector<2x2048xf32> -> vector<2x2048xf32>
    %38 = arith.addf %33, %37 : vector<2x2048xf32>
    %c0_31 = arith.constant 0 : index
    %c7 = arith.constant 7 : index
    %c0_32 = arith.constant 0 : index
    %39 = vector.load %arg2[%c0_31, %c7, %c0_32] : memref<2x8x64xbf16, #tpu.memory_space<vmem>>, vector<2x1x64xbf16>
    %40 = vector.shape_cast %39 : vector<2x1x64xbf16> to vector<2x64xbf16>
    %c448 = arith.constant 448 : index
    %c0_33 = arith.constant 0 : index
    %41 = vector.load %arg3[%c448, %c0_33] : memref<512x2048xbf16, #tpu.memory_space<vmem>>, vector<64x2048xbf16>
    %cst_34 = arith.constant dense<0.000000e+00> : vector<2x2048xf32>
    %42 = tpu.matmul %40, %41, %cst_34 {dimension_numbers = #tpu.dot_dimension_numbers<[1], [0], [0], [1], [0, 0, 1, 1], [], []>} : vector<2x64xbf16>, vector<64x2048xbf16>, vector<2x2048xf32> -> vector<2x2048xf32>
    %43 = arith.addf %38, %42 : vector<2x2048xf32>
    %c0_35 = arith.constant 0 : index
    %c0_36 = arith.constant 0 : index
    %44 = vector.load %arg8[%c0_35, %c0_36] : memref<2x2048xf32, #tpu.memory_space<vmem>>, vector<2x2048xf32>
    tpu.vector_store %arg8[%c0_35, %c0_36], %43 {strides = array<i32>} : memref<2x2048xf32, #tpu.memory_space<vmem>>, vector<2x2048xf32>,
    %c0_i32_37 = arith.constant 0 : i32
    %45 = arith.cmpi eq, %arg1, %c0_i32_37 : i32
    %46 = arith.extui %45 : i1 to i32
    %c0_i32_38 = arith.constant 0 : i32
    %47 = arith.cmpi ne, %46, %c0_i32_38 : i32
    scf.if %47 {
      %c0_39 = arith.constant 0 : index
      %c0_40 = arith.constant 0 : index
      %48 = vector.load %arg8[%c0_39, %c0_40] : memref<2x2048xf32, #tpu.memory_space<vmem>>, vector<2x2048xf32>
      %c0_41 = arith.constant 0 : index
      %c0_42 = arith.constant 0 : index
      %49 = vector.load %arg4[%c0_41, %c0_42] : memref<1x2048xf32, #tpu.memory_space<vmem>>, vector<1x2048xf32>
      %50 = vector.broadcast %49 : vector<1x2048xf32> to vector<2x2048xf32>
      %51 = arith.addf %48, %50 : vector<2x2048xf32>
      %52 = arith.truncf %51 : vector<2x2048xf32> to vector<2x2048xbf16>
      %c0_43 = arith.constant 0 : index
      %c0_44 = arith.constant 0 : index
      %53 = vector.load %arg5[%c0_43, %c0_44] : memref<2048x256xbf16, #tpu.memory_space<vmem>>, vector<2048x256xbf16>
      %cst_45 = arith.constant dense<0.000000e+00> : vector<2x256xf32>
      %54 = tpu.matmul %52, %53, %cst_45 {dimension_numbers = #tpu.dot_dimension_numbers<[1], [0], [0], [1], [0, 0, 1, 1], [], []>} : vector<2x2048xbf16>, vector<2048x256xbf16>, vector<2x256xf32> -> vector<2x256xf32>
      %c0_46 = arith.constant 0 : index
      %c0_47 = arith.constant 0 : index
      %55 = vector.load %arg6[%c0_46, %c0_47] : memref<1x256xf32, #tpu.memory_space<vmem>>, vector<1x256xf32>
      %56 = vector.broadcast %55 : vector<1x256xf32> to vector<2x256xf32>
      %57 = arith.addf %54, %56 : vector<2x256xf32>
      %c0_48 = arith.constant 0 : index
      %c0_49 = arith.constant 0 : index
      %58 = vector.load %arg7[%c0_48, %c0_49] : memref<2x256xf32, #tpu.memory_space<vmem>>, vector<2x256xf32>
      tpu.vector_store %arg7[%c0_48, %c0_49], %57 {strides = array<i32>} : memref<2x256xf32, #tpu.memory_space<vmem>>, vector<2x256xf32>,
    } else {
    }
    return
  }
  func.func @transform_0(%arg0: i32, %arg1: i32) -> (i32, i32, i32) {
    %c0_i32 = arith.constant 0 : i32
    %c0_i32_0 = arith.constant 0 : i32
    return %arg0, %arg1, %c0_i32 : i32, i32, i32
  }
  func.func @transform_1(%arg0: i32, %arg1: i32) -> (i32, i32) {
    %c0_i32 = arith.constant 0 : i32
    %c0_i32_0 = arith.constant 0 : i32
    return %arg1, %c0_i32 : i32, i32
  }
  func.func @transform_2(%arg0: i32, %arg1: i32) -> (i32, i32) {
    %c0_i32 = arith.constant 0 : i32
    %c0_i32_0 = arith.constant 0 : i32
    %c0_i32_1 = arith.constant 0 : i32
    return %c0_i32, %c0_i32_0 : i32, i32
  }
  func.func @transform_3(%arg0: i32, %arg1: i32) -> (i32, i32) {
    %c0_i32 = arith.constant 0 : i32
    %c0_i32_0 = arith.constant 0 : i32
    %c0_i32_1 = arith.constant 0 : i32
    return %c0_i32, %c0_i32_0 : i32, i32
  }
  func.func @transform_4(%arg0: i32, %arg1: i32) -> (i32, i32) {
    %c0_i32 = arith.constant 0 : i32
    %c0_i32_0 = arith.constant 0 : i32
    %c0_i32_1 = arith.constant 0 : i32
    return %c0_i32, %c0_i32_0 : i32, i32
  }
  func.func @transform_5(%arg0: i32, %arg1: i32) -> (i32, i32) {
    %c0_i32 = arith.constant 0 : i32
    %c0_i32_0 = arith.constant 0 : i32
    return %arg0, %c0_i32 : i32, i32
  }
}

</mosaic_0001>

<bundles_post_ra>
// kernel: _lambda_.2
= control target key start
LH: loop header
LB: loop body
LE: loop exit
PB: predicated region body
PF: predicated region fallthrough
CT: control target
= control target key end

     0   :  { %16 = vsyncpa [#allocation5], 0  ;;  %s6646_s0 = inlined_call_operand.vmem [shape: f32[2,66,4], index: 0, kind: input, shape index: {}]   ;;  %s6647_s1 = inlined_call_operand.vmem [shape: bf16[5,4,4], index: 1, kind: input, shape index: {}]   ;;  %s6648_s2 = inlined_call_operand.hbm [shape: f32[1,4], index: 2, kind: input, shape index: {}]   ;;  %s6649_s3 = inlined_call_operand.hbm [shape: bf16[5,4,8], index: 3, kind: input, shape index: {}]   ;;  %s6650_s4 = inlined_call_operand.hbm [shape: f32[1,8], index: 4, kind: input, shape index: {}]   ;;  %s6651_s5 = inlined_call_operand.hbm [shape: bf16[5,8,16], index: 5, kind: input, shape index: {}]   ;;  %s6652_s6 = inlined_call_operand.hbm [shape: f32[1,16], index: 6, kind: input, shape index: {}]   ;;  %s6653_s7 = inlined_call_operand.hbm [shape: bf16[5,16,32], index: 7, kind: input, shape index: {}]   ;;  %s6654_s8 = inlined_call_operand.hbm [shape: f32[1,32], index: 8, kind: input, shape index: {}]   ;;  %s6655_s9 = inlined_call_operand.hbm [shape: bf16[5,32,64], index: 9, kind: input, shape index: {}]   ;;  %s6656_s10 = inlined_call_operand.hbm [shape: f32[1,64], index: 10, kind: input, shape index: {}]   ;;  %s6657_s11 = inlined_call_operand.vmem [shape: bf16[2,8,64], index: 11, kind: output, shape index: {}]  }
   0x1   :  { %17 = vsyncpa [#allocation7], 0 }
   0x2   :  { %18 = vsyncpa [#allocation10], 0 }
   0x3   :  { %19 = vsyncpa [#allocation13], 0 }
   0x4   :  { %20 = vsyncpa [#allocation16], 0  ;;  %s5589_s17 = smov [#allocation6]   ;;  %s5381_s21 = scalar_lea.hbm %s6649_s3, 160 }
   0x5   :  { %s40_s18 = sshll.u32 %s5589_s17, 4  ;;  %p5382_p0 = scmp.ne.s32.totalorder %s6649_s3, %s5381_s21  ;;  %s41_s18 = int_to_ptr.vmem [resolvable:$true] %s40_s18 }
   0x6   :  { %p5385_p1 = scmp.lt.u32.totalorder %s5381_s21, %s6649_s3 }
   0x8   :  { %p5387_p2 = pnand %p5385_p1, %p5382_p0 }
   0xa   :  { %5390 = shalt.err (!%p5387_p2)
}
   0xb   :  { %s5391_s26 = scalar_lea.vmem %s41_s18, 160  ;;  %p5396_p4 = scmp.lt.s32.totalorder %s41_s18, %s41_s18 }
   0xc   :  { %p5392_p3 = scmp.ne.s32.totalorder %s41_s18, %s5391_s26  ;;  %p5397_p5 = scmp.lt.s32.totalorder %s5391_s26, %s5391_s26 }
   0xe   :  { %p5398_p6 = por %p5397_p5, %p5396_p4 }
  0x10   :  { %p5399_p7 = pnand %p5398_p6, %p5392_p3 }
  0x12   :  { %5402 = shalt.err (!%p5399_p7)
}
  0x13   :  { %s5590_s27 = smov 32   ;;  %s5591_s28 = smov 2  }
  0x14   :  { %46 = dma.hbm_to_vmem [thread:$0]  %s6649_s3, 160, %s41_s18, [#allocation7], %s5590_s27, %s5590_s27, %s5591_s28  }
  0x15   :  { %s5592_s12 = smov [#allocation9]   ;;  %s5403_s16 = scalar_lea.hbm %s6651_s5, 320 }
  0x16   :  { %s62_s13 = sshll.u32 %s5592_s12, 4  ;;  %p5404_p8 = scmp.ne.s32.totalorder %s6651_s5, %s5403_s16  ;;  %s63_s13 = int_to_ptr.vmem [resolvable:$true] %s62_s13 }
  0x17   :  { %p5407_p9 = scmp.lt.u32.totalorder %s5403_s16, %s6651_s5 }
  0x19   :  { %p5409_p10 = pnand %p5407_p9, %p5404_p8 }
  0x1b   :  { %5412 = shalt.err (!%p5409_p10)
}
  0x1c   :  { %s5413_s22 = scalar_lea.vmem %s63_s13, 320  ;;  %p5418_p12 = scmp.lt.s32.totalorder %s63_s13, %s63_s13 }
  0x1d   :  { %p5414_p11 = scmp.ne.s32.totalorder %s63_s13, %s5413_s22  ;;  %p5419_p13 = scmp.lt.s32.totalorder %s5413_s22, %s5413_s22 }
  0x1f   :  { %p5420_p0 = por %p5419_p13, %p5418_p12 }
  0x21   :  { %p5421_p1 = pnand %p5420_p0, %p5414_p11 }
  0x23   :  { %5424 = shalt.err (!%p5421_p1)
}
  0x24   :  { %s5593_s3 = smov 64   ;;  %s5594_s18 = smov 4  }
  0x25   :  { %68 = dma.hbm_to_vmem [thread:$0]  %s6651_s5, 320, %s63_s13, [#allocation10], %s5593_s3, %s5593_s3, %s5594_s18  }
  0x26   :  { %s5595_s25 = smov [#allocation12]   ;;  %s5596_s27 = smov [#allocation15]  }
  0x27   :  { %s84_s26 = sshll.u32 %s5595_s25, 4  ;;  %s106_s28 = sshll.u32 %s5596_s27, 4  ;;  %s85_s26 = int_to_ptr.vmem [resolvable:$true] %s84_s26  ;;  %s5692_s28 = int_to_ptr.vmem [resolvable:$true] %s106_s28 }
  0x28   :  { %s5425_s12 = scalar_lea.hbm %s6653_s7, 640 }
  0x29   :  { %p5426_p2 = scmp.ne.s32.totalorder %s6653_s7, %s5425_s12  ;;  %p5429_p3 = scmp.lt.u32.totalorder %s5425_s12, %s6653_s7 }
  0x2b   :  { %p5431_p4 = pnand %p5429_p3, %p5426_p2 }
  0x2d   :  { %5434 = shalt.err (!%p5431_p4)
}
  0x2e   :  { %s5435_s5 = scalar_lea.vmem %s85_s26, 640  ;;  %p5440_p6 = scmp.lt.s32.totalorder %s85_s26, %s85_s26 }
  0x2f   :  { %p5436_p5 = scmp.ne.s32.totalorder %s85_s26, %s5435_s5  ;;  %p5441_p7 = scmp.lt.s32.totalorder %s5435_s5, %s5435_s5 }
  0x31   :  { %p5442_p8 = por %p5441_p7, %p5440_p6 }
  0x33   :  { %p5443_p9 = pnand %p5442_p8, %p5436_p5 }
  0x35   :  { %5446 = shalt.err (!%p5443_p9)
}
  0x36   :  { %90 = dma.hbm_to_vmem [thread:$0]  %s6653_s7, 640, %s85_s26, [#allocation13], %s5593_s3, %s5593_s3, %s5594_s18  }
  0x37   :  { %s5447_s22 = scalar_lea.hbm %s6655_s9, 1280 }
  0x38   :  { %p5448_p10 = scmp.ne.s32.totalorder %s6655_s9, %s5447_s22  ;;  %p5451_p11 = scmp.lt.u32.totalorder %s5447_s22, %s6655_s9 }
  0x3a   :  { %p5453_p12 = pnand %p5451_p11, %p5448_p10 }
  0x3c   :  { %5456 = shalt.err (!%p5453_p12)
}
  0x3d   :  { %s5457_s29 = scalar_lea.vmem %s5692_s28, 1280  ;;  %p5462_p0 = scmp.lt.s32.totalorder %s5692_s28, %s5692_s28 }
  0x3e   :  { %p5458_p13 = scmp.ne.s32.totalorder %s5692_s28, %s5457_s29  ;;  %p5463_p1 = scmp.lt.s32.totalorder %s5457_s29, %s5457_s29 }
  0x40   :  { %p5464_p2 = por %p5463_p1, %p5462_p0 }
  0x42   :  { %p5465_p3 = pnand %p5464_p2, %p5458_p13 }
  0x44   :  { %5468 = shalt.err (!%p5465_p3)
}
  0x45   :  { %112 = dma.hbm_to_vmem [thread:$0]  %s6655_s9, 1280, %s5692_s28, [#allocation16], %s5593_s3, %s5593_s3, %s5594_s18  }
  0x46   :  { %s5597_s30 = smov [#allocation4]   ;;  %s5598_s14 = smov [#allocation8]  }
  0x47   :  { %s31_s12 = sshll.u32 %s5597_s30, 4  ;;  %s53_s15 = sshll.u32 %s5598_s14, 4  ;;  %s32_s12 = int_to_ptr.vmem [resolvable:$true] %s31_s12  ;;  %s54_s15 = int_to_ptr.vmem [resolvable:$true] %s53_s15 }
  0x48   :  { %s5469_s5 = scalar_lea.hbm %s6648_s2, 16 }
  0x49   :  { %p5470_p4 = scmp.ne.s32.totalorder %s6648_s2, %s5469_s5  ;;  %p5473_p5 = scmp.lt.u32.totalorder %s5469_s5, %s6648_s2 }
  0x4b   :  { %p5475_p6 = pnand %p5473_p5, %p5470_p4 }
  0x4d   :  { %5478 = shalt.err (!%p5475_p6)
}
  0x4e   :  { %s5479_s9 = scalar_lea.vmem %s32_s12, 16  ;;  %s5483_s3 = scalar_lea.vmem %s32_s12, 32 }
  0x4f   :  { %p5480_p7 = scmp.ne.s32.totalorder %s32_s12, %s5479_s9  ;;  %p5484_p8 = scmp.lt.s32.totalorder %s32_s12, %s32_s12 }
  0x50   :  { %p5485_p9 = scmp.lt.s32.totalorder %s5483_s3, %s5479_s9 }
  0x52   :  { %p5486_p10 = por %p5485_p9, %p5484_p8 }
  0x54   :  { %p5487_p11 = pnand %p5486_p10, %p5480_p7 }
  0x56   :  { %5490 = shalt.err (!%p5487_p11)
}
  0x57   :  { %34 = dma.hbm_to_vmem [thread:$0]  %s6648_s2, 16, %s32_s12, [#allocation5]  }
  0x58   :  { %s5491_s24 = scalar_lea.hbm %s6650_s4, 16 }
  0x59   :  { %p5492_p12 = scmp.ne.s32.totalorder %s6650_s4, %s5491_s24  ;;  %p5495_p13 = scmp.lt.u32.totalorder %s5491_s24, %s6650_s4 }
  0x5b   :  { %p5497_p0 = pnand %p5495_p13, %p5492_p12 }
  0x5d   :  { %5500 = shalt.err (!%p5497_p0)
}
  0x5e   :  { %s5501_s26 = scalar_lea.vmem %s54_s15, 16  ;;  %s5505_s30 = scalar_lea.vmem %s54_s15, 32 }
  0x5f   :  { %p5502_p1 = scmp.ne.s32.totalorder %s54_s15, %s5501_s26  ;;  %p5506_p2 = scmp.lt.s32.totalorder %s54_s15, %s54_s15 }
  0x60   :  { %p5507_p3 = scmp.lt.s32.totalorder %s5505_s30, %s5501_s26 }
  0x62   :  { %p5508_p4 = por %p5507_p3, %p5506_p2 }
  0x64   :  { %p5509_p5 = pnand %p5508_p4, %p5502_p1 }
  0x66   :  { %5512 = shalt.err (!%p5509_p5)
}
  0x67   :  { %56 = dma.hbm_to_vmem [thread:$0]  %s6650_s4, 16, %s54_s15, [#allocation7]  }
  0x68   :  { %s5599_s14 = smov [#allocation11]   ;;  %s5600_s17 = smov [#allocation14]  }
  0x69   :  { %s75_s16 = sshll.u32 %s5599_s14, 4  ;;  %s97_s5 = sshll.u32 %s5600_s17, 4  ;;  %s76_s16 = int_to_ptr.vmem [resolvable:$true] %s75_s16  ;;  %s98_s5 = int_to_ptr.vmem [resolvable:$true] %s97_s5 }
  0x6a   :  { %s5513_s20 = scalar_lea.hbm %s6652_s6, 16 }
  0x6b   :  { %p5514_p6 = scmp.ne.s32.totalorder %s6652_s6, %s5513_s20  ;;  %p5517_p7 = scmp.lt.u32.totalorder %s5513_s20, %s6652_s6 }
  0x6d   :  { %p5519_p8 = pnand %p5517_p7, %p5514_p6 }
  0x6f   :  { %5522 = shalt.err (!%p5519_p8)
}
  0x70   :  { %s5523_s4 = scalar_lea.vmem %s76_s16, 16  ;;  %s5527_s15 = scalar_lea.vmem %s76_s16, 32 }
  0x71   :  { %p5524_p9 = scmp.ne.s32.totalorder %s76_s16, %s5523_s4  ;;  %p5528_p10 = scmp.lt.s32.totalorder %s76_s16, %s76_s16 }
  0x72   :  { %p5529_p11 = scmp.lt.s32.totalorder %s5527_s15, %s5523_s4 }
  0x74   :  { %p5530_p12 = por %p5529_p11, %p5528_p10 }
  0x76   :  { %p5531_p13 = pnand %p5530_p12, %p5524_p9 }
  0x78   :  { %5534 = shalt.err (!%p5531_p13)
}
  0x79   :  { %78 = dma.hbm_to_vmem [thread:$0]  %s6652_s6, 16, %s76_s16, [#allocation10]  }
  0x7a   :  { %s5535_s25 = scalar_lea.hbm %s6654_s8, 16 }
  0x7b   :  { %p5536_p0 = scmp.ne.s32.totalorder %s6654_s8, %s5535_s25  ;;  %p5539_p1 = scmp.lt.u32.totalorder %s5535_s25, %s6654_s8 }
  0x7d   :  { %p5541_p2 = pnand %p5539_p1, %p5536_p0 }
  0x7f   :  { %5544 = shalt.err (!%p5541_p2)
}
  0x80   :  { %s5545_s30 = scalar_lea.vmem %s98_s5, 16  ;;  %s5549_s2 = scalar_lea.vmem %s98_s5, 32 }
  0x81   :  { %p5546_p3 = scmp.ne.s32.totalorder %s98_s5, %s5545_s30  ;;  %p5550_p4 = scmp.lt.s32.totalorder %s98_s5, %s98_s5 }
  0x82   :  { %p5551_p5 = scmp.lt.s32.totalorder %s5549_s2, %s5545_s30 }
  0x84   :  { %p5552_p6 = por %p5551_p5, %p5550_p4 }
  0x86   :  { %p5553_p7 = pnand %p5552_p6, %p5546_p3 }
  0x88   :  { %5556 = shalt.err (!%p5553_p7)
}
  0x89   :  { %100 = dma.hbm_to_vmem [thread:$0]  %s6654_s8, 16, %s98_s5, [#allocation13]  }
  0x8a   :  { %s5601_s14 = smov [#allocation17]   ;;  %s5557_s19 = scalar_lea.hbm %s6656_s10, 16 }
  0x8b   :  { %s119_s16 = sshll.u32 %s5601_s14, 4  ;;  %p5558_p8 = scmp.ne.s32.totalorder %s6656_s10, %s5557_s19  ;;  %s120_s16 = int_to_ptr.vmem [resolvable:$true] %s119_s16 }
  0x8c   :  { %p5561_p9 = scmp.lt.u32.totalorder %s5557_s19, %s6656_s10 }
  0x8e   :  { %p5563_p10 = pnand %p5561_p9, %p5558_p8 }
  0x90   :  { %5566 = shalt.err (!%p5563_p10)
}
  0x91   :  { %s5567_s18 = scalar_lea.vmem %s120_s16, 16  ;;  %s5571_s8 = scalar_lea.vmem %s120_s16, 32 }
  0x92   :  { %p5568_p11 = scmp.ne.s32.totalorder %s120_s16, %s5567_s18  ;;  %p5572_p12 = scmp.lt.s32.totalorder %s120_s16, %s120_s16 }
  0x93   :  { %p5573_p13 = scmp.lt.s32.totalorder %s5571_s8, %s5567_s18 }
  0x95   :  { %p5574_p0 = por %p5573_p13, %p5572_p12 }
  0x97   :  { %p5575_p1 = pnand %p5574_p0, %p5568_p11 }
  0x99   :  { %5578 = shalt.err (!%p5575_p1)
}
  0x9a   :  { %122 = dma.hbm_to_vmem [thread:$0]  %s6656_s10, 16, %s120_s16, [#allocation16]  }
  0x9b   :  { %5579 = dma.done.wait [#allocation5], 16  }
  0x9c   :  { %5580 = vsyncadd [#allocation5], 4294967280 }
  0x9d   :  { %5581 = dma.done.wait [#allocation7], 176  }
  0x9e   :  { %5582 = vsyncadd [#allocation7], 4294967120 }
  0x9f   :  { %5583 = dma.done.wait [#allocation10], 336  }
  0xa0   :  { %5584 = vsyncadd [#allocation10], 4294966960 }
  0xa1   :  { %5585 = dma.done.wait [#allocation13], 656  }
  0xa2   :  { %5586 = vsyncadd [#allocation13], 4294966640 }
  0xa3   :  { %5587 = dma.done.wait [#allocation16], 1296  }
  0xa4   :  { %5588 = vsyncadd [#allocation16], 4294966000  ;;  %vm223_vm0 = vcmask 1041408   ;;  %v5792_v0 = vld [vmem:[%s6647_s1 + $0x2] sm:$0x3]  ;;  %v197_v2 = vld [vmem:[%s6646_s0 + $0x9] sm:$0xff] }
  0xa5   :  { %v196_v1 = vld [vmem:[%s6646_s0 + $0x1] sm:$0xff]  ;;  %vm210_vm1 = vcmask 31744   ;;  %5330 = vmatprep.subr.msk.bf16.mxu0 %vm223_vm0, %v5792_v0  ;;  %v5804_v3 = vsel %vm223_vm0, %v5792_v0, 0  ;;  %v198_v5 = vld [vmem:[%s6646_s0 + $0x11] sm:$0xff]  ;;  %v199_v6 = vld [vmem:[%s6646_s0 + $0x19] sm:$0xff]  ;;  %vm678_vm3 = vcmask 506880  }
  0xa6   :  { %v204_v4 = vpack.c.bf16 %v197_v2, %v196_v1  ;;  %v200_v7 = vld [vmem:[%s6646_s0 + $0x21] sm:$0xff]  ;;  %4631 = vmatpush3.bf16.msra.mxu0 %v5804_v3  ;;  %v205_v8 = vpack.c.bf16 %v199_v6, %v198_v5  ;;  %v201_v9 = vld [vmem:[%s6646_s0 + $0x29] sm:$0xff]  ;;  %v202_v14 = vld [vmem:[%s6646_s0 + $0x31] sm:$0xff]  ;;  %vm691_vm11 = vcmask 1045504   ;;  %vm5603_vm12 = vmmov 1  }
  0xa7   :  { %v5822_v10 = vld [vmem:[%s6647_s1] sm:$0x3]  ;;  %v206_v11 = vpack.c.bf16 %v201_v9, %v200_v7  ;;  %v5835_v13 = vld [vmem:[%s6647_s1 + $0x4] sm:$0x3]  ;;  %v203_v15 = vld [vmem:[%s6646_s0 + $0x39] sm:$0x3f] }
  0xa8   :  { %4632 = vmatprep.mubr.msk.bf16.mxu0 %vm210_vm1, %v204_v4  ;;  %5331 = vmatprep.subr.msk.bf16.mxu0 %vm223_vm0, %v5822_v10  ;;  %v5829_v12 = vsel %vm223_vm0, %v5822_v10, 0  ;;  %v183_v16 = vld [vmem:[%s6646_s0] sm:$0xff]  ;;  %v184_v17 = vld [vmem:[%s6646_s0 + $0x8] sm:$0xff]  ;;  %v207_v18 = vpack.c.bf16 %v203_v15, %v202_v14  ;;  %v185_v20 = vld [vmem:[%s6646_s0 + $0x10] sm:$0xff]  ;;  %v5869_v24 = vsel %vm223_vm0, %v5835_v13, 0  ;;  %vm1550_vm14 = vcmask 24576  }
  0xa9   :  { %4633 = vmatmul.mubr.msk.bf16.vlgmr.msra.gmra.mrb[0].mxu0 %vm210_vm1, %v205_v8  ;;  %v191_v19 = vpack.c.bf16 %v184_v17, %v183_v16  ;;  %v186_v21 = vld [vmem:[%s6646_s0 + $0x18] sm:$0xff]  ;;  %v187_v22 = vld [vmem:[%s6646_s0 + $0x20] sm:$0xff]  ;;  %v188_v23 = vld [vmem:[%s6646_s0 + $0x28] sm:$0xff]  ;;  %v152_v8 = vlaneseq  ;;  %v5602_v17 = vmov 0.0   ;;  %vm1555_vm15 = vcmask 30720  }
  0xaa   :  { %4636 = vmatprep.mubr.msk.bf16.mxu0 %vm210_vm1, %v206_v11  ;;  %4641 = vmatpush3.bf16.msra.mxu0 %v5829_v12  ;;  %v192_v25 = vpack.c.bf16 %v186_v21, %v185_v20  ;;  %v193_v26 = vpack.c.bf16 %v188_v23, %v187_v22  ;;  %v5874_v27 = vld [vmem:[%s6647_s1 + $0x6] sm:$0x3]  ;;  %v189_v28 = vld [vmem:[%s6646_s0 + $0x30] sm:$0xff]  ;;  %v190_v29 = vld [vmem:[%s6646_s0 + $0x38] sm:$0x3f] }
  0xab   :  { %5332 = vmatprep.subr.msk.bf16.mxu0 %vm223_vm0, %v5835_v13  ;;  %v372_v30 = vld [vmem:[%s6646_s0 + $0x2] sm:$0xff]  ;;  %v373_v31 = vld [vmem:[%s6646_s0 + $0xa] sm:$0xff]  ;;  %v194_v32 = vpack.c.bf16 %v190_v29, %v189_v28  ;;  %v374_v34 = vld [vmem:[%s6646_s0 + $0x12] sm:$0xff]  ;;  %v5909_v40 = vsel %vm223_vm0, %v5874_v27, 0  ;;  %v153_v9 = vshrl.u32 %v152_v8, 7  ;;  %v5989_v14 = vand.u32 127, %v152_v8 }
  0xac   :  { %v380_v33 = vpack.c.bf16 %v373_v31, %v372_v30  ;;  %v375_v35 = vld [vmem:[%s6646_s0 + $0x1a] sm:$0xff]  ;;  %v376_v36 = vld [vmem:[%s6646_s0 + $0x22] sm:$0xff]  ;;  %v377_v37 = vld [vmem:[%s6646_s0 + $0x2a] sm:$0xff]  ;;  %1551 = vst.msk [vmem:[#allocation2] sm:$0x1] %vm1550_vm14, %v5602_v17 }
  0xad   :  { %v381_v38 = vpack.c.bf16 %v375_v35, %v374_v34  ;;  %v382_v39 = vpack.c.bf16 %v377_v37, %v376_v36  ;;  %v5914_v41 = vld [vmem:[%s6647_s1 + $0x8] sm:$0x3]  ;;  %v378_v42 = vld [vmem:[%s6646_s0 + $0x32] sm:$0xff]  ;;  %v379_v43 = vld [vmem:[%s6646_s0 + $0x3a] sm:$0x3f]  ;;  %v154_v11 = vadd.s32 8, %v153_v9 }
  0xae   :  { %v474_v44 = vld [vmem:[%s6646_s0 + $0x3] sm:$0xff]  ;;  %v475_v45 = vld [vmem:[%s6646_s0 + $0xb] sm:$0xff]  ;;  %v383_v46 = vpack.c.bf16 %v379_v43, %v378_v42  ;;  %v476_v48 = vld [vmem:[%s6646_s0 + $0x13] sm:$0xff]  ;;  %v5949_v54 = vsel %vm223_vm0, %v5914_v41, 0  ;;  %v159_v15 = vmul.u32 2, %v153_v9  ;;  %v155_v20 = vadd.s32 16, %v153_v9 }
  0xaf   :  { %v482_v47 = vpack.c.bf16 %v475_v45, %v474_v44  ;;  %v477_v49 = vld [vmem:[%s6646_s0 + $0x1b] sm:$0xff]  ;;  %v478_v50 = vld [vmem:[%s6646_s0 + $0x23] sm:$0xff]  ;;  %v479_v51 = vld [vmem:[%s6646_s0 + $0x2b] sm:$0xff]  ;;  %v160_v16 = vmul.u32 2, %v154_v11  ;;  %v156_v21 = vadd.s32 24, %v153_v9 }
  0xb0   :  { %v483_v52 = vpack.c.bf16 %v477_v49, %v476_v48  ;;  %v484_v53 = vpack.c.bf16 %v479_v51, %v478_v50  ;;  %v480_v55 = vld [vmem:[%s6646_s0 + $0x33] sm:$0xff]  ;;  %v481_v56 = vld [vmem:[%s6646_s0 + $0x3b] sm:$0x3f]  ;;  %v576_v57 = vld [vmem:[%s6646_s0 + $0x4] sm:$0xff]  ;;  %vm163_vm2 = vcmp.eq.s32.totalorder %v159_v15, %v5989_v14  ;;  %v161_v22 = vmul.u32 2, %v155_v20 }
  0xb1   :  { %4637 = vmatmul.mubr.msk.bf16.gmra.mrb[4].mxu0 %vm210_vm1, %v207_v18  ;;  %v577_v58 = vld [vmem:[%s6646_s0 + $0xc] sm:$0xff]  ;;  %v485_v59 = vpack.c.bf16 %v481_v56, %v480_v55  ;;  %v578_v61 = vld [vmem:[%s6646_s0 + $0x14] sm:$0xff]  ;;  %v579_v62 = vld [vmem:[%s6646_s0 + $0x1c] sm:$0xff]  ;;  %v5993_v18 = vsel %vm163_vm2, 1.0, %v5602_v17  ;;  %vm5996_vm4 = vcmp.eq.s32.totalorder %v160_v16, %v5989_v14  ;;  %v162_v23 = vmul.u32 2, %v156_v21 }
  0xb2   :  { %4642 = vmatprep.mubr.msk.bf16.mxu0 %vm210_vm1, %v191_v19  ;;  %v584_v60 = vpack.c.bf16 %v577_v58, %v576_v57  ;;  %v580_v63 = vld [vmem:[%s6646_s0 + $0x24] sm:$0xff]  ;;  %v581_v1 = vld [vmem:[%s6646_s0 + $0x2c] sm:$0xff]  ;;  %v585_v2 = vpack.c.bf16 %v579_v62, %v578_v61  ;;  %v582_v5 = vld [vmem:[%s6646_s0 + $0x34] sm:$0xff]  ;;  %4696 = vmatprep.mubr.msk.f32.mxu1 %vm678_vm3, %v5993_v18  ;;  %vm6005_vm5 = vcmp.eq.s32.totalorder %v161_v22, %v5989_v14  ;;  %v171_v29 = vadd.s32 1, %v159_v15 }
  0xb3   :  { %v586_v4 = vpack.c.bf16 %v581_v1, %v580_v63  ;;  %v583_v6 = vld [vmem:[%s6646_s0 + $0x3c] sm:$0x3f]  ;;  %vm6010_vm6 = vcmp.eq.s32.totalorder %v162_v23, %v5989_v14  ;;  %v173_v30 = vadd.s32 1, %v161_v22  ;;  %v174_v31 = vadd.s32 1, %v162_v23  ;;  %vm6019_vm13 = vmpackc.low %vm691_vm11, %vm5603_vm12  ;;  %v4265_v55 = vld [vmem:[%s6646_s0 + $0x51] sm:$0xff] }
  0xb4   :  { %v587_v7 = vpack.c.bf16 %v583_v6, %v582_v5  ;;  %vm175_vm7 = vcmp.eq.s32.totalorder %v171_v29, %v5989_v14  ;;  %v6035_v48 = vsel %vm6005_vm5, 1.0, %v5602_v17  ;;  %v6044_v49 = vsel %vm6010_vm6, 1.0, %v5602_v17  ;;  %v4266_v57 = vld [vmem:[%s6646_s0 + $0x59] sm:$0xff]  ;;  %v4267_v58 = vld [vmem:[%s6646_s0 + $0x61] sm:$0xff]  ;;  %v4257_v1 = vld [vmem:[%s6646_s0 + $0x50] sm:$0xff] }
  0xb5   :  { %vm177_vm9 = vcmp.eq.s32.totalorder %v173_v30, %v5989_v14  ;;  %vm178_vm10 = vcmp.eq.s32.totalorder %v174_v31, %v5989_v14  ;;  %v6049_v50 = vsel %vm175_vm7, 1.0, %v5602_v17  ;;  %v4270_v62 = vld [vmem:[%s6646_s0 + $0x79] sm:$0xff]  ;;  %v4271_v63 = vld [vmem:[%s6646_s0 + $0x81] sm:$0x3f]  ;;  %v4260_v6 = vld [vmem:[%s6646_s0 + $0x68] sm:$0xff]  ;;  %vm3092_vm2 = vcmask 122880  }
  0xb6   :  { %v6084_v56 = vsel %vm178_vm10, 1.0, %v5602_v17  ;;  %v4259_v5 = vld [vmem:[%s6646_s0 + $0x60] sm:$0xff]  ;;  %v4262_v9 = vld [vmem:[%s6646_s0 + $0x78] sm:$0xff]  ;;  %v4284_v21 = vld [vmem:[%s6646_s0 + $0x6a] sm:$0xff]  ;;  %1557 = vst.msk [vmem:[#allocation2 + $0x20] sm:$0x1] %vm1550_vm14, %v5602_v17 }
  0xb7   :  { %v4263_v11 = vld [vmem:[%s6646_s0 + $0x80] sm:$0x3f]  ;;  %v4281_v15 = vld [vmem:[%s6646_s0 + $0x52] sm:$0xff]  ;;  %1564 = vst.msk [vmem:[#allocation2 + $0x48] sm:$0x1] %vm1550_vm14, %v5602_v17  ;;  %vm2583_vm6 = vcmask 1043456  }
  0xb8   :  { %v4283_v20 = vld [vmem:[%s6646_s0 + $0x62] sm:$0xff]  ;;  %v4292_v28 = vld [vmem:[%s6646_s0 + $0x4b] sm:$0xff]  ;;  %v4293_v29 = vld [vmem:[%s6646_s0 + $0x53] sm:$0xff]  ;;  %1559 = vst.msk [vmem:[#allocation2 + $0x28] sm:$0x1] %vm1550_vm14, %v5602_v17  ;;  %vm2558_vm7 = vcmask 57344  }
  0xb9   :  { %4643 = vmatmul.mubr.msk.bf16.vlgmr.msra.gmra.mrb[0].mxu0 %vm210_vm1, %v192_v25  ;;  %v4286_v25 = vld [vmem:[%s6646_s0 + $0x7a] sm:$0xff]  ;;  %v1179_v31 = vpack.c.bf16 %v4293_v29, %v4292_v28  ;;  %2564 = vst.msk [vmem:[#allocation3 + $0xf] sm:$0x1] %vm2558_vm7, %v5602_v17  ;;  %2559 = vst.msk [vmem:[#allocation3] sm:$0x1] %vm2558_vm7, %v5602_v17  ;;  %vm3094_vm10 = vcmask 130048  }
  0xba   :  { %4646 = vmatprep.mubr.msk.bf16.mxu0 %vm210_vm1, %v193_v26  ;;  %4651 = vmatpush3.bf16.msra.mxu0 %v5869_v24  ;;  %v172_v26 = vadd.s32 1, %v160_v16  ;;  %v907_v16 = vpack.c.bf16 %v4263_v11, %v4262_v9  ;;  %2566 = vst.msk [vmem:[#allocation3 + $0x28] sm:$0x1] %vm2558_vm7, %v5602_v17  ;;  %2569 = vst.msk [vmem:[#allocation3 + $0x37] sm:$0x1] %vm2558_vm7, %v5602_v17  ;;  %vm3096_vm11 = vcmask 125952  }
  0xbb   :  { %5333 = vmatprep.subr.msk.bf16.mxu0 %vm223_vm0, %v5874_v27  ;;  %vm4207_vm14 = vcmask 519168  }
  0xbc   :  { %vm176_vm8 = vcmp.eq.s32.totalorder %v172_v26, %v5989_v14  ;;  %v4280_v14 = vld [vmem:[%s6646_s0 + $0x4a] sm:$0xff]  ;;  %v4287_v26 = vld [vmem:[%s6646_s0 + $0x82] sm:$0x3f] }
  0xbd   :  { %v6062_v51 = vsel %vm176_vm8, 1.0, %v5602_v17  ;;  %v1082_v19 = vpack.c.bf16 %v4281_v15, %v4280_v14  ;;  %v1085_v30 = vpack.c.bf16 %v4287_v26, %v4286_v25  ;;  %vm2560_vm8 = vcmask 64512  }
  0xc1   :  { %4647 = vmatmul.mubr.msk.bf16.gmra.mrb[4].mxu0 %vm210_vm1, %v194_v32 }
  0xc2   :  { %4652 = vmatprep.mubr.msk.bf16.mxu0 %vm210_vm1, %v380_v33 }
  0xc9   :  { %4653 = vmatmul.mubr.msk.bf16.vlgmr.msra.gmra.mrb[0].mxu0 %vm210_vm1, %v381_v38 }
  0xca   :  { %4656 = vmatprep.mubr.msk.bf16.mxu0 %vm210_vm1, %v382_v39  ;;  %4661 = vmatpush3.bf16.msra.mxu0 %v5909_v40 }
  0xcb   :  { %5334 = vmatprep.subr.msk.bf16.mxu0 %vm223_vm0, %v5914_v41 }
  0xd1   :  { %4657 = vmatmul.mubr.msk.bf16.gmra.mrb[4].mxu0 %vm210_vm1, %v383_v46 }
  0xd2   :  { %4662 = vmatprep.mubr.msk.bf16.mxu0 %vm210_vm1, %v482_v47  ;;  %v6030_v47 = vsel %vm5996_vm4, 1.0, %v5602_v17  ;;  %vm1912_vm4 = vcmask 1044480  }
  0xd3   :  { %vm6356_vm5 = vmpackc.low %vm1912_vm4, %vm5603_vm12  ;;  %vm3646_vm12 = vcmask 261120  }
  0xd9   :  { %4663 = vmatmul.mubr.msk.bf16.vlgmr.msra.gmra.mrb[0].mxu0 %vm210_vm1, %v483_v52  ;;  %v6067_v52 = vsel %vm177_vm9, 1.0, %v5602_v17  ;;  %vm3644_vm9 = vcmask 253952  }
  0xda   :  { %4666 = vmatprep.mubr.msk.bf16.mxu0 %vm210_vm1, %v484_v53  ;;  %4671 = vmatpush3.bf16.msra.mxu0 %v5949_v54  ;;  %v4264_v53 = vld [vmem:[%s6646_s0 + $0x49] sm:$0xff] }
  0xe1   :  { %4667 = vmatmul.mubr.msk.bf16.gmra.mrb[4].mxu0 %vm210_vm1, %v485_v59  ;;  %v4268_v59 = vld [vmem:[%s6646_s0 + $0x69] sm:$0xff] }
  0xe2   :  { %4672 = vmatprep.mubr.msk.bf16.mxu0 %vm210_vm1, %v584_v60  ;;  %v4269_v60 = vld [vmem:[%s6646_s0 + $0x71] sm:$0xff] }
  0xe3   :  { %v918_v61 = vpack.c.bf16 %v4269_v60, %v4268_v59 }
  0xe9   :  { %4673 = vmatmul.mubr.msk.bf16.vlgmr.msra.gmra.mrb[0].mxu0 %vm210_vm1, %v585_v2  ;;  %v919_v2 = vpack.c.bf16 %v4271_v63, %v4270_v62  ;;  %v6239_v63 = vld [vmem:[#allocation4] ss:$0 sm:$0xff] }
  0xea   :  { %4676 = vmatprep.mubr.msk.bf16.mxu0 %vm210_vm1, %v586_v4 }
  0xf1   :  { %4677 = vmatmul.mubr.msk.bf16.gmra.mrb[4].mxu0 %vm210_vm1, %v587_v7 }
  0xf2   :  { %4790 = vmatprep.mubr.msk.f32.mxu0 %vm678_vm3, %v5993_v18 }
 0x1bc   :  { %v4674_v32 = vpop.f32.mrb[0].mxu0 }
 0x1bd   :  { %v639_v33 = vpop.f32.mrb[1].mxu0 }
 0x1be   :  { %v4675_v34 = vpop.f32.mrb[2].mxu0 }
 0x1bf   :  { %v5126_v35 = vpack.c.bf16 %v4675_v34, %v4674_v32  ;;  %v642_v36 = vpop.f32.mrb[3].mxu0  ;;  %v4295_v32 = vld [vmem:[%s6646_s0 + $0x63] sm:$0xff] }
 0x1c0   :  { %v5122_v37 = vpack.c.bf16 %v642_v36, %v639_v33  ;;  %v4296_v33 = vld [vmem:[%s6646_s0 + $0x6b] sm:$0xff]  ;;  %v4298_v36 = vld [vmem:[%s6646_s0 + $0x7b] sm:$0xff] }
 0x1c2   :  { %5123 = vmatprep.subr.bf16.mxu1 %v5122_v37 }
 0x1c3   :  { %5125 = vmatpush3.bf16.msra.mxu1 %v5122_v37 }
 0x1c4   :  { %v4678_v38 = vpop.f32.mrb[4].mxu0  ;;  %5127 = vmatprep.subr.bf16.mxu1 %v5126_v35 }
 0x1c5   :  { %v655_v39 = vpop.f32.mrb[5].mxu0 }
 0x1c6   :  { %v4679_v42 = vpop.f32.mrb[6].mxu0 }
 0x1c7   :  { %v5134_v43 = vpack.c.bf16 %v4679_v42, %v4678_v38  ;;  %v658_v44 = vpop.f32.mrb[7].mxu0  ;;  %5129 = vmatpush3.bf16.msra.mxu1 %v5126_v35  ;;  %v4304_v38 = vld [vmem:[%s6646_s0 + $0x4c] sm:$0xff] }
 0x1c8   :  { %v5130_v45 = vpack.c.bf16 %v658_v44, %v655_v39  ;;  %v4305_v39 = vld [vmem:[%s6646_s0 + $0x54] sm:$0xff]  ;;  %v4306_v44 = vld [vmem:[%s6646_s0 + $0x5c] sm:$0xff] }
 0x1ca   :  { %5131 = vmatprep.subr.bf16.mxu1 %v5130_v45 }
 0x1cb   :  { %5133 = vmatpush3.bf16.msra.mxu1 %v5130_v45 }
 0x1cc   :  { %5136 = vmatprep.subr.msk.bf16.mxu1 %vm6019_vm13, %v5134_v43 }
 0x1cf   :  { %5139 = vmatpush3.bf16.msk.msra.mxu1 %vm6019_vm13, %v5134_v43 }
 0x1d0   :  { %5141 = vmatprep.subr.bf16.mxu1 %v5122_v37 }
 0x1d2   :  { %4697 = vmatmul.mubr.msk.f32.vlgmr.msra.gmra.mrb[0].mxu1 %vm678_vm3, %v6030_v47 }
 0x1d3   :  { %5143 = vmatpush3.bf16.msra.mxu1 %v5122_v37  ;;  %4699 = vmatprep.mubr.msk.f32.mxu1 %vm678_vm3, %v6035_v48  ;;  %v4299_v37 = vld [vmem:[%s6646_s0 + $0x83] sm:$0x3f] }
 0x1d4   :  { %5145 = vmatprep.subr.bf16.mxu1 %v5126_v35  ;;  %v1182_v42 = vpack.c.bf16 %v4299_v37, %v4298_v36  ;;  %v6273_v36 = vld [vmem:[#allocation6 + $0x2] sm:$0x3] }
 0x1d6   :  { %4700 = vmatmul.mubr.msk.f32.gmra.mrb[2].mxu1 %vm678_vm3, %v6044_v49 }
 0x1d7   :  { %5147 = vmatpush3.bf16.msra.mxu1 %v5126_v35  ;;  %4718 = vmatprep.mubr.msk.f32.mxu1 %vm678_vm3, %v6049_v50 }
 0x1d8   :  { %5149 = vmatprep.subr.bf16.mxu1 %v5130_v45 }
 0x1db   :  { %5151 = vmatpush3.bf16.msra.mxu1 %v5130_v45  ;;  %v4308_v45 = vld [vmem:[%s6646_s0 + $0x6c] sm:$0xff] }
 0x1dc   :  { %5154 = vmatprep.subr.msk.bf16.mxu1 %vm6019_vm13, %v5134_v43 }
 0x1df   :  { %5157 = vmatpush3.bf16.msk.msra.mxu1 %vm6019_vm13, %v5134_v43  ;;  %v1276_v43 = vpack.c.bf16 %v4305_v39, %v4304_v38 }
 0x1e0   :  { %5335 = vmatprep.subr.msk.bf16.mxu1 %vm223_vm0, %v5792_v0  ;;  %v916_v0 = vpack.c.bf16 %v4265_v55, %v4264_v53  ;;  %v4309_v53 = vld [vmem:[%s6646_s0 + $0x74] sm:$0xff] }
 0x1e2   :  { %4719 = vmatmul.mubr.msk.f32.vlgmr.msra.gmra.mrb[4].mxu1 %vm678_vm3, %v6062_v51 }
 0x1e3   :  { %4721 = vmatprep.mubr.msk.f32.mxu1 %vm678_vm3, %v6067_v52  ;;  %4725 = vmatpush3.bf16.msra.mxu1 %v5804_v3  ;;  %v917_v3 = vpack.c.bf16 %v4267_v58, %v4266_v57  ;;  %v4310_v57 = vld [vmem:[%s6646_s0 + $0x7c] sm:$0xff]  ;;  %v4311_v58 = vld [vmem:[%s6646_s0 + $0x84] sm:$0x3f] }
 0x1e4   :  { %5336 = vmatprep.subr.msk.bf16.mxu1 %vm223_vm0, %v5822_v10  ;;  %v4256_v10 = vld [vmem:[%s6646_s0 + $0x48] sm:$0xff]  ;;  %v1279_v59 = vpack.c.bf16 %v4311_v58, %v4310_v57 }
 0x1e5   :  { %v904_v4 = vpack.c.bf16 %v4257_v1, %v4256_v10  ;;  %v6311_v57 = vld [vmem:[#allocation6 + $0x6] sm:$0x3] }
 0x1e6   :  { %4722 = vmatmul.mubr.msk.f32.gmra.mrb[6].mxu1 %vm678_vm3, %v6084_v56 }
 0x1e7   :  { %4726 = vmatprep.mubr.msk.bf16.mxu1 %vm210_vm1, %v916_v0  ;;  %v1278_v0 = vpack.c.bf16 %v4309_v53, %v4308_v45 }
 0x1ea   :  { %4727 = vmatmul.mubr.msk.bf16.vlgmr.msra.gmra.mrb[8].mxu1 %vm210_vm1, %v917_v3 }
 0x1eb   :  { %4730 = vmatprep.mubr.msk.bf16.mxu1 %vm210_vm1, %v918_v61  ;;  %4735 = vmatpush3.bf16.msra.mxu1 %v5829_v12  ;;  %v4258_v12 = vld [vmem:[%s6646_s0 + $0x58] sm:$0xff] }
 0x1ec   :  { %5337 = vmatprep.subr.msk.bf16.mxu1 %vm223_vm0, %v5835_v13  ;;  %v4261_v13 = vld [vmem:[%s6646_s0 + $0x70] sm:$0xff]  ;;  %v905_v7 = vpack.c.bf16 %v4259_v5, %v4258_v12 }
 0x1ed   :  { %v906_v8 = vpack.c.bf16 %v4261_v13, %v4260_v6 }
 0x1f2   :  { %4731 = vmatmul.mubr.msk.bf16.gmra.mrb[12].mxu1 %vm210_vm1, %v919_v2 }
 0x1f3   :  { %4736 = vmatprep.mubr.msk.bf16.mxu1 %vm210_vm1, %v904_v4 }
 0x1fa   :  { %4737 = vmatmul.mubr.msk.bf16.vlgmr.msra.gmra.mrb[8].mxu1 %vm210_vm1, %v905_v7 }
 0x1fb   :  { %4740 = vmatprep.mubr.msk.bf16.mxu1 %vm210_vm1, %v906_v8  ;;  %4745 = vmatpush3.bf16.msra.mxu1 %v5869_v24  ;;  %v4282_v24 = vld [vmem:[%s6646_s0 + $0x5a] sm:$0xff] }
 0x1fc   :  { %5338 = vmatprep.subr.msk.bf16.mxu1 %vm223_vm0, %v5874_v27  ;;  %v4285_v27 = vld [vmem:[%s6646_s0 + $0x72] sm:$0xff]  ;;  %v1083_v22 = vpack.c.bf16 %v4283_v20, %v4282_v24 }
 0x1fd   :  { %v1084_v23 = vpack.c.bf16 %v4285_v27, %v4284_v21 }
 0x202   :  { %4741 = vmatmul.mubr.msk.bf16.gmra.mrb[12].mxu1 %vm210_vm1, %v907_v16 }
 0x203   :  { %4746 = vmatprep.mubr.msk.bf16.mxu1 %vm210_vm1, %v1082_v19 }
 0x20a   :  { %4747 = vmatmul.mubr.msk.bf16.vlgmr.msra.gmra.mrb[8].mxu1 %vm210_vm1, %v1083_v22 }
 0x20b   :  { %4750 = vmatprep.mubr.msk.bf16.mxu1 %vm210_vm1, %v1084_v23  ;;  %4755 = vmatpush3.bf16.msra.mxu1 %v5909_v40  ;;  %v4294_v40 = vld [vmem:[%s6646_s0 + $0x5b] sm:$0xff] }
 0x20c   :  { %5339 = vmatprep.subr.msk.bf16.mxu1 %vm223_vm0, %v5914_v41  ;;  %v4297_v41 = vld [vmem:[%s6646_s0 + $0x73] sm:$0xff]  ;;  %v1180_v34 = vpack.c.bf16 %v4295_v32, %v4294_v40 }
 0x20d   :  { %v1181_v35 = vpack.c.bf16 %v4297_v41, %v4296_v33 }
 0x212   :  { %4751 = vmatmul.mubr.msk.bf16.gmra.mrb[12].mxu1 %vm210_vm1, %v1085_v30 }
 0x213   :  { %4756 = vmatprep.mubr.msk.bf16.mxu1 %vm210_vm1, %v1179_v31 }
 0x21a   :  { %4757 = vmatmul.mubr.msk.bf16.vlgmr.msra.gmra.mrb[8].mxu1 %vm210_vm1, %v1180_v34 }
 0x21b   :  { %4760 = vmatprep.mubr.msk.bf16.mxu1 %vm210_vm1, %v1181_v35  ;;  %4765 = vmatpush3.bf16.msra.mxu1 %v5949_v54  ;;  %v4307_v54 = vld [vmem:[%s6646_s0 + $0x64] sm:$0xff] }
 0x21c   :  { %v1277_v55 = vpack.c.bf16 %v4307_v54, %v4306_v44 }
 0x222   :  { %4761 = vmatmul.mubr.msk.bf16.gmra.mrb[12].mxu1 %vm210_vm1, %v1182_v42 }
 0x223   :  { %4766 = vmatprep.mubr.msk.bf16.mxu1 %vm210_vm1, %v1276_v43 }
 0x22a   :  { %4767 = vmatmul.mubr.msk.bf16.vlgmr.msra.gmra.mrb[8].mxu1 %vm210_vm1, %v1277_v55 }
 0x22b   :  { %4770 = vmatprep.mubr.msk.bf16.mxu1 %vm210_vm1, %v1278_v0 }
 0x232   :  { %4771 = vmatmul.mubr.msk.bf16.gmra.mrb[12].mxu1 %vm210_vm1, %v1279_v59 }
 0x2a5   :  { %v4698_v60 = vpop.f32.mrb[0].mxu1 }
 0x2a6   :  { %v761_v3 = vpop.f32.mrb[1].mxu1 }
 0x2a9   :  { %v4701_v61 = vpop.f32.mrb[2].mxu1 }
 0x2aa   :  { %v771_v62 = vpop.f32.mrb[3].mxu1 }
 0x2b5   :  { %v4720_v10 = vpop.f32.mrb[4].mxu1 }
 0x2b6   :  { %v878_v1 = vmax.f32 %v4698_v60, %v4720_v10  ;;  %v858_v2 = vpop.f32.mrb[5].mxu1  ;;  %v6323_v10 = vld [vmem:[#allocation6 + $0x8] sm:$0x3] }
 0x2b7   :  { %v877_v4 = vmax.f32 %v761_v3, %v858_v2 }
 0x2b8   :  { %v888_v12 = vadd.f32 %v6239_v63, %v878_v1 }
 0x2b9   :  { %v887_v5 = vadd.f32 %v6239_v63, %v877_v4  ;;  %v4723_v6 = vpop.f32.mrb[6].mxu1 }
 0x2ba   :  { %v892_v13 = vmax.f32 %v888_v12, 0.0  ;;  %v880_v7 = vmax.f32 %v4701_v61, %v4723_v6  ;;  %v868_v8 = vpop.f32.mrb[7].mxu1  ;;  %v6320_v61 = vsel %vm223_vm0, %v6311_v57, 0 }
 0x2bb   :  { %v891_v9 = vmax.f32 %v887_v5, 0.0  ;;  %v879_v11 = vmax.f32 %v771_v62, %v868_v8  ;;  %v6332_v5 = vsel %vm223_vm0, %v6323_v10, 0 }
 0x2bc   :  { %1553 = vst.msk [vmem:[#allocation2 + $0x9] sm:$0xff] %vm210_vm1, %v892_v13  ;;  %v890_v14 = vadd.f32 %v6239_v63, %v880_v7 }
 0x2bd   :  { %1552 = vst.msk [vmem:[#allocation2 + $0x1] sm:$0xff] %vm210_vm1, %v891_v9  ;;  %v889_v15 = vadd.f32 %v6239_v63, %v879_v11 }
 0x2be   :  { %v894_v16 = vmax.f32 %v890_v14, 0.0 }
 0x2bf   :  { %v893_v19 = vmax.f32 %v889_v15, 0.0 }
 0x2c0   :  { %1556 = vst.msk [vmem:[#allocation2 + $0x19] sm:$0x7f] %vm1555_vm15, %v894_v16 }
 0x2c1   :  { %1554 = vst.msk [vmem:[#allocation2 + $0x11] sm:$0xff] %vm210_vm1, %v893_v19 }
 0x2c3   :  { %v1574_v20 = vld [vmem:[#allocation2 + $0x9] sm:$0xff] }
 0x2c4   :  { %v1566_v24 = vld [vmem:[#allocation2] sm:$0xff]  ;;  %v1567_v21 = vld [vmem:[#allocation2 + $0x8] sm:$0xff] }
 0x2c5   :  { %3093 = vst.msk [vmem:[#allocation2] sm:$0x1] %vm3092_vm2, %v5602_v17  ;;  %v1573_v37 = vld [vmem:[#allocation2 + $0x1] sm:$0xff]  ;;  %v1570_v44 = vpack.c.bf16 %v1567_v21, %v1566_v24 }
 0x2c6   :  { %v1577_v46 = vpack.c.bf16 %v1574_v20, %v1573_v37  ;;  %v1697_v53 = vld [vmem:[#allocation2 + $0x2] sm:$0xff] }
 0x2c7   :  { %v1576_v39 = vld [vmem:[#allocation2 + $0x19] sm:$0x1f]  ;;  %v1767_v3 = vld [vmem:[#allocation2 + $0x3] sm:$0xff] }
 0x2c8   :  { %v6251_v27 = vld [vmem:[#allocation2 + $0xa] sm:$0xff]  ;;  %v1569_v54 = vld [vmem:[#allocation2 + $0x18] sm:$0x1f] }
 0x2c9   :  { %v6253_v22 = vld [vmem:[#allocation2 + $0xb] sm:$0xff]  ;;  %v1701_v0 = vpack.c.bf16 %v6251_v27, %v1697_v53  ;;  %v1700_v59 = vld [vmem:[#allocation2 + $0x1a] sm:$0x1f] }
 0x2ca   :  { %v6255_v23 = vld [vmem:[#allocation2 + $0xc] sm:$0xff]  ;;  %v1771_v62 = vpack.c.bf16 %v6253_v22, %v1767_v3  ;;  %v1770_v2 = vld [vmem:[#allocation2 + $0x1b] sm:$0x1f]  ;;  %v1837_v12 = vld [vmem:[#allocation2 + $0x4] sm:$0xff] }
 0x2cb   :  { %3098 = vst.msk [vmem:[#allocation2 + $0xd] sm:$0x1] %vm3092_vm2, %v5602_v17  ;;  %v1575_v38 = vld [vmem:[#allocation2 + $0x11] sm:$0xff]  ;;  %v1841_v6 = vpack.c.bf16 %v6255_v23, %v1837_v12  ;;  %v1840_v7 = vld [vmem:[#allocation2 + $0x1c] sm:$0x1f] }
 0x2cc   :  { %v1578_v42 = vpack.c.bf16 %v1576_v39, %v1575_v38  ;;  %v1699_v58 = vld [vmem:[#allocation2 + $0x12] sm:$0xff] }
 0x2cd   :  { %v1702_v60 = vpack.c.bf16 %v1700_v59, %v1699_v58  ;;  %v1769_v1 = vld [vmem:[#allocation2 + $0x13] sm:$0xff] }
 0x2ce   :  { %v1772_v4 = vpack.c.bf16 %v1770_v2, %v1769_v1  ;;  %v1839_v13 = vld [vmem:[#allocation2 + $0x14] sm:$0xff] }
 0x2cf   :  { %v1842_v8 = vpack.c.bf16 %v1840_v7, %v1839_v13 }
 0x2fd   :  { %v4768_v25 = vpop.f32.mrb[8].mxu1 }
 0x2fe   :  { %v1326_v26 = vpop.f32.mrb[9].mxu1 }
 0x2ff   :  { %v4769_v28 = vpop.f32.mrb[10].mxu1 }
 0x300   :  { %v5162_v29 = vpack.c.bf16 %v4769_v28, %v4768_v25  ;;  %v1329_v30 = vpop.f32.mrb[11].mxu1 }
 0x301   :  { %v5158_v31 = vpack.c.bf16 %v1329_v30, %v1326_v26 }
 0x303   :  { %5159 = vmatprep.subr.bf16.mxu0 %v5158_v31 }
 0x304   :  { %5161 = vmatpush3.bf16.msra.mxu0 %v5158_v31 }
 0x305   :  { %v4772_v40 = vpop.f32.mrb[12].mxu1  ;;  %5163 = vmatprep.subr.bf16.mxu0 %v5162_v29 }
 0x306   :  { %v1342_v32 = vpop.f32.mrb[13].mxu1 }
 0x307   :  { %v4773_v33 = vpop.f32.mrb[14].mxu1 }
 0x308   :  { %v5170_v41 = vpack.c.bf16 %v4773_v33, %v4772_v40  ;;  %v1345_v34 = vpop.f32.mrb[15].mxu1  ;;  %5165 = vmatpush3.bf16.msra.mxu0 %v5162_v29 }
 0x309   :  { %v5166_v35 = vpack.c.bf16 %v1345_v34, %v1342_v32 }
 0x30b   :  { %5167 = vmatprep.subr.bf16.mxu0 %v5166_v35 }
 0x30c   :  { %5169 = vmatpush3.bf16.msra.mxu0 %v5166_v35 }
 0x30d   :  { %5172 = vmatprep.subr.msk.bf16.mxu0 %vm6019_vm13, %v5170_v41 }
 0x310   :  { %5175 = vmatpush3.bf16.msk.msra.mxu0 %vm6019_vm13, %v5170_v41 }
 0x311   :  { %5177 = vmatprep.subr.bf16.mxu0 %v5158_v31 }
 0x313   :  { %4791 = vmatmul.mubr.msk.f32.vlgmr.msra.gmra.mrb[8].mxu0 %vm678_vm3, %v6030_v47 }
 0x314   :  { %5179 = vmatpush3.bf16.msra.mxu0 %v5158_v31  ;;  %4793 = vmatprep.mubr.msk.f32.mxu0 %vm678_vm3, %v6035_v48  ;;  %v6281_v48 = vsel %vm223_vm0, %v6273_v36, 0 }
 0x315   :  { %5181 = vmatprep.subr.bf16.mxu0 %v5162_v29 }
 0x317   :  { %4794 = vmatmul.mubr.msk.f32.gmra.mrb[10].mxu0 %vm678_vm3, %v6044_v49  ;;  %v6283_v49 = vld [vmem:[#allocation6] sm:$0x3] }
 0x318   :  { %5183 = vmatpush3.bf16.msra.mxu0 %v5162_v29  ;;  %4812 = vmatprep.mubr.msk.f32.mxu0 %vm678_vm3, %v6049_v50  ;;  %v6297_v43 = vsel %vm223_vm0, %v6283_v49, 0 }
 0x319   :  { %5185 = vmatprep.subr.bf16.mxu0 %v5166_v35 }
 0x31c   :  { %5187 = vmatpush3.bf16.msra.mxu0 %v5166_v35 }
 0x31d   :  { %5190 = vmatprep.subr.msk.bf16.mxu0 %vm6019_vm13, %v5170_v41 }
 0x320   :  { %5193 = vmatpush3.bf16.msk.msra.mxu0 %vm6019_vm13, %v5170_v41  ;;  %vm3648_vm13 = vcmask 254976  }
 0x321   :  { %5340 = vmatprep.subr.msk.bf16.mxu0 %vm223_vm0, %v6273_v36 }
 0x323   :  { %4813 = vmatmul.mubr.msk.f32.vlgmr.msra.gmra.mrb[12].mxu0 %vm678_vm3, %v6062_v51 }
 0x324   :  { %4815 = vmatprep.mubr.msk.f32.mxu0 %vm678_vm3, %v6067_v52  ;;  %4819 = vmatpush3.bf16.msra.mxu0 %v6281_v48  ;;  %v6299_v52 = vld [vmem:[#allocation6 + $0x4] sm:$0x3] }
 0x325   :  { %5341 = vmatprep.subr.msk.bf16.mxu0 %vm223_vm0, %v6283_v49  ;;  %v6308_v55 = vsel %vm223_vm0, %v6299_v52, 0 }
 0x327   :  { %4816 = vmatmul.mubr.msk.f32.gmra.mrb[14].mxu0 %vm678_vm3, %v6084_v56  ;;  %v1568_v56 = vld [vmem:[#allocation2 + $0x10] sm:$0xff]  ;;  %vm1907_vm3 = vcmask 236544  }
 0x328   :  { %4820 = vmatprep.mubr.msk.bf16.mxu0 %vm210_vm1, %v1577_v46  ;;  %v1571_v45 = vpack.c.bf16 %v1569_v54, %v1568_v56  ;;  %4856 = vmatprep.mubr.msk.f32.mxu1 %vm1907_vm3, %v5993_v18 }
 0x32b   :  { %4821 = vmatmul.mubr.msk.bf16.vlgmr.msra.gmra.mrb[16].mxu0 %vm210_vm1, %v1578_v42 }
 0x32c   :  { %4826 = vmatprep.mubr.msk.bf16.mxu0 %vm210_vm1, %v1570_v44  ;;  %4825 = vmatpush3.bf16.msra.mxu0 %v6297_v43 }
 0x32d   :  { %5342 = vmatprep.subr.msk.bf16.mxu0 %vm223_vm0, %v6299_v52 }
 0x337   :  { %4827 = vmatmul.mubr.msk.bf16.vlgmr.msra.gmra.mrb[16].mxu0 %vm210_vm1, %v1571_v45 }
 0x338   :  { %4832 = vmatprep.mubr.msk.bf16.mxu0 %vm210_vm1, %v1701_v0  ;;  %4831 = vmatpush3.bf16.msra.mxu0 %v6308_v55 }
 0x339   :  { %5343 = vmatprep.subr.msk.bf16.mxu0 %vm223_vm0, %v6311_v57 }
 0x343   :  { %4833 = vmatmul.mubr.msk.bf16.vlgmr.msra.gmra.mrb[16].mxu0 %vm210_vm1, %v1702_v60 }
 0x344   :  { %4838 = vmatprep.mubr.msk.bf16.mxu0 %vm210_vm1, %v1771_v62  ;;  %4837 = vmatpush3.bf16.msra.mxu0 %v6320_v61 }
 0x345   :  { %5344 = vmatprep.subr.msk.bf16.mxu0 %vm223_vm0, %v6323_v10 }
 0x34f   :  { %4839 = vmatmul.mubr.msk.bf16.vlgmr.msra.gmra.mrb[16].mxu0 %vm210_vm1, %v1772_v4 }
 0x350   :  { %4844 = vmatprep.mubr.msk.bf16.mxu0 %vm210_vm1, %v1841_v6  ;;  %4843 = vmatpush3.bf16.msra.mxu0 %v6332_v5 }
 0x35b   :  { %4845 = vmatmul.mubr.msk.bf16.vlgmr.msra.gmra.mrb[16].mxu0 %vm210_vm1, %v1842_v8 }
 0x35c   :  { %4908 = vmatprep.mubr.msk.f32.mxu0 %vm1907_vm3, %v5993_v18 }
 0x3e6   :  { %v4792_v9 = vpop.f32.mrb[8].mxu0 }
 0x3e7   :  { %v1434_v11 = vpop.f32.mrb[9].mxu0 }
 0x3ea   :  { %v4795_v14 = vpop.f32.mrb[10].mxu0 }
 0x3eb   :  { %v1444_v15 = vpop.f32.mrb[11].mxu0 }
 0x3f6   :  { %v4814_v16 = vpop.f32.mrb[12].mxu0 }
 0x3f7   :  { %v1539_v19 = vmax.f32 %v4792_v9, %v4814_v16  ;;  %v1519_v24 = vpop.f32.mrb[13].mxu0 }
 0x3f8   :  { %v1538_v20 = vmax.f32 %v1434_v11, %v1519_v24  ;;  %v6411_v11 = vld [vmem:[#allocation8] ss:$0 sm:$0xff] }
 0x3f9   :  { %v1543_v21 = vadd.f32 %v6239_v63, %v1539_v19 }
 0x3fa   :  { %v1542_v27 = vadd.f32 %v6239_v63, %v1538_v20  ;;  %v4817_v22 = vpop.f32.mrb[14].mxu0 }
 0x3fb   :  { %v1547_v23 = vmax.f32 %v1543_v21, 0.0  ;;  %v1541_v25 = vmax.f32 %v4795_v14, %v4817_v22  ;;  %v1529_v26 = vpop.f32.mrb[15].mxu0  ;;  %v2787_v22 = vld [vmem:[#allocation9 + $0x10] sm:$0xf] }
 0x3fc   :  { %v1546_v28 = vmax.f32 %v1542_v27, 0.0  ;;  %v1540_v29 = vmax.f32 %v1444_v15, %v1529_v26 }
 0x3fd   :  { %1561 = vst.msk [vmem:[#allocation2 + $0x31] sm:$0xff] %vm210_vm1, %v1547_v23  ;;  %v1545_v18 = vadd.f32 %v6239_v63, %v1541_v25 }
 0x3fe   :  { %1560 = vst.msk [vmem:[#allocation2 + $0x29] sm:$0xff] %vm210_vm1, %v1546_v28  ;;  %v1544_v30 = vadd.f32 %v6239_v63, %v1540_v29  ;;  %v6418_v28 = vsel %vm2583_vm6, %v2787_v22, 0 }
 0x3ff   :  { %v1549_v31 = vmax.f32 %v1545_v18, 0.0 }
 0x400   :  { %v1548_v40 = vmax.f32 %v1544_v30, 0.0 }
 0x401   :  { %1563 = vst.msk [vmem:[#allocation2 + $0x41] sm:$0x7f] %vm1555_vm15, %v1549_v31 }
 0x402   :  { %1562 = vst.msk [vmem:[#allocation2 + $0x39] sm:$0xff] %vm210_vm1, %v1548_v40 }
 0x404   :  { %v2089_v33 = vld [vmem:[#allocation2 + $0x31] sm:$0xff] }
 0x405   :  { %v2082_v32 = vld [vmem:[#allocation2 + $0x28] sm:$0xff]  ;;  %v2083_v41 = vld [vmem:[#allocation2 + $0x30] sm:$0xff] }
 0x406   :  { %3099 = vst.msk [vmem:[#allocation2 + $0x28] sm:$0x1] %vm3092_vm2, %v5602_v17  ;;  %v2088_v54 = vld [vmem:[#allocation2 + $0x29] sm:$0xff]  ;;  %v2086_v59 = vpack.c.bf16 %v2083_v41, %v2082_v32 }
 0x407   :  { %v2092_v45 = vpack.c.bf16 %v2089_v33, %v2088_v54  ;;  %v2269_v2 = vld [vmem:[#allocation2 + $0x2b] sm:$0xff] }
 0x408   :  { %v2091_v0 = vld [vmem:[#allocation2 + $0x41] sm:$0x1f]  ;;  %v2334_v6 = vld [vmem:[#allocation2 + $0x2c] sm:$0xff] }
 0x409   :  { %v2205_v34 = vld [vmem:[#allocation2 + $0x32] sm:$0xff]  ;;  %v2085_v60 = vld [vmem:[#allocation2 + $0x40] sm:$0x1f]  ;;  %v2574_v33 = vld [vmem:[#allocation9] sm:$0xf] }
 0x40a   :  { %v2270_v35 = vld [vmem:[#allocation2 + $0x33] sm:$0xff]  ;;  %v2207_v1 = vld [vmem:[#allocation2 + $0x42] sm:$0x1f] }
 0x40b   :  { %v2335_v37 = vld [vmem:[#allocation2 + $0x34] sm:$0xff]  ;;  %v2273_v4 = vpack.c.bf16 %v2270_v35, %v2269_v2  ;;  %v2272_v12 = vld [vmem:[#allocation2 + $0x43] sm:$0x1f] }
 0x40c   :  { %3102 = vst.msk [vmem:[#allocation2 + $0x35] sm:$0x1] %vm3092_vm2, %v5602_v17  ;;  %v2090_v53 = vld [vmem:[#allocation2 + $0x39] sm:$0xff]  ;;  %v2338_v13 = vpack.c.bf16 %v2335_v37, %v2334_v6  ;;  %v2337_v7 = vld [vmem:[#allocation2 + $0x44] sm:$0x1f] }
 0x40d   :  { %v2093_v58 = vpack.c.bf16 %v2091_v0, %v2090_v53 }
 0x42e   :  { %v4846_v46 = vpop.f32.mrb[16].mxu0 }
 0x42f   :  { %v1888_v63 = vpop.f32.mrb[17].mxu0 }
 0x430   :  { %v4847_v38 = vpop.f32.mrb[18].mxu0 }
 0x431   :  { %v5198_v39 = vpack.c.bf16 %v4847_v38, %v4846_v46  ;;  %v1891_v42 = vpop.f32.mrb[19].mxu0 }
 0x432   :  { %v5194_v44 = vpack.c.bf16 %v1891_v42, %v1888_v63  ;;  %v2579_v42 = vld [vmem:[#allocation9 + $0x4] sm:$0xf] }
 0x434   :  { %5195 = vmatprep.subr.bf16.mxu1 %v5194_v44 }
 0x435   :  { %5197 = vmatpush3.bf16.msra.mxu1 %v5194_v44 }
 0x436   :  { %5200 = vmatprep.subr.msk.bf16.mxu1 %vm6356_vm5, %v5198_v39 }
 0x439   :  { %5203 = vmatpush3.bf16.msk.msra.mxu1 %vm6356_vm5, %v5198_v39 }
 0x43a   :  { %5205 = vmatprep.subr.bf16.mxu1 %v5194_v44 }
 0x43c   :  { %4857 = vmatmul.mubr.msk.f32.vlgmr.msra.gmra.mrb[16].mxu1 %vm1907_vm3, %v6030_v47 }
 0x43d   :  { %5207 = vmatpush3.bf16.msra.mxu1 %v5194_v44  ;;  %4867 = vmatprep.mubr.msk.f32.mxu1 %vm1907_vm3, %v6049_v50  ;;  %v2585_v44 = vsel %vm2583_vm6, %v2579_v42, 0 }
 0x43e   :  { %5210 = vmatprep.subr.msk.bf16.mxu1 %vm6356_vm5, %v5198_v39 }
 0x441   :  { %5213 = vmatpush3.bf16.msk.msra.mxu1 %vm6356_vm5, %v5198_v39 }
 0x442   :  { %5345 = vmatprep.subr.msk.bf16.mxu1 %vm223_vm0, %v6273_v36  ;;  %v2084_v36 = vld [vmem:[#allocation2 + $0x38] sm:$0xff] }
 0x443   :  { %v2087_v3 = vpack.c.bf16 %v2085_v60, %v2084_v36 }
 0x444   :  { %4868 = vmatmul.mubr.msk.f32.vlgmr.msra.gmra.mrb[18].mxu1 %vm1907_vm3, %v6062_v51 }
 0x445   :  { %4871 = vmatpush3.bf16.msra.mxu1 %v6281_v48  ;;  %4872 = vmatprep.mubr.msk.bf16.mxu1 %vm210_vm1, %v2092_v45  ;;  %v2204_v48 = vld [vmem:[#allocation2 + $0x2a] sm:$0xff] }
 0x446   :  { %5346 = vmatprep.subr.msk.bf16.mxu1 %vm223_vm0, %v6283_v49  ;;  %v2208_v62 = vpack.c.bf16 %v2205_v34, %v2204_v48  ;;  %v2206_v49 = vld [vmem:[#allocation2 + $0x3a] sm:$0xff]  ;;  %v2632_v34 = vsel %vm2583_vm6, %v2574_v33, 0 }
 0x448   :  { %4873 = vmatmul.mubr.msk.bf16.vlgmr.msra.gmra.mrb[20].mxu1 %vm210_vm1, %v2093_v58 }
 0x449   :  { %4878 = vmatprep.mubr.msk.bf16.mxu1 %vm210_vm1, %v2086_v59  ;;  %4877 = vmatpush3.bf16.msra.mxu1 %v6297_v43  ;;  %v2209_v43 = vpack.c.bf16 %v2207_v1, %v2206_v49 }
 0x44a   :  { %5347 = vmatprep.subr.msk.bf16.mxu1 %vm223_vm0, %v6299_v52  ;;  %v2271_v52 = vld [vmem:[#allocation2 + $0x3b] sm:$0xff] }
 0x454   :  { %4879 = vmatmul.mubr.msk.bf16.vlgmr.msra.gmra.mrb[20].mxu1 %vm210_vm1, %v2087_v3 }
 0x455   :  { %4884 = vmatprep.mubr.msk.bf16.mxu1 %vm210_vm1, %v2208_v62  ;;  %4883 = vmatpush3.bf16.msra.mxu1 %v6308_v55  ;;  %v2274_v55 = vpack.c.bf16 %v2272_v12, %v2271_v52 }
 0x456   :  { %5348 = vmatprep.subr.msk.bf16.mxu1 %vm223_vm0, %v6311_v57  ;;  %v2336_v57 = vld [vmem:[#allocation2 + $0x3c] sm:$0xff] }
 0x457   :  { %v2339_v8 = vpack.c.bf16 %v2337_v7, %v2336_v57 }
 0x460   :  { %4885 = vmatmul.mubr.msk.bf16.vlgmr.msra.gmra.mrb[20].mxu1 %vm210_vm1, %v2209_v43 }
 0x461   :  { %4890 = vmatprep.mubr.msk.bf16.mxu1 %vm210_vm1, %v2273_v4  ;;  %4889 = vmatpush3.bf16.msra.mxu1 %v6320_v61  ;;  %v2679_v61 = vld [vmem:[#allocation9 + $0x8] sm:$0xf] }
 0x462   :  { %5349 = vmatprep.subr.msk.bf16.mxu1 %vm223_vm0, %v6323_v10  ;;  %v6401_v10 = vsel %vm2583_vm6, %v2679_v61, 0  ;;  %vm5604_vm0 = vmmov 0  }
 0x46c   :  { %4891 = vmatmul.mubr.msk.bf16.vlgmr.msra.gmra.mrb[20].mxu1 %vm210_vm1, %v2274_v55 }
 0x46d   :  { %4896 = vmatprep.mubr.msk.bf16.mxu1 %vm210_vm1, %v2338_v13  ;;  %4895 = vmatpush3.bf16.msra.mxu1 %v6332_v5 }
 0x46e   :  { %4934 = vmatprep.subr.bf16.mxu1 %v5602_v17 }
 0x478   :  { %4897 = vmatmul.mubr.msk.bf16.vlgmr.msra.gmra.mrb[20].mxu1 %vm210_vm1, %v2339_v8  ;;  %vm2562_vm1 = vcmask 62464  }
 0x479   :  { %4936 = vmatprep.mubr.msk.bf16.mxu1 %vm5604_vm0, %v5602_v17  ;;  %4935 = vmatpush3.bf16.msra.mxu1 %v6401_v10 }
 0x47a   :  { %4946 = vmatprep.subr.bf16.mxu1 %v5602_v17 }
 0x50f   :  { %v4858_v5 = vpop.f32.mrb[16].mxu1 }
 0x510   :  { %v1982_v9 = vpop.f32.mrb[17].mxu1 }
 0x517   :  { %v4869_v14 = vpop.f32.mrb[18].mxu1 }
 0x518   :  { %v2071_v15 = vmax.f32 %v4858_v5, %v4869_v14  ;;  %v2061_v16 = vpop.f32.mrb[19].mxu1 }
 0x519   :  { %v2070_v19 = vmax.f32 %v1982_v9, %v2061_v16 }
 0x51a   :  { %v2079_v24 = vadd.f32 %v6411_v11, %v2071_v15 }
 0x51b   :  { %v2078_v20 = vadd.f32 %v6411_v11, %v2070_v19 }
 0x51c   :  { %v2081_v21 = vmax.f32 %v2079_v24, 0.0 }
 0x51d   :  { %v2080_v27 = vmax.f32 %v2078_v20, 0.0 }
 0x51e   :  { %2563 = vst.msk [vmem:[#allocation3 + $0x9] sm:$0x3f] %vm2562_vm1, %v2081_v21 }
 0x51f   :  { %2561 = vst.msk [vmem:[#allocation3 + $0x1] sm:$0xff] %vm2560_vm8, %v2080_v27 }
 0x525   :  { %v2676_v23 = vld [vmem:[#allocation3 + $0xa] sm:$0xf] }
 0x526   :  { %v2675_v25 = vld [vmem:[#allocation3 + $0x2] sm:$0xff]  ;;  %v2730_v40 = vld [vmem:[#allocation3 + $0xb] sm:$0xf] }
 0x527   :  { %v2677_v26 = vpack.c.bf16 %v2676_v23, %v2675_v25  ;;  %v2576_v29 = vld [vmem:[#allocation3 + $0x9] sm:$0xf]  ;;  %v2571_v18 = vld [vmem:[#allocation3] sm:$0xff] }
 0x528   :  { %v2783_v30 = vld [vmem:[#allocation3 + $0x4] sm:$0xff]  ;;  %3645 = vst.msk [vmem:[#allocation3] sm:$0x1] %vm3644_vm9, %v5602_v17  ;;  %v2784_v32 = vld [vmem:[#allocation3 + $0xc] sm:$0xf] }
 0x529   :  { %v2572_v31 = vld [vmem:[#allocation3 + $0x8] sm:$0xf]  ;;  %4937 = vmatmul.mubr.msk.bf16.vlgmr.msra.gmra.mrb[24].mxu1 %vm2560_vm8, %v2677_v26  ;;  %v2785_v41 = vpack.c.bf16 %v2784_v32, %v2783_v30 }
 0x52a   :  { %3650 = vst.msk [vmem:[#allocation3 + $0xb] sm:$0x1] %vm3644_vm9, %v5602_v17  ;;  %4947 = vmatpush3.bf16.msra.mxu1 %v6418_v28  ;;  %4948 = vmatprep.mubr.msk.bf16.mxu1 %vm5604_vm0, %v5602_v17  ;;  %v2575_v54 = vld [vmem:[#allocation3 + $0x1] sm:$0xff]  ;;  %v2573_v56 = vpack.c.bf16 %v2572_v31, %v2571_v18 }
 0x52b   :  { %4958 = vmatprep.subr.bf16.mxu1 %v5602_v17 }
 0x531   :  { %4949 = vmatmul.mubr.msk.bf16.vlgmr.msra.gmra.mrb[28].mxu1 %vm2560_vm8, %v2785_v41  ;;  %v6483_v41 = vld [vmem:[#allocation11] ss:$0 sm:$0xff] }
 0x532   :  { %4959 = vmatpush3.bf16.msra.mxu1 %v2632_v34  ;;  %4960 = vmatprep.mubr.msk.bf16.mxu1 %vm5604_vm0, %v5602_v17 }
 0x533   :  { %4970 = vmatprep.subr.bf16.mxu1 %v5602_v17 }
 0x54b   :  { %v4898_v35 = vpop.f32.mrb[20].mxu1 }
 0x54c   :  { %v2380_v37 = vpop.f32.mrb[21].mxu1 }
 0x54d   :  { %v4899_v46 = vpop.f32.mrb[22].mxu1 }
 0x54e   :  { %v5218_v63 = vpack.c.bf16 %v4899_v46, %v4898_v35  ;;  %v2383_v38 = vpop.f32.mrb[23].mxu1 }
 0x54f   :  { %v5214_v39 = vpack.c.bf16 %v2383_v38, %v2380_v37  ;;  %v5366_v38 = vld [vmem:[#allocation12 + $0x8] sm:$0xff]  }
 0x551   :  { %5215 = vmatprep.subr.bf16.mxu0 %v5214_v39 }
 0x552   :  { %5217 = vmatpush3.bf16.msra.mxu0 %v5214_v39 }
 0x553   :  { %5220 = vmatprep.subr.msk.bf16.mxu0 %vm6356_vm5, %v5218_v63 }
 0x556   :  { %5223 = vmatpush3.bf16.msk.msra.mxu0 %vm6356_vm5, %v5218_v63 }
 0x557   :  { %5225 = vmatprep.subr.bf16.mxu0 %v5214_v39 }
 0x559   :  { %4909 = vmatmul.mubr.msk.f32.vlgmr.msra.gmra.mrb[20].mxu0 %vm1907_vm3, %v6030_v47  ;;  %v2577_v47 = vpack.c.bf16 %v2576_v29, %v2575_v54 }
 0x55a   :  { %5227 = vmatpush3.bf16.msra.mxu0 %v5214_v39  ;;  %4919 = vmatprep.mubr.msk.f32.mxu0 %vm1907_vm3, %v6049_v50  ;;  %v2733_v50 = vld [vmem:[#allocation9 + $0xc] sm:$0xf] }
 0x55b   :  { %5230 = vmatprep.subr.msk.bf16.mxu0 %vm6356_vm5, %v5218_v63  ;;  %v2738_v45 = vsel %vm2583_vm6, %v2733_v50, 0 }
 0x55e   :  { %5233 = vmatpush3.bf16.msk.msra.mxu0 %vm6356_vm5, %v5218_v63 }
 0x55f   :  { %4922 = vmatprep.subr.bf16.mxu0 %v5602_v17 }
 0x561   :  { %4920 = vmatmul.mubr.msk.f32.vlgmr.msra.gmra.mrb[22].mxu0 %vm1907_vm3, %v6062_v51  ;;  %v2729_v51 = vld [vmem:[#allocation3 + $0x3] sm:$0xff] }
 0x562   :  { %4923 = vmatpush3.bf16.msra.mxu0 %v2585_v44  ;;  %4924 = vmatprep.mubr.msk.bf16.mxu0 %vm5604_vm0, %v5602_v17  ;;  %v2731_v53 = vpack.c.bf16 %v2730_v40, %v2729_v51  ;;  %v6502_v51 = vld [vmem:[#allocation12 + $0x10] sm:$0xff]  }
 0x563   :  { %4928 = vmatprep.subr.bf16.mxu0 %v5602_v17 }
 0x565   :  { %4925 = vmatmul.mubr.msk.bf16.vlgmr.msra.gmra.mrb[24].mxu0 %vm2560_vm8, %v2577_v47 }
 0x566   :  { %4929 = vmatpush3.bf16.msra.mxu0 %v2632_v34  ;;  %4930 = vmatprep.mubr.msk.bf16.mxu0 %vm5604_vm0, %v5602_v17 }
 0x567   :  { %4940 = vmatprep.subr.bf16.mxu0 %v5602_v17 }
 0x56d   :  { %4931 = vmatmul.mubr.msk.bf16.vlgmr.msra.gmra.mrb[28].mxu0 %vm2560_vm8, %v2573_v56  ;;  %v5367_v56 = vld [vmem:[#allocation12] sm:$0xff]  }
 0x56e   :  { %4941 = vmatpush3.bf16.msra.mxu0 %v2738_v45  ;;  %4942 = vmatprep.mubr.msk.bf16.mxu0 %vm5604_vm0, %v5602_v17 }
 0x56f   :  { %4952 = vmatprep.subr.bf16.mxu0 %v5602_v17 }
 0x575   :  { %4943 = vmatmul.mubr.msk.bf16.vlgmr.msra.gmra.mrb[32].mxu0 %vm2560_vm8, %v2731_v53 }
 0x576   :  { %4953 = vmatpush3.bf16.msra.mxu0 %v2585_v44  ;;  %4954 = vmatprep.mubr.msk.bf16.mxu0 %vm5604_vm0, %v5602_v17 }
 0x577   :  { %4964 = vmatprep.subr.bf16.mxu0 %v5602_v17 }
 0x5fc   :  { %v2720_v0 = vpop.f32.mrb[24].mxu1 }
 0x5fd   :  { %v4938_v58 = vpop.f32.mrb[25].mxu1 }
 0x5fe   :  { %v2723_v59 = vpop.f32.mrb[26].mxu1 }
 0x5ff   :  { %v4939_v36 = vpop.f32.mrb[27].mxu1 }
 0x604   :  { %v2828_v60 = vpop.f32.mrb[28].mxu1 }
 0x605   :  { %v4950_v3 = vpop.f32.mrb[29].mxu1 }
 0x606   :  { %v2831_v48 = vpop.f32.mrb[30].mxu1 }
 0x607   :  { %v4951_v62 = vpop.f32.mrb[31].mxu1 }
 0x62c   :  { %v4910_v49 = vpop.f32.mrb[20].mxu0 }
 0x62d   :  { %v2468_v1 = vpop.f32.mrb[21].mxu0 }
 0x634   :  { %v4921_v43 = vpop.f32.mrb[22].mxu0 }
 0x635   :  { %v2553_v2 = vmax.f32 %v4910_v49, %v4921_v43  ;;  %v2543_v4 = vpop.f32.mrb[23].mxu0 }
 0x636   :  { %v2552_v52 = vmax.f32 %v2468_v1, %v2543_v4  ;;  %v6516_v1 = vld [vmem:[#allocation12 + $0x20] sm:$0xff]  }
 0x637   :  { %v2555_v12 = vadd.f32 %v6411_v11, %v2553_v2 }
 0x638   :  { %v2554_v55 = vadd.f32 %v6411_v11, %v2552_v52  ;;  %v2621_v6 = vpop.f32.mrb[24].mxu0 }
 0x639   :  { %v2557_v13 = vmax.f32 %v2555_v12, 0.0  ;;  %v4926_v57 = vpop.f32.mrb[25].mxu0 }
 0x63a   :  { %v2556_v7 = vmax.f32 %v2554_v55, 0.0  ;;  %v2624_v8 = vpop.f32.mrb[26].mxu0 }
 0x63b   :  { %2568 = vst.msk [vmem:[#allocation3 + $0x31] sm:$0x3f] %vm2562_vm1, %v2557_v13  ;;  %v4927_v61 = vpop.f32.mrb[27].mxu0 }
 0x63c   :  { %2567 = vst.msk [vmem:[#allocation3 + $0x29] sm:$0xff] %vm2560_vm8, %v2556_v7 }
 0x640   :  { %v2668_v5 = vpop.f32.mrb[28].mxu0 }
 0x641   :  { %v2669_v9 = vadd.f32 %v2668_v5, %v2621_v6  ;;  %v4932_v14 = vpop.f32.mrb[29].mxu0 }
 0x642   :  { %v2671_v15 = vpop.f32.mrb[30].mxu0  ;;  %v2851_v16 = vld [vmem:[#allocation3 + $0x31] sm:$0xf] }
 0x643   :  { %v2672_v19 = vadd.f32 %v2671_v15, %v2624_v8  ;;  %v4933_v24 = vpop.f32.mrb[31].mxu0  ;;  %v2850_v20 = vld [vmem:[#allocation3 + $0x29] sm:$0xff]  ;;  %v2727_v27 = vadd.f32 %v2720_v0, %v2669_v9  ;;  %v2942_v26 = vld [vmem:[#allocation3 + $0x32] sm:$0xf] }
 0x644   :  { %v2847_v21 = vld [vmem:[#allocation3 + $0x28] sm:$0xff]  ;;  %v2848_v11 = vld [vmem:[#allocation3 + $0x30] sm:$0xf]  ;;  %v2852_v22 = vpack.c.bf16 %v2851_v16, %v2850_v20  ;;  %v3040_v50 = vld [vmem:[#allocation3 + $0x34] sm:$0xf] }
 0x645   :  { %v2849_v23 = vpack.c.bf16 %v2848_v11, %v2847_v21  ;;  %3651 = vst.msk [vmem:[#allocation3 + $0x28] sm:$0x1] %vm3644_vm9, %v5602_v17  ;;  %v2728_v25 = vadd.f32 %v2723_v59, %v2672_v19  ;;  %v2991_v29 = vld [vmem:[#allocation3 + $0x33] sm:$0xf]  ;;  %v2941_v32 = vld [vmem:[#allocation3 + $0x2a] sm:$0xff] }
 0x646   :  { %v3039_v18 = vld [vmem:[#allocation3 + $0x2c] sm:$0xff]  ;;  %4955 = vmatmul.mubr.msk.bf16.vlgmr.msra.gmra.mrb[36].mxu0 %vm2560_vm8, %v2852_v22  ;;  %v2943_v46 = vpack.c.bf16 %v2942_v26, %v2941_v32 }
 0x647   :  { %4961 = vmatmul.mubr.msk.bf16.vlgmr.msra.gmra.mrb[32].mxu1 %vm2560_vm8, %v2849_v23  ;;  %3654 = vst.msk [vmem:[#allocation3 + $0x33] sm:$0x1] %vm3644_vm9, %v5602_v17  ;;  %4965 = vmatpush3.bf16.msra.mxu0 %v6401_v10  ;;  %v2990_v33 = vld [vmem:[#allocation3 + $0x2b] sm:$0xff] }
 0x648   :  { %4971 = vmatpush3.bf16.msra.mxu1 %v2738_v45  ;;  %v2774_v30 = vpop.f32.mrb[32].mxu0  ;;  %4966 = vmatprep.mubr.msk.bf16.mxu0 %vm5604_vm0, %v5602_v17  ;;  %v2992_v63 = vpack.c.bf16 %v2991_v29, %v2990_v33 }
 0x649   :  { %4972 = vmatprep.mubr.msk.bf16.mxu1 %vm5604_vm0, %v5602_v17  ;;  %v2781_v31 = vadd.f32 %v2774_v30, %v2727_v27  ;;  %v4944_v40 = vpop.f32.mrb[33].mxu0  ;;  %4976 = vmatprep.subr.bf16.mxu0 %v5602_v17 }
 0x64a   :  { %4982 = vmatprep.subr.bf16.mxu1 %v5602_v17  ;;  %v2777_v34 = vpop.f32.mrb[34].mxu0 }
 0x64b   :  { %v2835_v10 = vadd.f32 %v2828_v60, %v2781_v31  ;;  %v2782_v35 = vadd.f32 %v2777_v34, %v2728_v25  ;;  %v4945_v37 = vpop.f32.mrb[35].mxu0  ;;  %v6504_v60 = vld [vmem:[#allocation12 + $0x18] sm:$0xff]  }
 0x64d   :  { %v2843_v39 = vadd.f32 %v6483_v41, %v2835_v10  ;;  %v2836_v42 = vadd.f32 %v2831_v48, %v2782_v35 }
 0x64e   :  { %4967 = vmatmul.mubr.msk.bf16.vlgmr.msra.gmra.mrb[40].mxu0 %vm2560_vm8, %v2943_v46 }
 0x64f   :  { %4973 = vmatmul.mubr.msk.bf16.vlgmr.msra.gmra.mrb[36].mxu1 %vm2560_vm8, %v2992_v63  ;;  %v2845_v44 = vmax.f32 %v2843_v39, 0.0  ;;  %v2844_v54 = vadd.f32 %v6483_v41, %v2836_v42  ;;  %4977 = vmatpush3.bf16.msra.mxu0 %v6418_v28  ;;  %v3041_v28 = vpack.c.bf16 %v3040_v50, %v3039_v18 }
 0x650   :  { %4978 = vmatprep.mubr.msk.bf16.mxu0 %vm5604_vm0, %v5602_v17  ;;  %4983 = vmatpush3.bf16.msra.mxu1 %v5366_v38 }
 0x651   :  { %4988 = vmatprep.subr.bf16.mxu0 %v5602_v17  ;;  %v2846_v47 = vmax.f32 %v2844_v54, 0.0  ;;  %4984 = vmatprep.mubr.msk.bf16.mxu1 %vm5604_vm0, %v5602_v17  ;;  %3095 = vst.msk [vmem:[#allocation2 + $0x1] sm:$0xff] %vm3094_vm10, %v2845_v44 }
 0x652   :  { %4994 = vmatprep.subr.bf16.mxu1 %v5602_v17 }
 0x653   :  { %3097 = vst.msk [vmem:[#allocation2 + $0x9] sm:$0xf] %vm3096_vm11, %v2846_v47 }
 0x656   :  { %4979 = vmatmul.mubr.msk.bf16.vlgmr.msra.gmra.mrb[44].mxu0 %vm2560_vm8, %v3041_v28 }
 0x657   :  { %4989 = vmatpush3.bf16.msra.mxu0 %v5367_v56  ;;  %4990 = vmatprep.mubr.msk.bf16.mxu0 %vm5604_vm0, %v5602_v17 }
 0x658   :  { %5000 = vmatprep.subr.bf16.mxu0 %v5602_v17  ;;  %v3109_v45 = vld [vmem:[#allocation2 + $0x1] sm:$0xff] }
 0x659   :  { %v3104_v0 = vld [vmem:[#allocation2] sm:$0xff] }
 0x65a   :  { %v3110_v53 = vld [vmem:[#allocation2 + $0x9] sm:$0x3]  ;;  %v3274_v49 = vld [vmem:[#allocation2 + $0xb] sm:$0x3] }
 0x65b   :  { %v3105_v58 = vld [vmem:[#allocation2 + $0x8] sm:$0x3]  ;;  %v3111_v59 = vpack.c.bf16 %v3110_v53, %v3109_v45  ;;  %v3216_v48 = vld [vmem:[#allocation2 + $0xa] sm:$0x3]  ;;  %v3332_v52 = vld [vmem:[#allocation2 + $0xc] sm:$0x3] }
 0x65c   :  { %v3106_v36 = vpack.c.bf16 %v3105_v58, %v3104_v0  ;;  %v3215_v3 = vld [vmem:[#allocation2 + $0x2] sm:$0xff] }
 0x65d   :  { %4985 = vmatmul.mubr.msk.bf16.vlgmr.msra.gmra.mrb[40].mxu1 %vm3094_vm10, %v3111_v59  ;;  %v3273_v62 = vld [vmem:[#allocation2 + $0x3] sm:$0xff]  ;;  %v3217_v43 = vpack.c.bf16 %v3216_v48, %v3215_v3 }
 0x65e   :  { %4991 = vmatmul.mubr.msk.bf16.vlgmr.msra.gmra.mrb[48].mxu0 %vm3094_vm10, %v3106_v36  ;;  %4995 = vmatpush3.bf16.msra.mxu1 %v6502_v51  ;;  %v3275_v2 = vpack.c.bf16 %v3274_v49, %v3273_v62  ;;  %v3331_v4 = vld [vmem:[#allocation2 + $0x4] sm:$0xff] }
 0x65f   :  { %5001 = vmatpush3.bf16.msra.mxu0 %v6504_v60  ;;  %4996 = vmatprep.mubr.msk.bf16.mxu1 %vm5604_vm0, %v5602_v17  ;;  %v3333_v12 = vpack.c.bf16 %v3332_v52, %v3331_v4 }
 0x660   :  { %5002 = vmatprep.mubr.msk.bf16.mxu0 %vm5604_vm0, %v5602_v17  ;;  %5006 = vmatprep.subr.bf16.mxu1 %v5602_v17 }
 0x661   :  { %5012 = vmatprep.subr.bf16.mxu0 %v5602_v17 }
 0x665   :  { %4997 = vmatmul.mubr.msk.bf16.vlgmr.msra.gmra.mrb[44].mxu1 %vm3094_vm10, %v3217_v43 }
 0x666   :  { %5003 = vmatmul.mubr.msk.bf16.vlgmr.msra.gmra.mrb[52].mxu0 %vm3094_vm10, %v3275_v2  ;;  %5007 = vmatpush3.bf16.msra.mxu1 %v6516_v1 }
 0x667   :  { %5008 = vmatprep.mubr.msk.bf16.mxu1 %vm5604_vm0, %v5602_v17  ;;  %5018 = vmatprep.subr.bf16.mxu1 %v5602_v17 }
 0x668   :  { %5013 = vmatpush3.bf16.msra.mxu0 %v5366_v38  ;;  %5014 = vmatprep.mubr.msk.bf16.mxu0 %vm5604_vm0, %v5602_v17 }
 0x669   :  { %5024 = vmatprep.subr.bf16.mxu0 %v5602_v17 }
 0x66d   :  { %5009 = vmatmul.mubr.msk.bf16.vlgmr.msra.gmra.mrb[48].mxu1 %vm3094_vm10, %v3333_v12 }
 0x66e   :  { %5019 = vmatpush3.bf16.msra.mxu1 %v5367_v56  ;;  %5020 = vmatprep.mubr.msk.bf16.mxu1 %vm5604_vm0, %v5602_v17 }
 0x66f   :  { %5030 = vmatprep.subr.bf16.mxu1 %v5602_v17 }
 0x719   :  { %v2890_v55 = vpop.f32.mrb[36].mxu0 }
 0x71a   :  { %v2934_v6 = vpop.f32.mrb[32].mxu1  ;;  %v4956_v57 = vpop.f32.mrb[37].mxu0 }
 0x71b   :  { %v2935_v13 = vadd.f32 %v2934_v6, %v2890_v55  ;;  %v4962_v7 = vpop.f32.mrb[33].mxu1  ;;  %v2893_v8 = vpop.f32.mrb[38].mxu0 }
 0x71c   :  { %v2937_v61 = vpop.f32.mrb[34].mxu1  ;;  %v4957_v9 = vpop.f32.mrb[39].mxu0  ;;  %v6545_v7 = vld [vmem:[#allocation14] ss:$0 sm:$0xff] }
 0x71d   :  { %v2938_v5 = vadd.f32 %v2937_v61, %v2893_v8  ;;  %v4963_v14 = vpop.f32.mrb[35].mxu1 }
 0x721   :  { %v2981_v15 = vpop.f32.mrb[40].mxu0 }
 0x722   :  { %v3030_v16 = vpop.f32.mrb[36].mxu1  ;;  %v2988_v19 = vadd.f32 %v2981_v15, %v2935_v13  ;;  %v4968_v24 = vpop.f32.mrb[41].mxu0 }
 0x723   :  { %v4974_v20 = vpop.f32.mrb[37].mxu1  ;;  %v2984_v21 = vpop.f32.mrb[42].mxu0 }
 0x724   :  { %v3033_v11 = vpop.f32.mrb[38].mxu1  ;;  %v3037_v27 = vadd.f32 %v3030_v16, %v2988_v19  ;;  %v2989_v22 = vadd.f32 %v2984_v21, %v2938_v5  ;;  %v4969_v23 = vpop.f32.mrb[43].mxu0  ;;  %v5373_v21 = vld [vmem:[#allocation15 + $0x18] sm:$0xff]  }
 0x725   :  { %v4975_v25 = vpop.f32.mrb[39].mxu1 }
 0x726   :  { %v3038_v26 = vadd.f32 %v3033_v11, %v2989_v22  ;;  %v5374_v25 = vld [vmem:[#allocation15 + $0x8] sm:$0xff]  }
 0x729   :  { %v3079_v29 = vpop.f32.mrb[44].mxu0 }
 0x72a   :  { %v3086_v18 = vadd.f32 %v3079_v29, %v3037_v27  ;;  %v4980_v30 = vpop.f32.mrb[45].mxu0  ;;  %v6568_v29 = vld [vmem:[#allocation15 + $0x20] sm:$0xff]  }
 0x72b   :  { %v3082_v31 = vpop.f32.mrb[46].mxu0 }
 0x72c   :  { %v3088_v40 = vadd.f32 %v6483_v41, %v3086_v18  ;;  %v3087_v32 = vadd.f32 %v3082_v31, %v3038_v26  ;;  %v4981_v33 = vpop.f32.mrb[47].mxu0  ;;  %v6571_v31 = vld [vmem:[#allocation15 + $0x30] sm:$0xff]  }
 0x72e   :  { %v3090_v34 = vmax.f32 %v3088_v40, 0.0  ;;  %v3089_v10 = vadd.f32 %v6483_v41, %v3087_v32  ;;  %v6575_v32 = vld [vmem:[#allocation15 + $0x28] sm:$0xff]  }
 0x730   :  { %3100 = vst.msk [vmem:[#allocation2 + $0x29] sm:$0xff] %vm3094_vm10, %v3090_v34  ;;  %v3091_v35 = vmax.f32 %v3089_v10, 0.0  ;;  %v3158_v37 = vpop.f32.mrb[40].mxu1  ;;  %v6582_v34 = vld [vmem:[#allocation15 + $0x38] sm:$0xff]   ;;  %v6588_v10 = vld [vmem:[#allocation15 + $0x40] sm:$0xff]  }
 0x731   :  { %v4986_v46 = vpop.f32.mrb[41].mxu1  ;;  %v3208_v63 = vpop.f32.mrb[48].mxu0 }
 0x732   :  { %3101 = vst.msk [vmem:[#allocation2 + $0x31] sm:$0xf] %vm3096_vm11, %v3091_v35  ;;  %v3209_v38 = vadd.f32 %v3208_v63, %v3158_v37  ;;  %v3161_v39 = vpop.f32.mrb[42].mxu1  ;;  %v4992_v42 = vpop.f32.mrb[49].mxu0  ;;  %v6594_v63 = vld [vmem:[#allocation15 + $0x48] sm:$0xff]  }
 0x733   :  { %v4987_v44 = vpop.f32.mrb[43].mxu1  ;;  %v3211_v54 = vpop.f32.mrb[50].mxu0 }
 0x734   :  { %v3212_v47 = vadd.f32 %v3211_v54, %v3161_v39  ;;  %v4993_v50 = vpop.f32.mrb[51].mxu0 }
 0x737   :  { %v3402_v28 = vld [vmem:[#allocation2 + $0x29] sm:$0xff] }
 0x738   :  { %v3264_v56 = vpop.f32.mrb[44].mxu1  ;;  %v3399_v45 = vld [vmem:[#allocation2 + $0x28] sm:$0xff] }
 0x739   :  { %v3271_v53 = vadd.f32 %v3264_v56, %v3209_v38  ;;  %v4998_v41 = vpop.f32.mrb[45].mxu1  ;;  %v3322_v0 = vpop.f32.mrb[52].mxu0  ;;  %v3403_v58 = vld [vmem:[#allocation2 + $0x31] sm:$0x3]  ;;  %v3543_v57 = vld [vmem:[#allocation2 + $0x33] sm:$0x3] }
 0x73a   :  { %v3400_v59 = vld [vmem:[#allocation2 + $0x30] sm:$0x3]  ;;  %v3267_v36 = vpop.f32.mrb[46].mxu1  ;;  %v5004_v3 = vpop.f32.mrb[53].mxu0  ;;  %v3404_v48 = vpack.c.bf16 %v3403_v58, %v3402_v28  ;;  %v3494_v6 = vld [vmem:[#allocation2 + $0x32] sm:$0x3] }
 0x73b   :  { %v3401_v62 = vpack.c.bf16 %v3400_v59, %v3399_v45  ;;  %v3329_v49 = vadd.f32 %v3322_v0, %v3271_v53  ;;  %v3272_v43 = vadd.f32 %v3267_v36, %v3212_v47  ;;  %v4999_v2 = vpop.f32.mrb[47].mxu1  ;;  %v3325_v4 = vpop.f32.mrb[54].mxu0  ;;  %v3493_v55 = vld [vmem:[#allocation2 + $0x2a] sm:$0xff]  ;;  %v3592_v22 = vld [vmem:[#allocation2 + $0x34] sm:$0x3] }
 0x73c   :  { %v5005_v52 = vpop.f32.mrb[55].mxu0  ;;  %5015 = vmatmul.mubr.msk.bf16.vlgmr.msra.gmra.mrb[56].mxu0 %vm3094_vm10, %v3404_v48  ;;  %v3542_v13 = vld [vmem:[#allocation2 + $0x2b] sm:$0xff]  ;;  %v3495_v9 = vpack.c.bf16 %v3494_v6, %v3493_v55 }
 0x73d   :  { %5021 = vmatmul.mubr.msk.bf16.vlgmr.msra.gmra.mrb[52].mxu1 %vm3094_vm10, %v3401_v62  ;;  %v3330_v12 = vadd.f32 %v3325_v4, %v3272_v43  ;;  %5025 = vmatpush3.bf16.msra.mxu0 %v6502_v51  ;;  %v3544_v14 = vpack.c.bf16 %v3543_v57, %v3542_v13  ;;  %v3591_v27 = vld [vmem:[#allocation2 + $0x2c] sm:$0xff] }
 0x73e   :  { %5031 = vmatpush3.bf16.msra.mxu1 %v6504_v60  ;;  %5026 = vmatprep.mubr.msk.bf16.mxu0 %vm5604_vm0, %v5602_v17  ;;  %v6547_v60 = vld [vmem:[#allocation15 + $0x10] sm:$0xff]   ;;  %v3593_v23 = vpack.c.bf16 %v3592_v22, %v3591_v27 }
 0x73f   :  { %5032 = vmatprep.mubr.msk.bf16.mxu1 %vm5604_vm0, %v5602_v17  ;;  %5036 = vmatprep.subr.bf16.mxu0 %v5602_v17 }
 0x740   :  { %5042 = vmatprep.subr.bf16.mxu1 %v5602_v17  ;;  %v3380_v8 = vpop.f32.mrb[48].mxu1 }
 0x741   :  { %v3387_v51 = vadd.f32 %v3380_v8, %v3329_v49  ;;  %v5010_v61 = vpop.f32.mrb[49].mxu1 }
 0x742   :  { %v3383_v5 = vpop.f32.mrb[50].mxu1 }
 0x743   :  { %v3395_v15 = vadd.f32 %v6545_v7, %v3387_v51  ;;  %v3388_v16 = vadd.f32 %v3383_v5, %v3330_v12  ;;  %v5011_v19 = vpop.f32.mrb[51].mxu1 }
 0x744   :  { %5027 = vmatmul.mubr.msk.bf16.vlgmr.msra.gmra.mrb[60].mxu0 %vm3094_vm10, %v3495_v9 }
 0x745   :  { %5033 = vmatmul.mubr.msk.bf16.vlgmr.msra.gmra.mrb[56].mxu1 %vm3094_vm10, %v3544_v14  ;;  %v3397_v24 = vmax.f32 %v3395_v15, 0.0  ;;  %v3396_v20 = vadd.f32 %v6545_v7, %v3388_v16  ;;  %5037 = vmatpush3.bf16.msra.mxu0 %v6516_v1  ;;  %v5372_v1 = vld [vmem:[#allocation15] sm:$0xff]  }
 0x746   :  { %5043 = vmatpush3.bf16.msra.mxu1 %v6547_v60  ;;  %5038 = vmatprep.mubr.msk.bf16.mxu0 %vm5604_vm0, %v5602_v17 }
 0x747   :  { %5050 = vmatprep.subr.bf16.mxu0 %v5602_v17  ;;  %v3398_v11 = vmax.f32 %v3396_v20, 0.0  ;;  %5044 = vmatprep.subr.bf16.mxu1 %v5602_v17  ;;  %3647 = vst.msk [vmem:[#allocation3 + $0x1] sm:$0xff] %vm3646_vm12, %v3397_v24 }
 0x748   :  { %5046 = vmatprep.mubr.msk.bf16.mxu1 %vm5604_vm0, %v5602_v17 }
 0x749   :  { %3649 = vst.msk [vmem:[#allocation3 + $0x9] sm:$0x3] %vm3648_vm13, %v3398_v11 }
 0x74a   :  { %5045 = vmatpush3.bf16.msra.mxu1 %v5373_v21 }
 0x74b   :  { %5058 = vmatprep.subr.bf16.mxu1 %v5602_v17 }
 0x74c   :  { %5039 = vmatmul.mubr.msk.bf16.vlgmr.msra.gmra.mrb[64].mxu0 %vm3094_vm10, %v3593_v23 }
 0x74d   :  { %5051 = vmatpush3.bf16.msra.mxu0 %v5372_v1  ;;  %5054 = vmatprep.mubr.msk.bf16.mxu0 %vm5604_vm0, %v5602_v17 }
 0x74e   :  { %5052 = vmatprep.subr.bf16.mxu0 %v5602_v17  ;;  %v3662_v26 = vld [vmem:[#allocation3 + $0x1] sm:$0xff] }
 0x74f   :  { %v3663_v18 = vpack.c.bf16 %v3662_v26, %v3662_v26  ;;  %v3656_v30 = vld [vmem:[#allocation3] sm:$0xff] }
 0x750   :  { %v3657_v40 = vpack.c.bf16 %v3656_v30, %v3656_v30  ;;  %v3779_v33 = vld [vmem:[#allocation3 + $0x2] sm:$0xff] }
 0x751   :  { %5047 = vmatmul.mubr.msk.bf16.vlgmr.msra.gmra.mrb[60].mxu1 %vm3646_vm12, %v3663_v18  ;;  %5053 = vmatpush3.bf16.msra.mxu0 %v5374_v25  ;;  %v3780_v35 = vpack.c.bf16 %v3779_v33, %v3779_v33  ;;  %v3842_v37 = vld [vmem:[#allocation3 + $0x3] sm:$0xff] }
 0x752   :  { %5059 = vmatpush3.bf16.msra.mxu1 %v6568_v29  ;;  %5066 = vmatprep.subr.bf16.mxu0 %v5602_v17  ;;  %v3843_v46 = vpack.c.bf16 %v3842_v37, %v3842_v37  ;;  %v3905_v38 = vld [vmem:[#allocation3 + $0x4] sm:$0xff] }
 0x753   :  { %5060 = vmatprep.subr.bf16.mxu1 %v5602_v17  ;;  %5062 = vmatprep.mubr.msk.bf16.mxu1 %vm5604_vm0, %v5602_v17  ;;  %v3906_v39 = vpack.c.bf16 %v3905_v38, %v3905_v38 }
 0x754   :  { %5055 = vmatmul.mubr.msk.bf16.vlgmr.msra.gmra.mrb[68].mxu0 %vm3646_vm12, %v3657_v40 }
 0x755   :  { %5067 = vmatpush3.bf16.msra.mxu0 %v6571_v31  ;;  %5070 = vmatprep.mubr.msk.bf16.mxu0 %vm5604_vm0, %v5602_v17 }
 0x756   :  { %5061 = vmatpush3.bf16.msra.mxu1 %v6575_v32  ;;  %5068 = vmatprep.subr.bf16.mxu0 %v5602_v17 }
 0x757   :  { %5074 = vmatprep.subr.bf16.mxu1 %v5602_v17 }
 0x759   :  { %5063 = vmatmul.mubr.msk.bf16.vlgmr.msra.gmra.mrb[64].mxu1 %vm3646_vm12, %v3780_v35  ;;  %5069 = vmatpush3.bf16.msra.mxu0 %v6582_v34 }
 0x75a   :  { %5075 = vmatpush3.bf16.msra.mxu1 %v6588_v10  ;;  %5078 = vmatprep.mubr.msk.bf16.mxu1 %vm5604_vm0, %v5602_v17 }
 0x75b   :  { %5076 = vmatprep.subr.bf16.mxu1 %v5602_v17  ;;  %5082 = vmatprep.subr.bf16.mxu0 %v5602_v17 }
 0x75c   :  { %5071 = vmatmul.mubr.msk.bf16.vlgmr.msra.gmra.mrb[72].mxu0 %vm3646_vm12, %v3843_v46 }
 0x75d   :  { %5083 = vmatpush3.bf16.msra.mxu0 %v6547_v60  ;;  %5086 = vmatprep.mubr.msk.bf16.mxu0 %vm5604_vm0, %v5602_v17 }
 0x75e   :  { %5077 = vmatpush3.bf16.msra.mxu1 %v6594_v63  ;;  %5084 = vmatprep.subr.bf16.mxu0 %v5602_v17 }
 0x75f   :  { %5090 = vmatprep.subr.bf16.mxu1 %v5602_v17 }
 0x761   :  { %5079 = vmatmul.mubr.msk.bf16.vlgmr.msra.gmra.mrb[68].mxu1 %vm3646_vm12, %v3906_v39  ;;  %5085 = vmatpush3.bf16.msra.mxu0 %v5373_v21 }
 0x762   :  { %5091 = vmatpush3.bf16.msra.mxu1 %v5372_v1  ;;  %5094 = vmatprep.mubr.msk.bf16.mxu1 %vm5604_vm0, %v5602_v17 }
 0x763   :  { %5092 = vmatprep.subr.bf16.mxu1 %v5602_v17  ;;  %5098 = vmatprep.subr.bf16.mxu0 %v5602_v17 }
 0x766   :  { %5093 = vmatpush3.bf16.msra.mxu1 %v5374_v25 }
 0x767   :  { %5106 = vmatprep.subr.bf16.mxu1 %v5602_v17 }
 0x80f   :  { %v3442_v42 = vpop.f32.mrb[56].mxu0 }
 0x810   :  { %v3486_v44 = vpop.f32.mrb[52].mxu1  ;;  %v5016_v47 = vpop.f32.mrb[57].mxu0 }
 0x811   :  { %v3487_v54 = vadd.f32 %v3486_v44, %v3442_v42  ;;  %v5022_v50 = vpop.f32.mrb[53].mxu1  ;;  %v3445_v56 = vpop.f32.mrb[58].mxu0  ;;  %v4401_v42 = vld [vmem:[#allocation17] ss:$0 sm:$0xff] }
 0x812   :  { %v3489_v28 = vpop.f32.mrb[54].mxu1  ;;  %v5017_v53 = vpop.f32.mrb[59].mxu0 }
 0x813   :  { %v3490_v45 = vadd.f32 %v3489_v28, %v3445_v56  ;;  %v5023_v41 = vpop.f32.mrb[55].mxu1 }
 0x817   :  { %v3533_v0 = vpop.f32.mrb[60].mxu0 }
 0x818   :  { %v3582_v58 = vpop.f32.mrb[56].mxu1  ;;  %v3540_v59 = vadd.f32 %v3533_v0, %v3487_v54  ;;  %v5028_v36 = vpop.f32.mrb[61].mxu0 }
 0x819   :  { %v5034_v3 = vpop.f32.mrb[57].mxu1  ;;  %v3536_v48 = vpop.f32.mrb[62].mxu0 }
 0x81a   :  { %v3585_v62 = vpop.f32.mrb[58].mxu1  ;;  %v3589_v49 = vadd.f32 %v3582_v58, %v3540_v59  ;;  %v3541_v43 = vadd.f32 %v3536_v48, %v3490_v45  ;;  %v5029_v2 = vpop.f32.mrb[63].mxu0 }
 0x81b   :  { %v5035_v4 = vpop.f32.mrb[59].mxu1 }
 0x81c   :  { %v3590_v52 = vadd.f32 %v3585_v62, %v3541_v43 }
 0x81f   :  { %v3631_v12 = vpop.f32.mrb[64].mxu0 }
 0x820   :  { %v3638_v55 = vadd.f32 %v3631_v12, %v3589_v49  ;;  %v5040_v6 = vpop.f32.mrb[65].mxu0 }
 0x821   :  { %v3634_v13 = vpop.f32.mrb[66].mxu0 }
 0x822   :  { %v3640_v57 = vadd.f32 %v6545_v7, %v3638_v55  ;;  %v3639_v8 = vadd.f32 %v3634_v13, %v3590_v52  ;;  %v5041_v51 = vpop.f32.mrb[67].mxu0 }
 0x824   :  { %v3642_v61 = vmax.f32 %v3640_v57, 0.0  ;;  %v3641_v60 = vadd.f32 %v6545_v7, %v3639_v8  ;;  %v3718_v5 = vpop.f32.mrb[60].mxu1 }
 0x825   :  { %v5048_v9 = vpop.f32.mrb[61].mxu1 }
 0x826   :  { %3652 = vst.msk [vmem:[#allocation3 + $0x29] sm:$0xff] %vm3646_vm12, %v3642_v61  ;;  %v3643_v14 = vmax.f32 %v3641_v60, 0.0  ;;  %v3721_v15 = vpop.f32.mrb[62].mxu1 }
 0x827   :  { %v5049_v16 = vpop.f32.mrb[63].mxu1  ;;  %v3773_v19 = vpop.f32.mrb[68].mxu0 }
 0x828   :  { %3653 = vst.msk [vmem:[#allocation3 + $0x31] sm:$0x3] %vm3648_vm13, %v3643_v14  ;;  %v3774_v24 = vadd.f32 %v3773_v19, %v3718_v5  ;;  %v5056_v20 = vpop.f32.mrb[69].mxu0 }
 0x829   :  { %v3776_v21 = vpop.f32.mrb[70].mxu0 }
 0x82a   :  { %v5057_v11 = vpop.f32.mrb[71].mxu0 }
 0x82c   :  { %v3835_v27 = vpop.f32.mrb[64].mxu1 }
 0x82d   :  { %v3841_v22 = vadd.f32 %v3835_v27, %v3774_v24  ;;  %v5064_v1 = vpop.f32.mrb[65].mxu1  ;;  %v3978_v23 = vld [vmem:[#allocation3 + $0x29] sm:$0xff] }
 0x82e   :  { %v3976_v25 = vld [vmem:[#allocation3 + $0x28] sm:$0xff]  ;;  %v3838_v7 = vpop.f32.mrb[66].mxu1  ;;  %v3979_v26 = vpack.c.bf16 %v3978_v23, %v3978_v23 }
 0x82f   :  { %v3977_v18 = vpack.c.bf16 %v3976_v25, %v3976_v25  ;;  %v5065_v30 = vpop.f32.mrb[67].mxu1  ;;  %v3898_v40 = vpop.f32.mrb[72].mxu0  ;;  %v4066_v38 = vld [vmem:[#allocation3 + $0x2a] sm:$0xff] }
 0x830   :  { %v3904_v33 = vadd.f32 %v3898_v40, %v3841_v22  ;;  %v5072_v35 = vpop.f32.mrb[73].mxu0  ;;  %5087 = vmatmul.mubr.msk.bf16.vlgmr.msra.gmra.mrb[76].mxu0 %vm3646_vm12, %v3979_v26  ;;  %v4112_v39 = vld [vmem:[#allocation3 + $0x2b] sm:$0xff] }
 0x831   :  { %5095 = vmatmul.mubr.msk.bf16.vlgmr.msra.gmra.mrb[72].mxu1 %vm3646_vm12, %v3977_v18  ;;  %v3901_v37 = vpop.f32.mrb[74].mxu0  ;;  %5099 = vmatpush3.bf16.msra.mxu0 %v6568_v29  ;;  %v4113_v50 = vpack.c.bf16 %v4112_v39, %v4112_v39 }
 0x832   :  { %5107 = vmatpush3.bf16.msra.mxu1 %v6571_v31  ;;  %v5073_v46 = vpop.f32.mrb[75].mxu0  ;;  %5100 = vmatprep.subr.bf16.mxu0 %v5602_v17  ;;  %v4067_v31 = vpack.c.bf16 %v4066_v38, %v4066_v38 }
 0x833   :  { %5108 = vmatprep.subr.bf16.mxu1 %v5602_v17  ;;  %5102 = vmatprep.mubr.msk.bf16.mxu0 %vm5604_vm0, %v5602_v17 }
 0x834   :  { %5110 = vmatprep.mubr.msk.bf16.mxu1 %vm5604_vm0, %v5602_v17  ;;  %v3961_v44 = vpop.f32.mrb[68].mxu1 }
 0x835   :  { %v3967_v54 = vadd.f32 %v3961_v44, %v3904_v33  ;;  %v5080_v47 = vpop.f32.mrb[69].mxu1  ;;  %5101 = vmatpush3.bf16.msra.mxu0 %v6575_v32 }
 0x836   :  { %5109 = vmatpush3.bf16.msra.mxu1 %v6582_v34  ;;  %v3964_v29 = vpop.f32.mrb[70].mxu1  ;;  %5114 = vmatprep.subr.bf16.mxu0 %v5602_v17  ;;  %v4158_v34 = vld [vmem:[#allocation3 + $0x2c] sm:$0xff] }
 0x837   :  { %v3974_v56 = vadd.f32 %v4401_v42, %v3967_v54  ;;  %v5081_v28 = vpop.f32.mrb[71].mxu1  ;;  %v4159_v53 = vpack.c.bf16 %v4158_v34, %v4158_v34 }
 0x838   :  { %5103 = vmatmul.mubr.msk.bf16.vlgmr.msra.gmra.mrb[80].mxu0 %vm3646_vm12, %v4067_v31 }
 0x839   :  { %5111 = vmatmul.mubr.msk.bf16.vlgmr.msra.gmra.mrb[76].mxu1 %vm3646_vm12, %v4113_v50  ;;  %v3975_v45 = vmax.f32 %v3974_v56, 0.0  ;;  %5115 = vmatpush3.bf16.msra.mxu0 %v6588_v10 }
 0x83a   :  { %5118 = vmatprep.mubr.msk.bf16.mxu0 %vm5604_vm0, %v5602_v17  ;;  %5116 = vmatprep.subr.bf16.mxu0 %v5602_v17 }
 0x83b   :  { %v4206_v32 = vpack.c.bf16 %v3975_v45, %v3975_v45 }
 0x83d   :  { %4208 = vst.msk [vmem:[%s6657_s11] sm:$0xf] %vm4207_vm14, %v4206_v32  ;;  %5117 = vmatpush3.bf16.msra.mxu0 %v6594_v63 }
 0x840   :  { %5119 = vmatmul.mubr.msk.bf16.vlgmr.msra.gmra.mrb[84].mxu0 %vm3646_vm12, %v4159_v53 }
 0x903   :  { %v4017_v41 = vpop.f32.mrb[76].mxu0 }
 0x904   :  { %v4060_v10 = vpop.f32.mrb[72].mxu1  ;;  %v5088_v58 = vpop.f32.mrb[77].mxu0 }
 0x905   :  { %v4061_v0 = vadd.f32 %v4060_v10, %v4017_v41  ;;  %v5096_v59 = vpop.f32.mrb[73].mxu1  ;;  %v4020_v36 = vpop.f32.mrb[78].mxu0 }
 0x906   :  { %v4063_v3 = vpop.f32.mrb[74].mxu1  ;;  %v5089_v17 = vpop.f32.mrb[79].mxu0 }
 0x907   :  { %v5097_v48 = vpop.f32.mrb[75].mxu1 }
 0x90b   :  { %v4105_v62 = vpop.f32.mrb[80].mxu0 }
 0x90c   :  { %v4151_v49 = vpop.f32.mrb[76].mxu1  ;;  %v4111_v43 = vadd.f32 %v4105_v62, %v4061_v0  ;;  %v5104_v2 = vpop.f32.mrb[81].mxu0 }
 0x90d   :  { %v5112_v4 = vpop.f32.mrb[77].mxu1  ;;  %v4108_v52 = vpop.f32.mrb[82].mxu0 }
 0x90e   :  { %v4154_v12 = vpop.f32.mrb[78].mxu1  ;;  %v4157_v63 = vadd.f32 %v4151_v49, %v4111_v43  ;;  %v5105_v55 = vpop.f32.mrb[83].mxu0 }
 0x90f   :  { %v5113_v6 = vpop.f32.mrb[79].mxu1 }
 0x913   :  { %v4197_v13 = vpop.f32.mrb[84].mxu0 }
 0x914   :  { %v4203_v57 = vadd.f32 %v4197_v13, %v4157_v63  ;;  %v5120_v8 = vpop.f32.mrb[85].mxu0 }
 0x915   :  { %v4200_v51 = vpop.f32.mrb[86].mxu0 }
 0x916   :  { %v4204_v61 = vadd.f32 %v4401_v42, %v4203_v57  ;;  %v5121_v60 = vpop.f32.mrb[87].mxu0 }
 0x918   :  { %v4205_v5 = vmax.f32 %v4204_v61, 0.0 }
 0x91a   :  { %v4209_v9 = vpack.c.bf16 %v4205_v5, %v4205_v5 }
 0x91c   :  { %4407 = vst.msk [vmem:[%s6657_s11 + $0x4] sm:$0xf] %vm4207_vm14, %v4209_v9 }
 0x91d   :  { %4216 = vsyncpa [#allocation5], 1 }
 0x91e   :  { %4217 = vsyncpa [#allocation7], 1 }
 0x91f   :  { %4218 = vsyncpa [#allocation10], 1 }
 0x920   :  { %4219 = vsyncpa [#allocation13], 1 }
 0x921   :  { %4220 = vsyncpa [#allocation16], 1 }

// kernel: _lambda_.3
= control target key start
LH: loop header
LB: loop body
LE: loop exit
PB: predicated region body
PF: predicated region fallthrough
CT: control target
= control target key end

     0   :  { %10 = vsyncpa [#allocation4], 0  ;;  %s10873_s0 = inlined_call_operand.vmem [shape: bf16[2,8,64], index: 0, kind: input, shape index: {}]   ;;  %s10874_s1 = inlined_call_operand.hbm [shape: bf16[512,2048], index: 1, kind: input, shape index: {}]   ;;  %s10875_s2 = inlined_call_operand.hbm [shape: f32[1,2048], index: 2, kind: input, shape index: {}]   ;;  %s10876_s3 = inlined_call_operand.hbm [shape: bf16[2048,256], index: 3, kind: input, shape index: {}]   ;;  %s10877_s4 = inlined_call_operand.hbm [shape: f32[1,256], index: 4, kind: input, shape index: {}]   ;;  %s10878_s5 = inlined_call_operand.hbm [shape: f32[2,256], index: 5, kind: output, shape index: {}]  }
   0x1   :  { %11 = vsyncpa [#allocation7], 0 }
   0x2   :  { %12 = vsyncpa [#allocation10], 0 }
   0x3   :  { %13 = vsyncpa [#allocation5], 0  ;;  %s10223_s18 = smov [#allocation6]   ;;  %s10224_s20 = smov [#allocation3]  }
   0x4   :  { %s34_s19 = sshll.u32 %s10223_s18, 4  ;;  %s21_s21 = sshll.u32 %s10224_s20, 4  ;;  %s35_s19 = int_to_ptr.vmem [resolvable:$true] %s34_s19  ;;  %s10264_s21 = int_to_ptr.vmem [resolvable:$true] %s21_s21 }
   0x5   :  { %s10105_s24 = scalar_lea.hbm %s10875_s2, 256 }
   0x6   :  { %p10106_p0 = scmp.ne.s32.totalorder %s10875_s2, %s10105_s24  ;;  %p10109_p1 = scmp.lt.u32.totalorder %s10105_s24, %s10875_s2 }
   0x8   :  { %p10111_p2 = pnand %p10109_p1, %p10106_p0 }
   0xa   :  { %10114 = shalt.err (!%p10111_p2)
}
   0xb   :  { %s10115_s29 = scalar_lea.vmem %s35_s19, 256  ;;  %p10120_p4 = scmp.lt.s32.totalorder %s35_s19, %s35_s19 }
   0xc   :  { %p10116_p3 = scmp.ne.s32.totalorder %s35_s19, %s10115_s29  ;;  %p10121_p5 = scmp.lt.s32.totalorder %s10115_s29, %s10115_s29 }
   0xe   :  { %p10122_p6 = por %p10121_p5, %p10120_p4 }
  0x10   :  { %p10123_p7 = pnand %p10122_p6, %p10116_p3 }
  0x12   :  { %10126 = shalt.err (!%p10123_p7)
}
  0x13   :  { %37 = dma.hbm_to_vmem [thread:$0]  %s10875_s2, 256, %s35_s19, [#allocation7]  }
  0x14   :  { %s10127_s9 = scalar_lea.hbm %s10874_s1, 65536 }
  0x15   :  { %p10128_p8 = scmp.ne.s32.totalorder %s10874_s1, %s10127_s9  ;;  %p10131_p9 = scmp.lt.u32.totalorder %s10127_s9, %s10874_s1 }
  0x17   :  { %p10133_p10 = pnand %p10131_p9, %p10128_p8 }
  0x19   :  { %10136 = shalt.err (!%p10133_p10)
}
  0x1a   :  { %s10137_s14 = scalar_lea.vmem %s10264_s21, 65536  ;;  %p10142_p12 = scmp.lt.s32.totalorder %s10264_s21, %s10264_s21 }
  0x1b   :  { %p10138_p11 = scmp.ne.s32.totalorder %s10264_s21, %s10137_s14  ;;  %p10143_p13 = scmp.lt.s32.totalorder %s10137_s14, %s10137_s14 }
  0x1d   :  { %p10144_p0 = por %p10143_p13, %p10142_p12 }
  0x1f   :  { %p10145_p1 = pnand %p10144_p0, %p10138_p11 }
  0x21   :  { %10148 = shalt.err (!%p10145_p1)
}
  0x22   :  { %s10225_s2 = smov 1024   ;;  %s10226_s15 = smov 64  }
  0x23   :  { %27 = dma.hbm_to_vmem [thread:$0]  %s10874_s1, 65536, %s10264_s21, [#allocation4], %s10225_s2, %s10225_s2, %s10226_s15  }
  0x24   :  { %s10227_s18 = smov [#allocation8]   ;;  %s10149_s23 = scalar_lea.hbm %s10876_s3, 32768 }
  0x25   :  { %s43_s19 = sshll.u32 %s10227_s18, 4  ;;  %p10150_p2 = scmp.ne.s32.totalorder %s10876_s3, %s10149_s23  ;;  %s44_s19 = int_to_ptr.vmem [resolvable:$true] %s43_s19 }
  0x26   :  { %p10153_p3 = scmp.lt.u32.totalorder %s10149_s23, %s10876_s3 }
  0x28   :  { %p10155_p4 = pnand %p10153_p3, %p10150_p2 }
  0x2a   :  { %10158 = shalt.err (!%p10155_p4)
}
  0x2b   :  { %s10159_s28 = scalar_lea.vmem %s44_s19, 32768  ;;  %p10164_p6 = scmp.lt.s32.totalorder %s44_s19, %s44_s19 }
  0x2c   :  { %p10160_p5 = scmp.ne.s32.totalorder %s44_s19, %s10159_s28  ;;  %p10165_p7 = scmp.lt.s32.totalorder %s10159_s28, %s10159_s28 }
  0x2e   :  { %p10166_p8 = por %p10165_p7, %p10164_p6 }
  0x30   :  { %p10167_p9 = pnand %p10166_p8, %p10160_p5 }
  0x32   :  { %10170 = shalt.err (!%p10167_p9)
}
  0x33   :  { %s10228_s1 = smov 128   ;;  %s10229_s21 = smov 8  }
  0x34   :  { %49 = dma.hbm_to_vmem [thread:$0]  %s10876_s3, 32768, %s44_s19, [#allocation7], %s10228_s1, %s10228_s1, %s10229_s21  }
  0x35   :  { %s10230_s6 = smov [#allocation9]   ;;  %s10171_s10 = scalar_lea.hbm %s10877_s4, 32 }
  0x36   :  { %s56_s7 = sshll.u32 %s10230_s6, 4  ;;  %p10172_p10 = scmp.ne.s32.totalorder %s10877_s4, %s10171_s10  ;;  %s57_s7 = int_to_ptr.vmem [resolvable:$true] %s56_s7 }
  0x37   :  { %p10175_p11 = scmp.lt.u32.totalorder %s10171_s10, %s10877_s4 }
  0x39   :  { %p10177_p12 = pnand %p10175_p11, %p10172_p10 }
  0x3b   :  { %10180 = shalt.err (!%p10177_p12)
}
  0x3c   :  { %s10181_s2 = scalar_lea.vmem %s57_s7, 32  ;;  %p10186_p0 = scmp.lt.s32.totalorder %s57_s7, %s57_s7 }
  0x3d   :  { %p10182_p13 = scmp.ne.s32.totalorder %s57_s7, %s10181_s2  ;;  %p10187_p1 = scmp.lt.s32.totalorder %s10181_s2, %s10181_s2 }
  0x3f   :  { %p10188_p2 = por %p10187_p1, %p10186_p0 }
  0x41   :  { %p10189_p3 = pnand %p10188_p2, %p10182_p13 }
  0x43   :  { %10192 = shalt.err (!%p10189_p3)
}
  0x44   :  { %59 = dma.hbm_to_vmem [thread:$0]  %s10877_s4, 32, %s57_s7, [#allocation10]  }
  0x45   :  { %10215 = dma.done.wait [#allocation4], 65536  }
  0x46   :  { %10216 = vsyncadd [#allocation4], 4294901760 }
  0x47   :  { %10217 = dma.done.wait [#allocation7], 33024  }
  0x48   :  { %10218 = vsyncadd [#allocation7], 4294934272 }
  0x49   :  { %10219 = dma.done.wait [#allocation10], 32  }
  0x4a   :  { %10220 = vsyncadd [#allocation10], 4294967264  ;;  %v10231_v0 = vmov 0   ;;  %v87_v1 = vld [vmem:[#allocation3] sm:$0xff]  ;;  %v88_v3 = vld [vmem:[#allocation3 + $0x8] sm:$0xff]  ;;  %vm160_vm0 = vcmask 1041409  }
  0x4b   :  { %519 = vmatprep.mubr.bf16.mxu0 %v10231_v0  ;;  %560 = vmatprep.mubr.bf16.mxu1 %v10231_v0  ;;  %v95_v2 = vld [vmem:[#allocation3 + $0x40] sm:$0xff]  ;;  %v96_v5 = vld [vmem:[#allocation3 + $0x48] sm:$0xff]  ;;  %v89_v36 = vld [vmem:[#allocation3 + $0x10] sm:$0xff]  ;;  %vm483_vm1 = vcmask 523264  }
  0x4c   :  { %v8820_v4 = vcombine.high %v87_v1, %v95_v2  ;;  %v8819_v6 = vcombine.low %v87_v1, %v95_v2  ;;  %v103_v7 = vld [vmem:[#allocation3 + $0x80] sm:$0xff]  ;;  %v8822_v9 = vcombine.high %v88_v3, %v96_v5  ;;  %v8821_v10 = vcombine.low %v88_v3, %v96_v5  ;;  %v104_v12 = vld [vmem:[#allocation3 + $0x88] sm:$0xff]  ;;  %v97_v37 = vld [vmem:[#allocation3 + $0x50] sm:$0xff] }
  0x4d   :  { %v111_v8 = vld [vmem:[#allocation3 + $0xc0] sm:$0xff]  ;;  %v112_v13 = vld [vmem:[#allocation3 + $0xc8] sm:$0xff]  ;;  %v90_v38 = vld [vmem:[#allocation3 + $0x18] sm:$0xff]  ;;  %v8824_v43 = vcombine.high %v89_v36, %v97_v37  ;;  %v8823_v50 = vcombine.low %v89_v36, %v97_v37 }
  0x4e   :  { %v8836_v11 = vcombine.high %v103_v7, %v111_v8  ;;  %v119_v14 = vld [vmem:[#allocation3 + $0x100] sm:$0xff]  ;;  %487 = vmatprep.subr.bf16.mxu0 %v8820_v4  ;;  %v8838_v15 = vcombine.high %v104_v12, %v112_v13  ;;  %v120_v17 = vld [vmem:[#allocation3 + $0x108] sm:$0xff]  ;;  %528 = vmatprep.subr.bf16.mxu1 %v8822_v9  ;;  %v8835_v19 = vcombine.low %v103_v7, %v111_v8  ;;  %v98_v39 = vld [vmem:[#allocation3 + $0x58] sm:$0xff] }
  0x4f   :  { %v127_v16 = vld [vmem:[#allocation3 + $0x140] sm:$0xff]  ;;  %v128_v18 = vld [vmem:[#allocation3 + $0x148] sm:$0xff]  ;;  %488 = vmatpush1.bf16.msra.mxu0 %v8819_v6  ;;  %529 = vmatpush1.bf16.msra.mxu1 %v8821_v10  ;;  %v8837_v21 = vcombine.low %v104_v12, %v112_v13  ;;  %v8826_v44 = vcombine.high %v90_v38, %v98_v39  ;;  %v105_v45 = vld [vmem:[#allocation3 + $0x90] sm:$0xff]  ;;  %v8825_v51 = vcombine.low %v90_v38, %v98_v39 }
  0x50   :  { %v135_v20 = vld [vmem:[#allocation3 + $0x180] sm:$0xff]  ;;  %489 = vmatprep.subr.bf16.mxu0 %v8836_v11  ;;  %v8852_v22 = vcombine.high %v119_v14, %v127_v16  ;;  %530 = vmatprep.subr.bf16.mxu1 %v8838_v15  ;;  %v8854_v24 = vcombine.high %v120_v17, %v128_v18  ;;  %v136_v27 = vld [vmem:[#allocation3 + $0x188] sm:$0xff]  ;;  %v8851_v29 = vcombine.low %v119_v14, %v127_v16  ;;  %v113_v46 = vld [vmem:[#allocation3 + $0xd0] sm:$0xff] }
  0x51   :  { %v143_v23 = vld [vmem:[#allocation3 + $0x1c0] sm:$0xff]  ;;  %v144_v28 = vld [vmem:[#allocation3 + $0x1c8] sm:$0xff]  ;;  %v8853_v32 = vcombine.low %v120_v17, %v128_v18  ;;  %v106_v48 = vld [vmem:[#allocation3 + $0x98] sm:$0xff]  ;;  %v8840_v52 = vcombine.high %v105_v45, %v113_v46  ;;  %v8839_v58 = vcombine.low %v105_v45, %v113_v46 }
  0x52   :  { %v9705_v25 = vld [vmem:[%s10873_s0] ss:$0 sps:$4 sm:$0x11]   ;;  %v9706_v26 = vld [vmem:[%s10873_s0 + $0x4] ss:$0 sps:$4 sm:$0x11]   ;;  %v8868_v33 = vcombine.high %v135_v20, %v143_v23  ;;  %v8870_v34 = vcombine.high %v136_v27, %v144_v28  ;;  %v8867_v40 = vcombine.low %v135_v20, %v143_v23  ;;  %v8869_v42 = vcombine.low %v136_v27, %v144_v28 }
  0x53   :  { %490 = vmatpush1.bf16.msra.mxu0 %v8835_v19  ;;  %v157_v30 = vunpack.c.l.b16 %v9705_v25  ;;  %v158_v31 = vunpack.c.l.b16 %v9706_v26  ;;  %531 = vmatpush1.bf16.msra.mxu1 %v8837_v21  ;;  %v114_v49 = vld [vmem:[#allocation3 + $0xd8] sm:$0xff]  ;;  %v121_v54 = vld [vmem:[#allocation3 + $0x110] sm:$0xff]  ;;  %v91_v7 = vld [vmem:[#allocation3 + $0x20] sm:$0xff] }
  0x54   :  { %491 = vmatprep.subr.bf16.mxu0 %v8852_v22  ;;  %532 = vmatprep.subr.bf16.mxu1 %v8854_v24  ;;  %v8842_v53 = vcombine.high %v106_v48, %v114_v49  ;;  %v129_v55 = vld [vmem:[#allocation3 + $0x150] sm:$0xff]  ;;  %v122_v56 = vld [vmem:[#allocation3 + $0x118] sm:$0xff]  ;;  %v8841_v59 = vcombine.low %v106_v48, %v114_v49  ;;  %v99_v8 = vld [vmem:[#allocation3 + $0x60] sm:$0xff] }
  0x55   :  { %v159_v35 = vrot.slane %v158_v31, 7  ;;  %v130_v57 = vld [vmem:[#allocation3 + $0x158] sm:$0xff]  ;;  %v8856_v60 = vcombine.high %v121_v54, %v129_v55  ;;  %v137_v62 = vld [vmem:[#allocation3 + $0x190] sm:$0xff]  ;;  %v8855_v3 = vcombine.low %v121_v54, %v129_v55  ;;  %v92_v9 = vld [vmem:[#allocation3 + $0x28] sm:$0xff]  ;;  %v8828_v13 = vcombine.high %v91_v7, %v99_v8 }
  0x56   :  { %v8858_v61 = vcombine.high %v122_v56, %v130_v57  ;;  %v145_v63 = vld [vmem:[#allocation3 + $0x1d0] sm:$0xff]  ;;  %v138_v1 = vld [vmem:[#allocation3 + $0x198] sm:$0xff]  ;;  %v8857_v4 = vcombine.low %v122_v56, %v130_v57  ;;  %v100_v10 = vld [vmem:[#allocation3 + $0x68] sm:$0xff]  ;;  %v8827_v19 = vcombine.low %v91_v7, %v99_v8 }
  0x57   :  { %492 = vmatpush1.bf16.msra.mxu0 %v8851_v29  ;;  %v161_v41 = vsel %vm160_vm0, %v159_v35, %v157_v30  ;;  %533 = vmatpush1.bf16.msra.mxu1 %v8853_v32  ;;  %v146_v2 = vld [vmem:[#allocation3 + $0x1d8] sm:$0xff]  ;;  %v8872_v5 = vcombine.high %v137_v62, %v145_v63  ;;  %v8871_v11 = vcombine.low %v137_v62, %v145_v63  ;;  %v107_v15 = vld [vmem:[#allocation3 + $0xa0] sm:$0xff]  ;;  %v108_v17 = vld [vmem:[#allocation3 + $0xa8] sm:$0xff] }
  0x58   :  { %493 = vmatprep.subr.bf16.mxu0 %v8868_v33  ;;  %534 = vmatprep.subr.bf16.mxu1 %v8870_v34  ;;  %v10328_v47 = vpack.c.b16 %v161_v41, %v161_v41  ;;  %v8874_v6 = vcombine.high %v138_v1, %v146_v2  ;;  %v8873_v12 = vcombine.low %v138_v1, %v146_v2  ;;  %v115_v16 = vld [vmem:[#allocation3 + $0xe0] sm:$0xff]  ;;  %v116_v18 = vld [vmem:[#allocation3 + $0xe8] sm:$0xff]  ;;  %v93_v39 = vld [vmem:[#allocation3 + $0x30] sm:$0xff] }
  0x59   :  { %v8830_v14 = vcombine.high %v92_v9, %v100_v10  ;;  %v8829_v20 = vcombine.low %v92_v9, %v100_v10  ;;  %v8844_v21 = vcombine.high %v107_v15, %v115_v16  ;;  %v8846_v22 = vcombine.high %v108_v17, %v116_v18  ;;  %v123_v23 = vld [vmem:[#allocation3 + $0x120] sm:$0xff]  ;;  %v124_v25 = vld [vmem:[#allocation3 + $0x128] sm:$0xff]  ;;  %v94_v41 = vld [vmem:[#allocation3 + $0x38] sm:$0xff] }
  0x5a   :  { %v131_v24 = vld [vmem:[#allocation3 + $0x160] sm:$0xff]  ;;  %v132_v26 = vld [vmem:[#allocation3 + $0x168] sm:$0xff]  ;;  %v8843_v27 = vcombine.low %v107_v15, %v115_v16  ;;  %v8845_v28 = vcombine.low %v108_v17, %v116_v18  ;;  %v109_v48 = vld [vmem:[#allocation3 + $0xb0] sm:$0xff] }
  0x5b   :  { %494 = vmatpush1.bf16.msra.mxu0 %v8867_v40  ;;  %535 = vmatpush1.bf16.msra.mxu1 %v8869_v42  ;;  %v8860_v29 = vcombine.high %v123_v23, %v131_v24  ;;  %v8862_v30 = vcombine.high %v124_v25, %v132_v26  ;;  %v139_v31 = vld [vmem:[#allocation3 + $0x1a0] sm:$0xff]  ;;  %v140_v33 = vld [vmem:[#allocation3 + $0x1a8] sm:$0xff]  ;;  %v8859_v35 = vcombine.low %v123_v23, %v131_v24  ;;  %v101_v40 = vld [vmem:[#allocation3 + $0x70] sm:$0xff] }
  0x5c   :  { %569 = vmatprep.subr.bf16.mxu0 %v8824_v43  ;;  %610 = vmatprep.subr.bf16.mxu1 %v8826_v44  ;;  %v147_v32 = vld [vmem:[#allocation3 + $0x1e0] sm:$0xff]  ;;  %v148_v34 = vld [vmem:[#allocation3 + $0x1e8] sm:$0xff]  ;;  %v8861_v36 = vcombine.low %v124_v25, %v132_v26  ;;  %v102_v42 = vld [vmem:[#allocation3 + $0x78] sm:$0xff]  ;;  %v8832_v45 = vcombine.high %v93_v39, %v101_v40 }
  0x5d   :  { %v8876_v37 = vcombine.high %v139_v31, %v147_v32  ;;  %v8878_v38 = vcombine.high %v140_v33, %v148_v34  ;;  %v8875_v43 = vcombine.low %v139_v31, %v147_v32  ;;  %v8877_v44 = vcombine.low %v140_v33, %v148_v34  ;;  %v117_v49 = vld [vmem:[#allocation3 + $0xf0] sm:$0xff]  ;;  %v909_v9 = vld [vmem:[#allocation3 + $0x200] sm:$0xff] }
  0x5e   :  { %8883 = vmatmul.mubr.msk.bf16.vlgmr.msra.gmra.mrb[0].mxu0 %vm483_vm1, %v10328_v47  ;;  %8884 = vmatmul.mubr.msk.bf16.vlgmr.msra.gmra.mrb[0].mxu1 %vm483_vm1, %v10328_v47  ;;  %v8834_v46 = vcombine.high %v94_v41, %v102_v42  ;;  %v8848_v54 = vcombine.high %v109_v48, %v117_v49  ;;  %v125_v56 = vld [vmem:[#allocation3 + $0x130] sm:$0xff]  ;;  %v917_v10 = vld [vmem:[#allocation3 + $0x240] sm:$0xff] }
  0x5f   :  { %570 = vmatpush1.bf16.msra.mxu0 %v8823_v50  ;;  %611 = vmatpush1.bf16.msra.mxu1 %v8825_v51  ;;  %v110_v50 = vld [vmem:[#allocation3 + $0xb8] sm:$0xff]  ;;  %v133_v57 = vld [vmem:[#allocation3 + $0x170] sm:$0xff]  ;;  %v8894_v15 = vcombine.high %v909_v9, %v917_v10  ;;  %v925_v17 = vld [vmem:[#allocation3 + $0x280] sm:$0xff] }
  0x60   :  { %571 = vmatprep.subr.bf16.mxu0 %v8840_v52  ;;  %612 = vmatprep.subr.bf16.mxu1 %v8842_v53  ;;  %v118_v51 = vld [vmem:[#allocation3 + $0xf8] sm:$0xff]  ;;  %v8831_v52 = vcombine.low %v93_v39, %v101_v40  ;;  %v8833_v53 = vcombine.low %v94_v41, %v102_v42  ;;  %v8864_v62 = vcombine.high %v125_v56, %v133_v57  ;;  %v141_v1 = vld [vmem:[#allocation3 + $0x1b0] sm:$0xff]  ;;  %v933_v18 = vld [vmem:[#allocation3 + $0x2c0] sm:$0xff] }
  0x61   :  { %601 = vmatprep.mubr.bf16.mxu0 %v10231_v0  ;;  %642 = vmatprep.mubr.bf16.mxu1 %v10231_v0  ;;  %v8850_v55 = vcombine.high %v110_v50, %v118_v51  ;;  %v149_v2 = vld [vmem:[#allocation3 + $0x1f0] sm:$0xff]  ;;  %v8910_v24 = vcombine.high %v925_v17, %v933_v18  ;;  %v941_v26 = vld [vmem:[#allocation3 + $0x300] sm:$0xff]  ;;  %v8909_v31 = vcombine.low %v925_v17, %v933_v18  ;;  %v966_v39 = vld [vmem:[#allocation3 + $0x3c8] sm:$0xff] }
  0x62   :  { %v8880_v7 = vcombine.high %v141_v1, %v149_v2  ;;  %v9708_v32 = vld [vmem:[%s10873_s0 + $0x4] ss:$0 sps:$4 sm:$0x11]   ;;  %v914_v18 = vld [vmem:[#allocation3 + $0x228] sm:$0xff] }
  0x63   :  { %572 = vmatpush1.bf16.msra.mxu0 %v8839_v58  ;;  %613 = vmatpush1.bf16.msra.mxu1 %v8841_v59  ;;  %v126_v58 = vld [vmem:[#allocation3 + $0x138] sm:$0xff]  ;;  %v980_v41 = vunpack.c.l.b16 %v9708_v32  ;;  %v921_v17 = vld [vmem:[#allocation3 + $0x260] sm:$0xff] }
  0x64   :  { %573 = vmatprep.subr.bf16.mxu0 %v8856_v60  ;;  %614 = vmatprep.subr.bf16.mxu1 %v8858_v61  ;;  %v134_v59 = vld [vmem:[#allocation3 + $0x178] sm:$0xff]  ;;  %v8847_v60 = vcombine.low %v109_v48, %v117_v49  ;;  %v8849_v61 = vcombine.low %v110_v50, %v118_v51  ;;  %v945_v32 = vld [vmem:[#allocation3 + $0x320] sm:$0xff] }
  0x65   :  { %v8866_v63 = vcombine.high %v126_v58, %v134_v59  ;;  %v912_v48 = vld [vmem:[#allocation3 + $0x218] sm:$0xff] }
  0x66   :  { %v920_v49 = vld [vmem:[#allocation3 + $0x258] sm:$0xff] }
  0x67   :  { %574 = vmatpush1.bf16.msra.mxu0 %v8855_v3  ;;  %615 = vmatpush1.bf16.msra.mxu1 %v8857_v4  ;;  %v142_v3 = vld [vmem:[#allocation3 + $0x1b8] sm:$0xff] }
  0x68   :  { %575 = vmatprep.subr.bf16.mxu0 %v8872_v5  ;;  %616 = vmatprep.subr.bf16.mxu1 %v8874_v6  ;;  %v150_v4 = vld [vmem:[#allocation3 + $0x1f8] sm:$0xff]  ;;  %v8863_v5 = vcombine.low %v125_v56, %v133_v57  ;;  %v8865_v6 = vcombine.low %v126_v58, %v134_v59  ;;  %v8900_v57 = vcombine.high %v912_v48, %v920_v49 }
  0x69   :  { %v8882_v8 = vcombine.high %v142_v3, %v150_v4  ;;  %v928_v56 = vld [vmem:[#allocation3 + $0x298] sm:$0xff] }
  0x6a   :  { %v936_v58 = vld [vmem:[#allocation3 + $0x2d8] sm:$0xff] }
  0x6b   :  { %576 = vmatpush1.bf16.msra.mxu0 %v8871_v11  ;;  %617 = vmatpush1.bf16.msra.mxu1 %v8873_v12  ;;  %v910_v11 = vld [vmem:[#allocation3 + $0x208] sm:$0xff] }
  0x6c   :  { %651 = vmatprep.subr.bf16.mxu0 %v8828_v13  ;;  %692 = vmatprep.subr.bf16.mxu1 %v8830_v14  ;;  %v918_v12 = vld [vmem:[#allocation3 + $0x248] sm:$0xff]  ;;  %v8879_v13 = vcombine.low %v141_v1, %v149_v2  ;;  %v8881_v14 = vcombine.low %v142_v3, %v150_v4  ;;  %v951_v1 = vld [vmem:[#allocation3 + $0x350] sm:$0xff]  ;;  %v944_v2 = vld [vmem:[#allocation3 + $0x318] sm:$0xff]  ;;  %v8916_v3 = vcombine.high %v928_v56, %v936_v58 }
  0x6d   :  { %v8896_v16 = vcombine.high %v910_v11, %v918_v12  ;;  %v8895_v23 = vcombine.low %v910_v11, %v918_v12  ;;  %v952_v4 = vld [vmem:[#allocation3 + $0x358] sm:$0xff] }
  0x6e   :  { %8885 = vmatmul.mubr.msk.bf16.vlgmr.msra.gmra.mrb[4].mxu0 %vm483_vm1, %v10328_v47  ;;  %8886 = vmatmul.mubr.msk.bf16.vlgmr.msra.gmra.mrb[4].mxu1 %vm483_vm1, %v10328_v47  ;;  %v8932_v11 = vcombine.high %v944_v2, %v952_v4  ;;  %v968_v12 = vld [vmem:[#allocation3 + $0x3d8] sm:$0xff] }
  0x6f   :  { %652 = vmatpush1.bf16.msra.mxu0 %v8827_v19  ;;  %693 = vmatpush1.bf16.msra.mxu1 %v8829_v20  ;;  %v926_v19 = vld [vmem:[#allocation3 + $0x288] sm:$0xff] }
  0x70   :  { %653 = vmatprep.subr.bf16.mxu0 %v8844_v21  ;;  %694 = vmatprep.subr.bf16.mxu1 %v8846_v22  ;;  %v934_v20 = vld [vmem:[#allocation3 + $0x2c8] sm:$0xff]  ;;  %v9707_v21 = vld [vmem:[%s10873_s0] ss:$0 sps:$4 sm:$0x11]   ;;  %v8893_v22 = vcombine.low %v909_v9, %v917_v10  ;;  %v967_v9 = vld [vmem:[#allocation3 + $0x3d0] sm:$0xff] }
  0x71   :  { %683 = vmatprep.mubr.bf16.mxu0 %v10231_v0  ;;  %724 = vmatprep.mubr.bf16.mxu1 %v10231_v0  ;;  %v8912_v25 = vcombine.high %v926_v19, %v934_v20  ;;  %v8911_v33 = vcombine.low %v926_v19, %v934_v20  ;;  %v960_v10 = vld [vmem:[#allocation3 + $0x398] sm:$0xff]  ;;  %v922_v20 = vld [vmem:[#allocation3 + $0x268] sm:$0xff] }
  0x72   :  { %v8948_v19 = vcombine.high %v960_v10, %v968_v12 }
  0x73   :  { %654 = vmatpush1.bf16.msra.mxu0 %v8843_v27  ;;  %695 = vmatpush1.bf16.msra.mxu1 %v8845_v28  ;;  %v949_v27 = vld [vmem:[#allocation3 + $0x340] sm:$0xff]  ;;  %v942_v28 = vld [vmem:[#allocation3 + $0x308] sm:$0xff] }
  0x74   :  { %655 = vmatprep.subr.bf16.mxu0 %v8860_v29  ;;  %696 = vmatprep.subr.bf16.mxu1 %v8862_v30  ;;  %v950_v29 = vld [vmem:[#allocation3 + $0x348] sm:$0xff]  ;;  %v979_v30 = vunpack.c.l.b16 %v9707_v21  ;;  %v8926_v34 = vcombine.high %v941_v26, %v949_v27  ;;  %v8925_v40 = vcombine.low %v941_v26, %v949_v27  ;;  %v8904_v27 = vcombine.high %v914_v18, %v922_v20 }
  0x75   :  { %v8927_v42 = vcombine.low %v942_v28, %v950_v29  ;;  %v930_v26 = vld [vmem:[#allocation3 + $0x2a8] sm:$0xff] }
  0x77   :  { %656 = vmatpush1.bf16.msra.mxu0 %v8859_v35  ;;  %697 = vmatpush1.bf16.msra.mxu1 %v8861_v36  ;;  %v8928_v35 = vcombine.high %v942_v28, %v950_v29  ;;  %v957_v36 = vld [vmem:[#allocation3 + $0x380] sm:$0xff]  ;;  %v938_v28 = vld [vmem:[#allocation3 + $0x2e8] sm:$0xff] }
  0x78   :  { %657 = vmatprep.subr.bf16.mxu0 %v8876_v37  ;;  %698 = vmatprep.subr.bf16.mxu1 %v8878_v38  ;;  %v965_v37 = vld [vmem:[#allocation3 + $0x3c0] sm:$0xff]  ;;  %v958_v38 = vld [vmem:[#allocation3 + $0x388] sm:$0xff] }
  0x79   :  { %v8941_v50 = vcombine.low %v957_v36, %v965_v37 }
  0x7b   :  { %658 = vmatpush1.bf16.msra.mxu0 %v8875_v43  ;;  %699 = vmatpush1.bf16.msra.mxu1 %v8877_v44  ;;  %v8942_v43 = vcombine.high %v957_v36, %v965_v37  ;;  %v911_v44 = vld [vmem:[#allocation3 + $0x210] sm:$0xff]  ;;  %v954_v36 = vld [vmem:[#allocation3 + $0x368] sm:$0xff] }
  0x7c   :  { %733 = vmatprep.subr.bf16.mxu0 %v8832_v45  ;;  %774 = vmatprep.subr.bf16.mxu1 %v8834_v46  ;;  %v8944_v45 = vcombine.high %v958_v38, %v966_v39  ;;  %v919_v46 = vld [vmem:[#allocation3 + $0x250] sm:$0xff] }
  0x7e   :  { %8887 = vmatmul.mubr.msk.bf16.vlgmr.msra.gmra.mrb[8].mxu0 %vm483_vm1, %v10328_v47  ;;  %8888 = vmatmul.mubr.msk.bf16.vlgmr.msra.gmra.mrb[8].mxu1 %vm483_vm1, %v10328_v47 }
  0x7f   :  { %734 = vmatpush1.bf16.msra.mxu0 %v8831_v52  ;;  %775 = vmatpush1.bf16.msra.mxu1 %v8833_v53  ;;  %v8943_v52 = vcombine.low %v958_v38, %v966_v39  ;;  %v8898_v53 = vcombine.high %v911_v44, %v919_v46  ;;  %v8919_v38 = vcombine.low %v930_v26, %v938_v28 }
  0x80   :  { %735 = vmatprep.subr.bf16.mxu0 %v8848_v54  ;;  %776 = vmatprep.subr.bf16.mxu1 %v8850_v55  ;;  %v927_v54 = vld [vmem:[#allocation3 + $0x290] sm:$0xff] }
  0x81   :  { %765 = vmatprep.mubr.bf16.mxu0 %v10231_v0  ;;  %806 = vmatprep.mubr.bf16.mxu1 %v10231_v0  ;;  %v935_v55 = vld [vmem:[#allocation3 + $0x2d0] sm:$0xff] }
  0x83   :  { %736 = vmatpush1.bf16.msra.mxu0 %v8847_v60  ;;  %777 = vmatpush1.bf16.msra.mxu1 %v8849_v61  ;;  %v8897_v60 = vcombine.low %v911_v44, %v919_v46  ;;  %v8899_v61 = vcombine.low %v912_v48, %v920_v49  ;;  %v915_v48 = vld [vmem:[#allocation3 + $0x230] sm:$0xff] }
  0x84   :  { %737 = vmatprep.subr.bf16.mxu0 %v8864_v62  ;;  %778 = vmatprep.subr.bf16.mxu1 %v8866_v63  ;;  %v8914_v62 = vcombine.high %v927_v54, %v935_v55  ;;  %v943_v63 = vld [vmem:[#allocation3 + $0x310] sm:$0xff] }
  0x85   :  { %v923_v49 = vld [vmem:[#allocation3 + $0x270] sm:$0xff] }
  0x87   :  { %738 = vmatpush1.bf16.msra.mxu0 %v8863_v5  ;;  %779 = vmatpush1.bf16.msra.mxu1 %v8865_v6  ;;  %v8913_v5 = vcombine.low %v927_v54, %v935_v55  ;;  %v8915_v6 = vcombine.low %v928_v56, %v936_v58  ;;  %v8906_v55 = vcombine.high %v915_v48, %v923_v49  ;;  %v931_v56 = vld [vmem:[#allocation3 + $0x2b0] sm:$0xff]  ;;  %v932_v58 = vld [vmem:[#allocation3 + $0x2b8] sm:$0xff] }
  0x88   :  { %739 = vmatprep.subr.bf16.mxu0 %v8880_v7  ;;  %780 = vmatprep.subr.bf16.mxu1 %v8882_v8  ;;  %v8930_v7 = vcombine.high %v943_v63, %v951_v1  ;;  %v959_v8 = vld [vmem:[#allocation3 + $0x390] sm:$0xff] }
  0x89   :  { %v8945_v21 = vcombine.low %v959_v8, %v967_v9 }
  0x8b   :  { %740 = vmatpush1.bf16.msra.mxu0 %v8879_v13  ;;  %781 = vmatpush1.bf16.msra.mxu1 %v8881_v14  ;;  %v8929_v13 = vcombine.low %v943_v63, %v951_v1  ;;  %v8931_v14 = vcombine.low %v944_v2, %v952_v4  ;;  %v947_v2 = vld [vmem:[#allocation3 + $0x330] sm:$0xff]  ;;  %v948_v4 = vld [vmem:[#allocation3 + $0x338] sm:$0xff] }
  0x8c   :  { %1307 = vmatprep.subr.bf16.mxu0 %v8894_v15  ;;  %1348 = vmatprep.subr.bf16.mxu1 %v8896_v16  ;;  %v8946_v15 = vcombine.high %v959_v8, %v967_v9  ;;  %v913_v16 = vld [vmem:[#allocation3 + $0x220] sm:$0xff] }
  0x8d   :  { %v8901_v29 = vcombine.low %v913_v16, %v921_v17 }
  0x8e   :  { %8889 = vmatmul.mubr.msk.bf16.vlgmr.msra.gmra.mrb[12].mxu0 %vm483_vm1, %v10328_v47  ;;  %8890 = vmatmul.mubr.msk.bf16.vlgmr.msra.gmra.mrb[12].mxu1 %vm483_vm1, %v10328_v47  ;;  %v981_v47 = vrot.slane %v979_v30, 1  ;;  %v8903_v30 = vcombine.low %v914_v18, %v922_v20  ;;  %v1729_v18 = vld [vmem:[#allocation3 + $0x400] sm:$0xff]  ;;  %v1730_v20 = vld [vmem:[#allocation3 + $0x408] sm:$0xff] }
  0x8f   :  { %1308 = vmatpush1.bf16.msra.mxu0 %v8893_v22  ;;  %1349 = vmatpush1.bf16.msra.mxu1 %v8895_v23  ;;  %v8947_v22 = vcombine.low %v960_v10, %v968_v12  ;;  %v8902_v23 = vcombine.high %v913_v16, %v921_v17  ;;  %v963_v10 = vld [vmem:[#allocation3 + $0x3b0] sm:$0xff]  ;;  %v964_v12 = vld [vmem:[#allocation3 + $0x3b8] sm:$0xff] }
  0x90   :  { %1309 = vmatprep.subr.bf16.mxu0 %v8910_v24  ;;  %1350 = vmatprep.subr.bf16.mxu1 %v8912_v25  ;;  %v982_v51 = vsel %vm160_vm0, %v980_v41, %v981_v47  ;;  %v929_v24 = vld [vmem:[#allocation3 + $0x2a0] sm:$0xff]  ;;  %v962_v41 = vld [vmem:[#allocation3 + $0x3a8] sm:$0xff] }
  0x91   :  { %1339 = vmatprep.mubr.bf16.mxu0 %v10231_v0  ;;  %1380 = vmatprep.mubr.bf16.mxu1 %v10231_v0  ;;  %v10361_v59 = vpack.c.b16 %v982_v51, %v982_v51  ;;  %v937_v25 = vld [vmem:[#allocation3 + $0x2e0] sm:$0xff] }
  0x92   :  { %v8917_v37 = vcombine.low %v929_v24, %v937_v25  ;;  %v961_v47 = vld [vmem:[#allocation3 + $0x3a0] sm:$0xff] }
  0x93   :  { %1310 = vmatpush1.bf16.msra.mxu0 %v8909_v31  ;;  %1351 = vmatpush1.bf16.msra.mxu1 %v8911_v33  ;;  %v8918_v31 = vcombine.high %v929_v24, %v937_v25  ;;  %v953_v33 = vld [vmem:[#allocation3 + $0x360] sm:$0xff] }
  0x94   :  { %1311 = vmatprep.subr.bf16.mxu0 %v8926_v34  ;;  %1352 = vmatprep.subr.bf16.mxu1 %v8928_v35  ;;  %v946_v34 = vld [vmem:[#allocation3 + $0x328] sm:$0xff]  ;;  %v8920_v35 = vcombine.high %v930_v26, %v938_v28  ;;  %v8934_v39 = vcombine.high %v945_v32, %v953_v33  ;;  %v8933_v44 = vcombine.low %v945_v32, %v953_v33  ;;  %v1745_v24 = vld [vmem:[#allocation3 + $0x480] sm:$0xff] }
  0x95   :  { %v1746_v28 = vld [vmem:[#allocation3 + $0x488] sm:$0xff]  ;;  %v9710_v32 = vld [vmem:[%s10873_s0 + $0x4] ss:$0 sps:$4 sm:$0x22]  }
  0x97   :  { %1312 = vmatpush1.bf16.msra.mxu0 %v8925_v40  ;;  %1353 = vmatpush1.bf16.msra.mxu1 %v8927_v42  ;;  %v969_v40 = vld [vmem:[#allocation3 + $0x3e0] sm:$0xff]  ;;  %v8936_v42 = vcombine.high %v946_v34, %v954_v36 }
  0x98   :  { %1313 = vmatprep.subr.bf16.mxu0 %v8942_v43  ;;  %1354 = vmatprep.subr.bf16.mxu1 %v8944_v45  ;;  %v970_v43 = vld [vmem:[#allocation3 + $0x3e8] sm:$0xff]  ;;  %v8935_v45 = vcombine.low %v946_v34, %v954_v36  ;;  %v8950_v46 = vcombine.high %v961_v47, %v969_v40  ;;  %v1761_v36 = vld [vmem:[#allocation3 + $0x500] sm:$0xff] }
  0x99   :  { %v8952_v51 = vcombine.high %v962_v41, %v970_v43  ;;  %v8951_v54 = vcombine.low %v962_v41, %v970_v43 }
  0x9b   :  { %1314 = vmatpush1.bf16.msra.mxu0 %v8941_v50  ;;  %1355 = vmatpush1.bf16.msra.mxu1 %v8943_v52  ;;  %v916_v50 = vld [vmem:[#allocation3 + $0x238] sm:$0xff] }
  0x9c   :  { %1389 = vmatprep.subr.bf16.mxu0 %v8898_v53  ;;  %1430 = vmatprep.subr.bf16.mxu1 %v8900_v57  ;;  %v924_v52 = vld [vmem:[#allocation3 + $0x278] sm:$0xff]  ;;  %v8949_v53 = vcombine.low %v961_v47, %v969_v40  ;;  %v939_v57 = vld [vmem:[#allocation3 + $0x2f0] sm:$0xff]  ;;  %v1770_v47 = vld [vmem:[#allocation3 + $0x548] sm:$0xff] }
  0x9d   :  { %v8907_v63 = vcombine.low %v916_v50, %v924_v52  ;;  %v8922_v1 = vcombine.high %v931_v56, %v939_v57 }
  0x9e   :  { %8957 = vmatmul.mubr.msk.bf16.vlgmr.msra.gmra.mrb[16].mxu0 %vm483_vm1, %v10361_v59  ;;  %8958 = vmatmul.mubr.msk.bf16.vlgmr.msra.gmra.mrb[16].mxu1 %vm483_vm1, %v10361_v59 }
  0x9f   :  { %1390 = vmatpush1.bf16.msra.mxu0 %v8897_v60  ;;  %1431 = vmatpush1.bf16.msra.mxu1 %v8899_v61  ;;  %v8908_v60 = vcombine.high %v916_v50, %v924_v52  ;;  %v940_v61 = vld [vmem:[#allocation3 + $0x2f8] sm:$0xff]  ;;  %v1786_v50 = vld [vmem:[#allocation3 + $0x5c8] sm:$0xff] }
  0xa0   :  { %1391 = vmatprep.subr.bf16.mxu0 %v8914_v62  ;;  %1432 = vmatprep.subr.bf16.mxu1 %v8916_v3  ;;  %v8905_v62 = vcombine.low %v915_v48, %v923_v49  ;;  %v955_v3 = vld [vmem:[#allocation3 + $0x370] sm:$0xff]  ;;  %v8923_v8 = vcombine.low %v932_v58, %v940_v61  ;;  %v1778_v48 = vld [vmem:[#allocation3 + $0x588] sm:$0xff] }
  0xa1   :  { %1421 = vmatprep.mubr.bf16.mxu0 %v10231_v0  ;;  %1462 = vmatprep.mubr.bf16.mxu1 %v10231_v0  ;;  %v8938_v9 = vcombine.high %v947_v2, %v955_v3 }
  0xa3   :  { %1392 = vmatpush1.bf16.msra.mxu0 %v8913_v5  ;;  %1433 = vmatpush1.bf16.msra.mxu1 %v8915_v6  ;;  %v8924_v5 = vcombine.high %v932_v58, %v940_v61  ;;  %v956_v6 = vld [vmem:[#allocation3 + $0x378] sm:$0xff] }
  0xa4   :  { %1393 = vmatprep.subr.bf16.mxu0 %v8930_v7  ;;  %1434 = vmatprep.subr.bf16.mxu1 %v8932_v11  ;;  %v8921_v7 = vcombine.low %v931_v56, %v939_v57  ;;  %v971_v11 = vld [vmem:[#allocation3 + $0x3f0] sm:$0xff]  ;;  %v8939_v16 = vcombine.low %v948_v4, %v956_v6  ;;  %v9018_v56 = vcombine.high %v1778_v48, %v1786_v50  ;;  %v1732_v58 = vld [vmem:[#allocation3 + $0x418] sm:$0xff] }
  0xa5   :  { %v8954_v17 = vcombine.high %v963_v10, %v971_v11  ;;  %v1739_v57 = vld [vmem:[#allocation3 + $0x450] sm:$0xff] }
  0xa7   :  { %1394 = vmatpush1.bf16.msra.mxu0 %v8929_v13  ;;  %1435 = vmatpush1.bf16.msra.mxu1 %v8931_v14  ;;  %v8940_v13 = vcombine.high %v948_v4, %v956_v6  ;;  %v972_v14 = vld [vmem:[#allocation3 + $0x3f8] sm:$0xff] }
  0xa8   :  { %1395 = vmatprep.subr.bf16.mxu0 %v8946_v15  ;;  %1436 = vmatprep.subr.bf16.mxu1 %v8948_v19  ;;  %v8937_v15 = vcombine.low %v947_v2, %v955_v3  ;;  %v1737_v19 = vld [vmem:[#allocation3 + $0x440] sm:$0xff]  ;;  %v8955_v25 = vcombine.low %v964_v12, %v972_v14  ;;  %v1747_v2 = vld [vmem:[#allocation3 + $0x490] sm:$0xff]  ;;  %v1748_v4 = vld [vmem:[#allocation3 + $0x498] sm:$0xff] }
  0xa9   :  { %v8968_v26 = vcombine.high %v1729_v18, %v1737_v19  ;;  %v8967_v33 = vcombine.low %v1729_v18, %v1737_v19  ;;  %v1755_v3 = vld [vmem:[#allocation3 + $0x4d0] sm:$0xff]  ;;  %v1756_v6 = vld [vmem:[#allocation3 + $0x4d8] sm:$0xff] }
  0xaa   :  { %v1779_v19 = vld [vmem:[#allocation3 + $0x590] sm:$0xff] }
  0xab   :  { %1396 = vmatpush1.bf16.msra.mxu0 %v8945_v21  ;;  %1437 = vmatpush1.bf16.msra.mxu1 %v8947_v22  ;;  %v8956_v21 = vcombine.high %v964_v12, %v972_v14  ;;  %v1738_v22 = vld [vmem:[#allocation3 + $0x448] sm:$0xff]  ;;  %v1771_v12 = vld [vmem:[#allocation3 + $0x550] sm:$0xff]  ;;  %v8990_v14 = vcombine.high %v1748_v4, %v1756_v6 }
  0xac   :  { %1471 = vmatprep.subr.bf16.mxu0 %v8902_v23  ;;  %1512 = vmatprep.subr.bf16.mxu1 %v8904_v27  ;;  %v8953_v23 = vcombine.low %v963_v10, %v971_v11  ;;  %v1753_v27 = vld [vmem:[#allocation3 + $0x4c0] sm:$0xff]  ;;  %v8969_v34 = vcombine.low %v1730_v20, %v1738_v22  ;;  %v8988_v10 = vcombine.high %v1747_v2, %v1755_v3  ;;  %v1763_v11 = vld [vmem:[#allocation3 + $0x510] sm:$0xff] }
  0xad   :  { %v8983_v40 = vcombine.low %v1745_v24, %v1753_v27  ;;  %v9004_v18 = vcombine.high %v1763_v11, %v1771_v12 }
  0xae   :  { %8959 = vmatmul.mubr.msk.bf16.vlgmr.msra.gmra.mrb[20].mxu0 %vm483_vm1, %v10361_v59  ;;  %8960 = vmatmul.mubr.msk.bf16.vlgmr.msra.gmra.mrb[20].mxu1 %vm483_vm1, %v10361_v59 }
  0xaf   :  { %1472 = vmatpush1.bf16.msra.mxu0 %v8901_v29  ;;  %1513 = vmatpush1.bf16.msra.mxu1 %v8903_v30  ;;  %v1754_v29 = vld [vmem:[#allocation3 + $0x4c8] sm:$0xff]  ;;  %v8970_v30 = vcombine.high %v1730_v20, %v1738_v22  ;;  %v1787_v20 = vld [vmem:[#allocation3 + $0x5d0] sm:$0xff] }
  0xb0   :  { %1473 = vmatprep.subr.bf16.mxu0 %v8918_v31  ;;  %1514 = vmatprep.subr.bf16.mxu1 %v8920_v35  ;;  %v9709_v31 = vld [vmem:[%s10873_s0] ss:$0 sps:$4 sm:$0x22]   ;;  %v8984_v35 = vcombine.high %v1745_v24, %v1753_v27  ;;  %v8985_v43 = vcombine.low %v1746_v28, %v1754_v29  ;;  %v9003_v24 = vcombine.low %v1763_v11, %v1771_v12 }
  0xb1   :  { %1503 = vmatprep.mubr.bf16.mxu0 %v10231_v0  ;;  %1544 = vmatprep.mubr.bf16.mxu1 %v10231_v0  ;;  %v1799_v41 = vunpack.c.l.b16 %v9709_v31  ;;  %v1733_v27 = vld [vmem:[#allocation3 + $0x420] sm:$0xff]  ;;  %v1742_v31 = vld [vmem:[#allocation3 + $0x468] sm:$0xff] }
  0xb3   :  { %1474 = vmatpush1.bf16.msra.mxu0 %v8917_v37  ;;  %1515 = vmatpush1.bf16.msra.mxu1 %v8919_v38  ;;  %v1769_v37 = vld [vmem:[#allocation3 + $0x540] sm:$0xff]  ;;  %v1762_v38 = vld [vmem:[#allocation3 + $0x508] sm:$0xff] }
  0xb4   :  { %1475 = vmatprep.subr.bf16.mxu0 %v8934_v39  ;;  %1516 = vmatprep.subr.bf16.mxu1 %v8936_v42  ;;  %v8986_v39 = vcombine.high %v1746_v28, %v1754_v29  ;;  %v1800_v42 = vunpack.c.l.b16 %v9710_v32  ;;  %v9002_v49 = vcombine.high %v1762_v38, %v1770_v47  ;;  %v1741_v28 = vld [vmem:[#allocation3 + $0x460] sm:$0xff]  ;;  %v1734_v29 = vld [vmem:[#allocation3 + $0x428] sm:$0xff]  ;;  %v9019_v32 = vcombine.low %v1779_v19, %v1787_v20 }
  0xb6   :  { %v1802_v52 = vrot.slane %v1800_v42, 1  ;;  %v1765_v42 = vld [vmem:[#allocation3 + $0x520] sm:$0xff] }
  0xb7   :  { %1476 = vmatpush1.bf16.msra.mxu0 %v8933_v44  ;;  %1517 = vmatpush1.bf16.msra.mxu1 %v8935_v45  ;;  %v9000_v44 = vcombine.high %v1761_v36, %v1769_v37  ;;  %v1777_v45 = vld [vmem:[#allocation3 + $0x580] sm:$0xff] }
  0xb8   :  { %1477 = vmatprep.subr.bf16.mxu0 %v8950_v46  ;;  %1518 = vmatprep.subr.bf16.mxu1 %v8952_v51  ;;  %v1785_v46 = vld [vmem:[#allocation3 + $0x5c0] sm:$0xff]  ;;  %v1801_v51 = vrot.slane %v1799_v41, 2 }
  0xb9   :  { %v9015_v61 = vcombine.low %v1777_v45, %v1785_v46 }
  0xbb   :  { %1478 = vmatpush1.bf16.msra.mxu0 %v8949_v53  ;;  %1519 = vmatpush1.bf16.msra.mxu1 %v8951_v54  ;;  %v9001_v53 = vcombine.low %v1762_v38, %v1770_v47  ;;  %v9016_v54 = vcombine.high %v1777_v45, %v1785_v46  ;;  %v8978_v38 = vcombine.high %v1734_v29, %v1742_v31  ;;  %v1774_v46 = vld [vmem:[#allocation3 + $0x568] sm:$0xff] }
  0xbc   :  { %1553 = vmatprep.subr.bf16.mxu0 %v8906_v55  ;;  %1594 = vmatprep.subr.bf16.mxu1 %v8908_v60  ;;  %v1731_v55 = vld [vmem:[#allocation3 + $0x410] sm:$0xff]  ;;  %v1740_v60 = vld [vmem:[#allocation3 + $0x458] sm:$0xff]  ;;  %v8975_v47 = vcombine.low %v1733_v27, %v1741_v28 }
  0xbe   :  { %8961 = vmatmul.mubr.msk.bf16.vlgmr.msra.gmra.mrb[24].mxu0 %vm483_vm1, %v10361_v59  ;;  %8962 = vmatmul.mubr.msk.bf16.vlgmr.msra.gmra.mrb[24].mxu1 %vm483_vm1, %v10361_v59 }
  0xbf   :  { %1554 = vmatpush1.bf16.msra.mxu0 %v8905_v62  ;;  %1595 = vmatpush1.bf16.msra.mxu1 %v8907_v63  ;;  %v1803_v62 = vsel %vm160_vm0, %v1802_v52, %v1801_v51  ;;  %v9017_v63 = vcombine.low %v1778_v48, %v1786_v50  ;;  %v1789_v51 = vld [vmem:[#allocation3 + $0x5e0] sm:$0xff]  ;;  %v1782_v52 = vld [vmem:[#allocation3 + $0x5a8] sm:$0xff] }
  0xc0   :  { %1555 = vmatprep.subr.bf16.mxu0 %v8922_v1  ;;  %1596 = vmatprep.subr.bf16.mxu1 %v8924_v5  ;;  %v8972_v1 = vcombine.high %v1731_v55, %v1739_v57  ;;  %v8974_v5 = vcombine.high %v1732_v58, %v1740_v60 }
  0xc1   :  { %1585 = vmatprep.mubr.bf16.mxu0 %v10231_v0  ;;  %1626 = vmatprep.mubr.bf16.mxu1 %v10231_v0 }
  0xc3   :  { %1556 = vmatpush1.bf16.msra.mxu0 %v8921_v7  ;;  %1597 = vmatpush1.bf16.msra.mxu1 %v8923_v8  ;;  %v10394_v7 = vpack.c.b16 %v1803_v62, %v1803_v62  ;;  %v8971_v8 = vcombine.low %v1731_v55, %v1739_v57 }
  0xc4   :  { %1557 = vmatprep.subr.bf16.mxu0 %v8938_v9  ;;  %1598 = vmatprep.subr.bf16.mxu1 %v8940_v13  ;;  %v8973_v9 = vcombine.low %v1732_v58, %v1740_v60  ;;  %v1764_v13 = vld [vmem:[#allocation3 + $0x518] sm:$0xff]  ;;  %v1735_v58 = vld [vmem:[#allocation3 + $0x430] sm:$0xff] }
  0xc5   :  { %v1743_v60 = vld [vmem:[#allocation3 + $0x470] sm:$0xff] }
  0xc7   :  { %1558 = vmatpush1.bf16.msra.mxu0 %v8937_v15  ;;  %1599 = vmatpush1.bf16.msra.mxu1 %v8939_v16  ;;  %v1772_v15 = vld [vmem:[#allocation3 + $0x558] sm:$0xff]  ;;  %v8987_v16 = vcombine.low %v1747_v2, %v1755_v3  ;;  %v8980_v3 = vcombine.high %v1735_v58, %v1743_v60 }
  0xc8   :  { %1559 = vmatprep.subr.bf16.mxu0 %v8954_v17  ;;  %1600 = vmatprep.subr.bf16.mxu1 %v8956_v21  ;;  %v8989_v17 = vcombine.low %v1748_v4, %v1756_v6  ;;  %v1780_v21 = vld [vmem:[#allocation3 + $0x598] sm:$0xff]  ;;  %v9006_v22 = vcombine.high %v1764_v13, %v1772_v15  ;;  %v1751_v4 = vld [vmem:[#allocation3 + $0x4b0] sm:$0xff] }
  0xc9   :  { %v1752_v6 = vld [vmem:[#allocation3 + $0x4b8] sm:$0xff] }
  0xcb   :  { %1560 = vmatpush1.bf16.msra.mxu0 %v8953_v23  ;;  %1601 = vmatpush1.bf16.msra.mxu1 %v8955_v25  ;;  %v1788_v23 = vld [vmem:[#allocation3 + $0x5d8] sm:$0xff]  ;;  %v9005_v25 = vcombine.low %v1764_v13, %v1772_v15  ;;  %v1767_v13 = vld [vmem:[#allocation3 + $0x530] sm:$0xff] }
  0xcc   :  { %2128 = vmatprep.subr.bf16.mxu0 %v8968_v26  ;;  %2169 = vmatprep.subr.bf16.mxu1 %v8970_v30  ;;  %v9020_v26 = vcombine.high %v1779_v19, %v1787_v20  ;;  %v9022_v30 = vcombine.high %v1780_v21, %v1788_v23  ;;  %v1768_v15 = vld [vmem:[#allocation3 + $0x538] sm:$0xff] }
  0xce   :  { %8963 = vmatmul.mubr.msk.bf16.vlgmr.msra.gmra.mrb[28].mxu0 %vm483_vm1, %v10361_v59  ;;  %8964 = vmatmul.mubr.msk.bf16.vlgmr.msra.gmra.mrb[28].mxu1 %vm483_vm1, %v10361_v59  ;;  %v8999_v59 = vcombine.low %v1761_v36, %v1769_v37  ;;  %v1757_v36 = vld [vmem:[#allocation3 + $0x4e0] sm:$0xff]  ;;  %v1750_v37 = vld [vmem:[#allocation3 + $0x4a8] sm:$0xff] }
  0xcf   :  { %2129 = vmatpush1.bf16.msra.mxu0 %v8967_v33  ;;  %2170 = vmatpush1.bf16.msra.mxu1 %v8969_v34  ;;  %v9021_v33 = vcombine.low %v1780_v21, %v1788_v23  ;;  %v8976_v34 = vcombine.high %v1733_v27, %v1741_v28  ;;  %v1783_v21 = vld [vmem:[#allocation3 + $0x5b0] sm:$0xff]  ;;  %v1784_v23 = vld [vmem:[#allocation3 + $0x5b8] sm:$0xff] }
  0xd0   :  { %2130 = vmatprep.subr.bf16.mxu0 %v8984_v35  ;;  %2171 = vmatprep.subr.bf16.mxu1 %v8986_v39  ;;  %v1749_v35 = vld [vmem:[#allocation3 + $0x4a0] sm:$0xff]  ;;  %v1758_v39 = vld [vmem:[#allocation3 + $0x4e8] sm:$0xff] }
  0xd1   :  { %2160 = vmatprep.mubr.bf16.mxu0 %v10231_v0  ;;  %2201 = vmatprep.mubr.bf16.mxu1 %v10231_v0  ;;  %v8992_v41 = vcombine.high %v1749_v35, %v1757_v36  ;;  %v8994_v45 = vcombine.high %v1750_v37, %v1758_v39  ;;  %v8991_v48 = vcombine.low %v1749_v35, %v1757_v36  ;;  %v2566_v35 = vld [vmem:[#allocation3 + $0x680] sm:$0xff] }
  0xd3   :  { %2131 = vmatpush1.bf16.msra.mxu0 %v8983_v40  ;;  %2172 = vmatpush1.bf16.msra.mxu1 %v8985_v43  ;;  %v8977_v40 = vcombine.low %v1734_v29, %v1742_v31  ;;  %v1773_v43 = vld [vmem:[#allocation3 + $0x560] sm:$0xff]  ;;  %v2551_v31 = vld [vmem:[#allocation3 + $0x608] sm:$0xff] }
  0xd4   :  { %2132 = vmatprep.subr.bf16.mxu0 %v9000_v44  ;;  %2173 = vmatprep.subr.bf16.mxu1 %v9002_v49  ;;  %v1766_v44 = vld [vmem:[#allocation3 + $0x528] sm:$0xff]  ;;  %v8993_v49 = vcombine.low %v1750_v37, %v1758_v39  ;;  %v9008_v50 = vcombine.high %v1765_v42, %v1773_v43  ;;  %v9007_v55 = vcombine.low %v1765_v42, %v1773_v43  ;;  %v2550_v29 = vld [vmem:[#allocation3 + $0x600] sm:$0xff] }
  0xd5   :  { %v2567_v39 = vld [vmem:[#allocation3 + $0x688] sm:$0xff]  ;;  %v9712_v42 = vld [vmem:[%s10873_s0 + $0x4] ss:$0 sps:$4 sm:$0x22]  }
  0xd7   :  { %2133 = vmatpush1.bf16.msra.mxu0 %v8999_v59  ;;  %2174 = vmatpush1.bf16.msra.mxu1 %v9001_v53  ;;  %v1781_v59 = vld [vmem:[#allocation3 + $0x5a0] sm:$0xff]  ;;  %v9010_v53 = vcombine.high %v1766_v44, %v1774_v46 }
  0xd8   :  { %2134 = vmatprep.subr.bf16.mxu0 %v9016_v54  ;;  %2175 = vmatprep.subr.bf16.mxu1 %v9018_v56  ;;  %v1790_v54 = vld [vmem:[#allocation3 + $0x5e8] sm:$0xff]  ;;  %v9009_v56 = vcombine.low %v1766_v44, %v1774_v46  ;;  %v9024_v57 = vcombine.high %v1781_v59, %v1789_v51  ;;  %v2582_v46 = vld [vmem:[#allocation3 + $0x700] sm:$0xff] }
  0xd9   :  { %v9026_v62 = vcombine.high %v1782_v52, %v1790_v54  ;;  %v9025_v2 = vcombine.low %v1782_v52, %v1790_v54 }
  0xdb   :  { %2135 = vmatpush1.bf16.msra.mxu0 %v9015_v61  ;;  %2176 = vmatpush1.bf16.msra.mxu1 %v9017_v63  ;;  %v1736_v61 = vld [vmem:[#allocation3 + $0x438] sm:$0xff] }
  0xdc   :  { %2210 = vmatprep.subr.bf16.mxu0 %v8972_v1  ;;  %2251 = vmatprep.subr.bf16.mxu1 %v8974_v5  ;;  %v1744_v63 = vld [vmem:[#allocation3 + $0x478] sm:$0xff]  ;;  %v9023_v1 = vcombine.low %v1781_v59, %v1789_v51  ;;  %v1759_v5 = vld [vmem:[#allocation3 + $0x4f0] sm:$0xff]  ;;  %v2591_v59 = vld [vmem:[#allocation3 + $0x748] sm:$0xff] }
  0xdd   :  { %v8981_v11 = vcombine.low %v1736_v61, %v1744_v63  ;;  %v8996_v12 = vcombine.high %v1751_v4, %v1759_v5 }
  0xde   :  { %9031 = vmatmul.mubr.msk.bf16.vlgmr.msra.gmra.mrb[32].mxu0 %vm483_vm1, %v10394_v7  ;;  %9032 = vmatmul.mubr.msk.bf16.vlgmr.msra.gmra.mrb[32].mxu1 %vm483_vm1, %v10394_v7 }
  0xdf   :  { %2211 = vmatpush1.bf16.msra.mxu0 %v8971_v8  ;;  %2252 = vmatpush1.bf16.msra.mxu1 %v8973_v9  ;;  %v8982_v8 = vcombine.high %v1736_v61, %v1744_v63  ;;  %v1760_v9 = vld [vmem:[#allocation3 + $0x4f8] sm:$0xff]  ;;  %v2607_v61 = vld [vmem:[#allocation3 + $0x7c8] sm:$0xff] }
  0xe0   :  { %2212 = vmatprep.subr.bf16.mxu0 %v8988_v10  ;;  %2253 = vmatprep.subr.bf16.mxu1 %v8990_v14  ;;  %v8979_v10 = vcombine.low %v1735_v58, %v1743_v60  ;;  %v1775_v14 = vld [vmem:[#allocation3 + $0x570] sm:$0xff]  ;;  %v8997_v19 = vcombine.low %v1752_v6, %v1760_v9  ;;  %v2599_v58 = vld [vmem:[#allocation3 + $0x788] sm:$0xff] }
  0xe1   :  { %2242 = vmatprep.mubr.bf16.mxu0 %v10231_v0  ;;  %2283 = vmatprep.mubr.bf16.mxu1 %v10231_v0  ;;  %v9012_v20 = vcombine.high %v1767_v13, %v1775_v14 }
  0xe3   :  { %2213 = vmatpush1.bf16.msra.mxu0 %v8987_v16  ;;  %2254 = vmatpush1.bf16.msra.mxu1 %v8989_v17  ;;  %v8998_v16 = vcombine.high %v1752_v6, %v1760_v9  ;;  %v1776_v17 = vld [vmem:[#allocation3 + $0x578] sm:$0xff] }
  0xe4   :  { %2214 = vmatprep.subr.bf16.mxu0 %v9004_v18  ;;  %2255 = vmatprep.subr.bf16.mxu1 %v9006_v22  ;;  %v8995_v18 = vcombine.low %v1751_v4, %v1759_v5  ;;  %v1791_v22 = vld [vmem:[#allocation3 + $0x5f0] sm:$0xff]  ;;  %v9013_v27 = vcombine.low %v1768_v15, %v1776_v17  ;;  %v9092_v4 = vcombine.high %v2599_v58, %v2607_v61  ;;  %v2553_v6 = vld [vmem:[#allocation3 + $0x618] sm:$0xff] }
  0xe5   :  { %v9028_v28 = vcombine.high %v1783_v21, %v1791_v22  ;;  %v2560_v5 = vld [vmem:[#allocation3 + $0x650] sm:$0xff] }
  0xe7   :  { %2215 = vmatpush1.bf16.msra.mxu0 %v9003_v24  ;;  %2256 = vmatpush1.bf16.msra.mxu1 %v9005_v25  ;;  %v9014_v24 = vcombine.high %v1768_v15, %v1776_v17  ;;  %v1792_v25 = vld [vmem:[#allocation3 + $0x5f8] sm:$0xff] }
  0xe8   :  { %2216 = vmatprep.subr.bf16.mxu0 %v9020_v26  ;;  %2257 = vmatprep.subr.bf16.mxu1 %v9022_v30  ;;  %v9011_v26 = vcombine.low %v1767_v13, %v1775_v14  ;;  %v2558_v30 = vld [vmem:[#allocation3 + $0x640] sm:$0xff]  ;;  %v9029_v36 = vcombine.low %v1784_v23, %v1792_v25  ;;  %v2568_v13 = vld [vmem:[#allocation3 + $0x690] sm:$0xff]  ;;  %v2569_v15 = vld [vmem:[#allocation3 + $0x698] sm:$0xff] }
  0xe9   :  { %v9042_v37 = vcombine.high %v2550_v29, %v2558_v30  ;;  %v9041_v43 = vcombine.low %v2550_v29, %v2558_v30  ;;  %v2576_v14 = vld [vmem:[#allocation3 + $0x6d0] sm:$0xff]  ;;  %v2577_v17 = vld [vmem:[#allocation3 + $0x6d8] sm:$0xff] }
  0xeb   :  { %2217 = vmatpush1.bf16.msra.mxu0 %v9019_v32  ;;  %2258 = vmatpush1.bf16.msra.mxu1 %v9021_v33  ;;  %v9030_v32 = vcombine.high %v1784_v23, %v1792_v25  ;;  %v2559_v33 = vld [vmem:[#allocation3 + $0x648] sm:$0xff]  ;;  %v2584_v23 = vld [vmem:[#allocation3 + $0x710] sm:$0xff]  ;;  %v2585_v25 = vld [vmem:[#allocation3 + $0x718] sm:$0xff] }
  0xec   :  { %2292 = vmatprep.subr.bf16.mxu0 %v8976_v34  ;;  %2333 = vmatprep.subr.bf16.mxu1 %v8978_v38  ;;  %v9027_v34 = vcombine.low %v1783_v21, %v1791_v22  ;;  %v2574_v38 = vld [vmem:[#allocation3 + $0x6c0] sm:$0xff]  ;;  %v9043_v44 = vcombine.low %v2551_v31, %v2559_v33  ;;  %v9062_v21 = vcombine.high %v2568_v13, %v2576_v14 }
  0xed   :  { %v9057_v51 = vcombine.low %v2566_v35, %v2574_v38  ;;  %v9064_v22 = vcombine.high %v2569_v15, %v2577_v17 }
  0xee   :  { %9033 = vmatmul.mubr.msk.bf16.vlgmr.msra.gmra.mrb[36].mxu0 %vm483_vm1, %v10394_v7  ;;  %9034 = vmatmul.mubr.msk.bf16.vlgmr.msra.gmra.mrb[36].mxu1 %vm483_vm1, %v10394_v7 }
  0xef   :  { %2293 = vmatpush1.bf16.msra.mxu0 %v8975_v47  ;;  %2334 = vmatpush1.bf16.msra.mxu1 %v8977_v40  ;;  %v2575_v47 = vld [vmem:[#allocation3 + $0x6c8] sm:$0xff]  ;;  %v9044_v40 = vcombine.high %v2551_v31, %v2559_v33  ;;  %v2600_v31 = vld [vmem:[#allocation3 + $0x790] sm:$0xff]  ;;  %v2601_v33 = vld [vmem:[#allocation3 + $0x798] sm:$0xff] }
  0xf0   :  { %2294 = vmatprep.subr.bf16.mxu0 %v8992_v41  ;;  %2335 = vmatprep.subr.bf16.mxu1 %v8994_v45  ;;  %v9711_v41 = vld [vmem:[%s10873_s0] ss:$0 sps:$4 sm:$0x22]   ;;  %v9058_v45 = vcombine.high %v2566_v35, %v2574_v38  ;;  %v9059_v54 = vcombine.low %v2567_v39, %v2575_v47 }
  0xf1   :  { %2324 = vmatprep.mubr.bf16.mxu0 %v10231_v0  ;;  %2365 = vmatprep.mubr.bf16.mxu1 %v10231_v0  ;;  %v2620_v52 = vunpack.c.l.b16 %v9711_v41  ;;  %v2563_v41 = vld [vmem:[#allocation3 + $0x668] sm:$0xff] }
  0xf3   :  { %2295 = vmatpush1.bf16.msra.mxu0 %v8991_v48  ;;  %2336 = vmatpush1.bf16.msra.mxu1 %v8993_v49  ;;  %v2590_v48 = vld [vmem:[#allocation3 + $0x740] sm:$0xff]  ;;  %v2583_v49 = vld [vmem:[#allocation3 + $0x708] sm:$0xff] }
  0xf4   :  { %2296 = vmatprep.subr.bf16.mxu0 %v9008_v50  ;;  %2337 = vmatprep.subr.bf16.mxu1 %v9010_v53  ;;  %v9060_v50 = vcombine.high %v2567_v39, %v2575_v47  ;;  %v2621_v53 = vunpack.c.l.b16 %v9712_v42  ;;  %v9076_v60 = vcombine.high %v2583_v49, %v2591_v59  ;;  %v2554_v39 = vld [vmem:[#allocation3 + $0x620] sm:$0xff] }
  0xf5   :  { %v2562_v47 = vld [vmem:[#allocation3 + $0x660] sm:$0xff] }
  0xf6   :  { %v2623_v63 = vrot.slane %v2621_v53, 2  ;;  %v9049_v53 = vcombine.low %v2554_v39, %v2562_v47 }
  0xf7   :  { %2297 = vmatpush1.bf16.msra.mxu0 %v9007_v55  ;;  %2338 = vmatpush1.bf16.msra.mxu1 %v9009_v56  ;;  %v9074_v55 = vcombine.high %v2582_v46, %v2590_v48  ;;  %v2598_v56 = vld [vmem:[#allocation3 + $0x780] sm:$0xff] }
  0xf8   :  { %2298 = vmatprep.subr.bf16.mxu0 %v9024_v57  ;;  %2339 = vmatprep.subr.bf16.mxu1 %v9026_v62  ;;  %v2606_v57 = vld [vmem:[#allocation3 + $0x7c0] sm:$0xff]  ;;  %v2622_v62 = vrot.slane %v2620_v52, 3  ;;  %v2579_v52 = vld [vmem:[#allocation3 + $0x6e8] sm:$0xff] }
  0xf9   :  { %v9089_v9 = vcombine.low %v2598_v56, %v2606_v57 }
  0xfb   :  { %2299 = vmatpush1.bf16.msra.mxu0 %v9023_v1  ;;  %2340 = vmatpush1.bf16.msra.mxu1 %v9025_v2  ;;  %v9075_v1 = vcombine.low %v2583_v49, %v2591_v59  ;;  %v9090_v2 = vcombine.high %v2598_v56, %v2606_v57  ;;  %v836_v49 = vlaneseq  ;;  %v2578_v59 = vld [vmem:[#allocation3 + $0x6e0] sm:$0xff] }
  0xfc   :  { %2374 = vmatprep.subr.bf16.mxu0 %v8980_v3  ;;  %2415 = vmatprep.subr.bf16.mxu1 %v8982_v8  ;;  %v2552_v3 = vld [vmem:[#allocation3 + $0x610] sm:$0xff]  ;;  %v2561_v8 = vld [vmem:[#allocation3 + $0x658] sm:$0xff] }
  0xfd   :  { %v10435_v57 = vshrl.u32 %v836_v49, 7 }
  0xfe   :  { %9035 = vmatmul.mubr.msk.bf16.vlgmr.msra.gmra.mrb[40].mxu0 %vm483_vm1, %v10394_v7  ;;  %9036 = vmatmul.mubr.msk.bf16.vlgmr.msra.gmra.mrb[40].mxu1 %vm483_vm1, %v10394_v7 }
  0xff   :  { %2375 = vmatpush1.bf16.msra.mxu0 %v8979_v10  ;;  %2416 = vmatpush1.bf16.msra.mxu1 %v8981_v11  ;;  %v2624_v10 = vsel %vm160_vm0, %v2623_v63, %v2622_v62  ;;  %v9091_v11 = vcombine.low %v2599_v58, %v2607_v61  ;;  %v2594_v61 = vld [vmem:[#allocation3 + $0x760] sm:$0xff]  ;;  %v2595_v62 = vld [vmem:[#allocation3 + $0x768] sm:$0xff] }
 0x100   :  { %2376 = vmatprep.subr.bf16.mxu0 %v8996_v12  ;;  %2417 = vmatprep.subr.bf16.mxu1 %v8998_v16  ;;  %v9046_v12 = vcombine.high %v2552_v3, %v2560_v5  ;;  %v9048_v16 = vcombine.high %v2553_v6, %v2561_v8 }
 0x101   :  { %2406 = vmatprep.mubr.bf16.mxu0 %v10231_v0  ;;  %2447 = vmatprep.mubr.bf16.mxu1 %v10231_v0 }
 0x103   :  { %2377 = vmatpush1.bf16.msra.mxu0 %v8995_v18  ;;  %2418 = vmatpush1.bf16.msra.mxu1 %v8997_v19  ;;  %v10427_v18 = vpack.c.b16 %v2624_v10, %v2624_v10  ;;  %v9045_v19 = vcombine.low %v2552_v3, %v2560_v5 }
 0x104   :  { %2378 = vmatprep.subr.bf16.mxu0 %v9012_v20  ;;  %2419 = vmatprep.subr.bf16.mxu1 %v9014_v24  ;;  %v9047_v20 = vcombine.low %v2553_v6, %v2561_v8  ;;  %v2592_v24 = vld [vmem:[#allocation3 + $0x750] sm:$0xff]  ;;  %v2602_v6 = vld [vmem:[#allocation3 + $0x7a0] sm:$0xff] }
 0x105   :  { %v9078_v29 = vcombine.high %v2584_v23, %v2592_v24  ;;  %v9077_v35 = vcombine.low %v2584_v23, %v2592_v24  ;;  %v2610_v8 = vld [vmem:[#allocation3 + $0x7e0] sm:$0xff] }
 0x107   :  { %2379 = vmatpush1.bf16.msra.mxu0 %v9011_v26  ;;  %2420 = vmatpush1.bf16.msra.mxu1 %v9013_v27  ;;  %v2593_v26 = vld [vmem:[#allocation3 + $0x758] sm:$0xff]  ;;  %v9061_v27 = vcombine.low %v2568_v13, %v2576_v14 }
 0x108   :  { %2380 = vmatprep.subr.bf16.mxu0 %v9028_v28  ;;  %2421 = vmatprep.subr.bf16.mxu1 %v9030_v32  ;;  %v9063_v28 = vcombine.low %v2569_v15, %v2577_v17  ;;  %v9080_v30 = vcombine.high %v2585_v25, %v2593_v26  ;;  %v2608_v32 = vld [vmem:[#allocation3 + $0x7d0] sm:$0xff] }
 0x109   :  { %v9093_v42 = vcombine.low %v2600_v31, %v2608_v32 }
 0x10b   :  { %2381 = vmatpush1.bf16.msra.mxu0 %v9027_v34  ;;  %2422 = vmatpush1.bf16.msra.mxu1 %v9029_v36  ;;  %v2609_v34 = vld [vmem:[#allocation3 + $0x7d8] sm:$0xff]  ;;  %v9079_v36 = vcombine.low %v2585_v25, %v2593_v26  ;;  %v2556_v26 = vld [vmem:[#allocation3 + $0x630] sm:$0xff] }
 0x10c   :  { %2949 = vmatprep.subr.bf16.mxu0 %v9042_v37  ;;  %2990 = vmatprep.subr.bf16.mxu1 %v9044_v40  ;;  %v9094_v37 = vcombine.high %v2600_v31, %v2608_v32  ;;  %v9096_v38 = vcombine.high %v2601_v33, %v2609_v34  ;;  %v2555_v40 = vld [vmem:[#allocation3 + $0x628] sm:$0xff]  ;;  %v9097_v31 = vcombine.low %v2602_v6, %v2610_v8 }
 0x10e   :  { %9037 = vmatmul.mubr.msk.bf16.vlgmr.msra.gmra.mrb[44].mxu0 %vm483_vm1, %v10394_v7  ;;  %9038 = vmatmul.mubr.msk.bf16.vlgmr.msra.gmra.mrb[44].mxu1 %vm483_vm1, %v10394_v7  ;;  %v9073_v7 = vcombine.low %v2582_v46, %v2590_v48  ;;  %v10232_v46 = vmov 1983009808  }
 0x10f   :  { %2950 = vmatpush1.bf16.msra.mxu0 %v9041_v43  ;;  %2991 = vmatpush1.bf16.msra.mxu1 %v9043_v44  ;;  %v9095_v43 = vcombine.low %v2601_v33, %v2609_v34  ;;  %v9050_v44 = vcombine.high %v2554_v39, %v2562_v47  ;;  %v834_v48 = vunpack.c.l.s4 %v10232_v46  ;;  %v2581_v39 = vld [vmem:[#allocation3 + $0x6f8] sm:$0xff] }
 0x110   :  { %2951 = vmatprep.subr.bf16.mxu0 %v9058_v45  ;;  %2992 = vmatprep.subr.bf16.mxu1 %v9060_v50  ;;  %v9052_v45 = vcombine.high %v2555_v40, %v2563_v41  ;;  %v2570_v50 = vld [vmem:[#allocation3 + $0x6a0] sm:$0xff]  ;;  %v2597_v46 = vld [vmem:[#allocation3 + $0x778] sm:$0xff] }
 0x111   :  { %2981 = vmatprep.mubr.bf16.mxu0 %v10231_v0  ;;  %3022 = vmatprep.mubr.bf16.mxu1 %v10231_v0  ;;  %v835_v56 = vunpack.c.0.s8 %v834_v48  ;;  %v9065_v63 = vcombine.low %v2570_v50, %v2578_v59 }
 0x113   :  { %2952 = vmatpush1.bf16.msra.mxu0 %v9057_v51  ;;  %2993 = vmatpush1.bf16.msra.mxu1 %v9059_v54  ;;  %v2571_v51 = vld [vmem:[#allocation3 + $0x6a8] sm:$0xff]  ;;  %v9051_v54 = vcombine.low %v2555_v40, %v2563_v41 }
 0x114   :  { %2953 = vmatprep.subr.bf16.mxu0 %v9074_v55  ;;  %2994 = vmatprep.subr.bf16.mxu1 %v9076_v60  ;;  %v9066_v55 = vcombine.high %v2570_v50, %v2578_v59  ;;  %v9068_v58 = vcombine.high %v2571_v51, %v2579_v52  ;;  %v2586_v60 = vld [vmem:[#allocation3 + $0x720] sm:$0xff] }
 0x117   :  { %2954 = vmatpush1.bf16.msra.mxu0 %v9073_v7  ;;  %2995 = vmatpush1.bf16.msra.mxu1 %v9075_v1  ;;  %v2587_v7 = vld [vmem:[#allocation3 + $0x728] sm:$0xff]  ;;  %v9067_v1 = vcombine.low %v2571_v51, %v2579_v52  ;;  %v2604_v52 = vld [vmem:[#allocation3 + $0x7b0] sm:$0xff] }
 0x118   :  { %2955 = vmatprep.subr.bf16.mxu0 %v9090_v2  ;;  %2996 = vmatprep.subr.bf16.mxu1 %v9092_v4  ;;  %v9082_v2 = vcombine.high %v2586_v60, %v2594_v61  ;;  %v10442_v4 = vsub.s32 %v835_v56, %v10435_v57  ;;  %v9084_v5 = vcombine.high %v2587_v7, %v2595_v62  ;;  %v2605_v56 = vld [vmem:[#allocation3 + $0x7b8] sm:$0xff] }
 0x11b   :  { %2956 = vmatpush1.bf16.msra.mxu0 %v9089_v9  ;;  %2997 = vmatpush1.bf16.msra.mxu1 %v9091_v11  ;;  %v2603_v11 = vld [vmem:[#allocation3 + $0x7a8] sm:$0xff] }
 0x11c   :  { %3031 = vmatprep.subr.bf16.mxu0 %v9046_v12  ;;  %3072 = vmatprep.subr.bf16.mxu1 %v9048_v16  ;;  %v2611_v12 = vld [vmem:[#allocation3 + $0x7e8] sm:$0xff]  ;;  %v9081_v16 = vcombine.low %v2586_v60, %v2594_v61 }
 0x11d   :  { %v9100_v25 = vcombine.high %v2603_v11, %v2611_v12  ;;  %v9099_v33 = vcombine.low %v2603_v11, %v2611_v12  ;;  %v3379_v11 = vld [vmem:[#allocation3 + $0x840] sm:$0xff] }
 0x11e   :  { %9105 = vmatmul.mubr.msk.bf16.vlgmr.msra.gmra.mrb[48].mxu0 %vm483_vm1, %v10427_v18  ;;  %9106 = vmatmul.mubr.msk.bf16.vlgmr.msra.gmra.mrb[48].mxu1 %vm483_vm1, %v10427_v18 }
 0x11f   :  { %3032 = vmatpush1.bf16.msra.mxu0 %v9045_v19  ;;  %3073 = vmatpush1.bf16.msra.mxu1 %v9047_v20 }
 0x120   :  { %3033 = vmatprep.subr.bf16.mxu0 %v9062_v21  ;;  %3074 = vmatprep.subr.bf16.mxu1 %v9064_v22  ;;  %v9083_v21 = vcombine.low %v2587_v7, %v2595_v62  ;;  %v9098_v22 = vcombine.high %v2602_v6, %v2610_v8 }
 0x121   :  { %3063 = vmatprep.mubr.bf16.mxu0 %v10231_v0  ;;  %3104 = vmatprep.mubr.bf16.mxu1 %v10231_v0 }
 0x123   :  { %3034 = vmatpush1.bf16.msra.mxu0 %v9061_v27  ;;  %3075 = vmatpush1.bf16.msra.mxu1 %v9063_v28  ;;  %v2564_v27 = vld [vmem:[#allocation3 + $0x670] sm:$0xff] }
 0x124   :  { %3035 = vmatprep.subr.bf16.mxu0 %v9078_v29  ;;  %3076 = vmatprep.subr.bf16.mxu1 %v9080_v30  ;;  %v2557_v29 = vld [vmem:[#allocation3 + $0x638] sm:$0xff]  ;;  %v9054_v34 = vcombine.high %v2556_v26, %v2564_v27  ;;  %v9053_v47 = vcombine.low %v2556_v26, %v2564_v27  ;;  %v9713_v27 = vld [vmem:[%s10873_s0] ss:$0 sps:$4 sm:$0x44]  }
 0x125   :  { %v2565_v30 = vld [vmem:[#allocation3 + $0x678] sm:$0xff] }
 0x126   :  { %v9055_v40 = vcombine.low %v2557_v29, %v2565_v30 }
 0x127   :  { %3036 = vmatpush1.bf16.msra.mxu0 %v9077_v35  ;;  %3077 = vmatpush1.bf16.msra.mxu1 %v9079_v36  ;;  %v9056_v35 = vcombine.high %v2557_v29, %v2565_v30  ;;  %v2572_v36 = vld [vmem:[#allocation3 + $0x6b0] sm:$0xff]  ;;  %v9714_v29 = vld [vmem:[%s10873_s0 + $0x4] ss:$0 sps:$4 sm:$0x44]  }
 0x128   :  { %3037 = vmatprep.subr.bf16.mxu0 %v9094_v37  ;;  %3078 = vmatprep.subr.bf16.mxu1 %v9096_v38  ;;  %v2580_v37 = vld [vmem:[#allocation3 + $0x6f0] sm:$0xff]  ;;  %v2573_v38 = vld [vmem:[#allocation3 + $0x6b8] sm:$0xff] }
 0x129   :  { %v9070_v41 = vcombine.high %v2572_v36, %v2580_v37  ;;  %v9069_v48 = vcombine.low %v2572_v36, %v2580_v37  ;;  %v9071_v49 = vcombine.low %v2573_v38, %v2581_v39  ;;  %v3404_v36 = vld [vmem:[#allocation3 + $0x908] sm:$0xff] }
 0x12a   :  { %v3412_v37 = vld [vmem:[#allocation3 + $0x948] sm:$0xff] }
 0x12b   :  { %3038 = vmatpush1.bf16.msra.mxu0 %v9093_v42  ;;  %3079 = vmatpush1.bf16.msra.mxu1 %v9095_v43  ;;  %v9072_v42 = vcombine.high %v2573_v38, %v2581_v39  ;;  %v2588_v43 = vld [vmem:[#allocation3 + $0x730] sm:$0xff]  ;;  %v3441_v39 = vunpack.c.l.b16 %v9713_v27 }
 0x12c   :  { %3113 = vmatprep.subr.bf16.mxu0 %v9050_v44  ;;  %3154 = vmatprep.subr.bf16.mxu1 %v9052_v45  ;;  %v2596_v44 = vld [vmem:[#allocation3 + $0x770] sm:$0xff]  ;;  %v2589_v45 = vld [vmem:[#allocation3 + $0x738] sm:$0xff] }
 0x12d   :  { %v9086_v50 = vcombine.high %v2588_v43, %v2596_v44  ;;  %v9088_v51 = vcombine.high %v2589_v45, %v2597_v46  ;;  %v9085_v62 = vcombine.low %v2588_v43, %v2596_v44  ;;  %v9150_v43 = vcombine.high %v3404_v36, %v3412_v37  ;;  %v3419_v44 = vld [vmem:[#allocation3 + $0x980] sm:$0xff] }
 0x12e   :  { %9107 = vmatmul.mubr.msk.bf16.vlgmr.msra.gmra.mrb[52].mxu0 %vm483_vm1, %v10427_v18  ;;  %9108 = vmatmul.mubr.msk.bf16.vlgmr.msra.gmra.mrb[52].mxu1 %vm483_vm1, %v10427_v18 }
 0x12f   :  { %3114 = vmatpush1.bf16.msra.mxu0 %v9049_v53  ;;  %3155 = vmatpush1.bf16.msra.mxu1 %v9051_v54  ;;  %v2612_v53 = vld [vmem:[#allocation3 + $0x7f0] sm:$0xff] }
 0x130   :  { %3115 = vmatprep.subr.bf16.mxu0 %v9066_v55  ;;  %3156 = vmatprep.subr.bf16.mxu1 %v9068_v58  ;;  %v2613_v58 = vld [vmem:[#allocation3 + $0x7f8] sm:$0xff] }
 0x131   :  { %v521_v3 = vpop.f32.mrb[0].mxu0  ;;  %3145 = vmatprep.mubr.bf16.mxu0 %v10231_v0  ;;  %v562_v9 = vpop.f32.mrb[0].mxu1  ;;  %3186 = vmatprep.mubr.bf16.mxu1 %v10231_v0 }
 0x132   :  { %v523_v10 = vpop.f32.mrb[1].mxu0  ;;  %v564_v14 = vpop.f32.mrb[1].mxu1 }
 0x133   :  { %v831_v13 = vcombine.low %v521_v3, %v523_v10  ;;  %v525_v15 = vpop.f32.mrb[2].mxu0  ;;  %3116 = vmatpush1.bf16.msra.mxu0 %v9065_v63  ;;  %v832_v17 = vcombine.low %v562_v9, %v564_v14  ;;  %v566_v19 = vpop.f32.mrb[2].mxu1  ;;  %3157 = vmatpush1.bf16.msra.mxu1 %v9067_v1  ;;  %v9087_v3 = vcombine.low %v2589_v45, %v2597_v46  ;;  %v3371_v10 = vld [vmem:[#allocation3 + $0x800] sm:$0xff]  ;;  %v3380_v14 = vld [vmem:[#allocation3 + $0x848] sm:$0xff] }
 0x134   :  { %v526_v20 = vpop.f32.mrb[3].mxu0  ;;  %3117 = vmatprep.subr.bf16.mxu0 %v9082_v2  ;;  %v567_v24 = vpop.f32.mrb[3].mxu1  ;;  %3158 = vmatprep.subr.bf16.mxu1 %v9084_v5  ;;  %v9102_v5 = vcombine.high %v2604_v52, %v2612_v53  ;;  %v9104_v9 = vcombine.high %v2605_v56, %v2613_v58  ;;  %v9101_v15 = vcombine.low %v2604_v52, %v2612_v53  ;;  %v3427_v45 = vld [vmem:[#allocation3 + $0x9c0] sm:$0xff]  ;;  %v3443_v53 = vrot.slane %v3441_v39, 4  ;;  %v3421_v39 = vld [vmem:[#allocation3 + $0x990] sm:$0xff] }
 0x135   :  { %v10447_v23 = vrot.slane %v831_v13, %v10442_v4  ;;  %v10450_v28 = vrot.slane %v832_v17, %v10442_v4  ;;  %v3372_v13 = vld [vmem:[#allocation3 + $0x808] sm:$0xff]  ;;  %v9103_v17 = vcombine.low %v2605_v56, %v2613_v58  ;;  %v9116_v19 = vcombine.high %v3371_v10, %v3379_v11 }
 0x136   :  { %v9118_v20 = vcombine.high %v3372_v13, %v3380_v14  ;;  %v3388_v24 = vld [vmem:[#allocation3 + $0x888] sm:$0xff]  ;;  %v9115_v26 = vcombine.low %v3371_v10, %v3379_v11  ;;  %v9117_v30 = vcombine.low %v3372_v13, %v3380_v14 }
 0x137   :  { %3118 = vmatpush1.bf16.msra.mxu0 %v9081_v16  ;;  %v847_v32 = vcombine.low %v10447_v23, %v10450_v28  ;;  %3159 = vmatpush1.bf16.msra.mxu1 %v9083_v21  ;;  %v3387_v21 = vld [vmem:[#allocation3 + $0x880] sm:$0xff] }
 0x138   :  { %3119 = vmatprep.subr.bf16.mxu0 %v9098_v22  ;;  %3160 = vmatprep.subr.bf16.mxu1 %v9100_v25  ;;  %v3395_v22 = vld [vmem:[#allocation3 + $0x8c0] sm:$0xff]  ;;  %v3396_v25 = vld [vmem:[#allocation3 + $0x8c8] sm:$0xff] }
 0x139   :  { %v9131_v38 = vcombine.low %v3387_v21, %v3395_v22 }
 0x13b   :  { %3120 = vmatpush1.bf16.msra.mxu0 %v9097_v31  ;;  %3161 = vmatpush1.bf16.msra.mxu1 %v9099_v33  ;;  %v9132_v31 = vcombine.high %v3387_v21, %v3395_v22  ;;  %v9134_v33 = vcombine.high %v3388_v24, %v3396_v25  ;;  %v3390_v21 = vld [vmem:[#allocation3 + $0x898] sm:$0xff] }
 0x13c   :  { %3195 = vmatprep.subr.bf16.mxu0 %v9054_v34  ;;  %3236 = vmatprep.subr.bf16.mxu1 %v9056_v35  ;;  %v3403_v34 = vld [vmem:[#allocation3 + $0x900] sm:$0xff]  ;;  %v3398_v22 = vld [vmem:[#allocation3 + $0x8d8] sm:$0xff] }
 0x13d   :  { %v3411_v35 = vld [vmem:[#allocation3 + $0x940] sm:$0xff]  ;;  %v9138_v27 = vcombine.high %v3390_v21, %v3398_v22 }
 0x13e   :  { %9109 = vmatmul.mubr.msk.bf16.vlgmr.msra.gmra.mrb[56].mxu0 %vm483_vm1, %v10427_v18  ;;  %9110 = vmatmul.mubr.msk.bf16.vlgmr.msra.gmra.mrb[56].mxu1 %vm483_vm1, %v10427_v18  ;;  %v9147_v52 = vcombine.low %v3403_v34, %v3411_v35 }
 0x13f   :  { %3196 = vmatpush1.bf16.msra.mxu0 %v9053_v47  ;;  %3237 = vmatpush1.bf16.msra.mxu1 %v9055_v40  ;;  %v3442_v47 = vunpack.c.l.b16 %v9714_v29  ;;  %v9133_v40 = vcombine.low %v3388_v24, %v3396_v25  ;;  %v3405_v29 = vld [vmem:[#allocation3 + $0x910] sm:$0xff] }
 0x140   :  { %3197 = vmatprep.subr.bf16.mxu0 %v9070_v41  ;;  %3238 = vmatprep.subr.bf16.mxu1 %v9072_v42  ;;  %v9148_v41 = vcombine.high %v3403_v34, %v3411_v35  ;;  %v9137_v35 = vcombine.low %v3390_v21, %v3398_v22  ;;  %v3407_v21 = vld [vmem:[#allocation3 + $0x920] sm:$0xff] }
 0x141   :  { %v603_v59 = vpop.f32.mrb[4].mxu0  ;;  %3227 = vmatprep.mubr.bf16.mxu0 %v10231_v0  ;;  %v644_v54 = vpop.f32.mrb[4].mxu1  ;;  %3268 = vmatprep.mubr.bf16.mxu1 %v10231_v0  ;;  %v3415_v22 = vld [vmem:[#allocation3 + $0x960] sm:$0xff] }
 0x142   :  { %v605_v55 = vpop.f32.mrb[5].mxu0  ;;  %v646_v61 = vpop.f32.mrb[5].mxu1 }
 0x143   :  { %v848_v60 = vcombine.low %v603_v59, %v605_v55  ;;  %v607_v7 = vpop.f32.mrb[6].mxu0  ;;  %3198 = vmatpush1.bf16.msra.mxu0 %v9069_v48  ;;  %v849_v63 = vcombine.low %v644_v54, %v646_v61  ;;  %v648_v1 = vpop.f32.mrb[6].mxu1  ;;  %3239 = vmatpush1.bf16.msra.mxu1 %v9071_v49  ;;  %v3420_v49 = vld [vmem:[#allocation3 + $0x988] sm:$0xff]  ;;  %v3444_v54 = vrot.slane %v3442_v47, 3  ;;  %v9164_v61 = vcombine.high %v3419_v44, %v3427_v45  ;;  %v3429_v47 = vld [vmem:[#allocation3 + $0x9d0] sm:$0xff] }
 0x144   :  { %v608_v2 = vpop.f32.mrb[7].mxu0  ;;  %3199 = vmatprep.subr.bf16.mxu0 %v9086_v50  ;;  %v649_v8 = vpop.f32.mrb[7].mxu1  ;;  %3240 = vmatprep.subr.bf16.mxu1 %v9088_v51  ;;  %v3428_v50 = vld [vmem:[#allocation3 + $0x9c8] sm:$0xff]  ;;  %v3373_v1 = vld [vmem:[#allocation3 + $0x810] sm:$0xff] }
 0x145   :  { %v10461_v6 = vrot.slane %v848_v60, %v10442_v4  ;;  %v10464_v12 = vrot.slane %v849_v63, %v10442_v4  ;;  %v9149_v60 = vcombine.low %v3404_v36, %v3412_v37  ;;  %v9166_v63 = vcombine.high %v3420_v49, %v3428_v50  ;;  %v3381_v2 = vld [vmem:[#allocation3 + $0x850] sm:$0xff]  ;;  %v3382_v8 = vld [vmem:[#allocation3 + $0x858] sm:$0xff] }
 0x146   :  { %v3445_v10 = vsel %vm160_vm0, %v3444_v54, %v3443_v53  ;;  %v9165_v13 = vcombine.low %v3420_v49, %v3428_v50  ;;  %v9120_v14 = vcombine.high %v3373_v1, %v3381_v2  ;;  %v9119_v24 = vcombine.low %v3373_v1, %v3381_v2 }
 0x147   :  { %3200 = vmatpush1.bf16.msra.mxu0 %v9085_v62  ;;  %v864_v16 = vcombine.low %v10461_v6, %v10464_v12  ;;  %3241 = vmatpush1.bf16.msra.mxu1 %v9087_v3  ;;  %v4224_v12 = vld [vmem:[#allocation3 + $0xb00] sm:$0xff] }
 0x148   :  { %3201 = vmatprep.subr.bf16.mxu0 %v9102_v5  ;;  %3242 = vmatprep.subr.bf16.mxu1 %v9104_v9  ;;  %v3374_v5 = vld [vmem:[#allocation3 + $0x818] sm:$0xff]  ;;  %v9163_v9 = vcombine.low %v3419_v44, %v3427_v45 }
 0x149   :  { %v9121_v25 = vcombine.low %v3374_v5, %v3382_v8 }
 0x14b   :  { %3202 = vmatpush1.bf16.msra.mxu0 %v9101_v15  ;;  %3243 = vmatpush1.bf16.msra.mxu1 %v9103_v17  ;;  %v9122_v15 = vcombine.high %v3374_v5, %v3382_v8  ;;  %v3389_v17 = vld [vmem:[#allocation3 + $0x890] sm:$0xff]  ;;  %v3391_v8 = vld [vmem:[#allocation3 + $0x8a0] sm:$0xff] }
 0x14c   :  { %3770 = vmatprep.subr.bf16.mxu0 %v9116_v19  ;;  %3811 = vmatprep.subr.bf16.mxu1 %v9118_v20  ;;  %v3397_v19 = vld [vmem:[#allocation3 + $0x8d0] sm:$0xff]  ;;  %v10489_v20 = vpack.c.b16 %v3445_v10, %v3445_v10  ;;  %v3392_v10 = vld [vmem:[#allocation3 + $0x8a8] sm:$0xff] }
 0x14d   :  { %v9135_v34 = vcombine.low %v3389_v17, %v3397_v19 }
 0x14e   :  { %9111 = vmatmul.mubr.msk.bf16.vlgmr.msra.gmra.mrb[60].mxu0 %vm483_vm1, %v10427_v18  ;;  %9112 = vmatmul.mubr.msk.bf16.vlgmr.msra.gmra.mrb[60].mxu1 %vm483_vm1, %v10427_v18 }
 0x14f   :  { %3771 = vmatpush1.bf16.msra.mxu0 %v9115_v26  ;;  %3812 = vmatpush1.bf16.msra.mxu1 %v9117_v30  ;;  %v9136_v26 = vcombine.high %v3389_v17, %v3397_v19  ;;  %v3413_v30 = vld [vmem:[#allocation3 + $0x950] sm:$0xff] }
 0x150   :  { %3772 = vmatprep.subr.bf16.mxu0 %v9132_v31  ;;  %3813 = vmatprep.subr.bf16.mxu1 %v9134_v33  ;;  %v3406_v31 = vld [vmem:[#allocation3 + $0x918] sm:$0xff]  ;;  %v9152_v36 = vcombine.high %v3405_v29, %v3413_v30 }
 0x151   :  { %v685_v42 = vpop.f32.mrb[8].mxu0  ;;  %3802 = vmatprep.mubr.bf16.mxu0 %v10231_v0  ;;  %v726_v46 = vpop.f32.mrb[8].mxu1  ;;  %3843 = vmatprep.mubr.bf16.mxu1 %v10231_v0  ;;  %v3414_v33 = vld [vmem:[#allocation3 + $0x958] sm:$0xff] }
 0x152   :  { %v687_v48 = vpop.f32.mrb[9].mxu0  ;;  %v728_v59 = vpop.f32.mrb[9].mxu1 }
 0x153   :  { %v865_v18 = vcombine.low %v685_v42, %v687_v48  ;;  %v689_v51 = vpop.f32.mrb[10].mxu0  ;;  %3773 = vmatpush1.bf16.msra.mxu0 %v9131_v38  ;;  %v866_v55 = vcombine.low %v726_v46, %v728_v59  ;;  %v730_v56 = vpop.f32.mrb[10].mxu1  ;;  %3814 = vmatpush1.bf16.msra.mxu1 %v9133_v40  ;;  %v9154_v38 = vcombine.high %v3406_v31, %v3414_v33  ;;  %v3422_v42 = vld [vmem:[#allocation3 + $0x998] sm:$0xff] }
 0x154   :  { %v690_v58 = vpop.f32.mrb[11].mxu0  ;;  %3774 = vmatprep.subr.bf16.mxu0 %v9148_v41  ;;  %v731_v62 = vpop.f32.mrb[11].mxu1  ;;  %3815 = vmatprep.subr.bf16.mxu1 %v9150_v43  ;;  %v3430_v43 = vld [vmem:[#allocation3 + $0x9d8] sm:$0xff]  ;;  %v9151_v48 = vcombine.low %v3405_v29, %v3413_v30  ;;  %v9153_v59 = vcombine.low %v3406_v31, %v3414_v33  ;;  %v9168_v51 = vcombine.high %v3421_v39, %v3429_v47  ;;  %v3383_v56 = vld [vmem:[#allocation3 + $0x860] sm:$0xff] }
 0x155   :  { %v10481_v7 = vrot.slane %v865_v18, %v10442_v4  ;;  %v10484_v3 = vrot.slane %v866_v55, %v10442_v4  ;;  %v9170_v54 = vcombine.high %v3422_v42, %v3430_v43  ;;  %v3375_v55 = vld [vmem:[#allocation3 + $0x820] sm:$0xff]  ;;  %v9167_v62 = vcombine.low %v3421_v39, %v3429_v47 }
 0x156   :  { %v9169_v1 = vcombine.low %v3422_v42, %v3430_v43  ;;  %v9124_v2 = vcombine.high %v3375_v55, %v3383_v56  ;;  %v9156_v29 = vcombine.high %v3407_v21, %v3415_v22  ;;  %v3423_v33 = vld [vmem:[#allocation3 + $0x9a0] sm:$0xff] }
 0x157   :  { %3775 = vmatpush1.bf16.msra.mxu0 %v9147_v52  ;;  %v881_v11 = vcombine.low %v10481_v7, %v10484_v3  ;;  %3816 = vmatpush1.bf16.msra.mxu1 %v9149_v60  ;;  %v3376_v60 = vld [vmem:[#allocation3 + $0x828] sm:$0xff]  ;;  %v4227_v7 = vld [vmem:[#allocation3 + $0xb18] sm:$0xff] }
 0x158   :  { %3776 = vmatprep.subr.bf16.mxu0 %v9164_v61  ;;  %3817 = vmatprep.subr.bf16.mxu1 %v9166_v63  ;;  %v3384_v61 = vld [vmem:[#allocation3 + $0x868] sm:$0xff]  ;;  %v4235_v3 = vld [vmem:[#allocation3 + $0xb58] sm:$0xff] }
 0x159   :  { %v9126_v5 = vcombine.high %v3376_v60, %v3384_v61 }
 0x15b   :  { %3777 = vmatpush1.bf16.msra.mxu0 %v9163_v9  ;;  %3818 = vmatpush1.bf16.msra.mxu1 %v9165_v13  ;;  %v3399_v9 = vld [vmem:[#allocation3 + $0x8e0] sm:$0xff]  ;;  %v3400_v13 = vld [vmem:[#allocation3 + $0x8e8] sm:$0xff] }
 0x15c   :  { %3852 = vmatprep.subr.bf16.mxu0 %v9120_v14  ;;  %3893 = vmatprep.subr.bf16.mxu1 %v9122_v15  ;;  %v9123_v14 = vcombine.low %v3375_v55, %v3383_v56  ;;  %v9125_v15 = vcombine.low %v3376_v60, %v3384_v61  ;;  %v9140_v17 = vcombine.high %v3391_v8, %v3399_v9 }
 0x15d   :  { %v9142_v19 = vcombine.high %v3392_v10, %v3400_v13 }
 0x15e   :  { %9179 = vmatmul.mubr.msk.bf16.vlgmr.msra.gmra.mrb[64].mxu0 %vm483_vm1, %v10489_v20  ;;  %9180 = vmatmul.mubr.msk.bf16.vlgmr.msra.gmra.mrb[64].mxu1 %vm483_vm1, %v10489_v20 }
 0x15f   :  { %3853 = vmatpush1.bf16.msra.mxu0 %v9119_v24  ;;  %3894 = vmatpush1.bf16.msra.mxu1 %v9121_v25  ;;  %v3408_v24 = vld [vmem:[#allocation3 + $0x928] sm:$0xff] }
 0x160   :  { %3854 = vmatprep.subr.bf16.mxu0 %v9136_v26  ;;  %3895 = vmatprep.subr.bf16.mxu1 %v9138_v27  ;;  %v3416_v25 = vld [vmem:[#allocation3 + $0x968] sm:$0xff]  ;;  %v9139_v26 = vcombine.low %v3391_v8, %v3399_v9  ;;  %v9141_v27 = vcombine.low %v3392_v10, %v3400_v13  ;;  %v3394_v8 = vld [vmem:[#allocation3 + $0x8b8] sm:$0xff] }
 0x161   :  { %v767_v37 = vpop.f32.mrb[12].mxu0  ;;  %3884 = vmatprep.mubr.bf16.mxu0 %v10231_v0  ;;  %v808_v40 = vpop.f32.mrb[12].mxu1  ;;  %3925 = vmatprep.mubr.bf16.mxu1 %v10231_v0  ;;  %v9158_v31 = vcombine.high %v3408_v24, %v3416_v25  ;;  %v3402_v9 = vld [vmem:[#allocation3 + $0x8f8] sm:$0xff] }
 0x162   :  { %v769_v41 = vpop.f32.mrb[13].mxu0  ;;  %v810_v45 = vpop.f32.mrb[13].mxu1  ;;  %v9145_v28 = vcombine.low %v3394_v8, %v3402_v9 }
 0x163   :  { %v882_v44 = vcombine.low %v767_v37, %v769_v41  ;;  %v771_v46 = vpop.f32.mrb[14].mxu0  ;;  %3855 = vmatpush1.bf16.msra.mxu0 %v9135_v34  ;;  %v883_v49 = vcombine.low %v808_v40, %v810_v45  ;;  %v812_v50 = vpop.f32.mrb[14].mxu1  ;;  %3896 = vmatpush1.bf16.msra.mxu1 %v9137_v35  ;;  %v3431_v34 = vld [vmem:[#allocation3 + $0x9e0] sm:$0xff]  ;;  %v3424_v37 = vld [vmem:[#allocation3 + $0x9a8] sm:$0xff]  ;;  %v9155_v41 = vcombine.low %v3407_v21, %v3415_v22  ;;  %v3410_v21 = vld [vmem:[#allocation3 + $0x938] sm:$0xff] }
 0x164   :  { %v772_v18 = vpop.f32.mrb[15].mxu0  ;;  %3856 = vmatprep.subr.bf16.mxu0 %v9152_v36  ;;  %v813_v53 = vpop.f32.mrb[15].mxu1  ;;  %3897 = vmatprep.subr.bf16.mxu1 %v9154_v38  ;;  %v3432_v38 = vld [vmem:[#allocation3 + $0x9e8] sm:$0xff]  ;;  %v9157_v45 = vcombine.low %v3408_v24, %v3416_v25  ;;  %v9172_v46 = vcombine.high %v3423_v33, %v3431_v34  ;;  %v9171_v55 = vcombine.low %v3423_v33, %v3431_v34  ;;  %v3418_v22 = vld [vmem:[#allocation3 + $0x978] sm:$0xff] }
 0x165   :  { %v10498_v52 = vrot.slane %v882_v44, %v10442_v4  ;;  %v10501_v58 = vrot.slane %v883_v49, %v10442_v4  ;;  %v9174_v50 = vcombine.high %v3424_v37, %v3432_v38  ;;  %v3377_v18 = vld [vmem:[#allocation3 + $0x830] sm:$0xff]  ;;  %v3378_v53 = vld [vmem:[#allocation3 + $0x838] sm:$0xff]  ;;  %v9173_v60 = vcombine.low %v3424_v37, %v3432_v38 }
 0x166   :  { %v9162_v25 = vcombine.high %v3410_v21, %v3418_v22  ;;  %v3434_v33 = vld [vmem:[#allocation3 + $0x9f8] sm:$0xff] }
 0x167   :  { %3857 = vmatpush1.bf16.msra.mxu0 %v9151_v48  ;;  %v898_v63 = vcombine.low %v10498_v52, %v10501_v58  ;;  %3898 = vmatpush1.bf16.msra.mxu1 %v9153_v59  ;;  %v3385_v59 = vld [vmem:[#allocation3 + $0x870] sm:$0xff] }
 0x168   :  { %3858 = vmatprep.subr.bf16.mxu0 %v9168_v51  ;;  %3899 = vmatprep.subr.bf16.mxu1 %v9170_v54  ;;  %v3386_v54 = vld [vmem:[#allocation3 + $0x878] sm:$0xff]  ;;  %v9128_v61 = vcombine.high %v3377_v18, %v3385_v59  ;;  %v9127_v10 = vcombine.low %v3377_v18, %v3385_v59 }
 0x169   :  { %v9129_v13 = vcombine.low %v3378_v53, %v3386_v54 }
 0x16b   :  { %3859 = vmatpush1.bf16.msra.mxu0 %v9167_v62  ;;  %3900 = vmatpush1.bf16.msra.mxu1 %v9169_v1  ;;  %v9130_v62 = vcombine.high %v3378_v53, %v3386_v54  ;;  %v3393_v1 = vld [vmem:[#allocation3 + $0x8b0] sm:$0xff] }
 0x16c   :  { %3934 = vmatprep.subr.bf16.mxu0 %v9124_v2  ;;  %3975 = vmatprep.subr.bf16.mxu1 %v9126_v5  ;;  %v3401_v2 = vld [vmem:[#allocation3 + $0x8f0] sm:$0xff] }
 0x16d   :  { %v9143_v23 = vcombine.low %v3393_v1, %v3401_v2 }
 0x16e   :  { %9181 = vmatmul.mubr.msk.bf16.vlgmr.msra.gmra.mrb[68].mxu0 %vm483_vm1, %v10489_v20  ;;  %9182 = vmatmul.mubr.msk.bf16.vlgmr.msra.gmra.mrb[68].mxu1 %vm483_vm1, %v10489_v20 }
 0x16f   :  { %3935 = vmatpush1.bf16.msra.mxu0 %v9123_v14  ;;  %3976 = vmatpush1.bf16.msra.mxu1 %v9125_v15  ;;  %v9144_v14 = vcombine.high %v3393_v1, %v3401_v2  ;;  %v9146_v15 = vcombine.high %v3394_v8, %v3402_v9  ;;  %v9715_v2 = vld [vmem:[%s10873_s0] ss:$0 sps:$4 sm:$0x44]   ;;  %v9716_v8 = vld [vmem:[%s10873_s0 + $0x4] ss:$0 sps:$4 sm:$0x44]  }
 0x170   :  { %3936 = vmatprep.subr.bf16.mxu0 %v9140_v17  ;;  %3977 = vmatprep.subr.bf16.mxu1 %v9142_v19  ;;  %v3409_v17 = vld [vmem:[#allocation3 + $0x930] sm:$0xff] }
 0x171   :  { %v1341_v30 = vpop.f32.mrb[16].mxu0  ;;  %3966 = vmatprep.mubr.bf16.mxu0 %v10231_v0  ;;  %v1382_v35 = vpop.f32.mrb[16].mxu1  ;;  %4007 = vmatprep.mubr.bf16.mxu1 %v10231_v0  ;;  %v3417_v19 = vld [vmem:[#allocation3 + $0x970] sm:$0xff] }
 0x172   :  { %v1343_v36 = vpop.f32.mrb[17].mxu0  ;;  %v1384_v47 = vpop.f32.mrb[17].mxu1  ;;  %v9159_v37 = vcombine.low %v3409_v17, %v3417_v19 }
 0x173   :  { %v1651_v39 = vcombine.low %v1341_v30, %v1343_v36  ;;  %v1345_v40 = vpop.f32.mrb[18].mxu0  ;;  %3937 = vmatpush1.bf16.msra.mxu0 %v9139_v26  ;;  %v1652_v42 = vcombine.low %v1382_v35, %v1384_v47  ;;  %v1386_v43 = vpop.f32.mrb[18].mxu1  ;;  %3978 = vmatpush1.bf16.msra.mxu1 %v9141_v27  ;;  %v3425_v26 = vld [vmem:[#allocation3 + $0x9b0] sm:$0xff] }
 0x174   :  { %v1346_v44 = vpop.f32.mrb[19].mxu0  ;;  %3938 = vmatprep.subr.bf16.mxu0 %v9156_v29  ;;  %v1387_v49 = vpop.f32.mrb[19].mxu1  ;;  %3979 = vmatprep.subr.bf16.mxu1 %v9158_v31  ;;  %v3433_v27 = vld [vmem:[#allocation3 + $0x9f0] sm:$0xff]  ;;  %v3426_v31 = vld [vmem:[#allocation3 + $0x9b8] sm:$0xff]  ;;  %v9161_v40 = vcombine.low %v3410_v21, %v3418_v22 }
 0x175   :  { %v1659_v48 = vrot.slane %v1651_v39, %v10442_v4  ;;  %v1666_v51 = vrot.slane %v1652_v42, %v10442_v4  ;;  %v9178_v44 = vcombine.high %v3426_v31, %v3434_v33  ;;  %v4193_v49 = vld [vmem:[#allocation3 + $0xa08] sm:$0xff]  ;;  %v9175_v18 = vcombine.low %v3425_v26, %v3433_v27 }
 0x177   :  { %3939 = vmatpush1.bf16.msra.mxu0 %v9155_v41  ;;  %v1667_v56 = vcombine.low %v1659_v48, %v1666_v51  ;;  %3980 = vmatpush1.bf16.msra.mxu1 %v9157_v45  ;;  %v9176_v41 = vcombine.high %v3425_v26, %v3433_v27  ;;  %v4192_v45 = vld [vmem:[#allocation3 + $0xa00] sm:$0xff]  ;;  %v9177_v51 = vcombine.low %v3426_v31, %v3434_v33  ;;  %v4241_v27 = vld [vmem:[#allocation3 + $0xb88] sm:$0xff] }
 0x178   :  { %3940 = vmatprep.subr.bf16.mxu0 %v9172_v46  ;;  %3981 = vmatprep.subr.bf16.mxu1 %v9174_v50  ;;  %v4200_v46 = vld [vmem:[#allocation3 + $0xa40] sm:$0xff]  ;;  %v4201_v50 = vld [vmem:[#allocation3 + $0xa48] sm:$0xff] }
 0x179   :  { %v10516_v5 = vadd.f32 %v1667_v56, %v847_v32  ;;  %v9160_v32 = vcombine.high %v3409_v17, %v3417_v19  ;;  %v9190_v53 = vcombine.high %v4192_v45, %v4200_v46  ;;  %v9192_v54 = vcombine.high %v4193_v49, %v4201_v50  ;;  %v4216_v56 = vld [vmem:[#allocation3 + $0xac0] sm:$0xff] }
 0x17a   :  { %v9189_v1 = vcombine.low %v4192_v45, %v4200_v46  ;;  %v9191_v9 = vcombine.low %v4193_v49, %v4201_v50  ;;  %v4262_v17 = vunpack.c.l.b16 %v9715_v2  ;;  %v4263_v19 = vunpack.c.l.b16 %v9716_v8  ;;  %v4195_v46 = vld [vmem:[#allocation3 + $0xa18] sm:$0xff] }
 0x17b   :  { %3941 = vmatpush1.bf16.msra.mxu0 %v9171_v55  ;;  %3982 = vmatpush1.bf16.msra.mxu1 %v9173_v60  ;;  %v4208_v55 = vld [vmem:[#allocation3 + $0xa80] sm:$0xff] }
 0x17c   :  { %4016 = vmatprep.subr.bf16.mxu0 %v9128_v61  ;;  %4057 = vmatprep.subr.bf16.mxu1 %v9130_v62  ;;  %v4209_v61 = vld [vmem:[#allocation3 + $0xa88] sm:$0xff] }
 0x17d   :  { %v4217_v62 = vld [vmem:[#allocation3 + $0xac8] sm:$0xff] }
 0x17e   :  { %9183 = vmatmul.mubr.msk.bf16.vlgmr.msra.gmra.mrb[72].mxu0 %vm483_vm1, %v10489_v20  ;;  %9184 = vmatmul.mubr.msk.bf16.vlgmr.msra.gmra.mrb[72].mxu1 %vm483_vm1, %v10489_v20  ;;  %v9208_v6 = vcombine.high %v4209_v61, %v4217_v62  ;;  %v9207_v21 = vcombine.low %v4209_v61, %v4217_v62  ;;  %v4211_v62 = vld [vmem:[#allocation3 + $0xa98] sm:$0xff] }
 0x17f   :  { %4017 = vmatpush1.bf16.msra.mxu0 %v9127_v10  ;;  %4058 = vmatpush1.bf16.msra.mxu1 %v9129_v13  ;;  %v9206_v10 = vcombine.high %v4208_v55, %v4216_v56  ;;  %v4225_v13 = vld [vmem:[#allocation3 + $0xb08] sm:$0xff] }
 0x180   :  { %4018 = vmatprep.subr.bf16.mxu0 %v9144_v14  ;;  %4059 = vmatprep.subr.bf16.mxu1 %v9146_v15  ;;  %v4233_v14 = vld [vmem:[#allocation3 + $0xb48] sm:$0xff]  ;;  %v9205_v15 = vcombine.low %v4208_v55, %v4216_v56  ;;  %v4218_v55 = vld [vmem:[#allocation3 + $0xad0] sm:$0xff] }
 0x181   :  { %v1423_v24 = vpop.f32.mrb[20].mxu0  ;;  %4048 = vmatprep.mubr.bf16.mxu0 %v10231_v0  ;;  %v1464_v29 = vpop.f32.mrb[20].mxu1  ;;  %4089 = vmatprep.mubr.bf16.mxu1 %v10231_v0 }
 0x182   :  { %v1425_v30 = vpop.f32.mrb[21].mxu0  ;;  %v1466_v35 = vpop.f32.mrb[21].mxu1 }
 0x183   :  { %v1668_v34 = vcombine.low %v1423_v24, %v1425_v30  ;;  %v1427_v36 = vpop.f32.mrb[22].mxu0  ;;  %4019 = vmatpush1.bf16.msra.mxu0 %v9143_v23  ;;  %v1669_v38 = vcombine.low %v1464_v29, %v1466_v35  ;;  %v1468_v39 = vpop.f32.mrb[22].mxu1  ;;  %4060 = vmatpush1.bf16.msra.mxu1 %v9145_v28  ;;  %v9224_v28 = vcombine.high %v4225_v13, %v4233_v14  ;;  %v4248_v24 = vld [vmem:[#allocation3 + $0xbc0] sm:$0xff]  ;;  %v4249_v29 = vld [vmem:[#allocation3 + $0xbc8] sm:$0xff]  ;;  %v4265_v35 = vrot.slane %v4263_v19, 4  ;;  %v4250_v19 = vld [vmem:[#allocation3 + $0xbd0] sm:$0xff] }
 0x184   :  { %v1428_v47 = vpop.f32.mrb[23].mxu0  ;;  %4020 = vmatprep.subr.bf16.mxu0 %v9160_v32  ;;  %v1469_v43 = vpop.f32.mrb[23].mxu1  ;;  %4061 = vmatprep.subr.bf16.mxu1 %v9162_v25  ;;  %v4240_v32 = vld [vmem:[#allocation3 + $0xb80] sm:$0xff]  ;;  %v9223_v39 = vcombine.low %v4225_v13, %v4233_v14 }
 0x185   :  { %v1676_v42 = vrot.slane %v1668_v34, %v10442_v4  ;;  %v1683_v48 = vrot.slane %v1669_v38, %v10442_v4  ;;  %v4264_v34 = vrot.slane %v4262_v17, 5  ;;  %v9238_v47 = vcombine.high %v4240_v32, %v4248_v24  ;;  %v4194_v43 = vld [vmem:[#allocation3 + $0xa10] sm:$0xff] }
 0x186   :  { %v9237_v49 = vcombine.low %v4240_v32, %v4248_v24  ;;  %v4242_v17 = vld [vmem:[#allocation3 + $0xb90] sm:$0xff] }
 0x187   :  { %4021 = vmatpush1.bf16.msra.mxu0 %v9159_v37  ;;  %v1684_v59 = vcombine.low %v1676_v42, %v1683_v48  ;;  %4062 = vmatpush1.bf16.msra.mxu1 %v9161_v40  ;;  %v9240_v42 = vcombine.high %v4241_v27, %v4249_v29  ;;  %v4203_v48 = vld [vmem:[#allocation3 + $0xa58] sm:$0xff]  ;;  %v4266_v50 = vsel %vm160_vm0, %v4265_v35, %v4264_v34 }
 0x188   :  { %4022 = vmatprep.subr.bf16.mxu0 %v9176_v41  ;;  %4063 = vmatprep.subr.bf16.mxu1 %v9178_v44  ;;  %v4202_v44 = vld [vmem:[#allocation3 + $0xa50] sm:$0xff]  ;;  %v10551_v61 = vpack.c.b16 %v4266_v50, %v4266_v50  ;;  %v9195_v8 = vcombine.low %v4195_v46, %v4203_v48  ;;  %v4221_v50 = vld [vmem:[#allocation3 + $0xae8] sm:$0xff] }
 0x189   :  { %v10529_v60 = vadd.f32 %v1684_v59, %v864_v16  ;;  %v4232_v16 = vld [vmem:[#allocation3 + $0xb40] sm:$0xff]  ;;  %v9239_v59 = vcombine.low %v4241_v27, %v4249_v29  ;;  %v9193_v2 = vcombine.low %v4194_v43, %v4202_v44 }
 0x18a   :  { %v9222_v22 = vcombine.high %v4224_v12, %v4232_v16  ;;  %v9221_v33 = vcombine.low %v4224_v12, %v4232_v16  ;;  %v4234_v12 = vld [vmem:[#allocation3 + $0xb50] sm:$0xff] }
 0x18b   :  { %4023 = vmatpush1.bf16.msra.mxu0 %v9175_v18  ;;  %4064 = vmatpush1.bf16.msra.mxu1 %v9177_v51  ;;  %v9194_v51 = vcombine.high %v4194_v43, %v4202_v44 }
 0x18c   :  { %4591 = vmatprep.subr.bf16.mxu0 %v9190_v53  ;;  %4632 = vmatprep.subr.bf16.mxu1 %v9192_v54  ;;  %v9196_v53 = vcombine.high %v4195_v46, %v4203_v48  ;;  %v4210_v54 = vld [vmem:[#allocation3 + $0xa90] sm:$0xff]  ;;  %v4220_v46 = vld [vmem:[#allocation3 + $0xae0] sm:$0xff] }
 0x18e   :  { %9185 = vmatmul.mubr.msk.bf16.vlgmr.msra.gmra.mrb[76].mxu0 %vm483_vm1, %v10489_v20  ;;  %9186 = vmatmul.mubr.msk.bf16.vlgmr.msra.gmra.mrb[76].mxu1 %vm483_vm1, %v10489_v20 }
 0x18f   :  { %4592 = vmatpush1.bf16.msra.mxu0 %v9189_v1  ;;  %4633 = vmatpush1.bf16.msra.mxu1 %v9191_v9  ;;  %v4219_v1 = vld [vmem:[#allocation3 + $0xad8] sm:$0xff]  ;;  %v9210_v9 = vcombine.high %v4210_v54, %v4218_v55 }
 0x190   :  { %4593 = vmatprep.subr.bf16.mxu0 %v9206_v10  ;;  %4634 = vmatprep.subr.bf16.mxu1 %v9208_v6  ;;  %v9212_v10 = vcombine.high %v4211_v62, %v4219_v1  ;;  %v4226_v6 = vld [vmem:[#allocation3 + $0xb10] sm:$0xff]  ;;  %v9211_v16 = vcombine.low %v4211_v62, %v4219_v1  ;;  %v4229_v62 = vld [vmem:[#allocation3 + $0xb28] sm:$0xff] }
 0x191   :  { %v1505_v23 = vpop.f32.mrb[24].mxu0  ;;  %4623 = vmatprep.mubr.bf16.mxu0 %v10231_v0  ;;  %v1546_v25 = vpop.f32.mrb[24].mxu1  ;;  %4664 = vmatprep.mubr.bf16.mxu1 %v10231_v0  ;;  %v9226_v13 = vcombine.high %v4226_v6, %v4234_v12  ;;  %v4237_v1 = vld [vmem:[#allocation3 + $0xb68] sm:$0xff] }
 0x192   :  { %v1507_v26 = vpop.f32.mrb[25].mxu0  ;;  %v1548_v30 = vpop.f32.mrb[25].mxu1 }
 0x193   :  { %v1685_v20 = vcombine.low %v1505_v23, %v1507_v26  ;;  %v1509_v31 = vpop.f32.mrb[26].mxu0  ;;  %4594 = vmatpush1.bf16.msra.mxu0 %v9205_v15  ;;  %v1686_v36 = vcombine.low %v1546_v25, %v1548_v30  ;;  %v1550_v37 = vpop.f32.mrb[26].mxu1  ;;  %4635 = vmatpush1.bf16.msra.mxu1 %v9207_v21  ;;  %v9228_v15 = vcombine.high %v4227_v7, %v4235_v3  ;;  %v4243_v23 = vld [vmem:[#allocation3 + $0xb98] sm:$0xff] }
 0x194   :  { %v1510_v38 = vpop.f32.mrb[27].mxu0  ;;  %4595 = vmatprep.subr.bf16.mxu0 %v9222_v22  ;;  %v1551_v41 = vpop.f32.mrb[27].mxu1  ;;  %4636 = vmatprep.subr.bf16.mxu1 %v9224_v28  ;;  %v4251_v28 = vld [vmem:[#allocation3 + $0xbd8] sm:$0xff]  ;;  %v9225_v26 = vcombine.low %v4226_v6, %v4234_v12  ;;  %v9227_v30 = vcombine.low %v4227_v7, %v4235_v3  ;;  %v9242_v31 = vcombine.high %v4242_v17, %v4250_v19  ;;  %v4204_v37 = vld [vmem:[#allocation3 + $0xa60] sm:$0xff]  ;;  %v4245_v7 = vld [vmem:[#allocation3 + $0xba8] sm:$0xff] }
 0x195   :  { %v1693_v40 = vrot.slane %v1685_v20, %v10442_v4  ;;  %v1700_v45 = vrot.slane %v1686_v36, %v10442_v4  ;;  %v9244_v35 = vcombine.high %v4243_v23, %v4251_v28  ;;  %v4196_v36 = vld [vmem:[#allocation3 + $0xa20] sm:$0xff]  ;;  %v4253_v3 = vld [vmem:[#allocation3 + $0xbe8] sm:$0xff] }
 0x196   :  { %v9198_v43 = vcombine.high %v4196_v36, %v4204_v37 }
 0x197   :  { %4596 = vmatpush1.bf16.msra.mxu0 %v9221_v33  ;;  %v1701_v18 = vcombine.low %v1693_v40, %v1700_v45  ;;  %4637 = vmatpush1.bf16.msra.mxu1 %v9223_v39  ;;  %v4197_v39 = vld [vmem:[#allocation3 + $0xa28] sm:$0xff]  ;;  %v9241_v40 = vcombine.low %v4242_v17, %v4250_v19  ;;  %v4212_v45 = vld [vmem:[#allocation3 + $0xaa0] sm:$0xff] }
 0x198   :  { %4597 = vmatprep.subr.bf16.mxu0 %v9238_v47  ;;  %4638 = vmatprep.subr.bf16.mxu1 %v9240_v42  ;;  %v4205_v47 = vld [vmem:[#allocation3 + $0xa68] sm:$0xff]  ;;  %v9243_v42 = vcombine.low %v4243_v23, %v4251_v28  ;;  %v9213_v52 = vcombine.low %v4212_v45, %v4220_v46 }
 0x199   :  { %v10549_v56 = vadd.f32 %v1701_v18, %v881_v11  ;;  %v9209_v11 = vcombine.low %v4210_v54, %v4218_v55  ;;  %v9200_v44 = vcombine.high %v4197_v39, %v4205_v47  ;;  %v9197_v18 = vcombine.low %v4196_v36, %v4204_v37  ;;  %v4228_v54 = vld [vmem:[#allocation3 + $0xb20] sm:$0xff]  ;;  %v4222_v36 = vld [vmem:[#allocation3 + $0xaf0] sm:$0xff] }
 0x19a   :  { %v4236_v55 = vld [vmem:[#allocation3 + $0xb60] sm:$0xff] }
 0x19b   :  { %4598 = vmatpush1.bf16.msra.mxu0 %v9237_v49  ;;  %4639 = vmatpush1.bf16.msra.mxu1 %v9239_v59  ;;  %v4213_v49 = vld [vmem:[#allocation3 + $0xaa8] sm:$0xff]  ;;  %v9199_v59 = vcombine.low %v4197_v39, %v4205_v47  ;;  %v4223_v39 = vld [vmem:[#allocation3 + $0xaf8] sm:$0xff] }
 0x19c   :  { %4673 = vmatprep.subr.bf16.mxu0 %v9194_v51  ;;  %4714 = vmatprep.subr.bf16.mxu1 %v9196_v53  ;;  %v9214_v51 = vcombine.high %v4212_v45, %v4220_v46  ;;  %v9216_v53 = vcombine.high %v4213_v49, %v4221_v50  ;;  %v9215_v58 = vcombine.low %v4213_v49, %v4221_v50  ;;  %v4231_v45 = vld [vmem:[#allocation3 + $0xb38] sm:$0xff] }
 0x19d   :  { %v4239_v46 = vld [vmem:[#allocation3 + $0xb78] sm:$0xff] }
 0x19e   :  { %9253 = vmatmul.mubr.msk.bf16.vlgmr.msra.gmra.mrb[80].mxu0 %vm483_vm1, %v10551_v61  ;;  %9254 = vmatmul.mubr.msk.bf16.vlgmr.msra.gmra.mrb[80].mxu1 %vm483_vm1, %v10551_v61 }
 0x19f   :  { %4674 = vmatpush1.bf16.msra.mxu0 %v9193_v2  ;;  %4715 = vmatpush1.bf16.msra.mxu1 %v9195_v8  ;;  %v9232_v8 = vcombine.high %v4229_v62, %v4237_v1 }
 0x1a0   :  { %4675 = vmatprep.subr.bf16.mxu0 %v9210_v9  ;;  %4716 = vmatprep.subr.bf16.mxu1 %v9212_v10  ;;  %v4244_v9 = vld [vmem:[#allocation3 + $0xba0] sm:$0xff] }
 0x1a1   :  { %v1587_v14 = vpop.f32.mrb[28].mxu0  ;;  %4705 = vmatprep.mubr.bf16.mxu0 %v10231_v0  ;;  %v1628_v21 = vpop.f32.mrb[28].mxu1  ;;  %4746 = vmatprep.mubr.bf16.mxu1 %v10231_v0  ;;  %v4252_v10 = vld [vmem:[#allocation3 + $0xbe0] sm:$0xff] }
 0x1a2   :  { %v1589_v22 = vpop.f32.mrb[29].mxu0  ;;  %v1630_v24 = vpop.f32.mrb[29].mxu1 }
 0x1a3   :  { %v1702_v32 = vcombine.low %v1587_v14, %v1589_v22  ;;  %v1591_v25 = vpop.f32.mrb[30].mxu0  ;;  %4676 = vmatpush1.bf16.msra.mxu0 %v9209_v11  ;;  %v1703_v27 = vcombine.low %v1628_v21, %v1630_v24  ;;  %v1632_v29 = vpop.f32.mrb[30].mxu1  ;;  %4717 = vmatpush1.bf16.msra.mxu1 %v9211_v16  ;;  %v9229_v14 = vcombine.low %v4228_v54, %v4236_v55  ;;  %v4198_v24 = vld [vmem:[#allocation3 + $0xa30] sm:$0xff] }
 0x1a4   :  { %v1592_v20 = vpop.f32.mrb[31].mxu0  ;;  %4677 = vmatprep.subr.bf16.mxu0 %v9226_v13  ;;  %v1633_v34 = vpop.f32.mrb[31].mxu1  ;;  %4718 = vmatprep.subr.bf16.mxu1 %v9228_v15  ;;  %v9231_v21 = vcombine.low %v4229_v62, %v4237_v1  ;;  %v9246_v22 = vcombine.high %v4244_v9, %v4252_v10  ;;  %v4206_v25 = vld [vmem:[#allocation3 + $0xa70] sm:$0xff]  ;;  %v4207_v29 = vld [vmem:[#allocation3 + $0xa78] sm:$0xff] }
 0x1a5   :  { %v1710_v33 = vrot.slane %v1702_v32, %v10442_v4  ;;  %v1717_v38 = vrot.slane %v1703_v27, %v10442_v4  ;;  %v9248_v32 = vcombine.high %v4245_v7, %v4253_v3  ;;  %v4199_v27 = vld [vmem:[#allocation3 + $0xa38] sm:$0xff]  ;;  %v9245_v20 = vcombine.low %v4244_v9, %v4252_v10 }
 0x1a6   :  { %v9204_v34 = vcombine.high %v4199_v27, %v4207_v29  ;;  %v9201_v47 = vcombine.low %v4198_v24, %v4206_v25  ;;  %v4247_v62 = vld [vmem:[#allocation3 + $0xbb8] sm:$0xff] }
 0x1a7   :  { %4678 = vmatpush1.bf16.msra.mxu0 %v9225_v26  ;;  %v1718_v41 = vcombine.low %v1710_v33, %v1717_v38  ;;  %4719 = vmatpush1.bf16.msra.mxu1 %v9227_v30  ;;  %v9202_v33 = vcombine.high %v4198_v24, %v4206_v25  ;;  %v4215_v38 = vld [vmem:[#allocation3 + $0xab8] sm:$0xff]  ;;  %v5037_v24 = vld [vmem:[#allocation3 + $0xcc0] sm:$0xff] }
 0x1a8   :  { %4679 = vmatprep.subr.bf16.mxu0 %v9242_v31  ;;  %4720 = vmatprep.subr.bf16.mxu1 %v9244_v35  ;;  %v9247_v31 = vcombine.low %v4245_v7, %v4253_v3  ;;  %v4214_v35 = vld [vmem:[#allocation3 + $0xab0] sm:$0xff]  ;;  %v9219_v49 = vcombine.low %v4215_v38, %v4223_v39  ;;  %v4255_v1 = vld [vmem:[#allocation3 + $0xbf8] sm:$0xff] }
 0x1a9   :  { %v10564_v48 = vadd.f32 %v1718_v41, %v898_v63  ;;  %v9230_v63 = vcombine.high %v4228_v54, %v4236_v55  ;;  %v9218_v41 = vcombine.high %v4214_v35, %v4222_v36 }
 0x1ab   :  { %4680 = vmatpush1.bf16.msra.mxu0 %v9241_v40  ;;  %4721 = vmatpush1.bf16.msra.mxu1 %v9243_v42  ;;  %v9203_v40 = vcombine.low %v4199_v27, %v4207_v29  ;;  %v9220_v42 = vcombine.high %v4215_v38, %v4223_v39  ;;  %v5038_v27 = vld [vmem:[#allocation3 + $0xcc8] sm:$0xff] }
 0x1ac   :  { %4755 = vmatprep.subr.bf16.mxu0 %v9198_v43  ;;  %4796 = vmatprep.subr.bf16.mxu1 %v9200_v44  ;;  %v4230_v43 = vld [vmem:[#allocation3 + $0xb30] sm:$0xff]  ;;  %v5054_v38 = vld [vmem:[#allocation3 + $0xd48] sm:$0xff] }
 0x1ad   :  { %v4238_v44 = vld [vmem:[#allocation3 + $0xb70] sm:$0xff] }
 0x1ae   :  { %9255 = vmatmul.mubr.msk.bf16.vlgmr.msra.gmra.mrb[84].mxu0 %vm483_vm1, %v10551_v61  ;;  %9256 = vmatmul.mubr.msk.bf16.vlgmr.msra.gmra.mrb[84].mxu1 %vm483_vm1, %v10551_v61  ;;  %v9234_v50 = vcombine.high %v4230_v43, %v4238_v44 }
 0x1af   :  { %4756 = vmatpush1.bf16.msra.mxu0 %v9197_v18  ;;  %4797 = vmatpush1.bf16.msra.mxu1 %v9199_v59  ;;  %v9236_v59 = vcombine.high %v4231_v45, %v4239_v46 }
 0x1b0   :  { %4757 = vmatprep.subr.bf16.mxu0 %v9214_v51  ;;  %4798 = vmatprep.subr.bf16.mxu1 %v9216_v53  ;;  %v4246_v51 = vld [vmem:[#allocation3 + $0xbb0] sm:$0xff] }
 0x1b1   :  { %v2162_v2 = vpop.f32.mrb[32].mxu0  ;;  %4787 = vmatprep.mubr.bf16.mxu0 %v10231_v0  ;;  %v2203_v6 = vpop.f32.mrb[32].mxu1  ;;  %4828 = vmatprep.mubr.bf16.mxu1 %v10231_v0  ;;  %v4254_v53 = vld [vmem:[#allocation3 + $0xbf0] sm:$0xff] }
 0x1b2   :  { %v2164_v12 = vpop.f32.mrb[33].mxu0  ;;  %v2205_v16 = vpop.f32.mrb[33].mxu1 }
 0x1b3   :  { %v2472_v11 = vcombine.low %v2162_v2, %v2164_v12  ;;  %v2166_v13 = vpop.f32.mrb[34].mxu0  ;;  %4758 = vmatpush1.bf16.msra.mxu0 %v9213_v52  ;;  %v2473_v15 = vcombine.low %v2203_v6, %v2205_v16  ;;  %v2207_v17 = vpop.f32.mrb[34].mxu1  ;;  %4799 = vmatpush1.bf16.msra.mxu1 %v9215_v58  ;;  %v9233_v2 = vcombine.low %v4230_v43, %v4238_v44  ;;  %v5013_v16 = vld [vmem:[#allocation3 + $0xc00] sm:$0xff] }
 0x1b4   :  { %v2167_v19 = vpop.f32.mrb[35].mxu0  ;;  %4759 = vmatprep.subr.bf16.mxu0 %v9230_v63  ;;  %v2208_v28 = vpop.f32.mrb[35].mxu1  ;;  %4800 = vmatprep.subr.bf16.mxu1 %v9232_v8  ;;  %v9235_v6 = vcombine.low %v4231_v45, %v4239_v46  ;;  %v9250_v12 = vcombine.high %v4246_v51, %v4254_v53  ;;  %v5021_v13 = vld [vmem:[#allocation3 + $0xc40] sm:$0xff]  ;;  %v5022_v17 = vld [vmem:[#allocation3 + $0xc48] sm:$0xff] }
 0x1b5   :  { %v2480_v23 = vrot.slane %v2472_v11, %v10442_v4  ;;  %v2487_v26 = vrot.slane %v2473_v15, %v10442_v4  ;;  %v9252_v11 = vcombine.high %v4247_v62, %v4255_v1  ;;  %v5014_v15 = vld [vmem:[#allocation3 + $0xc08] sm:$0xff]  ;;  %v9249_v19 = vcombine.low %v4246_v51, %v4254_v53  ;;  %v5061_v45 = vld [vmem:[#allocation3 + $0xd80] sm:$0xff] }
 0x1b6   :  { %v9266_v28 = vcombine.high %v5014_v15, %v5022_v17  ;;  %v9263_v29 = vcombine.low %v5013_v16, %v5021_v13  ;;  %v5069_v46 = vld [vmem:[#allocation3 + $0xdc0] sm:$0xff] }
 0x1b7   :  { %4760 = vmatpush1.bf16.msra.mxu0 %v9229_v14  ;;  %v2488_v30 = vcombine.low %v2480_v23, %v2487_v26  ;;  %4801 = vmatpush1.bf16.msra.mxu1 %v9231_v21  ;;  %v9264_v23 = vcombine.high %v5013_v16, %v5021_v13  ;;  %v5030_v26 = vld [vmem:[#allocation3 + $0xc88] sm:$0xff] }
 0x1b8   :  { %4761 = vmatprep.subr.bf16.mxu0 %v9246_v22  ;;  %4802 = vmatprep.subr.bf16.mxu1 %v9248_v32  ;;  %v9251_v22 = vcombine.low %v4247_v62, %v4255_v1  ;;  %v5029_v32 = vld [vmem:[#allocation3 + $0xc80] sm:$0xff] }
 0x1b9   :  { %v10575_v37 = vadd.f32 %v2488_v30, %v10516_v5  ;;  %v9217_v5 = vcombine.low %v4214_v35, %v4222_v36  ;;  %v9718_v30 = vld [vmem:[%s10873_s0 + $0x4] ss:$0 sps:$4 sm:$0x88]   ;;  %v5046_v36 = vld [vmem:[#allocation3 + $0xd08] sm:$0xff]  ;;  %v9279_v39 = vcombine.low %v5029_v32, %v5037_v24 }
 0x1ba   :  { %v5053_v35 = vld [vmem:[#allocation3 + $0xd40] sm:$0xff]  ;;  %v9298_v44 = vcombine.high %v5046_v36, %v5054_v38 }
 0x1bb   :  { %4762 = vmatpush1.bf16.msra.mxu0 %v9245_v20  ;;  %4803 = vmatpush1.bf16.msra.mxu1 %v9247_v31  ;;  %v9717_v20 = vld [vmem:[%s10873_s0] ss:$0 sps:$4 sm:$0x88]   ;;  %v9265_v31 = vcombine.low %v5014_v15, %v5022_v17 }
 0x1bc   :  { %4837 = vmatprep.subr.bf16.mxu0 %v9202_v33  ;;  %4878 = vmatprep.subr.bf16.mxu1 %v9204_v34  ;;  %v9280_v33 = vcombine.high %v5029_v32, %v5037_v24  ;;  %v9282_v34 = vcombine.high %v5030_v26, %v5038_v27  ;;  %v5040_v32 = vld [vmem:[#allocation3 + $0xcd8] sm:$0xff] }
 0x1be   :  { %9257 = vmatmul.mubr.msk.bf16.vlgmr.msra.gmra.mrb[88].mxu0 %vm483_vm1, %v10551_v61  ;;  %9258 = vmatmul.mubr.msk.bf16.vlgmr.msra.gmra.mrb[88].mxu1 %vm483_vm1, %v10551_v61 }
 0x1bf   :  { %4838 = vmatpush1.bf16.msra.mxu0 %v9201_v47  ;;  %4879 = vmatpush1.bf16.msra.mxu1 %v9203_v40  ;;  %v5083_v47 = vunpack.c.l.b16 %v9717_v20  ;;  %v5084_v40 = vunpack.c.l.b16 %v9718_v30  ;;  %v5047_v20 = vld [vmem:[#allocation3 + $0xd10] sm:$0xff] }
 0x1c0   :  { %4839 = vmatprep.subr.bf16.mxu0 %v9218_v41  ;;  %4880 = vmatprep.subr.bf16.mxu1 %v9220_v42  ;;  %v9281_v41 = vcombine.low %v5030_v26, %v5038_v27  ;;  %v5055_v30 = vld [vmem:[#allocation3 + $0xd50] sm:$0xff] }
 0x1c1   :  { %v2244_v18 = vpop.f32.mrb[36].mxu0  ;;  %4869 = vmatprep.mubr.bf16.mxu0 %v10231_v0  ;;  %v2285_v54 = vpop.f32.mrb[36].mxu1  ;;  %4910 = vmatprep.mubr.bf16.mxu1 %v10231_v0 }
 0x1c2   :  { %v2246_v55 = vpop.f32.mrb[37].mxu0  ;;  %v2287_v58 = vpop.f32.mrb[37].mxu1 }
 0x1c3   :  { %v2489_v52 = vcombine.low %v2244_v18, %v2246_v55  ;;  %v2248_v63 = vpop.f32.mrb[38].mxu0  ;;  %4840 = vmatpush1.bf16.msra.mxu0 %v9217_v5  ;;  %v2490_v8 = vcombine.low %v2285_v54, %v2287_v58  ;;  %v2289_v9 = vpop.f32.mrb[38].mxu1  ;;  %4881 = vmatpush1.bf16.msra.mxu1 %v9219_v49  ;;  %v5070_v18 = vld [vmem:[#allocation3 + $0xdc8] sm:$0xff]  ;;  %v5085_v54 = vrot.slane %v5083_v47, 6  ;;  %v5086_v55 = vrot.slane %v5084_v40, 5 }
 0x1c4   :  { %v2249_v10 = vpop.f32.mrb[39].mxu0  ;;  %4841 = vmatprep.subr.bf16.mxu0 %v9234_v50  ;;  %v2290_v3 = vpop.f32.mrb[39].mxu1  ;;  %4882 = vmatprep.subr.bf16.mxu1 %v9236_v59  ;;  %v5062_v50 = vld [vmem:[#allocation3 + $0xd88] sm:$0xff]  ;;  %v9297_v58 = vcombine.low %v5046_v36, %v5054_v38  ;;  %v9312_v63 = vcombine.high %v5061_v45, %v5069_v46  ;;  %v5063_v38 = vld [vmem:[#allocation3 + $0xd90] sm:$0xff] }
 0x1c5   :  { %v2497_v7 = vrot.slane %v2489_v52, %v10442_v4  ;;  %v2504_v14 = vrot.slane %v2490_v8, %v10442_v4  ;;  %v9314_v9 = vcombine.high %v5062_v50, %v5070_v18  ;;  %v5015_v10 = vld [vmem:[#allocation3 + $0xc10] sm:$0xff]  ;;  %v5024_v3 = vld [vmem:[#allocation3 + $0xc58] sm:$0xff]  ;;  %v5087_v16 = vsel %vm160_vm0, %v5086_v55, %v5085_v54  ;;  %v5017_v54 = vld [vmem:[#allocation3 + $0xc20] sm:$0xff] }
 0x1c6   :  { %v5025_v55 = vld [vmem:[#allocation3 + $0xc60] sm:$0xff] }
 0x1c7   :  { %4842 = vmatpush1.bf16.msra.mxu0 %v9233_v2  ;;  %v2505_v21 = vcombine.low %v2497_v7, %v2504_v14  ;;  %4883 = vmatpush1.bf16.msra.mxu1 %v9235_v6  ;;  %v5023_v6 = vld [vmem:[#allocation3 + $0xc50] sm:$0xff]  ;;  %v5016_v7 = vld [vmem:[#allocation3 + $0xc18] sm:$0xff]  ;;  %v9313_v14 = vcombine.low %v5062_v50, %v5070_v18 }
 0x1c8   :  { %4843 = vmatprep.subr.bf16.mxu0 %v9250_v12  ;;  %4884 = vmatprep.subr.bf16.mxu1 %v9252_v11  ;;  %v9311_v11 = vcombine.low %v5061_v45, %v5069_v46  ;;  %v9268_v15 = vcombine.high %v5015_v10, %v5023_v6  ;;  %v9270_v17 = vcombine.high %v5016_v7, %v5024_v3 }
 0x1c9   :  { %v10586_v25 = vadd.f32 %v2505_v21, %v10529_v60  ;;  %v5045_v60 = vld [vmem:[#allocation3 + $0xd00] sm:$0xff]  ;;  %v5039_v21 = vld [vmem:[#allocation3 + $0xcd0] sm:$0xff]  ;;  %v9267_v24 = vcombine.low %v5015_v10, %v5023_v6  ;;  %v9269_v26 = vcombine.low %v5016_v7, %v5024_v3  ;;  %v9299_v46 = vcombine.low %v5047_v20, %v5055_v30  ;;  %v5034_v7 = vld [vmem:[#allocation3 + $0xca8] sm:$0xff] }
 0x1ca   :  { %v9296_v42 = vcombine.high %v5045_v60, %v5053_v35  ;;  %v9295_v53 = vcombine.low %v5045_v60, %v5053_v35  ;;  %v9300_v60 = vcombine.high %v5047_v20, %v5055_v30  ;;  %v5033_v10 = vld [vmem:[#allocation3 + $0xca0] sm:$0xff]  ;;  %v5042_v3 = vld [vmem:[#allocation3 + $0xce8] sm:$0xff] }
 0x1cb   :  { %4844 = vmatpush1.bf16.msra.mxu0 %v9249_v19  ;;  %4885 = vmatpush1.bf16.msra.mxu1 %v9251_v22  ;;  %v5031_v19 = vld [vmem:[#allocation3 + $0xc90] sm:$0xff]  ;;  %v5041_v6 = vld [vmem:[#allocation3 + $0xce0] sm:$0xff] }
 0x1cc   :  { %5412 = vmatprep.subr.bf16.mxu0 %v9264_v23  ;;  %5453 = vmatprep.subr.bf16.mxu1 %v9266_v28  ;;  %v10606_v23 = vpack.c.b16 %v5087_v16, %v5087_v16  ;;  %v5032_v28 = vld [vmem:[#allocation3 + $0xc98] sm:$0xff]  ;;  %v9284_v27 = vcombine.high %v5031_v19, %v5039_v21 }
 0x1ce   :  { %9259 = vmatmul.mubr.msk.bf16.vlgmr.msra.gmra.mrb[92].mxu0 %vm483_vm1, %v10551_v61  ;;  %9260 = vmatmul.mubr.msk.bf16.vlgmr.msra.gmra.mrb[92].mxu1 %vm483_vm1, %v10551_v61 }
 0x1cf   :  { %5413 = vmatpush1.bf16.msra.mxu0 %v9263_v29  ;;  %5454 = vmatpush1.bf16.msra.mxu1 %v9265_v31  ;;  %v9286_v29 = vcombine.high %v5032_v28, %v5040_v32  ;;  %v5048_v31 = vld [vmem:[#allocation3 + $0xd18] sm:$0xff] }
 0x1d0   :  { %5414 = vmatprep.subr.bf16.mxu0 %v9280_v33  ;;  %5455 = vmatprep.subr.bf16.mxu1 %v9282_v34  ;;  %v9283_v33 = vcombine.low %v5031_v19, %v5039_v21  ;;  %v9285_v34 = vcombine.low %v5032_v28, %v5040_v32  ;;  %v5050_v19 = vld [vmem:[#allocation3 + $0xd28] sm:$0xff]  ;;  %v9289_v28 = vcombine.low %v5034_v7, %v5042_v3 }
 0x1d1   :  { %v2326_v43 = vpop.f32.mrb[40].mxu0  ;;  %5444 = vmatprep.mubr.bf16.mxu0 %v10231_v0  ;;  %v2367_v5 = vpop.f32.mrb[40].mxu1  ;;  %5485 = vmatprep.mubr.bf16.mxu1 %v10231_v0  ;;  %v5058_v21 = vld [vmem:[#allocation3 + $0xd68] sm:$0xff] }
 0x1d2   :  { %v2328_v49 = vpop.f32.mrb[41].mxu0  ;;  %v2369_v59 = vpop.f32.mrb[41].mxu1 }
 0x1d3   :  { %v2506_v61 = vcombine.low %v2326_v43, %v2328_v49  ;;  %v2330_v51 = vpop.f32.mrb[42].mxu0  ;;  %5415 = vmatpush1.bf16.msra.mxu0 %v9279_v39  ;;  %v2507_v62 = vcombine.low %v2367_v5, %v2369_v59  ;;  %v2371_v1 = vpop.f32.mrb[42].mxu1  ;;  %5456 = vmatpush1.bf16.msra.mxu1 %v9281_v41  ;;  %v5071_v39 = vld [vmem:[#allocation3 + $0xdd0] sm:$0xff]  ;;  %v5064_v41 = vld [vmem:[#allocation3 + $0xd98] sm:$0xff] }
 0x1d4   :  { %v2331_v52 = vpop.f32.mrb[43].mxu0  ;;  %5416 = vmatprep.subr.bf16.mxu0 %v9296_v42  ;;  %v2372_v8 = vpop.f32.mrb[43].mxu1  ;;  %5457 = vmatprep.subr.bf16.mxu1 %v9298_v44  ;;  %v5072_v42 = vld [vmem:[#allocation3 + $0xdd8] sm:$0xff]  ;;  %v5018_v1 = vld [vmem:[#allocation3 + $0xc28] sm:$0xff] }
 0x1d5   :  { %v2514_v2 = vrot.slane %v2506_v61, %v10442_v4  ;;  %v2521_v12 = vrot.slane %v2507_v62, %v10442_v4  ;;  %v9316_v61 = vcombine.high %v5063_v38, %v5071_v39  ;;  %v5026_v52 = vld [vmem:[#allocation3 + $0xc68] sm:$0xff]  ;;  %v9272_v8 = vcombine.high %v5017_v54, %v5025_v55 }
 0x1d6   :  { %v9273_v16 = vcombine.low %v5018_v1, %v5026_v52 }
 0x1d7   :  { %5417 = vmatpush1.bf16.msra.mxu0 %v9295_v53  ;;  %v2522_v13 = vcombine.low %v2514_v2, %v2521_v12  ;;  %5458 = vmatpush1.bf16.msra.mxu1 %v9297_v58  ;;  %v9318_v53 = vcombine.high %v5064_v41, %v5072_v42  ;;  %v9315_v58 = vcombine.low %v5063_v38, %v5071_v39 }
 0x1d8   :  { %5418 = vmatprep.subr.bf16.mxu0 %v9312_v63  ;;  %5459 = vmatprep.subr.bf16.mxu1 %v9314_v9  ;;  %v9317_v2 = vcombine.low %v5064_v41, %v5072_v42  ;;  %v9274_v9 = vcombine.high %v5018_v1, %v5026_v52  ;;  %v5044_v1 = vld [vmem:[#allocation3 + $0xcf8] sm:$0xff] }
 0x1d9   :  { %v10604_v22 = vadd.f32 %v2522_v13, %v10549_v56  ;;  %v5056_v56 = vld [vmem:[#allocation3 + $0xd58] sm:$0xff]  ;;  %v9288_v13 = vcombine.high %v5033_v10, %v5041_v6 }
 0x1da   :  { %v9302_v36 = vcombine.high %v5048_v31, %v5056_v56  ;;  %v9301_v18 = vcombine.low %v5048_v31, %v5056_v56  ;;  %v5066_v31 = vld [vmem:[#allocation3 + $0xda8] sm:$0xff] }
 0x1db   :  { %5419 = vmatpush1.bf16.msra.mxu0 %v9311_v11  ;;  %5460 = vmatpush1.bf16.msra.mxu1 %v9313_v14  ;;  %v9271_v11 = vcombine.low %v5017_v54, %v5025_v55  ;;  %v9290_v14 = vcombine.high %v5034_v7, %v5042_v3  ;;  %v5074_v56 = vld [vmem:[#allocation3 + $0xde8] sm:$0xff]  ;;  %v5043_v54 = vld [vmem:[#allocation3 + $0xcf0] sm:$0xff] }
 0x1dc   :  { %5494 = vmatprep.subr.bf16.mxu0 %v9268_v15  ;;  %5535 = vmatprep.subr.bf16.mxu1 %v9270_v17  ;;  %v5049_v15 = vld [vmem:[#allocation3 + $0xd20] sm:$0xff] }
 0x1dd   :  { %v5057_v17 = vld [vmem:[#allocation3 + $0xd60] sm:$0xff] }
 0x1de   :  { %9327 = vmatmul.mubr.msk.bf16.vlgmr.msra.gmra.mrb[96].mxu0 %vm483_vm1, %v10606_v23  ;;  %9328 = vmatmul.mubr.msk.bf16.vlgmr.msra.gmra.mrb[96].mxu1 %vm483_vm1, %v10606_v23  ;;  %v9304_v32 = vcombine.high %v5049_v15, %v5057_v17 }
 0x1df   :  { %5495 = vmatpush1.bf16.msra.mxu0 %v9267_v24  ;;  %5536 = vmatpush1.bf16.msra.mxu1 %v9269_v26  ;;  %v9306_v26 = vcombine.high %v5050_v19, %v5058_v21 }
 0x1e0   :  { %5496 = vmatprep.subr.bf16.mxu0 %v9284_v27  ;;  %5537 = vmatprep.subr.bf16.mxu1 %v9286_v29  ;;  %v5065_v27 = vld [vmem:[#allocation3 + $0xda0] sm:$0xff] }
 0x1e1   :  { %v2408_v35 = vpop.f32.mrb[44].mxu0  ;;  %5526 = vmatprep.mubr.bf16.mxu0 %v10231_v0  ;;  %v2449_v47 = vpop.f32.mrb[44].mxu1  ;;  %5567 = vmatprep.mubr.bf16.mxu1 %v10231_v0  ;;  %v5073_v29 = vld [vmem:[#allocation3 + $0xde0] sm:$0xff] }
 0x1e2   :  { %v2410_v40 = vpop.f32.mrb[45].mxu0  ;;  %v2451_v44 = vpop.f32.mrb[45].mxu1 }
 0x1e3   :  { %v2523_v43 = vcombine.low %v2408_v35, %v2410_v40  ;;  %v2412_v45 = vpop.f32.mrb[46].mxu0  ;;  %5497 = vmatpush1.bf16.msra.mxu0 %v9283_v33  ;;  %v2524_v5 = vcombine.low %v2449_v47, %v2451_v44  ;;  %v2453_v49 = vpop.f32.mrb[46].mxu1  ;;  %5538 = vmatpush1.bf16.msra.mxu1 %v9285_v34  ;;  %v9303_v35 = vcombine.low %v5049_v15, %v5057_v17  ;;  %v5019_v44 = vld [vmem:[#allocation3 + $0xc30] sm:$0xff] }
 0x1e4   :  { %v2413_v50 = vpop.f32.mrb[47].mxu0  ;;  %5498 = vmatprep.subr.bf16.mxu0 %v9300_v60  ;;  %v2454_v51 = vpop.f32.mrb[47].mxu1  ;;  %5539 = vmatprep.subr.bf16.mxu1 %v9302_v36  ;;  %v9305_v47 = vcombine.low %v5050_v19, %v5058_v21  ;;  %v9320_v40 = vcombine.high %v5065_v27, %v5073_v29  ;;  %v5027_v45 = vld [vmem:[#allocation3 + $0xc70] sm:$0xff]  ;;  %v5028_v49 = vld [vmem:[#allocation3 + $0xc78] sm:$0xff] }
 0x1e5   :  { %v2531_v59 = vrot.slane %v2523_v43, %v10442_v4  ;;  %v2538_v62 = vrot.slane %v2524_v5, %v10442_v4  ;;  %v9322_v43 = vcombine.high %v5066_v31, %v5074_v56  ;;  %v5020_v5 = vld [vmem:[#allocation3 + $0xc38] sm:$0xff]  ;;  %v9319_v50 = vcombine.low %v5065_v27, %v5073_v29 }
 0x1e6   :  { %v9278_v51 = vcombine.high %v5020_v5, %v5028_v49  ;;  %v9275_v52 = vcombine.low %v5019_v44, %v5027_v45  ;;  %v5068_v19 = vld [vmem:[#allocation3 + $0xdb8] sm:$0xff] }
 0x1e7   :  { %5499 = vmatpush1.bf16.msra.mxu0 %v9299_v46  ;;  %v2539_v63 = vcombine.low %v2531_v59, %v2538_v62  ;;  %5540 = vmatpush1.bf16.msra.mxu1 %v9301_v18  ;;  %v9276_v59 = vcombine.high %v5019_v44, %v5027_v45  ;;  %v5036_v62 = vld [vmem:[#allocation3 + $0xcb8] sm:$0xff]  ;;  %v5858_v44 = vld [vmem:[#allocation3 + $0xec0] sm:$0xff] }
 0x1e8   :  { %5500 = vmatprep.subr.bf16.mxu0 %v9316_v61  ;;  %5541 = vmatprep.subr.bf16.mxu1 %v9318_v53  ;;  %v9321_v61 = vcombine.low %v5066_v31, %v5074_v56  ;;  %v5035_v53 = vld [vmem:[#allocation3 + $0xcb0] sm:$0xff]  ;;  %v9293_v7 = vcombine.low %v5036_v62, %v5044_v1  ;;  %v5076_v21 = vld [vmem:[#allocation3 + $0xdf8] sm:$0xff] }
 0x1e9   :  { %v10617_v12 = vadd.f32 %v2539_v63, %v10564_v48  ;;  %v9287_v48 = vcombine.low %v5033_v10, %v5041_v6  ;;  %v9292_v63 = vcombine.high %v5035_v53, %v5043_v54  ;;  %v5052_v10 = vld [vmem:[#allocation3 + $0xd38] sm:$0xff] }
 0x1ea   :  { %v5060_v6 = vld [vmem:[#allocation3 + $0xd78] sm:$0xff] }
 0x1eb   :  { %5501 = vmatpush1.bf16.msra.mxu0 %v9315_v58  ;;  %5542 = vmatpush1.bf16.msra.mxu1 %v9317_v2  ;;  %v9277_v58 = vcombine.low %v5020_v5, %v5028_v49  ;;  %v9294_v2 = vcombine.high %v5036_v62, %v5044_v1  ;;  %v5859_v5 = vld [vmem:[#allocation3 + $0xec8] sm:$0xff] }
 0x1ec   :  { %5576 = vmatprep.subr.bf16.mxu0 %v9272_v8  ;;  %5617 = vmatprep.subr.bf16.mxu1 %v9274_v9  ;;  %v5051_v8 = vld [vmem:[#allocation3 + $0xd30] sm:$0xff]  ;;  %v5875_v62 = vld [vmem:[#allocation3 + $0xf48] sm:$0xff] }
 0x1ed   :  { %v5059_v9 = vld [vmem:[#allocation3 + $0xd70] sm:$0xff] }
 0x1ee   :  { %9329 = vmatmul.mubr.msk.bf16.vlgmr.msra.gmra.mrb[100].mxu0 %vm483_vm1, %v10606_v23  ;;  %9330 = vmatmul.mubr.msk.bf16.vlgmr.msra.gmra.mrb[100].mxu1 %vm483_vm1, %v10606_v23  ;;  %v9308_v3 = vcombine.high %v5051_v8, %v5059_v9 }
 0x1ef   :  { %5577 = vmatpush1.bf16.msra.mxu0 %v9271_v11  ;;  %5618 = vmatpush1.bf16.msra.mxu1 %v9273_v16  ;;  %v9310_v16 = vcombine.high %v5052_v10, %v5060_v6 }
 0x1f0   :  { %5578 = vmatprep.subr.bf16.mxu0 %v9288_v13  ;;  %5619 = vmatprep.subr.bf16.mxu1 %v9290_v14  ;;  %v5067_v13 = vld [vmem:[#allocation3 + $0xdb0] sm:$0xff] }
 0x1f1   :  { %v2983_v24 = vpop.f32.mrb[48].mxu0  ;;  %5608 = vmatprep.mubr.bf16.mxu0 %v10231_v0  ;;  %v3024_v20 = vpop.f32.mrb[48].mxu1  ;;  %5649 = vmatprep.mubr.bf16.mxu1 %v10231_v0  ;;  %v5075_v14 = vld [vmem:[#allocation3 + $0xdf0] sm:$0xff] }
 0x1f2   :  { %v2985_v30 = vpop.f32.mrb[49].mxu0  ;;  %v3026_v34 = vpop.f32.mrb[49].mxu1 }
 0x1f3   :  { %v3293_v33 = vcombine.low %v2983_v24, %v2985_v30  ;;  %v2987_v60 = vpop.f32.mrb[50].mxu0  ;;  %5579 = vmatpush1.bf16.msra.mxu0 %v9287_v48  ;;  %v3294_v36 = vcombine.low %v3024_v20, %v3026_v34  ;;  %v3028_v38 = vpop.f32.mrb[50].mxu1  ;;  %5620 = vmatpush1.bf16.msra.mxu1 %v9289_v28  ;;  %v9307_v24 = vcombine.low %v5051_v8, %v5059_v9  ;;  %v5834_v34 = vld [vmem:[#allocation3 + $0xe00] sm:$0xff] }
 0x1f4   :  { %v2988_v39 = vpop.f32.mrb[51].mxu0  ;;  %5580 = vmatprep.subr.bf16.mxu0 %v9304_v32  ;;  %v3029_v42 = vpop.f32.mrb[51].mxu1  ;;  %5621 = vmatprep.subr.bf16.mxu1 %v9306_v26  ;;  %v9309_v20 = vcombine.low %v5052_v10, %v5060_v6  ;;  %v9324_v30 = vcombine.high %v5067_v13, %v5075_v14  ;;  %v5842_v60 = vld [vmem:[#allocation3 + $0xe40] sm:$0xff]  ;;  %v5843_v38 = vld [vmem:[#allocation3 + $0xe48] sm:$0xff] }
 0x1f5   :  { %v3301_v41 = vrot.slane %v3293_v33, %v10442_v4  ;;  %v3308_v46 = vrot.slane %v3294_v36, %v10442_v4  ;;  %v9326_v33 = vcombine.high %v5068_v19, %v5076_v21  ;;  %v5835_v36 = vld [vmem:[#allocation3 + $0xe08] sm:$0xff]  ;;  %v9323_v39 = vcombine.low %v5067_v13, %v5075_v14  ;;  %v5882_v10 = vld [vmem:[#allocation3 + $0xf80] sm:$0xff] }
 0x1f6   :  { %v9340_v42 = vcombine.high %v5835_v36, %v5843_v38  ;;  %v9337_v49 = vcombine.low %v5834_v34, %v5842_v60  ;;  %v5890_v6 = vld [vmem:[#allocation3 + $0xfc0] sm:$0xff] }
 0x1f7   :  { %5581 = vmatpush1.bf16.msra.mxu0 %v9303_v35  ;;  %v3309_v18 = vcombine.low %v3301_v41, %v3308_v46  ;;  %5622 = vmatpush1.bf16.msra.mxu1 %v9305_v47  ;;  %v9338_v41 = vcombine.high %v5834_v34, %v5842_v60  ;;  %v5851_v46 = vld [vmem:[#allocation3 + $0xe88] sm:$0xff] }
 0x1f8   :  { %5582 = vmatprep.subr.bf16.mxu0 %v9320_v40  ;;  %5623 = vmatprep.subr.bf16.mxu1 %v9322_v43  ;;  %v9325_v40 = vcombine.low %v5068_v19, %v5076_v21  ;;  %v5850_v43 = vld [vmem:[#allocation3 + $0xe80] sm:$0xff] }
 0x1f9   :  { %v10628_v55 = vadd.f32 %v3309_v18, %v10575_v37  ;;  %v9291_v37 = vcombine.low %v5035_v53, %v5043_v54  ;;  %v9720_v18 = vld [vmem:[%s10873_s0 + $0x4] ss:$0 sps:$4 sm:$0x88]   ;;  %v5867_v54 = vld [vmem:[#allocation3 + $0xf08] sm:$0xff]  ;;  %v9353_v1 = vcombine.low %v5850_v43, %v5858_v44 }
 0x1fa   :  { %v5874_v53 = vld [vmem:[#allocation3 + $0xf40] sm:$0xff]  ;;  %v9372_v9 = vcombine.high %v5867_v54, %v5875_v62 }
 0x1fb   :  { %5583 = vmatpush1.bf16.msra.mxu0 %v9319_v50  ;;  %5624 = vmatpush1.bf16.msra.mxu1 %v9321_v61  ;;  %v9719_v50 = vld [vmem:[%s10873_s0] ss:$0 sps:$4 sm:$0x88]   ;;  %v9339_v61 = vcombine.low %v5835_v36, %v5843_v38  ;;  %s10233_s0 = smov [#allocation11]  }
 0x1fc   :  { %5658 = vmatprep.subr.bf16.mxu0 %v9276_v59  ;;  %5699 = vmatprep.subr.bf16.mxu1 %v9278_v51  ;;  %v9354_v59 = vcombine.high %v5850_v43, %v5858_v44  ;;  %v9356_v51 = vcombine.high %v5851_v46, %v5859_v5  ;;  %v5861_v43 = vld [vmem:[#allocation3 + $0xed8] sm:$0xff]  ;;  %s8806_s18 = sshll.u32 %s10233_s0, 4  ;;  %s8807_s18 = int_to_ptr.vmem [resolvable:$true] %s8806_s18 }
 0x1fd   :  { %s10193_s19 = scalar_lea.vmem %s8807_s18, 64  ;;  %p10198_p5 = scmp.lt.s32.totalorder %s8807_s18, %s8807_s18 }
 0x1fe   :  { %9331 = vmatmul.mubr.msk.bf16.vlgmr.msra.gmra.mrb[104].mxu0 %vm483_vm1, %v10606_v23  ;;  %9332 = vmatmul.mubr.msk.bf16.vlgmr.msra.gmra.mrb[104].mxu1 %vm483_vm1, %v10606_v23  ;;  %p10194_p4 = scmp.ne.s32.totalorder %s8807_s18, %s10193_s19  ;;  %p10199_p6 = scmp.lt.s32.totalorder %s10193_s19, %s10193_s19 }
 0x1ff   :  { %5659 = vmatpush1.bf16.msra.mxu0 %v9275_v52  ;;  %5700 = vmatpush1.bf16.msra.mxu1 %v9277_v58  ;;  %v5904_v52 = vunpack.c.l.b16 %v9719_v50  ;;  %v5905_v58 = vunpack.c.l.b16 %v9720_v18  ;;  %v5868_v50 = vld [vmem:[#allocation3 + $0xf10] sm:$0xff] }
 0x200   :  { %5660 = vmatprep.subr.bf16.mxu0 %v9292_v63  ;;  %5701 = vmatprep.subr.bf16.mxu1 %v9294_v2  ;;  %v9355_v63 = vcombine.low %v5851_v46, %v5859_v5  ;;  %v5876_v18 = vld [vmem:[#allocation3 + $0xf50] sm:$0xff]  ;;  %p10200_p7 = por %p10199_p6, %p10198_p5 }
 0x201   :  { %v3065_v11 = vpop.f32.mrb[52].mxu0  ;;  %5690 = vmatprep.mubr.bf16.mxu0 %v10231_v0  ;;  %v3106_v15 = vpop.f32.mrb[52].mxu1  ;;  %5731 = vmatprep.mubr.bf16.mxu1 %v10231_v0 }
 0x202   :  { %v3067_v17 = vpop.f32.mrb[53].mxu0  ;;  %v3108_v28 = vpop.f32.mrb[53].mxu1  ;;  %p10201_p8 = pnand %p10200_p7, %p10194_p4 }
 0x203   :  { %v3310_v48 = vcombine.low %v3065_v11, %v3067_v17  ;;  %v3069_v32 = vpop.f32.mrb[54].mxu0  ;;  %5661 = vmatpush1.bf16.msra.mxu0 %v9291_v37  ;;  %v3311_v26 = vcombine.low %v3106_v15, %v3108_v28  ;;  %v3110_v27 = vpop.f32.mrb[54].mxu1  ;;  %5702 = vmatpush1.bf16.msra.mxu1 %v9293_v7  ;;  %v5891_v11 = vld [vmem:[#allocation3 + $0xfc8] sm:$0xff]  ;;  %v5906_v15 = vrot.slane %v5904_v52, 7  ;;  %v5907_v17 = vrot.slane %v5905_v58, 6 }
 0x204   :  { %v3070_v29 = vpop.f32.mrb[55].mxu0  ;;  %5662 = vmatprep.subr.bf16.mxu0 %v9308_v3  ;;  %v3111_v56 = vpop.f32.mrb[55].mxu1  ;;  %5703 = vmatprep.subr.bf16.mxu1 %v9310_v16  ;;  %v5883_v3 = vld [vmem:[#allocation3 + $0xf88] sm:$0xff]  ;;  %v9371_v28 = vcombine.low %v5867_v54, %v5875_v62  ;;  %v9386_v32 = vcombine.high %v5882_v10, %v5890_v6  ;;  %v5884_v62 = vld [vmem:[#allocation3 + $0xf90] sm:$0xff] }
 0x205   :  { %v3318_v31 = vrot.slane %v3310_v48, %v10442_v4  ;;  %v3325_v35 = vrot.slane %v3311_v26, %v10442_v4  ;;  %v9388_v27 = vcombine.high %v5883_v3, %v5891_v11  ;;  %v5836_v29 = vld [vmem:[#allocation3 + $0xe10] sm:$0xff]  ;;  %v5845_v56 = vld [vmem:[#allocation3 + $0xe58] sm:$0xff]  ;;  %v5908_v34 = vsel %vm160_vm0, %v5907_v17, %v5906_v15  ;;  %v5838_v15 = vld [vmem:[#allocation3 + $0xe20] sm:$0xff] }
 0x206   :  { %v5846_v17 = vld [vmem:[#allocation3 + $0xe60] sm:$0xff] }
 0x207   :  { %5663 = vmatpush1.bf16.msra.mxu0 %v9307_v24  ;;  %v3326_v47 = vcombine.low %v3318_v31, %v3325_v35  ;;  %5704 = vmatpush1.bf16.msra.mxu1 %v9309_v20  ;;  %v5844_v20 = vld [vmem:[#allocation3 + $0xe50] sm:$0xff]  ;;  %v5837_v31 = vld [vmem:[#allocation3 + $0xe18] sm:$0xff]  ;;  %v9387_v35 = vcombine.low %v5883_v3, %v5891_v11 }
 0x208   :  { %5664 = vmatprep.subr.bf16.mxu0 %v9324_v30  ;;  %5705 = vmatprep.subr.bf16.mxu1 %v9326_v33  ;;  %v9385_v33 = vcombine.low %v5882_v10, %v5890_v6  ;;  %v9342_v36 = vcombine.high %v5836_v29, %v5844_v20  ;;  %v9344_v38 = vcombine.high %v5837_v31, %v5845_v56 }
 0x209   :  { %v10639_v45 = vadd.f32 %v3326_v47, %v10586_v25  ;;  %v5866_v25 = vld [vmem:[#allocation3 + $0xf00] sm:$0xff]  ;;  %v5860_v47 = vld [vmem:[#allocation3 + $0xed0] sm:$0xff]  ;;  %v9341_v44 = vcombine.low %v5836_v29, %v5844_v20  ;;  %v9343_v46 = vcombine.low %v5837_v31, %v5845_v56  ;;  %v9373_v6 = vcombine.low %v5868_v50, %v5876_v18  ;;  %v5855_v31 = vld [vmem:[#allocation3 + $0xea8] sm:$0xff] }
 0x20a   :  { %v9370_v2 = vcombine.high %v5866_v25, %v5874_v53  ;;  %v9369_v14 = vcombine.low %v5866_v25, %v5874_v53  ;;  %v9374_v25 = vcombine.high %v5868_v50, %v5876_v18  ;;  %v5854_v29 = vld [vmem:[#allocation3 + $0xea0] sm:$0xff]  ;;  %v5863_v56 = vld [vmem:[#allocation3 + $0xee8] sm:$0xff] }
 0x20b   :  { %5665 = vmatpush1.bf16.msra.mxu0 %v9323_v39  ;;  %5706 = vmatpush1.bf16.msra.mxu1 %v9325_v40  ;;  %v5852_v39 = vld [vmem:[#allocation3 + $0xe90] sm:$0xff]  ;;  %v5862_v20 = vld [vmem:[#allocation3 + $0xee0] sm:$0xff] }
 0x20c   :  { %6233 = vmatprep.subr.bf16.mxu0 %v9338_v41  ;;  %6274 = vmatprep.subr.bf16.mxu1 %v9340_v42  ;;  %v10659_v41 = vpack.c.b16 %v5908_v34, %v5908_v34  ;;  %v5853_v42 = vld [vmem:[#allocation3 + $0xe98] sm:$0xff]  ;;  %v9358_v5 = vcombine.high %v5852_v39, %v5860_v47 }
 0x20e   :  { %9333 = vmatmul.mubr.msk.bf16.vlgmr.msra.gmra.mrb[108].mxu0 %vm483_vm1, %v10606_v23  ;;  %9334 = vmatmul.mubr.msk.bf16.vlgmr.msra.gmra.mrb[108].mxu1 %vm483_vm1, %v10606_v23 }
 0x20f   :  { %6234 = vmatpush1.bf16.msra.mxu0 %v9337_v49  ;;  %6275 = vmatpush1.bf16.msra.mxu1 %v9339_v61  ;;  %v9360_v49 = vcombine.high %v5853_v42, %v5861_v43  ;;  %v5869_v61 = vld [vmem:[#allocation3 + $0xf18] sm:$0xff] }
 0x210   :  { %6235 = vmatprep.subr.bf16.mxu0 %v9354_v59  ;;  %6276 = vmatprep.subr.bf16.mxu1 %v9356_v51  ;;  %v9357_v59 = vcombine.low %v5852_v39, %v5860_v47  ;;  %v9359_v51 = vcombine.low %v5853_v42, %v5861_v43  ;;  %v5871_v39 = vld [vmem:[#allocation3 + $0xf28] sm:$0xff]  ;;  %v9363_v42 = vcombine.low %v5855_v31, %v5863_v56 }
 0x211   :  { %v3147_v8 = vpop.f32.mrb[56].mxu0  ;;  %6265 = vmatprep.mubr.bf16.mxu0 %v10231_v0  ;;  %v3188_v37 = vpop.f32.mrb[56].mxu1  ;;  %6306 = vmatprep.mubr.bf16.mxu1 %v10231_v0  ;;  %v5879_v47 = vld [vmem:[#allocation3 + $0xf68] sm:$0xff] }
 0x212   :  { %v3149_v7 = vpop.f32.mrb[57].mxu0  ;;  %v3190_v16 = vpop.f32.mrb[57].mxu1 }
 0x213   :  { %v3327_v23 = vcombine.low %v3147_v8, %v3149_v7  ;;  %v3151_v13 = vpop.f32.mrb[58].mxu0  ;;  %6236 = vmatpush1.bf16.msra.mxu0 %v9353_v1  ;;  %v3328_v19 = vcombine.low %v3188_v37, %v3190_v16  ;;  %v3192_v21 = vpop.f32.mrb[58].mxu1  ;;  %6277 = vmatpush1.bf16.msra.mxu1 %v9355_v63  ;;  %v5892_v1 = vld [vmem:[#allocation3 + $0xfd0] sm:$0xff]  ;;  %v5885_v63 = vld [vmem:[#allocation3 + $0xf98] sm:$0xff] }
 0x214   :  { %v3152_v48 = vpop.f32.mrb[59].mxu0  ;;  %6237 = vmatprep.subr.bf16.mxu0 %v9370_v2  ;;  %v3193_v26 = vpop.f32.mrb[59].mxu1  ;;  %6278 = vmatprep.subr.bf16.mxu1 %v9372_v9  ;;  %v5893_v2 = vld [vmem:[#allocation3 + $0xfd8] sm:$0xff]  ;;  %v5839_v21 = vld [vmem:[#allocation3 + $0xe28] sm:$0xff] }
 0x215   :  { %v3335_v24 = vrot.slane %v3327_v23, %v10442_v4  ;;  %v3342_v30 = vrot.slane %v3328_v19, %v10442_v4  ;;  %v9390_v23 = vcombine.high %v5884_v62, %v5892_v1  ;;  %v5847_v48 = vld [vmem:[#allocation3 + $0xe68] sm:$0xff]  ;;  %v9346_v26 = vcombine.high %v5838_v15, %v5846_v17 }
 0x216   :  { %v9347_v34 = vcombine.low %v5839_v21, %v5847_v48 }
 0x217   :  { %6238 = vmatpush1.bf16.msra.mxu0 %v9369_v14  ;;  %v3343_v60 = vcombine.low %v3335_v24, %v3342_v30  ;;  %6279 = vmatpush1.bf16.msra.mxu1 %v9371_v28  ;;  %v9392_v14 = vcombine.high %v5885_v63, %v5893_v2  ;;  %v9389_v28 = vcombine.low %v5884_v62, %v5892_v1 }
 0x218   :  { %6239 = vmatprep.subr.bf16.mxu0 %v9386_v32  ;;  %6280 = vmatprep.subr.bf16.mxu1 %v9388_v27  ;;  %v9391_v24 = vcombine.low %v5885_v63, %v5893_v2  ;;  %v9348_v27 = vcombine.high %v5839_v21, %v5847_v48  ;;  %v5865_v21 = vld [vmem:[#allocation3 + $0xef8] sm:$0xff] }
 0x219   :  { %v10657_v40 = vadd.f32 %v3343_v60, %v10604_v22  ;;  %v5877_v22 = vld [vmem:[#allocation3 + $0xf58] sm:$0xff]  ;;  %v9362_v60 = vcombine.high %v5854_v29, %v5862_v20 }
 0x21a   :  { %v9376_v54 = vcombine.high %v5869_v61, %v5877_v22  ;;  %v9375_v11 = vcombine.low %v5869_v61, %v5877_v22  ;;  %v5887_v61 = vld [vmem:[#allocation3 + $0xfa8] sm:$0xff] }
 0x21b   :  { %6240 = vmatpush1.bf16.msra.mxu0 %v9385_v33  ;;  %6281 = vmatpush1.bf16.msra.mxu1 %v9387_v35  ;;  %v9345_v33 = vcombine.low %v5838_v15, %v5846_v17  ;;  %v9364_v35 = vcombine.high %v5855_v31, %v5863_v56  ;;  %v5895_v22 = vld [vmem:[#allocation3 + $0xfe8] sm:$0xff]  ;;  %v5864_v15 = vld [vmem:[#allocation3 + $0xef0] sm:$0xff] }
 0x21c   :  { %6315 = vmatprep.subr.bf16.mxu0 %v9342_v36  ;;  %6356 = vmatprep.subr.bf16.mxu1 %v9344_v38  ;;  %v5870_v36 = vld [vmem:[#allocation3 + $0xf20] sm:$0xff] }
 0x21d   :  { %v5878_v38 = vld [vmem:[#allocation3 + $0xf60] sm:$0xff] }
 0x21e   :  { %9401 = vmatmul.mubr.msk.bf16.vlgmr.msra.gmra.mrb[112].mxu0 %vm483_vm1, %v10659_v41  ;;  %9402 = vmatmul.mubr.msk.bf16.vlgmr.msra.gmra.mrb[112].mxu1 %vm483_vm1, %v10659_v41  ;;  %v9378_v43 = vcombine.high %v5870_v36, %v5878_v38 }
 0x21f   :  { %6316 = vmatpush1.bf16.msra.mxu0 %v9341_v44  ;;  %6357 = vmatpush1.bf16.msra.mxu1 %v9343_v46  ;;  %v9380_v46 = vcombine.high %v5871_v39, %v5879_v47 }
 0x220   :  { %6317 = vmatprep.subr.bf16.mxu0 %v9358_v5  ;;  %6358 = vmatprep.subr.bf16.mxu1 %v9360_v49  ;;  %v5886_v5 = vld [vmem:[#allocation3 + $0xfa0] sm:$0xff] }
 0x221   :  { %v3229_v53 = vpop.f32.mrb[60].mxu0  ;;  %6347 = vmatprep.mubr.bf16.mxu0 %v10231_v0  ;;  %v3270_v52 = vpop.f32.mrb[60].mxu1  ;;  %6388 = vmatprep.mubr.bf16.mxu1 %v10231_v0  ;;  %v5894_v49 = vld [vmem:[#allocation3 + $0xfe0] sm:$0xff] }
 0x222   :  { %v3231_v58 = vpop.f32.mrb[61].mxu0  ;;  %v3272_v9 = vpop.f32.mrb[61].mxu1 }
 0x223   :  { %v3344_v8 = vcombine.low %v3229_v53, %v3231_v58  ;;  %v3233_v10 = vpop.f32.mrb[62].mxu0  ;;  %6318 = vmatpush1.bf16.msra.mxu0 %v9357_v59  ;;  %v3345_v37 = vcombine.low %v3270_v52, %v3272_v9  ;;  %v3274_v7 = vpop.f32.mrb[62].mxu1  ;;  %6359 = vmatpush1.bf16.msra.mxu1 %v9359_v51  ;;  %v9377_v53 = vcombine.low %v5870_v36, %v5878_v38  ;;  %v5840_v9 = vld [vmem:[#allocation3 + $0xe30] sm:$0xff] }
 0x224   :  { %v3234_v3 = vpop.f32.mrb[63].mxu0  ;;  %6319 = vmatprep.subr.bf16.mxu0 %v9374_v25  ;;  %v3275_v13 = vpop.f32.mrb[63].mxu1  ;;  %6360 = vmatprep.subr.bf16.mxu1 %v9376_v54  ;;  %v9379_v52 = vcombine.low %v5871_v39, %v5879_v47  ;;  %v9394_v58 = vcombine.high %v5886_v5, %v5894_v49  ;;  %v5848_v10 = vld [vmem:[#allocation3 + $0xe70] sm:$0xff]  ;;  %v5849_v7 = vld [vmem:[#allocation3 + $0xe78] sm:$0xff] }
 0x225   :  { %v3352_v16 = vrot.slane %v3344_v8, %v10442_v4  ;;  %v3359_v19 = vrot.slane %v3345_v37, %v10442_v4  ;;  %v9396_v8 = vcombine.high %v5887_v61, %v5895_v22  ;;  %v5841_v37 = vld [vmem:[#allocation3 + $0xe38] sm:$0xff]  ;;  %v9393_v3 = vcombine.low %v5886_v5, %v5894_v49 }
 0x226   :  { %v9352_v13 = vcombine.high %v5841_v37, %v5849_v7  ;;  %v9349_v48 = vcombine.low %v5840_v9, %v5848_v10  ;;  %v5889_v39 = vld [vmem:[#allocation3 + $0xfb8] sm:$0xff] }
 0x227   :  { %6320 = vmatpush1.bf16.msra.mxu0 %v9373_v6  ;;  %v3360_v32 = vcombine.low %v3352_v16, %v3359_v19  ;;  %6361 = vmatpush1.bf16.msra.mxu1 %v9375_v11  ;;  %v9350_v16 = vcombine.high %v5840_v9, %v5848_v10  ;;  %v5857_v19 = vld [vmem:[#allocation3 + $0xeb8] sm:$0xff] }
 0x228   :  { %6321 = vmatprep.subr.bf16.mxu0 %v9390_v23  ;;  %6362 = vmatprep.subr.bf16.mxu1 %v9392_v14  ;;  %v9395_v23 = vcombine.low %v5887_v61, %v5895_v22  ;;  %v5856_v14 = vld [vmem:[#allocation3 + $0xeb0] sm:$0xff]  ;;  %v9367_v31 = vcombine.low %v5857_v19, %v5865_v21  ;;  %v5897_v47 = vld [vmem:[#allocation3 + $0xff8] sm:$0xff] }
 0x229   :  { %v10670_v30 = vadd.f32 %v3360_v32, %v10617_v12  ;;  %v9361_v12 = vcombine.low %v5854_v29, %v5862_v20  ;;  %v9366_v32 = vcombine.high %v5856_v14, %v5864_v15  ;;  %v5873_v29 = vld [vmem:[#allocation3 + $0xf38] sm:$0xff] }
 0x22a   :  { %v5881_v20 = vld [vmem:[#allocation3 + $0xf78] sm:$0xff] }
 0x22b   :  { %6322 = vmatpush1.bf16.msra.mxu0 %v9389_v28  ;;  %6363 = vmatpush1.bf16.msra.mxu1 %v9391_v24  ;;  %v9351_v28 = vcombine.low %v5841_v37, %v5849_v7  ;;  %v9368_v24 = vcombine.high %v5857_v19, %v5865_v21  ;;  %v9735_v19 = vld [vmem:[#allocation8 + $0x44] ss:$8 sps:$4 sm:$0xff]  }
 0x22c   :  { %6397 = vmatprep.subr.bf16.mxu0 %v9346_v26  ;;  %6438 = vmatprep.subr.bf16.mxu1 %v9348_v27  ;;  %v5872_v26 = vld [vmem:[#allocation3 + $0xf30] sm:$0xff] }
 0x22d   :  { %v5880_v27 = vld [vmem:[#allocation3 + $0xf70] sm:$0xff] }
 0x22e   :  { %9403 = vmatmul.mubr.msk.bf16.vlgmr.msra.gmra.mrb[116].mxu0 %vm483_vm1, %v10659_v41  ;;  %9404 = vmatmul.mubr.msk.bf16.vlgmr.msra.gmra.mrb[116].mxu1 %vm483_vm1, %v10659_v41  ;;  %v9382_v56 = vcombine.high %v5872_v26, %v5880_v27 }
 0x22f   :  { %6398 = vmatpush1.bf16.msra.mxu0 %v9345_v33  ;;  %6439 = vmatpush1.bf16.msra.mxu1 %v9347_v34  ;;  %v9384_v34 = vcombine.high %v5873_v29, %v5881_v20 }
 0x230   :  { %6399 = vmatprep.subr.bf16.mxu0 %v9362_v60  ;;  %6440 = vmatprep.subr.bf16.mxu1 %v9364_v35  ;;  %v5888_v60 = vld [vmem:[#allocation3 + $0xfb0] sm:$0xff] }
 0x231   :  { %v3804_v44 = vpop.f32.mrb[64].mxu0  ;;  %6429 = vmatprep.mubr.bf16.mxu0 %v10231_v0  ;;  %v3845_v50 = vpop.f32.mrb[64].mxu1  ;;  %6470 = vmatprep.mubr.bf16.mxu1 %v10231_v0  ;;  %v5896_v35 = vld [vmem:[#allocation3 + $0xff0] sm:$0xff] }
 0x232   :  { %v3806_v18 = vpop.f32.mrb[65].mxu0  ;;  %v3847_v51 = vpop.f32.mrb[65].mxu1 }
 0x233   :  { %v4114_v59 = vcombine.low %v3804_v44, %v3806_v18  ;;  %v3808_v25 = vpop.f32.mrb[66].mxu0  ;;  %6400 = vmatpush1.bf16.msra.mxu0 %v9361_v12  ;;  %v4115_v54 = vcombine.low %v3845_v50, %v3847_v51  ;;  %v3849_v62 = vpop.f32.mrb[66].mxu1  ;;  %6441 = vmatpush1.bf16.msra.mxu1 %v9363_v42  ;;  %v9381_v44 = vcombine.low %v5872_v26, %v5880_v27  ;;  %v9741_v26 = vld [vmem:[#allocation8 + $0x64] ss:$8 sps:$4 sm:$0xff]  }
 0x234   :  { %v3809_v1 = vpop.f32.mrb[67].mxu0  ;;  %6401 = vmatprep.subr.bf16.mxu0 %v9378_v43  ;;  %v3850_v2 = vpop.f32.mrb[67].mxu1  ;;  %6442 = vmatprep.subr.bf16.mxu1 %v9380_v46  ;;  %v9383_v50 = vcombine.low %v5873_v29, %v5881_v20  ;;  %v9398_v18 = vcombine.high %v5888_v60, %v5896_v35  ;;  %v9750_v20 = vld [vmem:[#allocation8 + $0x404] ss:$8 sps:$4 sm:$0xff]  }
 0x235   :  { %v4122_v63 = vrot.slane %v4114_v59, %v10442_v4  ;;  %v4129_v6 = vrot.slane %v4115_v54, %v10442_v4  ;;  %v9400_v59 = vcombine.high %v5889_v39, %v5897_v47  ;;  %v9723_v54 = vld [vmem:[#allocation8 + $0x4] ss:$8 sps:$4 sm:$0xff]   ;;  %v9721_v1 = vld [vmem:[#allocation8] ss:$8 sps:$4 sm:$0xff]  }
 0x236   :  { %v9729_v2 = vld [vmem:[#allocation8 + $0x24] ss:$8 sps:$4 sm:$0xff]  }
 0x237   :  { %6402 = vmatpush1.bf16.msra.mxu0 %v9377_v53  ;;  %v4130_v11 = vcombine.low %v4122_v63, %v4129_v6  ;;  %6443 = vmatpush1.bf16.msra.mxu1 %v9379_v52  ;;  %v9399_v53 = vcombine.low %v5889_v39, %v5897_v47  ;;  %v9726_v52 = vld [vmem:[#allocation8 + $0x14] ss:$8 sps:$4 sm:$0xff]  }
 0x238   :  { %6403 = vmatprep.subr.bf16.mxu0 %v9394_v58  ;;  %6444 = vmatprep.subr.bf16.mxu1 %v9396_v8  ;;  %v9724_v58 = vld [vmem:[#allocation8 + $0x10] ss:$8 sps:$4 sm:$0xff]   ;;  %v9744_v39 = vld [vmem:[#allocation8 + $0x74] ss:$8 sps:$4 sm:$0xff]  }
 0x239   :  { %v10681_v17 = vadd.f32 %v4130_v11, %v10628_v55  ;;  %v9365_v55 = vcombine.low %v5856_v14, %v5864_v15  ;;  %v9727_v11 = vld [vmem:[#allocation8 + $0x20] ss:$8 sps:$4 sm:$0xff]   ;;  %v9730_v15 = vld [vmem:[#allocation8 + $0x30] ss:$8 sps:$4 sm:$0xff]  }
 0x23b   :  { %6404 = vmatpush1.bf16.msra.mxu0 %v9393_v3  ;;  %6445 = vmatpush1.bf16.msra.mxu1 %v9395_v23 }
 0x23c   :  { %6479 = vmatprep.subr.bf16.mxu0 %v9350_v16  ;;  %6520 = vmatprep.subr.bf16.mxu1 %v9352_v13 }
 0x23e   :  { %9405 = vmatmul.mubr.msk.bf16.vlgmr.msra.gmra.mrb[120].mxu0 %vm483_vm1, %v10659_v41  ;;  %9406 = vmatmul.mubr.msk.bf16.vlgmr.msra.gmra.mrb[120].mxu1 %vm483_vm1, %v10659_v41 }
 0x23f   :  { %6480 = vmatpush1.bf16.msra.mxu0 %v9349_v48  ;;  %6521 = vmatpush1.bf16.msra.mxu1 %v9351_v28  ;;  %v9733_v48 = vld [vmem:[#allocation8 + $0x40] ss:$8 sps:$4 sm:$0xff]   ;;  %v9738_v28 = vld [vmem:[#allocation8 + $0x54] ss:$8 sps:$4 sm:$0xff]  }
 0x240   :  { %6481 = vmatprep.subr.bf16.mxu0 %v9366_v32  ;;  %6522 = vmatprep.subr.bf16.mxu1 %v9368_v24  ;;  %v9736_v32 = vld [vmem:[#allocation8 + $0x50] ss:$8 sps:$4 sm:$0xff]  }
 0x241   :  { %v3886_v33 = vpop.f32.mrb[68].mxu0  ;;  %6511 = vmatprep.mubr.bf16.mxu0 %v10231_v0  ;;  %v3927_v36 = vpop.f32.mrb[68].mxu1  ;;  %6552 = vmatprep.mubr.bf16.mxu1 %v10231_v0  ;;  %v9397_v0 = vcombine.low %v5888_v60, %v5896_v35  ;;  %v9739_v35 = vld [vmem:[#allocation8 + $0x60] ss:$8 sps:$4 sm:$0xff]  }
 0x242   :  { %v3888_v38 = vpop.f32.mrb[69].mxu0  ;;  %v3929_v42 = vpop.f32.mrb[69].mxu1 }
 0x243   :  { %v4131_v12 = vcombine.low %v3886_v33, %v3888_v38  ;;  %v3890_v43 = vpop.f32.mrb[70].mxu0  ;;  %6482 = vmatpush1.bf16.msra.mxu0 %v9365_v55  ;;  %v4132_v46 = vcombine.low %v3927_v36, %v3929_v42  ;;  %v3931_v5 = vpop.f32.mrb[70].mxu1  ;;  %6523 = vmatpush1.bf16.msra.mxu1 %v9367_v31  ;;  %v9748_v33 = vld [vmem:[#allocation8 + $0x400] ss:$8 sps:$4 sm:$0xff]   ;;  %v9754_v42 = vld [vmem:[#allocation8 + $0x410] ss:$8 sps:$4 sm:$0xff]  }
 0x244   :  { %v3891_v49 = vpop.f32.mrb[71].mxu0  ;;  %6483 = vmatprep.subr.bf16.mxu0 %v9382_v56  ;;  %v3932_v22 = vpop.f32.mrb[71].mxu1  ;;  %6524 = vmatprep.subr.bf16.mxu1 %v9384_v34 }
 0x245   :  { %v4139_v61 = vrot.slane %v4131_v12, %v10442_v4  ;;  %v4146_v51 = vrot.slane %v4132_v46, %v10442_v4  ;;  %v9756_v12 = vld [vmem:[#allocation8 + $0x414] ss:$8 sps:$4 sm:$0xff]   ;;  %v9747_v46 = vld [vmem:[#allocation8 + $0x84] ss:$8 sps:$4 sm:$0xff]   ;;  %v9760_v49 = vld [vmem:[#allocation8 + $0x420] ss:$8 sps:$4 sm:$0xff]  }
 0x246   :  { %v9753_v22 = vld [vmem:[#allocation8 + $0x94] ss:$8 sps:$4 sm:$0xff]  }
 0x247   :  { %6484 = vmatpush1.bf16.msra.mxu0 %v9381_v44  ;;  %v4147_v25 = vcombine.low %v4139_v61, %v4146_v51  ;;  %6525 = vmatpush1.bf16.msra.mxu1 %v9383_v50  ;;  %v9742_v44 = vld [vmem:[#allocation8 + $0x70] ss:$8 sps:$4 sm:$0xff]   ;;  %v9762_v50 = vld [vmem:[#allocation8 + $0x424] ss:$8 sps:$4 sm:$0xff]   ;;  %v9768_v61 = vld [vmem:[#allocation8 + $0x434] ss:$8 sps:$4 sm:$0xff]  }
 0x248   :  { %6485 = vmatprep.subr.bf16.mxu0 %v9398_v18  ;;  %6526 = vmatprep.subr.bf16.mxu1 %v9400_v59  ;;  %v9745_v18 = vld [vmem:[#allocation8 + $0x80] ss:$8 sps:$4 sm:$0xff]   ;;  %v9766_v59 = vld [vmem:[#allocation8 + $0x430] ss:$8 sps:$4 sm:$0xff]  }
 0x249   :  { %v10692_v62 = vadd.f32 %v4147_v25, %v10639_v45  ;;  %v9751_v51 = vld [vmem:[#allocation8 + $0x90] ss:$8 sps:$4 sm:$0xff]   ;;  %v9759_v25 = vld [vmem:[#allocation8 + $0xa4] ss:$8 sps:$4 sm:$0xff]  }
 0x24b   :  { %6486 = vmatpush1.bf16.msra.mxu0 %v9397_v0  ;;  %6527 = vmatpush1.bf16.msra.mxu1 %v9399_v53 }
 0x24c   :  { %8460 = vmatprep.subr.bf16.mxu1 %v9723_v54  ;;  %8624 = vmatprep.subr.bf16.mxu0 %v9750_v20  ;;  %v9798_v20 = vld [vmem:[#allocation8 + $0x484] ss:$8 sps:$4 sm:$0xff]  }
 0x24e   :  { %9407 = vmatmul.mubr.msk.bf16.vlgmr.msra.gmra.mrb[124].mxu0 %vm483_vm1, %v10659_v41  ;;  %9408 = vmatmul.mubr.msk.bf16.vlgmr.msra.gmra.mrb[124].mxu1 %vm483_vm1, %v10659_v41  ;;  %v9732_v41 = vld [vmem:[#allocation8 + $0x34] ss:$8 sps:$4 sm:$0xff]  }
 0x24f   :  { %8461 = vmatpush1.bf16.msra.mxu1 %v9721_v1  ;;  %8625 = vmatpush1.bf16.msra.mxu0 %v9748_v33  ;;  %v9796_v33 = vld [vmem:[#allocation8 + $0x480] ss:$8 sps:$4 sm:$0xff]  }
 0x250   :  { %8462 = vmatprep.subr.bf16.mxu1 %v9726_v52  ;;  %8626 = vmatprep.subr.bf16.mxu0 %v9756_v12  ;;  %v9804_v12 = vld [vmem:[#allocation8 + $0x494] ss:$8 sps:$4 sm:$0xff]  }
 0x251   :  { %v3968_v63 = vpop.f32.mrb[72].mxu0  ;;  %v4009_v8 = vpop.f32.mrb[72].mxu1 }
 0x252   :  { %v3970_v9 = vpop.f32.mrb[73].mxu0  ;;  %v4011_v10 = vpop.f32.mrb[73].mxu1 }
 0x253   :  { %v4148_v45 = vcombine.low %v3968_v63, %v3970_v9  ;;  %v3972_v6 = vpop.f32.mrb[74].mxu0  ;;  %v4149_v37 = vcombine.low %v4009_v8, %v4011_v10  ;;  %v4013_v7 = vpop.f32.mrb[74].mxu1  ;;  %8463 = vmatpush1.bf16.msra.mxu1 %v9724_v58  ;;  %8627 = vmatpush1.bf16.msra.mxu0 %v9754_v42  ;;  %v9772_v63 = vld [vmem:[#allocation8 + $0x440] ss:$8 sps:$4 sm:$0xff]  }
 0x254   :  { %v3973_v3 = vpop.f32.mrb[75].mxu0  ;;  %v4014_v16 = vpop.f32.mrb[75].mxu1  ;;  %8464 = vmatprep.subr.bf16.mxu1 %v9729_v2  ;;  %8628 = vmatprep.subr.bf16.mxu0 %v9762_v50  ;;  %v9808_v50 = vld [vmem:[#allocation8 + $0x4a0] ss:$8 sps:$4 sm:$0xff]  }
 0x255   :  { %v4156_v23 = vrot.slane %v4148_v45, %v10442_v4  ;;  %v4163_v13 = vrot.slane %v4149_v37, %v10442_v4  ;;  %v9757_v45 = vld [vmem:[#allocation8 + $0xa0] ss:$8 sps:$4 sm:$0xff]   ;;  %v9765_v37 = vld [vmem:[#allocation8 + $0xb4] ss:$8 sps:$4 sm:$0xff]   ;;  %v9763_v16 = vld [vmem:[#allocation8 + $0xb0] ss:$8 sps:$4 sm:$0xff]  }
 0x256   :  { %v9780_v3 = vld [vmem:[#allocation8 + $0x454] ss:$8 sps:$4 sm:$0xff]  }
 0x257   :  { %v4164_v14 = vcombine.low %v4156_v23, %v4163_v13  ;;  %8465 = vmatpush1.bf16.msra.mxu1 %v9727_v11  ;;  %8629 = vmatpush1.bf16.msra.mxu0 %v9760_v49  ;;  %v9778_v11 = vld [vmem:[#allocation8 + $0x450] ss:$8 sps:$4 sm:$0xff]  }
 0x258   :  { %8466 = vmatprep.subr.bf16.mxu1 %v9732_v41  ;;  %8630 = vmatprep.subr.bf16.mxu0 %v9768_v61  ;;  %v9771_v41 = vld [vmem:[#allocation8 + $0xc4] ss:$8 sps:$4 sm:$0xff]   ;;  %v9814_v61 = vld [vmem:[#allocation8 + $0x4b0] ss:$8 sps:$4 sm:$0xff]  }
 0x259   :  { %v10701_v21 = vadd.f32 %v4164_v14, %v10657_v40  ;;  %v9784_v14 = vld [vmem:[#allocation8 + $0x460] ss:$8 sps:$4 sm:$0xff]  }
 0x25b   :  { %8467 = vmatpush1.bf16.msra.mxu1 %v9730_v15  ;;  %8631 = vmatpush1.bf16.msra.mxu0 %v9766_v59  ;;  %v9786_v15 = vld [vmem:[#allocation8 + $0x464] ss:$8 sps:$4 sm:$0xff]  }
 0x25c   :  { %8468 = vmatprep.subr.bf16.mxu1 %v9735_v19  ;;  %v9769_v19 = vld [vmem:[#allocation8 + $0xc0] ss:$8 sps:$4 sm:$0xff]  }
 0x25f   :  { %8469 = vmatpush1.bf16.msra.mxu1 %v9733_v48  ;;  %v9792_v48 = vld [vmem:[#allocation8 + $0x474] ss:$8 sps:$4 sm:$0xff]  }
 0x260   :  { %8470 = vmatprep.subr.bf16.mxu1 %v9738_v28  ;;  %v9777_v28 = vld [vmem:[#allocation8 + $0xd4] ss:$8 sps:$4 sm:$0xff]  }
 0x261   :  { %v4050_v24 = vpop.f32.mrb[76].mxu0  ;;  %v4091_v27 = vpop.f32.mrb[76].mxu1 }
 0x262   :  { %v4052_v29 = vpop.f32.mrb[77].mxu0  ;;  %v4093_v31 = vpop.f32.mrb[77].mxu1 }
 0x263   :  { %v4165_v55 = vcombine.low %v4050_v24, %v4052_v29  ;;  %v4054_v56 = vpop.f32.mrb[78].mxu0  ;;  %v4166_v34 = vcombine.low %v4091_v27, %v4093_v31  ;;  %v4095_v60 = vpop.f32.mrb[78].mxu1  ;;  %8471 = vmatpush1.bf16.msra.mxu1 %v9736_v32  ;;  %v9790_v32 = vld [vmem:[#allocation8 + $0x470] ss:$8 sps:$4 sm:$0xff]   ;;  %v9783_v27 = vld [vmem:[#allocation8 + $0xe4] ss:$8 sps:$4 sm:$0xff]  }
 0x264   :  { %v4055_v40 = vpop.f32.mrb[79].mxu0  ;;  %v4096_v38 = vpop.f32.mrb[79].mxu1  ;;  %8472 = vmatprep.subr.bf16.mxu1 %v9741_v26  ;;  %v9775_v24 = vld [vmem:[#allocation8 + $0xd0] ss:$8 sps:$4 sm:$0xff]  }
 0x265   :  { %v4173_v36 = vrot.slane %v4165_v55, %v10442_v4  ;;  %v4180_v47 = vrot.slane %v4166_v34, %v10442_v4 }
 0x267   :  { %v4181_v43 = vcombine.low %v4173_v36, %v4180_v47  ;;  %8473 = vmatpush1.bf16.msra.mxu1 %v9739_v35  ;;  %v9781_v35 = vld [vmem:[#allocation8 + $0xe0] ss:$8 sps:$4 sm:$0xff]  }
 0x268   :  { %8474 = vmatprep.subr.bf16.mxu1 %v9744_v39  ;;  %v9789_v39 = vld [vmem:[#allocation8 + $0xf4] ss:$8 sps:$4 sm:$0xff]  }
 0x269   :  { %v10706_v5 = vadd.f32 %v4181_v43, %v10670_v30  ;;  %v9774_v30 = vld [vmem:[#allocation8 + $0x444] ss:$8 sps:$4 sm:$0xff]   ;;  %v9787_v43 = vld [vmem:[#allocation8 + $0xf0] ss:$8 sps:$4 sm:$0xff]  }
 0x26a   :  { %8632 = vmatprep.subr.bf16.mxu0 %v9774_v30  ;;  %v9822_v30 = vld [vmem:[#allocation8 + $0x4c4] ss:$8 sps:$4 sm:$0xff]  }
 0x26b   :  { %8475 = vmatpush1.bf16.msra.mxu1 %v9742_v44  ;;  %8633 = vmatpush1.bf16.msra.mxu0 %v9772_v63  ;;  %v9802_v44 = vld [vmem:[#allocation8 + $0x490] ss:$8 sps:$4 sm:$0xff]  }
 0x26c   :  { %8476 = vmatprep.subr.bf16.mxu1 %v9747_v46  ;;  %8634 = vmatprep.subr.bf16.mxu0 %v9780_v3  ;;  %v9795_v46 = vld [vmem:[#allocation8 + $0x104] ss:$8 sps:$4 sm:$0xff]   ;;  %v9838_v3 = vld [vmem:[#allocation8 + $0x4f0] ss:$8 sps:$4 sm:$0xff]  }
 0x26f   :  { %8477 = vmatpush1.bf16.msra.mxu1 %v9745_v18  ;;  %8635 = vmatpush1.bf16.msra.mxu0 %v9778_v11  ;;  %v9810_v18 = vld [vmem:[#allocation8 + $0x4a4] ss:$8 sps:$4 sm:$0xff]   ;;  %v9840_v11 = vld [vmem:[#allocation8 + $0x4f4] ss:$8 sps:$4 sm:$0xff]  }
 0x270   :  { %8478 = vmatprep.subr.bf16.mxu1 %v9753_v22  ;;  %8636 = vmatprep.subr.bf16.mxu0 %v9786_v15  ;;  %v9816_v22 = vld [vmem:[#allocation8 + $0x4b4] ss:$8 sps:$4 sm:$0xff]  }
 0x271   :  { %v4625_v0 = vpop.f32.mrb[80].mxu0  ;;  %v4666_v53 = vpop.f32.mrb[80].mxu1 }
 0x272   :  { %v4627_v54 = vpop.f32.mrb[81].mxu0  ;;  %v4668_v52 = vpop.f32.mrb[81].mxu1 }
 0x273   :  { %v4935_v1 = vcombine.low %v4625_v0, %v4627_v54  ;;  %v4629_v58 = vpop.f32.mrb[82].mxu0  ;;  %v4936_v2 = vcombine.low %v4666_v53, %v4668_v52  ;;  %v4670_v8 = vpop.f32.mrb[82].mxu1  ;;  %8479 = vmatpush1.bf16.msra.mxu1 %v9751_v51  ;;  %8637 = vmatpush1.bf16.msra.mxu0 %v9784_v14 }
 0x274   :  { %v4630_v9 = vpop.f32.mrb[83].mxu0  ;;  %v4671_v6 = vpop.f32.mrb[83].mxu1  ;;  %8480 = vmatprep.subr.bf16.mxu1 %v9759_v25  ;;  %8638 = vmatprep.subr.bf16.mxu0 %v9792_v48  ;;  %v9820_v58 = vld [vmem:[#allocation8 + $0x4c0] ss:$8 sps:$4 sm:$0xff]   ;;  %v9846_v48 = vld [vmem:[#allocation8 + $0x504] ss:$8 sps:$4 sm:$0xff]  }
 0x275   :  { %v4943_v10 = vrot.slane %v4935_v1, %v10442_v4  ;;  %v4950_v7 = vrot.slane %v4936_v2, %v10442_v4  ;;  %v9828_v9 = vld [vmem:[#allocation8 + $0x4d4] ss:$8 sps:$4 sm:$0xff]  }
 0x277   :  { %v4951_v23 = vcombine.low %v4943_v10, %v4950_v7  ;;  %8481 = vmatpush1.bf16.msra.mxu1 %v9757_v45  ;;  %8639 = vmatpush1.bf16.msra.mxu0 %v9790_v32  ;;  %v9826_v10 = vld [vmem:[#allocation8 + $0x4d0] ss:$8 sps:$4 sm:$0xff]   ;;  %v9834_v7 = vld [vmem:[#allocation8 + $0x4e4] ss:$8 sps:$4 sm:$0xff]  }
 0x278   :  { %8482 = vmatprep.subr.bf16.mxu1 %v9765_v37  ;;  %8640 = vmatprep.subr.bf16.mxu0 %v9798_v20  ;;  %v9832_v37 = vld [vmem:[#allocation8 + $0x4e0] ss:$8 sps:$4 sm:$0xff]  }
 0x279   :  { %v10711_v13 = vadd.f32 %v4951_v23, %v10681_v17 }
 0x27b   :  { %8483 = vmatpush1.bf16.msra.mxu1 %v9763_v16  ;;  %8641 = vmatpush1.bf16.msra.mxu0 %v9796_v33 }
 0x27c   :  { %8484 = vmatprep.subr.bf16.mxu1 %v9771_v41  ;;  %8642 = vmatprep.subr.bf16.mxu0 %v9804_v12 }
 0x27f   :  { %8485 = vmatpush1.bf16.msra.mxu1 %v9769_v19  ;;  %8643 = vmatpush1.bf16.msra.mxu0 %v9802_v44 }
 0x280   :  { %8486 = vmatprep.subr.bf16.mxu1 %v9777_v28  ;;  %8644 = vmatprep.subr.bf16.mxu0 %v9810_v18 }
 0x281   :  { %v4707_v26 = vpop.f32.mrb[84].mxu0  ;;  %v4748_v29 = vpop.f32.mrb[84].mxu1 }
 0x282   :  { %v4709_v17 = vpop.f32.mrb[85].mxu0  ;;  %v4750_v31 = vpop.f32.mrb[85].mxu1 }
 0x283   :  { %v4952_v55 = vcombine.low %v4707_v26, %v4709_v17  ;;  %v4711_v56 = vpop.f32.mrb[86].mxu0  ;;  %v4953_v34 = vcombine.low %v4748_v29, %v4750_v31  ;;  %v4752_v60 = vpop.f32.mrb[86].mxu1  ;;  %8487 = vmatpush1.bf16.msra.mxu1 %v9775_v24  ;;  %8645 = vmatpush1.bf16.msra.mxu0 %v9808_v50 }
 0x284   :  { %v4712_v40 = vpop.f32.mrb[87].mxu0  ;;  %v4753_v38 = vpop.f32.mrb[87].mxu1  ;;  %8488 = vmatprep.subr.bf16.mxu1 %v9783_v27  ;;  %8646 = vmatprep.subr.bf16.mxu0 %v9816_v22 }
 0x285   :  { %v4960_v36 = vrot.slane %v4952_v55, %v10442_v4  ;;  %v4967_v47 = vrot.slane %v4953_v34, %v10442_v4 }
 0x287   :  { %v4968_v42 = vcombine.low %v4960_v36, %v4967_v47  ;;  %8489 = vmatpush1.bf16.msra.mxu1 %v9781_v35  ;;  %8647 = vmatpush1.bf16.msra.mxu0 %v9814_v61 }
 0x288   :  { %8490 = vmatprep.subr.bf16.mxu1 %v9789_v39  ;;  %8648 = vmatprep.subr.bf16.mxu0 %v9822_v30 }
 0x289   :  { %v10716_v49 = vadd.f32 %v4968_v42, %v10692_v62 }
 0x28b   :  { %8491 = vmatpush1.bf16.msra.mxu1 %v9787_v43  ;;  %8649 = vmatpush1.bf16.msra.mxu0 %v9820_v58 }
 0x28c   :  { %8501 = vmatprep.subr.bf16.mxu1 %v9795_v46  ;;  %8650 = vmatprep.subr.bf16.mxu0 %v9828_v9 }
 0x28f   :  { %8651 = vmatpush1.bf16.msra.mxu0 %v9826_v10 }
 0x290   :  { %8652 = vmatprep.subr.bf16.mxu0 %v9834_v7 }
 0x291   :  { %v4789_v59 = vpop.f32.mrb[88].mxu0  ;;  %v4830_v51 = vpop.f32.mrb[88].mxu1 }
 0x292   :  { %v4791_v0 = vpop.f32.mrb[89].mxu0  ;;  %v4832_v53 = vpop.f32.mrb[89].mxu1 }
 0x293   :  { %v4969_v25 = vcombine.low %v4789_v59, %v4791_v0  ;;  %v4793_v54 = vpop.f32.mrb[90].mxu0  ;;  %v4970_v62 = vcombine.low %v4830_v51, %v4832_v53  ;;  %v4834_v1 = vpop.f32.mrb[90].mxu1  ;;  %8653 = vmatpush1.bf16.msra.mxu0 %v9832_v37 }
 0x294   :  { %v4794_v52 = vpop.f32.mrb[91].mxu0  ;;  %v4835_v2 = vpop.f32.mrb[91].mxu1  ;;  %8654 = vmatprep.subr.bf16.mxu0 %v9840_v11 }
 0x295   :  { %v4977_v63 = vrot.slane %v4969_v25, %v10442_v4  ;;  %v4984_v8 = vrot.slane %v4970_v62, %v10442_v4 }
 0x297   :  { %v4985_v45 = vcombine.low %v4977_v63, %v4984_v8  ;;  %8655 = vmatpush1.bf16.msra.mxu0 %v9838_v3 }
 0x298   :  { %8665 = vmatprep.subr.bf16.mxu0 %v9846_v48 }
 0x299   :  { %v10721_v6 = vadd.f32 %v4985_v45, %v10701_v21 }
 0x2a1   :  { %v4871_v23 = vpop.f32.mrb[92].mxu0  ;;  %v4912_v16 = vpop.f32.mrb[92].mxu1 }
 0x2a2   :  { %v4873_v41 = vpop.f32.mrb[93].mxu0  ;;  %v4914_v15 = vpop.f32.mrb[93].mxu1 }
 0x2a3   :  { %v4986_v14 = vcombine.low %v4871_v23, %v4873_v41  ;;  %v4875_v19 = vpop.f32.mrb[94].mxu0  ;;  %v4987_v28 = vcombine.low %v4912_v16, %v4914_v15  ;;  %v4916_v32 = vpop.f32.mrb[94].mxu1 }
 0x2a4   :  { %v4876_v21 = vpop.f32.mrb[95].mxu0  ;;  %v4917_v26 = vpop.f32.mrb[95].mxu1  ;;  %v10744_v32 = vsub.s32 0, %v10435_v57 }
 0x2a5   :  { %v4994_v24 = vrot.slane %v4986_v14, %v10442_v4  ;;  %v5001_v27 = vrot.slane %v4987_v28, %v10442_v4  ;;  %v6678_v21 = vsub.s32 2, %v10435_v57 }
 0x2a7   :  { %v5002_v29 = vcombine.low %v4994_v24, %v5001_v27  ;;  %v6682_v24 = vsub.s32 3, %v10435_v57  ;;  %v6664_v27 = vld [vmem:[#allocation6] sm:$0xff] }
 0x2a9   :  { %v5010_v17 = vadd.f32 %v5002_v29, %v10706_v5 }
 0x2b1   :  { %v5446_v20 = vpop.f32.mrb[96].mxu0  ;;  %v5487_v55 = vpop.f32.mrb[96].mxu1 }
 0x2b2   :  { %v5448_v31 = vpop.f32.mrb[97].mxu0  ;;  %v5489_v33 = vpop.f32.mrb[97].mxu1 }
 0x2b3   :  { %v5756_v56 = vcombine.low %v5446_v20, %v5448_v31  ;;  %v5450_v34 = vpop.f32.mrb[98].mxu0  ;;  %v5757_v60 = vcombine.low %v5487_v55, %v5489_v33  ;;  %v5491_v40 = vpop.f32.mrb[98].mxu1  ;;  %v6671_v20 = vrot.slane %v6664_v27, %v10744_v32  ;;  %v6679_v31 = vrot.slane %v6664_v27, %v6678_v21 }
 0x2b4   :  { %v5451_v35 = vpop.f32.mrb[99].mxu0  ;;  %v5492_v38 = vpop.f32.mrb[99].mxu1 }
 0x2b5   :  { %v5764_v36 = vrot.slane %v5756_v56, %v10442_v4  ;;  %v5771_v39 = vrot.slane %v5757_v60, %v10442_v4  ;;  %v6683_v56 = vrot.slane %v6664_v27, %v6682_v24 }
 0x2b7   :  { %v5772_v47 = vcombine.low %v5764_v36, %v5771_v39  ;;  %v6733_v34 = vcombine.low %v6679_v31, %v6683_v56  ;;  %v9799_v56 = vld [vmem:[#allocation8 + $0x110] ss:$8 sps:$4 sm:$0xff]  }
 0x2b9   :  { %v10729_v12 = vadd.f32 %v5772_v47, %v10711_v13  ;;  %v6747_v47 = vrot.slane %v6733_v34, %v10442_v4 }
 0x2c1   :  { %v5528_v42 = vpop.f32.mrb[100].mxu0  ;;  %v5569_v5 = vpop.f32.mrb[100].mxu1 }
 0x2c2   :  { %v5530_v43 = vpop.f32.mrb[101].mxu0  ;;  %v5571_v46 = vpop.f32.mrb[101].mxu1 }
 0x2c3   :  { %v5773_v44 = vcombine.low %v5528_v42, %v5530_v43  ;;  %v5532_v50 = vpop.f32.mrb[102].mxu0  ;;  %v5774_v18 = vcombine.low %v5569_v5, %v5571_v46  ;;  %v5573_v61 = vpop.f32.mrb[102].mxu1 }
 0x2c4   :  { %v5533_v22 = vpop.f32.mrb[103].mxu0  ;;  %v5574_v51 = vpop.f32.mrb[103].mxu1  ;;  %v6686_v61 = vsub.s32 4, %v10435_v57 }
 0x2c5   :  { %v5781_v59 = vrot.slane %v5773_v44, %v10442_v4  ;;  %v5788_v0 = vrot.slane %v5774_v18, %v10442_v4  ;;  %v6694_v51 = vsub.s32 6, %v10435_v57 }
 0x2c7   :  { %v5789_v25 = vcombine.low %v5781_v59, %v5788_v0  ;;  %v6690_v59 = vsub.s32 5, %v10435_v57  ;;  %v6698_v0 = vsub.s32 7, %v10435_v57 }
 0x2c9   :  { %v10734_v53 = vadd.f32 %v5789_v25, %v10716_v49 }
 0x2d1   :  { %v5610_v13 = vpop.f32.mrb[104].mxu0  ;;  %v5651_v54 = vpop.f32.mrb[104].mxu1 }
 0x2d2   :  { %v5612_v30 = vpop.f32.mrb[105].mxu0  ;;  %v5653_v1 = vpop.f32.mrb[105].mxu1 }
 0x2d3   :  { %v5790_v62 = vcombine.low %v5610_v13, %v5612_v30  ;;  %v5614_v52 = vpop.f32.mrb[106].mxu0  ;;  %v5791_v58 = vcombine.low %v5651_v54, %v5653_v1  ;;  %v5655_v63 = vpop.f32.mrb[106].mxu1  ;;  %v6687_v13 = vrot.slane %v6664_v27, %v6686_v61  ;;  %v6691_v30 = vrot.slane %v6664_v27, %v6690_v59 }
 0x2d4   :  { %v5615_v2 = vpop.f32.mrb[107].mxu0  ;;  %v5656_v9 = vpop.f32.mrb[107].mxu1  ;;  %v6699_v1 = vrot.slane %v6664_v27, %v6698_v0 }
 0x2d5   :  { %v5798_v8 = vrot.slane %v5790_v62, %v10442_v4  ;;  %v5805_v45 = vrot.slane %v5791_v58, %v10442_v4  ;;  %v6695_v62 = vrot.slane %v6664_v27, %v6694_v51 }
 0x2d7   :  { %v5806_v10 = vcombine.low %v5798_v8, %v5805_v45  ;;  %v6750_v8 = vcombine.low %v6695_v62, %v6699_v1 }
 0x2d9   :  { %v10739_v37 = vadd.f32 %v5806_v10, %v10721_v6  ;;  %v10747_v6 = vsub.s32 1, %v10435_v57 }
 0x2db   :  { %v6675_v55 = vrot.slane %v6664_v27, %v10747_v6  ;;  %v6764_v27 = vrot.slane %v6750_v8, %v10442_v4 }
 0x2dd   :  { %v6732_v33 = vcombine.low %v6671_v20, %v6675_v55 }
 0x2e1   :  { %v5692_v49 = vpop.f32.mrb[108].mxu0  ;;  %v5733_v7 = vpop.f32.mrb[108].mxu1 }
 0x2e2   :  { %v5694_v3 = vpop.f32.mrb[109].mxu0  ;;  %v5735_v23 = vpop.f32.mrb[109].mxu1 }
 0x2e3   :  { %v5807_v11 = vcombine.low %v5692_v49, %v5694_v3  ;;  %v5696_v16 = vpop.f32.mrb[110].mxu0  ;;  %v5808_v41 = vcombine.low %v5733_v7, %v5735_v23  ;;  %v5737_v14 = vpop.f32.mrb[110].mxu1  ;;  %v9793_v7 = vld [vmem:[#allocation8 + $0x100] ss:$8 sps:$4 sm:$0xff]  }
 0x2e4   :  { %v5697_v15 = vpop.f32.mrb[111].mxu0  ;;  %v5738_v48 = vpop.f32.mrb[111].mxu1  ;;  %v9801_v14 = vld [vmem:[#allocation8 + $0x114] ss:$8 sps:$4 sm:$0xff]  }
 0x2e5   :  { %v5815_v19 = vrot.slane %v5807_v11, %v10442_v4  ;;  %v5822_v28 = vrot.slane %v5808_v41, %v10442_v4 }
 0x2e7   :  { %v5823_v26 = vcombine.low %v5815_v19, %v5822_v28 }
 0x2e9   :  { %v10751_v29 = vadd.f32 %v5823_v26, %v5010_v17  ;;  %v6740_v17 = vrot.slane %v6732_v33, %v10442_v4  ;;  %v9807_v33 = vld [vmem:[#allocation8 + $0x124] ss:$8 sps:$4 sm:$0xff]  }
 0x2eb   :  { %v6748_v18 = vcombine.low %v6740_v17, %v6747_v47 }
 0x2f1   :  { %v6267_v60 = vpop.f32.mrb[112].mxu0  ;;  %v6308_v40 = vpop.f32.mrb[112].mxu1 }
 0x2f2   :  { %v6269_v35 = vpop.f32.mrb[113].mxu0  ;;  %v6310_v38 = vpop.f32.mrb[113].mxu1 }
 0x2f3   :  { %v6577_v36 = vcombine.low %v6267_v60, %v6269_v35  ;;  %v6271_v39 = vpop.f32.mrb[114].mxu0  ;;  %v6578_v42 = vcombine.low %v6308_v40, %v6310_v38  ;;  %v6312_v5 = vpop.f32.mrb[114].mxu1  ;;  %v6665_v60 = vld [vmem:[#allocation6 + $0x8] sm:$0xff] }
 0x2f4   :  { %v6272_v43 = vpop.f32.mrb[115].mxu0  ;;  %v6313_v46 = vpop.f32.mrb[115].mxu1  ;;  %v9813_v38 = vld [vmem:[#allocation8 + $0x134] ss:$8 sps:$4 sm:$0xff]   ;;  %v6703_v39 = vrot.slane %v6665_v60, %v10744_v32  ;;  %v6707_v17 = vrot.slane %v6665_v60, %v10747_v6  ;;  %v6711_v47 = vrot.slane %v6665_v60, %v6678_v21 }
 0x2f5   :  { %v6585_v44 = vrot.slane %v6577_v36, %v10442_v4  ;;  %v6592_v50 = vrot.slane %v6578_v42, %v10442_v4  ;;  %v9805_v36 = vld [vmem:[#allocation8 + $0x120] ss:$8 sps:$4 sm:$0xff]   ;;  %v6715_v42 = vrot.slane %v6665_v60, %v6682_v24  ;;  %v9811_v43 = vld [vmem:[#allocation8 + $0x130] ss:$8 sps:$4 sm:$0xff]   ;;  %v9825_v21 = vld [vmem:[#allocation8 + $0x154] ss:$8 sps:$4 sm:$0xff]  }
 0x2f7   :  { %v6593_v22 = vcombine.low %v6585_v44, %v6592_v50  ;;  %v6766_v44 = vcombine.low %v6703_v39, %v6707_v17  ;;  %v6767_v46 = vcombine.low %v6711_v47, %v6715_v42  ;;  %v9852_v39 = vld [vmem:[#allocation8 + $0x514] ss:$8 sps:$4 sm:$0xff]  }
 0x2f9   :  { %v6649_v25 = vadd.f32 %v6593_v22, %v10729_v12  ;;  %v6749_v12 = vcombine.low %v6687_v13, %v6691_v30 }
 0x2fb   :  { %v6804_v54 = vadd.f32 %v6748_v18, %v6649_v25  ;;  %v6757_v26 = vrot.slane %v6749_v12, %v10442_v4  ;;  %v9817_v25 = vld [vmem:[#allocation8 + $0x140] ss:$8 sps:$4 sm:$0xff]  }
 0x2fd   :  { %v6819_v52 = vrot.slane %v6804_v54, %v10442_v4  ;;  %v6812_v58 = vcombine.high %v6804_v54, %v6804_v54  ;;  %v6765_v40 = vcombine.low %v6757_v26, %v6764_v27 }
 0x2ff   :  { %v6827_v63 = vcombine.high %v6819_v52, %v6819_v52  ;;  %v10778_v2 = vrot.slane %v6812_v58, %v10442_v4  ;;  %v6896_v41 = vpack.c.bf16 %v6819_v52, %v6819_v52  ;;  %v6774_v52 = vrot.slane %v6766_v44, %v10442_v4 }
 0x300   :  { %v6781_v58 = vrot.slane %v6767_v46, %v10442_v4 }
 0x301   :  { %v6349_v9 = vpop.f32.mrb[116].mxu0  ;;  %v6390_v45 = vpop.f32.mrb[116].mxu1  ;;  %v6897_v49 = vpack.c.bf16 %v6827_v63, %v6827_v63  ;;  %v6828_v3 = vcombine.high %v10778_v2, %v10778_v2 }
 0x302   :  { %v6351_v10 = vpop.f32.mrb[117].mxu0  ;;  %v6392_v23 = vpop.f32.mrb[117].mxu1 }
 0x303   :  { %v6594_v11 = vcombine.low %v6349_v9, %v6351_v10  ;;  %v6353_v16 = vpop.f32.mrb[118].mxu0  ;;  %v6595_v15 = vcombine.low %v6390_v45, %v6392_v23  ;;  %v6394_v19 = vpop.f32.mrb[118].mxu1  ;;  %8492 = vmatprep.mubr.bf16.mxu1 %v6897_v49  ;;  %v6899_v28 = vpack.c.bf16 %v6828_v3, %v6828_v3  ;;  %v9823_v9 = vld [vmem:[#allocation8 + $0x150] ss:$8 sps:$4 sm:$0xff]   ;;  %v9831_v45 = vld [vmem:[#allocation8 + $0x164] ss:$8 sps:$4 sm:$0xff]   ;;  %v6782_v49 = vcombine.low %v6774_v52, %v6781_v58 }
 0x304   :  { %v6354_v48 = vpop.f32.mrb[119].mxu0  ;;  %v6395_v55 = vpop.f32.mrb[119].mxu1  ;;  %8493 = vmatmul.mubr.bf16.vlgmr.msra.gmra.mrb[128].mxu1 %v6896_v41  ;;  %v9829_v3 = vld [vmem:[#allocation8 + $0x160] ss:$8 sps:$4 sm:$0xff]   ;;  %v6719_v23 = vrot.slane %v6665_v60, %v6686_v61  ;;  %v6723_v41 = vrot.slane %v6665_v60, %v6690_v59  ;;  %v9835_v19 = vld [vmem:[#allocation8 + $0x170] ss:$8 sps:$4 sm:$0xff]  }
 0x305   :  { %v6602_v20 = vrot.slane %v6594_v11, %v10442_v4  ;;  %v6609_v31 = vrot.slane %v6595_v15, %v10442_v4  ;;  %8502 = vmatpush1.bf16.msra.mxu1 %v9793_v7  ;;  %8533 = vmatprep.mubr.bf16.mxu1 %v6899_v28  ;;  %v9837_v11 = vld [vmem:[#allocation8 + $0x174] ss:$8 sps:$4 sm:$0xff]   ;;  %v6731_v15 = vrot.slane %v6665_v60, %v6698_v0  ;;  %v9843_v28 = vld [vmem:[#allocation8 + $0x184] ss:$8 sps:$4 sm:$0xff]   ;;  %v9844_v0 = vld [vmem:[#allocation8 + $0x500] ss:$8 sps:$4 sm:$0xff]  }
 0x306   :  { %8503 = vmatprep.subr.bf16.mxu1 %v9801_v14  ;;  %v6727_v14 = vrot.slane %v6665_v60, %v6694_v51  ;;  %v6783_v27 = vcombine.low %v6719_v23, %v6723_v41  ;;  %v9859_v58 = vld [vmem:[#allocation8 + $0x1b0] ss:$8 sps:$4 sm:$0xff]   ;;  %v9877_v23 = vld [vmem:[#allocation8 + $0x1e0] ss:$8 sps:$4 sm:$0xff]   ;;  %v9885_v41 = vld [vmem:[#allocation8 + $0x1f4] ss:$8 sps:$4 sm:$0xff]  }
 0x307   :  { %v6610_v34 = vcombine.low %v6602_v20, %v6609_v31  ;;  %v9841_v31 = vld [vmem:[#allocation8 + $0x180] ss:$8 sps:$4 sm:$0xff]  }
 0x308   :  { %v6784_v20 = vcombine.low %v6727_v14, %v6731_v15  ;;  %v6791_v17 = vrot.slane %v6783_v27, %v10442_v4  ;;  %v9888_v14 = vld [vmem:[#allocation8 + $0x574] ss:$8 sps:$4 sm:$0xff]   ;;  %v9889_v27 = vld [vmem:[#allocation8 + $0x200] ss:$8 sps:$4 sm:$0xff]  }
 0x309   :  { %v6650_v35 = vadd.f32 %v6610_v34, %v10734_v53  ;;  %8504 = vmatpush1.bf16.msra.mxu1 %v9799_v56  ;;  %v9819_v53 = vld [vmem:[#allocation8 + $0x144] ss:$8 sps:$4 sm:$0xff]  }
 0x30a   :  { %8505 = vmatprep.subr.bf16.mxu1 %v9807_v33  ;;  %v6798_v47 = vrot.slane %v6784_v20, %v10442_v4  ;;  %v6898_v20 = vpack.c.bf16 %v10778_v2, %v10778_v2  ;;  %v9904_v2 = vld [vmem:[#allocation8 + $0x5a0] ss:$8 sps:$4 sm:$0xff]  }
 0x30b   :  { %v10793_v5 = vadd.f32 %v6765_v40, %v6650_v35  ;;  %v9849_v40 = vld [vmem:[#allocation8 + $0x194] ss:$8 sps:$4 sm:$0xff]  }
 0x30d   :  { %8506 = vmatpush1.bf16.msra.mxu1 %v9805_v36  ;;  %v10823_v15 = vrot.slane %v10793_v5, %v10442_v4 }
 0x30e   :  { %8507 = vmatprep.subr.bf16.mxu1 %v9813_v38 }
 0x311   :  { %v6431_v50 = vpop.f32.mrb[120].mxu0  ;;  %8508 = vmatpush1.bf16.msra.mxu1 %v9811_v43  ;;  %v6472_v18 = vpop.f32.mrb[120].mxu1 }
 0x312   :  { %v6433_v22 = vpop.f32.mrb[121].mxu0  ;;  %v6474_v54 = vpop.f32.mrb[121].mxu1  ;;  %8509 = vmatprep.subr.bf16.mxu1 %v9819_v53 }
 0x313   :  { %v6611_v13 = vcombine.low %v6431_v50, %v6433_v22  ;;  %v6435_v30 = vpop.f32.mrb[122].mxu0  ;;  %v6612_v62 = vcombine.low %v6472_v18, %v6474_v54  ;;  %v6476_v24 = vpop.f32.mrb[122].mxu1  ;;  %v9847_v50 = vld [vmem:[#allocation8 + $0x190] ss:$8 sps:$4 sm:$0xff]   ;;  %v9855_v22 = vld [vmem:[#allocation8 + $0x1a4] ss:$8 sps:$4 sm:$0xff]   ;;  %v6799_v54 = vcombine.low %v6791_v17, %v6798_v47 }
 0x314   :  { %v6436_v1 = vpop.f32.mrb[123].mxu0  ;;  %v6477_v12 = vpop.f32.mrb[123].mxu1  ;;  %v9850_v18 = vld [vmem:[#allocation8 + $0x510] ss:$8 sps:$4 sm:$0xff]   ;;  %v9861_v24 = vld [vmem:[#allocation8 + $0x1b4] ss:$8 sps:$4 sm:$0xff]  }
 0x315   :  { %v6619_v63 = vrot.slane %v6611_v13, %v10442_v4  ;;  %v6626_v8 = vrot.slane %v6612_v62, %v10442_v4  ;;  %8510 = vmatpush1.bf16.msra.mxu1 %v9817_v25  ;;  %v9858_v25 = vld [vmem:[#allocation8 + $0x524] ss:$8 sps:$4 sm:$0xff]   ;;  %v9856_v62 = vld [vmem:[#allocation8 + $0x520] ss:$8 sps:$4 sm:$0xff]   ;;  %v9864_v1 = vld [vmem:[#allocation8 + $0x534] ss:$8 sps:$4 sm:$0xff]  }
 0x316   :  { %8511 = vmatprep.subr.bf16.mxu1 %v9825_v21  ;;  %v9853_v21 = vld [vmem:[#allocation8 + $0x1a0] ss:$8 sps:$4 sm:$0xff]   ;;  %v9867_v12 = vld [vmem:[#allocation8 + $0x1c4] ss:$8 sps:$4 sm:$0xff]  }
 0x317   :  { %v6627_v10 = vcombine.low %v6619_v63, %v6626_v8  ;;  %v9862_v63 = vld [vmem:[#allocation8 + $0x530] ss:$8 sps:$4 sm:$0xff]   ;;  %v9870_v8 = vld [vmem:[#allocation8 + $0x544] ss:$8 sps:$4 sm:$0xff]   ;;  %v9913_v17 = vld [vmem:[#allocation8 + $0x240] ss:$8 sps:$4 sm:$0xff]  }
 0x318   :  { %v9916_v47 = vld [vmem:[#allocation8 + $0x5c0] ss:$8 sps:$4 sm:$0xff]  }
 0x319   :  { %v6651_v7 = vadd.f32 %v6627_v10, %v10739_v37  ;;  %8512 = vmatpush1.bf16.msra.mxu1 %v9823_v9  ;;  %v9868_v9 = vld [vmem:[#allocation8 + $0x540] ss:$8 sps:$4 sm:$0xff]   ;;  %v9876_v10 = vld [vmem:[#allocation8 + $0x554] ss:$8 sps:$4 sm:$0xff]  }
 0x31a   :  { %8513 = vmatprep.subr.bf16.mxu1 %v9831_v45  ;;  %v9873_v45 = vld [vmem:[#allocation8 + $0x1d4] ss:$8 sps:$4 sm:$0xff]  }
 0x31b   :  { %v6806_v16 = vadd.f32 %v6782_v49, %v6651_v7  ;;  %v9871_v49 = vld [vmem:[#allocation8 + $0x1d0] ss:$8 sps:$4 sm:$0xff]  }
 0x31c   :  { %v9874_v7 = vld [vmem:[#allocation8 + $0x550] ss:$8 sps:$4 sm:$0xff]  }
 0x31d   :  { %8514 = vmatpush1.bf16.msra.mxu1 %v9829_v3  ;;  %v6853_v37 = vrot.slane %v6806_v16, %v10442_v4  ;;  %v6846_v48 = vcombine.high %v6806_v16, %v6806_v16  ;;  %v9879_v3 = vld [vmem:[#allocation8 + $0x1e4] ss:$8 sps:$4 sm:$0xff]   ;;  %v9880_v16 = vld [vmem:[#allocation8 + $0x560] ss:$8 sps:$4 sm:$0xff]  }
 0x31e   :  { %8515 = vmatprep.subr.bf16.mxu1 %v9837_v11  ;;  %v9882_v11 = vld [vmem:[#allocation8 + $0x564] ss:$8 sps:$4 sm:$0xff]  }
 0x31f   :  { %v6861_v26 = vcombine.high %v6853_v37, %v6853_v37  ;;  %v10810_v61 = vrot.slane %v6846_v48, %v10442_v4  ;;  %v6904_v60 = vpack.c.bf16 %v6853_v37, %v6853_v37  ;;  %v9886_v37 = vld [vmem:[#allocation8 + $0x570] ss:$8 sps:$4 sm:$0xff]   ;;  %v9891_v48 = vld [vmem:[#allocation8 + $0x204] ss:$8 sps:$4 sm:$0xff]  }
 0x321   :  { %v6513_v59 = vpop.f32.mrb[124].mxu0  ;;  %8516 = vmatpush1.bf16.msra.mxu1 %v9835_v19  ;;  %v6554_v55 = vpop.f32.mrb[124].mxu1  ;;  %v6905_v57 = vpack.c.bf16 %v6861_v26, %v6861_v26  ;;  %v6862_v56 = vcombine.high %v10810_v61, %v10810_v61  ;;  %v9883_v19 = vld [vmem:[#allocation8 + $0x1f0] ss:$8 sps:$4 sm:$0xff]   ;;  %v6844_v26 = vcombine.high %v10823_v15, %v10823_v15 }
 0x322   :  { %v6515_v51 = vpop.f32.mrb[125].mxu0  ;;  %v6556_v34 = vpop.f32.mrb[125].mxu1  ;;  %8517 = vmatprep.subr.bf16.mxu1 %v9843_v28  ;;  %v9894_v28 = vld [vmem:[#allocation8 + $0x584] ss:$8 sps:$4 sm:$0xff]  }
 0x323   :  { %v6628_v33 = vcombine.low %v6513_v59, %v6515_v51  ;;  %v6517_v35 = vpop.f32.mrb[126].mxu0  ;;  %v6629_v36 = vcombine.low %v6554_v55, %v6556_v34  ;;  %8656 = vmatprep.mubr.bf16.mxu0 %v6905_v57  ;;  %v6907_v38 = vpack.c.bf16 %v6862_v56, %v6862_v56  ;;  %v6558_v42 = vpop.f32.mrb[126].mxu1  ;;  %v9892_v59 = vld [vmem:[#allocation8 + $0x580] ss:$8 sps:$4 sm:$0xff]   ;;  %v9897_v55 = vld [vmem:[#allocation8 + $0x214] ss:$8 sps:$4 sm:$0xff]   ;;  %v6901_v51 = vpack.c.bf16 %v6844_v26, %v6844_v26 }
 0x324   :  { %v6518_v43 = vpop.f32.mrb[127].mxu0  ;;  %8657 = vmatmul.mubr.bf16.vlgmr.msra.gmra.mrb[128].mxu0 %v6904_v60  ;;  %v6559_v44 = vpop.f32.mrb[127].mxu1  ;;  %v9895_v57 = vld [vmem:[#allocation8 + $0x210] ss:$8 sps:$4 sm:$0xff]   ;;  %v9903_v56 = vld [vmem:[#allocation8 + $0x224] ss:$8 sps:$4 sm:$0xff]  }
 0x325   :  { %v6636_v53 = vrot.slane %v6628_v33, %v10442_v4  ;;  %v6643_v46 = vrot.slane %v6629_v36, %v10442_v4  ;;  %8518 = vmatpush1.bf16.msra.mxu1 %v9841_v31  ;;  %8666 = vmatpush1.bf16.msra.mxu0 %v9844_v0  ;;  %v9900_v31 = vld [vmem:[#allocation8 + $0x594] ss:$8 sps:$4 sm:$0xff]   ;;  %v9898_v0 = vld [vmem:[#allocation8 + $0x590] ss:$8 sps:$4 sm:$0xff]   ;;  %v9906_v33 = vld [vmem:[#allocation8 + $0x5a4] ss:$8 sps:$4 sm:$0xff]  }
 0x326   :  { %8697 = vmatprep.mubr.bf16.mxu0 %v6907_v38  ;;  %8519 = vmatprep.subr.bf16.mxu1 %v9849_v40  ;;  %v9901_v34 = vld [vmem:[#allocation8 + $0x220] ss:$8 sps:$4 sm:$0xff]   ;;  %v9909_v60 = vld [vmem:[#allocation8 + $0x234] ss:$8 sps:$4 sm:$0xff]   ;;  %v9907_v35 = vld [vmem:[#allocation8 + $0x230] ss:$8 sps:$4 sm:$0xff]  }
 0x327   :  { %v6644_v13 = vcombine.low %v6636_v53, %v6643_v46  ;;  %8667 = vmatprep.subr.bf16.mxu0 %v9852_v39  ;;  %v9912_v40 = vld [vmem:[#allocation8 + $0x5b4] ss:$8 sps:$4 sm:$0xff]   ;;  %v9910_v36 = vld [vmem:[#allocation8 + $0x5b0] ss:$8 sps:$4 sm:$0xff]   ;;  %v9915_v38 = vld [vmem:[#allocation8 + $0x244] ss:$8 sps:$4 sm:$0xff]  }
 0x328   :  { %v9918_v39 = vld [vmem:[#allocation8 + $0x5c4] ss:$8 sps:$4 sm:$0xff]   ;;  %v9921_v42 = vld [vmem:[#allocation8 + $0x254] ss:$8 sps:$4 sm:$0xff]   ;;  %v9919_v53 = vld [vmem:[#allocation8 + $0x250] ss:$8 sps:$4 sm:$0xff]  }
 0x329   :  { %v6652_v30 = vadd.f32 %v6644_v13, %v10751_v29  ;;  %8520 = vmatpush1.bf16.msra.mxu1 %v9847_v50  ;;  %8668 = vmatpush1.bf16.msra.mxu0 %v9850_v18  ;;  %v9865_v29 = vld [vmem:[#allocation8 + $0x1c0] ss:$8 sps:$4 sm:$0xff]   ;;  %v9924_v43 = vld [vmem:[#allocation8 + $0x5d4] ss:$8 sps:$4 sm:$0xff]   ;;  %v9922_v44 = vld [vmem:[#allocation8 + $0x5d0] ss:$8 sps:$4 sm:$0xff]  }
 0x32a   :  { %8521 = vmatprep.subr.bf16.mxu1 %v9855_v22  ;;  %8669 = vmatprep.subr.bf16.mxu0 %v9858_v25  ;;  %v9927_v46 = vld [vmem:[#allocation8 + $0x264] ss:$8 sps:$4 sm:$0xff]   ;;  %v9925_v18 = vld [vmem:[#allocation8 + $0x260] ss:$8 sps:$4 sm:$0xff]   ;;  %v9933_v25 = vld [vmem:[#allocation8 + $0x274] ss:$8 sps:$4 sm:$0xff]  }
 0x32b   :  { %v10819_v52 = vadd.f32 %v6799_v54, %v6652_v30  ;;  %v9930_v50 = vld [vmem:[#allocation8 + $0x5e4] ss:$8 sps:$4 sm:$0xff]   ;;  %v9928_v22 = vld [vmem:[#allocation8 + $0x5e0] ss:$8 sps:$4 sm:$0xff]   ;;  %v9936_v13 = vld [vmem:[#allocation8 + $0x5f4] ss:$8 sps:$4 sm:$0xff]  }
 0x32c   :  { %v9931_v30 = vld [vmem:[#allocation8 + $0x270] ss:$8 sps:$4 sm:$0xff]   ;;  %v9972_v26 = vld [vmem:[#allocation8 + $0x654] ss:$8 sps:$4 sm:$0xff]  }
 0x32d   :  { %8522 = vmatpush1.bf16.msra.mxu1 %v9853_v21  ;;  %8670 = vmatpush1.bf16.msra.mxu0 %v9856_v62  ;;  %v10831_v54 = vrot.slane %v10819_v52, %v10442_v4  ;;  %v9934_v21 = vld [vmem:[#allocation8 + $0x5f0] ss:$8 sps:$4 sm:$0xff]   ;;  %v9939_v62 = vld [vmem:[#allocation8 + $0x284] ss:$8 sps:$4 sm:$0xff]  }
 0x32e   :  { %8523 = vmatprep.subr.bf16.mxu1 %v9861_v24  ;;  %8671 = vmatprep.subr.bf16.mxu0 %v9864_v1  ;;  %v9942_v24 = vld [vmem:[#allocation8 + $0x604] ss:$8 sps:$4 sm:$0xff]  }
 0x32f   :  { %v6878_v1 = vcombine.high %v10831_v54, %v10831_v54 }
 0x331   :  { %8524 = vmatpush1.bf16.msra.mxu1 %v9859_v58  ;;  %8672 = vmatpush1.bf16.msra.mxu0 %v9862_v63  ;;  %v9937_v58 = vld [vmem:[#allocation8 + $0x280] ss:$8 sps:$4 sm:$0xff]  }
 0x332   :  { %8525 = vmatprep.subr.bf16.mxu1 %v9867_v12  ;;  %8673 = vmatprep.subr.bf16.mxu0 %v9870_v8  ;;  %v9940_v63 = vld [vmem:[#allocation8 + $0x600] ss:$8 sps:$4 sm:$0xff]   ;;  %v6906_v12 = vpack.c.bf16 %v10810_v61, %v10810_v61  ;;  %v9945_v8 = vld [vmem:[#allocation8 + $0x294] ss:$8 sps:$4 sm:$0xff]  }
 0x333   :  { %v9957_v61 = vld [vmem:[#allocation8 + $0x2b4] ss:$8 sps:$4 sm:$0xff]  }
 0x335   :  { %8526 = vmatpush1.bf16.msra.mxu1 %v9865_v29  ;;  %8674 = vmatpush1.bf16.msra.mxu0 %v9868_v9  ;;  %v9948_v29 = vld [vmem:[#allocation8 + $0x614] ss:$8 sps:$4 sm:$0xff]   ;;  %v6909_v9 = vpack.c.bf16 %v6878_v1, %v6878_v1 }
 0x336   :  { %8527 = vmatprep.subr.bf16.mxu1 %v9873_v45  ;;  %8675 = vmatprep.subr.bf16.mxu0 %v9876_v10  ;;  %v9943_v45 = vld [vmem:[#allocation8 + $0x290] ss:$8 sps:$4 sm:$0xff]   ;;  %v10020_v1 = vld [vmem:[#allocation8 + $0x6d4] ss:$8 sps:$4 sm:$0xff]  }
 0x337   :  { %v9946_v10 = vld [vmem:[#allocation8 + $0x610] ss:$8 sps:$4 sm:$0xff]  }
 0x339   :  { %8528 = vmatpush1.bf16.msra.mxu1 %v9871_v49  ;;  %8676 = vmatpush1.bf16.msra.mxu0 %v9874_v7  ;;  %v9951_v49 = vld [vmem:[#allocation8 + $0x2a4] ss:$8 sps:$4 sm:$0xff]  }
 0x33a   :  { %8529 = vmatprep.subr.bf16.mxu1 %v9879_v3  ;;  %8677 = vmatprep.subr.bf16.mxu0 %v9882_v11  ;;  %v9954_v7 = vld [vmem:[#allocation8 + $0x624] ss:$8 sps:$4 sm:$0xff]   ;;  %v9949_v3 = vld [vmem:[#allocation8 + $0x2a0] ss:$8 sps:$4 sm:$0xff]  }
 0x33b   :  { %v9952_v11 = vld [vmem:[#allocation8 + $0x620] ss:$8 sps:$4 sm:$0xff]  }
 0x33d   :  { %8530 = vmatpush1.bf16.msra.mxu1 %v9877_v23  ;;  %8678 = vmatpush1.bf16.msra.mxu0 %v9880_v16  ;;  %v9960_v23 = vld [vmem:[#allocation8 + $0x634] ss:$8 sps:$4 sm:$0xff]   ;;  %v9955_v16 = vld [vmem:[#allocation8 + $0x2b0] ss:$8 sps:$4 sm:$0xff]  }
 0x33e   :  { %8531 = vmatprep.subr.bf16.mxu1 %v9885_v41  ;;  %8679 = vmatprep.subr.bf16.mxu0 %v9888_v14  ;;  %v9958_v41 = vld [vmem:[#allocation8 + $0x630] ss:$8 sps:$4 sm:$0xff]   ;;  %v9963_v14 = vld [vmem:[#allocation8 + $0x2c4] ss:$8 sps:$4 sm:$0xff]  }
 0x341   :  { %8532 = vmatpush1.bf16.msra.mxu1 %v9883_v19  ;;  %8680 = vmatpush1.bf16.msra.mxu0 %v9886_v37  ;;  %v9966_v19 = vld [vmem:[#allocation8 + $0x644] ss:$8 sps:$4 sm:$0xff]   ;;  %v9961_v37 = vld [vmem:[#allocation8 + $0x2c0] ss:$8 sps:$4 sm:$0xff]  }
 0x342   :  { %8542 = vmatprep.subr.bf16.mxu1 %v9891_v48  ;;  %8681 = vmatprep.subr.bf16.mxu0 %v9894_v28  ;;  %v9964_v48 = vld [vmem:[#allocation8 + $0x640] ss:$8 sps:$4 sm:$0xff]   ;;  %v9969_v28 = vld [vmem:[#allocation8 + $0x2d4] ss:$8 sps:$4 sm:$0xff]  }
 0x344   :  { %8534 = vmatmul.mubr.bf16.vlgmr.msra.gmra.mrb[128].mxu1 %v6898_v20  ;;  %v9970_v20 = vld [vmem:[#allocation8 + $0x650] ss:$8 sps:$4 sm:$0xff]  }
 0x345   :  { %8543 = vmatpush1.bf16.msra.mxu1 %v9889_v27  ;;  %8574 = vmatprep.mubr.bf16.mxu1 %v6901_v51  ;;  %v9967_v27 = vld [vmem:[#allocation8 + $0x2d0] ss:$8 sps:$4 sm:$0xff]   ;;  %v6829_v51 = vcombine.high %v10793_v5, %v10793_v5 }
 0x346   :  { %8682 = vmatpush1.bf16.msra.mxu0 %v9892_v59  ;;  %8544 = vmatprep.subr.bf16.mxu1 %v9897_v55  ;;  %v9975_v59 = vld [vmem:[#allocation8 + $0x2e4] ss:$8 sps:$4 sm:$0xff]  }
 0x347   :  { %8683 = vmatprep.subr.bf16.mxu0 %v9900_v31  ;;  %v9978_v55 = vld [vmem:[#allocation8 + $0x664] ss:$8 sps:$4 sm:$0xff]   ;;  %v9973_v31 = vld [vmem:[#allocation8 + $0x2e0] ss:$8 sps:$4 sm:$0xff]  }
 0x349   :  { %8545 = vmatpush1.bf16.msra.mxu1 %v9895_v57  ;;  %v9976_v57 = vld [vmem:[#allocation8 + $0x660] ss:$8 sps:$4 sm:$0xff]  }
 0x34a   :  { %8684 = vmatpush1.bf16.msra.mxu0 %v9898_v0  ;;  %8546 = vmatprep.subr.bf16.mxu1 %v9903_v56  ;;  %v9981_v0 = vld [vmem:[#allocation8 + $0x2f4] ss:$8 sps:$4 sm:$0xff]  }
 0x34b   :  { %8685 = vmatprep.subr.bf16.mxu0 %v9906_v33  ;;  %v9984_v56 = vld [vmem:[#allocation8 + $0x674] ss:$8 sps:$4 sm:$0xff]   ;;  %v10840_v33 = vrot.slane %v6829_v51, %v10442_v4  ;;  %v10051_v51 = vld [vmem:[#allocation8 + $0x3b0] ss:$8 sps:$4 sm:$0xff]  }
 0x34d   :  { %8547 = vmatpush1.bf16.msra.mxu1 %v9901_v34  ;;  %v9979_v34 = vld [vmem:[#allocation8 + $0x2f0] ss:$8 sps:$4 sm:$0xff]   ;;  %v6845_v5 = vcombine.high %v10840_v33, %v10840_v33 }
 0x34e   :  { %8686 = vmatpush1.bf16.msra.mxu0 %v9904_v2  ;;  %8548 = vmatprep.subr.bf16.mxu1 %v9909_v60  ;;  %v9982_v2 = vld [vmem:[#allocation8 + $0x670] ss:$8 sps:$4 sm:$0xff]   ;;  %v9987_v60 = vld [vmem:[#allocation8 + $0x304] ss:$8 sps:$4 sm:$0xff]  }
 0x34f   :  { %8687 = vmatprep.subr.bf16.mxu0 %v9912_v40  ;;  %v9990_v40 = vld [vmem:[#allocation8 + $0x684] ss:$8 sps:$4 sm:$0xff]  }
 0x351   :  { %8549 = vmatpush1.bf16.msra.mxu1 %v9907_v35  ;;  %v9985_v35 = vld [vmem:[#allocation8 + $0x300] ss:$8 sps:$4 sm:$0xff]  }
 0x352   :  { %8688 = vmatpush1.bf16.msra.mxu0 %v9910_v36  ;;  %8550 = vmatprep.subr.bf16.mxu1 %v9915_v38  ;;  %v6900_v36 = vpack.c.bf16 %v10823_v15, %v10823_v15  ;;  %v9988_v38 = vld [vmem:[#allocation8 + $0x680] ss:$8 sps:$4 sm:$0xff]  }
 0x353   :  { %8689 = vmatprep.subr.bf16.mxu0 %v9918_v39  ;;  %v9993_v39 = vld [vmem:[#allocation8 + $0x314] ss:$8 sps:$4 sm:$0xff]   ;;  %v10000_v15 = vld [vmem:[#allocation8 + $0x6a0] ss:$8 sps:$4 sm:$0xff]  }
 0x355   :  { %8551 = vmatpush1.bf16.msra.mxu1 %v9913_v17  ;;  %v6903_v17 = vpack.c.bf16 %v6845_v5, %v6845_v5  ;;  %v10066_v5 = vld [vmem:[#allocation8 + $0x750] ss:$8 sps:$4 sm:$0xff]  }
 0x356   :  { %8690 = vmatpush1.bf16.msra.mxu0 %v9916_v47  ;;  %8552 = vmatprep.subr.bf16.mxu1 %v9921_v42  ;;  %v9996_v47 = vld [vmem:[#allocation8 + $0x694] ss:$8 sps:$4 sm:$0xff]   ;;  %v9991_v42 = vld [vmem:[#allocation8 + $0x310] ss:$8 sps:$4 sm:$0xff]  }
 0x357   :  { %8691 = vmatprep.subr.bf16.mxu0 %v9924_v43  ;;  %v9994_v43 = vld [vmem:[#allocation8 + $0x690] ss:$8 sps:$4 sm:$0xff]  }
 0x359   :  { %8553 = vmatpush1.bf16.msra.mxu1 %v9919_v53  ;;  %v9999_v53 = vld [vmem:[#allocation8 + $0x324] ss:$8 sps:$4 sm:$0xff]  }
 0x35a   :  { %8692 = vmatpush1.bf16.msra.mxu0 %v9922_v44  ;;  %8554 = vmatprep.subr.bf16.mxu1 %v9927_v46  ;;  %v10002_v44 = vld [vmem:[#allocation8 + $0x6a4] ss:$8 sps:$4 sm:$0xff]   ;;  %v9997_v46 = vld [vmem:[#allocation8 + $0x320] ss:$8 sps:$4 sm:$0xff]  }
 0x35b   :  { %8693 = vmatprep.subr.bf16.mxu0 %v9930_v50  ;;  %v10005_v50 = vld [vmem:[#allocation8 + $0x334] ss:$8 sps:$4 sm:$0xff]  }
 0x35d   :  { %8555 = vmatpush1.bf16.msra.mxu1 %v9925_v18  ;;  %v10008_v18 = vld [vmem:[#allocation8 + $0x6b4] ss:$8 sps:$4 sm:$0xff]  }
 0x35e   :  { %8694 = vmatpush1.bf16.msra.mxu0 %v9928_v22  ;;  %8556 = vmatprep.subr.bf16.mxu1 %v9933_v25  ;;  %v10003_v22 = vld [vmem:[#allocation8 + $0x330] ss:$8 sps:$4 sm:$0xff]  }
 0x35f   :  { %8695 = vmatprep.subr.bf16.mxu0 %v9936_v13  ;;  %v10006_v25 = vld [vmem:[#allocation8 + $0x6b0] ss:$8 sps:$4 sm:$0xff]   ;;  %v10011_v13 = vld [vmem:[#allocation8 + $0x344] ss:$8 sps:$4 sm:$0xff]  }
 0x361   :  { %8557 = vmatpush1.bf16.msra.mxu1 %v9931_v30  ;;  %v10014_v30 = vld [vmem:[#allocation8 + $0x6c4] ss:$8 sps:$4 sm:$0xff]  }
 0x362   :  { %8696 = vmatpush1.bf16.msra.mxu0 %v9934_v21  ;;  %8558 = vmatprep.subr.bf16.mxu1 %v9939_v62  ;;  %v10009_v21 = vld [vmem:[#allocation8 + $0x340] ss:$8 sps:$4 sm:$0xff]  }
 0x363   :  { %8706 = vmatprep.subr.bf16.mxu0 %v9942_v24  ;;  %v10012_v62 = vld [vmem:[#allocation8 + $0x6c0] ss:$8 sps:$4 sm:$0xff]   ;;  %v10017_v24 = vld [vmem:[#allocation8 + $0x354] ss:$8 sps:$4 sm:$0xff]  }
 0x365   :  { %8698 = vmatmul.mubr.bf16.vlgmr.msra.gmra.mrb[128].mxu0 %v6906_v12  ;;  %8559 = vmatpush1.bf16.msra.mxu1 %v9937_v58  ;;  %v10015_v58 = vld [vmem:[#allocation8 + $0x350] ss:$8 sps:$4 sm:$0xff]   ;;  %v10023_v12 = vld [vmem:[#allocation8 + $0x364] ss:$8 sps:$4 sm:$0xff]  }
 0x366   :  { %8707 = vmatpush1.bf16.msra.mxu0 %v9940_v63  ;;  %8738 = vmatprep.mubr.bf16.mxu0 %v6909_v9  ;;  %v10018_v63 = vld [vmem:[#allocation8 + $0x6d0] ss:$8 sps:$4 sm:$0xff]   ;;  %v10021_v9 = vld [vmem:[#allocation8 + $0x360] ss:$8 sps:$4 sm:$0xff]  }
 0x367   :  { %8560 = vmatprep.subr.bf16.mxu1 %v9945_v8  ;;  %8708 = vmatprep.subr.bf16.mxu0 %v9948_v29  ;;  %v10026_v8 = vld [vmem:[#allocation8 + $0x6e4] ss:$8 sps:$4 sm:$0xff]   ;;  %v6863_v29 = vcombine.high %v10819_v52, %v10819_v52 }
 0x369   :  { %8561 = vmatpush1.bf16.msra.mxu1 %v9943_v45  ;;  %v10024_v45 = vld [vmem:[#allocation8 + $0x6e0] ss:$8 sps:$4 sm:$0xff]  }
 0x36a   :  { %8709 = vmatpush1.bf16.msra.mxu0 %v9946_v10  ;;  %8562 = vmatprep.subr.bf16.mxu1 %v9951_v49  ;;  %v10029_v10 = vld [vmem:[#allocation8 + $0x374] ss:$8 sps:$4 sm:$0xff]  }
 0x36b   :  { %8710 = vmatprep.subr.bf16.mxu0 %v9954_v7  ;;  %v10032_v49 = vld [vmem:[#allocation8 + $0x6f4] ss:$8 sps:$4 sm:$0xff]   ;;  %v10849_v7 = vrot.slane %v6863_v29, %v10442_v4  ;;  %v6908_v4 = vpack.c.bf16 %v10831_v54, %v10831_v54 }
 0x36c   :  { %v10053_v54 = vld [vmem:[#allocation8 + $0x3b4] ss:$8 sps:$4 sm:$0xff]  }
 0x36d   :  { %8563 = vmatpush1.bf16.msra.mxu1 %v9949_v3  ;;  %v10027_v3 = vld [vmem:[#allocation8 + $0x370] ss:$8 sps:$4 sm:$0xff]   ;;  %v6879_v52 = vcombine.high %v10849_v7, %v10849_v7 }
 0x36e   :  { %8711 = vmatpush1.bf16.msra.mxu0 %v9952_v11  ;;  %8564 = vmatprep.subr.bf16.mxu1 %v9957_v61  ;;  %v10030_v11 = vld [vmem:[#allocation8 + $0x6f0] ss:$8 sps:$4 sm:$0xff]   ;;  %v10035_v61 = vld [vmem:[#allocation8 + $0x384] ss:$8 sps:$4 sm:$0xff]  }
 0x36f   :  { %8712 = vmatprep.subr.bf16.mxu0 %v9960_v23  ;;  %v10038_v23 = vld [vmem:[#allocation8 + $0x704] ss:$8 sps:$4 sm:$0xff]  }
 0x371   :  { %8565 = vmatpush1.bf16.msra.mxu1 %v9955_v16  ;;  %v10033_v16 = vld [vmem:[#allocation8 + $0x380] ss:$8 sps:$4 sm:$0xff]  }
 0x372   :  { %8713 = vmatpush1.bf16.msra.mxu0 %v9958_v41  ;;  %8566 = vmatprep.subr.bf16.mxu1 %v9963_v14  ;;  %v10036_v41 = vld [vmem:[#allocation8 + $0x700] ss:$8 sps:$4 sm:$0xff]   ;;  %v10041_v14 = vld [vmem:[#allocation8 + $0x394] ss:$8 sps:$4 sm:$0xff]  }
 0x373   :  { %8714 = vmatprep.subr.bf16.mxu0 %v9966_v19  ;;  %v10044_v19 = vld [vmem:[#allocation8 + $0x714] ss:$8 sps:$4 sm:$0xff]  }
 0x375   :  { %8567 = vmatpush1.bf16.msra.mxu1 %v9961_v37  ;;  %v6911_v37 = vpack.c.bf16 %v6879_v52, %v6879_v52 }
 0x376   :  { %8715 = vmatpush1.bf16.msra.mxu0 %v9964_v48  ;;  %8568 = vmatprep.subr.bf16.mxu1 %v9969_v28  ;;  %v10039_v48 = vld [vmem:[#allocation8 + $0x390] ss:$8 sps:$4 sm:$0xff]  }
 0x377   :  { %8716 = vmatprep.subr.bf16.mxu0 %v9972_v26  ;;  %v10042_v28 = vld [vmem:[#allocation8 + $0x710] ss:$8 sps:$4 sm:$0xff]   ;;  %v10047_v26 = vld [vmem:[#allocation8 + $0x3a4] ss:$8 sps:$4 sm:$0xff]  }
 0x379   :  { %8569 = vmatpush1.bf16.msra.mxu1 %v9967_v27  ;;  %v10050_v27 = vld [vmem:[#allocation8 + $0x724] ss:$8 sps:$4 sm:$0xff]  }
 0x37a   :  { %8717 = vmatpush1.bf16.msra.mxu0 %v9970_v20  ;;  %8570 = vmatprep.subr.bf16.mxu1 %v9975_v59  ;;  %v10045_v20 = vld [vmem:[#allocation8 + $0x3a0] ss:$8 sps:$4 sm:$0xff]  }
 0x37b   :  { %8718 = vmatprep.subr.bf16.mxu0 %v9978_v55  ;;  %v10048_v59 = vld [vmem:[#allocation8 + $0x720] ss:$8 sps:$4 sm:$0xff]   ;;  %v10056_v55 = vld [vmem:[#allocation8 + $0x734] ss:$8 sps:$4 sm:$0xff]  }
 0x37d   :  { %8571 = vmatpush1.bf16.msra.mxu1 %v9973_v31  ;;  %v10054_v31 = vld [vmem:[#allocation8 + $0x730] ss:$8 sps:$4 sm:$0xff]  }
 0x37e   :  { %8719 = vmatpush1.bf16.msra.mxu0 %v9976_v57  ;;  %8572 = vmatprep.subr.bf16.mxu1 %v9981_v0  ;;  %v10059_v57 = vld [vmem:[#allocation8 + $0x3c4] ss:$8 sps:$4 sm:$0xff]  }
 0x37f   :  { %8720 = vmatprep.subr.bf16.mxu0 %v9984_v56  ;;  %v10062_v0 = vld [vmem:[#allocation8 + $0x744] ss:$8 sps:$4 sm:$0xff]   ;;  %v10057_v56 = vld [vmem:[#allocation8 + $0x3c0] ss:$8 sps:$4 sm:$0xff]  }
 0x381   :  { %8573 = vmatpush1.bf16.msra.mxu1 %v9979_v34  ;;  %v10060_v34 = vld [vmem:[#allocation8 + $0x740] ss:$8 sps:$4 sm:$0xff]  }
 0x382   :  { %8721 = vmatpush1.bf16.msra.mxu0 %v9982_v2  ;;  %8583 = vmatprep.subr.bf16.mxu1 %v9987_v60  ;;  %v10065_v2 = vld [vmem:[#allocation8 + $0x3d4] ss:$8 sps:$4 sm:$0xff]  }
 0x383   :  { %8722 = vmatprep.subr.bf16.mxu0 %v9990_v40  ;;  %v10068_v60 = vld [vmem:[#allocation8 + $0x754] ss:$8 sps:$4 sm:$0xff]   ;;  %v10063_v40 = vld [vmem:[#allocation8 + $0x3d0] ss:$8 sps:$4 sm:$0xff]  }
 0x384   :  { %8575 = vmatmul.mubr.bf16.vlgmr.msra.gmra.mrb[128].mxu1 %v6900_v36  ;;  %v10074_v36 = vld [vmem:[#allocation8 + $0x764] ss:$8 sps:$4 sm:$0xff]  }
 0x385   :  { %8584 = vmatpush1.bf16.msra.mxu1 %v9985_v35  ;;  %8615 = vmatprep.mubr.bf16.mxu1 %v6903_v17  ;;  %v10071_v35 = vld [vmem:[#allocation8 + $0x3e4] ss:$8 sps:$4 sm:$0xff]   ;;  %v10077_v17 = vld [vmem:[#allocation8 + $0x3f4] ss:$8 sps:$4 sm:$0xff]  }
 0x386   :  { %8723 = vmatpush1.bf16.msra.mxu0 %v9988_v38  ;;  %8585 = vmatprep.subr.bf16.mxu1 %v9993_v39  ;;  %v10069_v38 = vld [vmem:[#allocation8 + $0x3e0] ss:$8 sps:$4 sm:$0xff]  }
 0x387   :  { %8724 = vmatprep.subr.bf16.mxu0 %v9996_v47  ;;  %v10072_v39 = vld [vmem:[#allocation8 + $0x760] ss:$8 sps:$4 sm:$0xff]   ;;  %v10080_v47 = vld [vmem:[#allocation8 + $0x774] ss:$8 sps:$4 sm:$0xff]  }
 0x389   :  { %8586 = vmatpush1.bf16.msra.mxu1 %v9991_v42  ;;  %v10075_v42 = vld [vmem:[#allocation8 + $0x3f0] ss:$8 sps:$4 sm:$0xff]  }
 0x38a   :  { %8725 = vmatpush1.bf16.msra.mxu0 %v9994_v43  ;;  %8587 = vmatprep.subr.bf16.mxu1 %v9999_v53  ;;  %v10078_v43 = vld [vmem:[#allocation8 + $0x770] ss:$8 sps:$4 sm:$0xff]   ;;  %v10083_v53 = vld [vmem:[#allocation8 + $0x784] ss:$8 sps:$4 sm:$0xff]  }
 0x38b   :  { %8726 = vmatprep.subr.bf16.mxu0 %v10002_v44  ;;  %v6902_v44 = vpack.c.bf16 %v10840_v33, %v10840_v33  ;;  %v10098_v33 = vld [vmem:[#allocation8 + $0x7d4] ss:$8 sps:$4 sm:$0xff]  }
 0x38d   :  { %8588 = vmatpush1.bf16.msra.mxu1 %v9997_v46  ;;  %v10081_v46 = vld [vmem:[#allocation8 + $0x780] ss:$8 sps:$4 sm:$0xff]  }
 0x38e   :  { %8727 = vmatpush1.bf16.msra.mxu0 %v10000_v15  ;;  %8589 = vmatprep.subr.bf16.mxu1 %v10005_v50  ;;  %v10086_v15 = vld [vmem:[#allocation8 + $0x794] ss:$8 sps:$4 sm:$0xff]   ;;  %v10084_v50 = vld [vmem:[#allocation8 + $0x790] ss:$8 sps:$4 sm:$0xff]  }
 0x38f   :  { %8728 = vmatprep.subr.bf16.mxu0 %v10008_v18  ;;  %v10089_v18 = vld [vmem:[#allocation8 + $0x7a4] ss:$8 sps:$4 sm:$0xff]  }
 0x391   :  { %8590 = vmatpush1.bf16.msra.mxu1 %v10003_v22  ;;  %v10087_v22 = vld [vmem:[#allocation8 + $0x7a0] ss:$8 sps:$4 sm:$0xff]  }
 0x392   :  { %8729 = vmatpush1.bf16.msra.mxu0 %v10006_v25  ;;  %8591 = vmatprep.subr.bf16.mxu1 %v10011_v13  ;;  %v10092_v25 = vld [vmem:[#allocation8 + $0x7b4] ss:$8 sps:$4 sm:$0xff]   ;;  %v10090_v13 = vld [vmem:[#allocation8 + $0x7b0] ss:$8 sps:$4 sm:$0xff]  }
 0x393   :  { %8730 = vmatprep.subr.bf16.mxu0 %v10014_v30  ;;  %v10095_v30 = vld [vmem:[#allocation8 + $0x7c4] ss:$8 sps:$4 sm:$0xff]  }
 0x395   :  { %8592 = vmatpush1.bf16.msra.mxu1 %v10009_v21  ;;  %v10093_v21 = vld [vmem:[#allocation8 + $0x7c0] ss:$8 sps:$4 sm:$0xff]  }
 0x396   :  { %8731 = vmatpush1.bf16.msra.mxu0 %v10012_v62  ;;  %8593 = vmatprep.subr.bf16.mxu1 %v10017_v24  ;;  %v10096_v62 = vld [vmem:[#allocation8 + $0x7d0] ss:$8 sps:$4 sm:$0xff]   ;;  %v10101_v24 = vld [vmem:[#allocation8 + $0x7e4] ss:$8 sps:$4 sm:$0xff]  }
 0x397   :  { %8732 = vmatprep.subr.bf16.mxu0 %v10020_v1  ;;  %v10099_v1 = vld [vmem:[#allocation8 + $0x7e0] ss:$8 sps:$4 sm:$0xff]  }
 0x399   :  { %8594 = vmatpush1.bf16.msra.mxu1 %v10015_v58  ;;  %v10104_v58 = vld [vmem:[#allocation8 + $0x7f4] ss:$8 sps:$4 sm:$0xff]  }
 0x39a   :  { %8733 = vmatpush1.bf16.msra.mxu0 %v10018_v63  ;;  %8595 = vmatprep.subr.bf16.mxu1 %v10023_v12  ;;  %v10102_v63 = vld [vmem:[#allocation8 + $0x7f0] ss:$8 sps:$4 sm:$0xff]   ;;  %v6910_v12 = vpack.c.bf16 %v10849_v7, %v10849_v7 }
 0x39b   :  { %8734 = vmatprep.subr.bf16.mxu0 %v10026_v8 }
 0x39d   :  { %8596 = vmatpush1.bf16.msra.mxu1 %v10021_v9 }
 0x39e   :  { %8735 = vmatpush1.bf16.msra.mxu0 %v10024_v45  ;;  %8597 = vmatprep.subr.bf16.mxu1 %v10029_v10  ;;  %v7168_v10 = vld [vmem:[#allocation9] sm:$0x3] }
 0x39f   :  { %8736 = vmatprep.subr.bf16.mxu0 %v10032_v49  ;;  %v7173_v49 = vrot.slane %v7168_v10, %v10744_v32 }
 0x3a1   :  { %8598 = vmatpush1.bf16.msra.mxu1 %v10027_v3  ;;  %v7177_v3 = vrot.slane %v7168_v10, %v10747_v6 }
 0x3a2   :  { %8737 = vmatpush1.bf16.msra.mxu0 %v10030_v11  ;;  %8599 = vmatprep.subr.bf16.mxu1 %v10035_v61 }
 0x3a3   :  { %8747 = vmatprep.subr.bf16.mxu0 %v10038_v23 }
 0x3a5   :  { %8739 = vmatmul.mubr.bf16.vlgmr.msra.gmra.mrb[128].mxu0 %v6908_v4  ;;  %8600 = vmatpush1.bf16.msra.mxu1 %v10033_v16 }
 0x3a6   :  { %8748 = vmatpush1.bf16.msra.mxu0 %v10036_v41  ;;  %8779 = vmatprep.mubr.bf16.mxu0 %v6911_v37 }
 0x3a7   :  { %8601 = vmatprep.subr.bf16.mxu1 %v10041_v14  ;;  %8749 = vmatprep.subr.bf16.mxu0 %v10044_v19 }
 0x3a9   :  { %8602 = vmatpush1.bf16.msra.mxu1 %v10039_v48 }
 0x3aa   :  { %8750 = vmatpush1.bf16.msra.mxu0 %v10042_v28  ;;  %8603 = vmatprep.subr.bf16.mxu1 %v10047_v26 }
 0x3ab   :  { %8751 = vmatprep.subr.bf16.mxu0 %v10050_v27 }
 0x3ad   :  { %8604 = vmatpush1.bf16.msra.mxu1 %v10045_v20 }
 0x3ae   :  { %8752 = vmatpush1.bf16.msra.mxu0 %v10048_v59  ;;  %8605 = vmatprep.subr.bf16.mxu1 %v10053_v54 }
 0x3af   :  { %8753 = vmatprep.subr.bf16.mxu0 %v10056_v55 }
 0x3b1   :  { %8606 = vmatpush1.bf16.msra.mxu1 %v10051_v51 }
 0x3b2   :  { %8754 = vmatpush1.bf16.msra.mxu0 %v10054_v31  ;;  %8607 = vmatprep.subr.bf16.mxu1 %v10059_v57 }
 0x3b3   :  { %8755 = vmatprep.subr.bf16.mxu0 %v10062_v0 }
 0x3b5   :  { %8608 = vmatpush1.bf16.msra.mxu1 %v10057_v56 }
 0x3b6   :  { %8756 = vmatpush1.bf16.msra.mxu0 %v10060_v34  ;;  %8609 = vmatprep.subr.bf16.mxu1 %v10065_v2 }
 0x3b7   :  { %8757 = vmatprep.subr.bf16.mxu0 %v10068_v60 }
 0x3b9   :  { %8610 = vmatpush1.bf16.msra.mxu1 %v10063_v40 }
 0x3ba   :  { %8758 = vmatpush1.bf16.msra.mxu0 %v10066_v5  ;;  %8611 = vmatprep.subr.bf16.mxu1 %v10071_v35 }
 0x3bb   :  { %8759 = vmatprep.subr.bf16.mxu0 %v10074_v36 }
 0x3bd   :  { %8612 = vmatpush1.bf16.msra.mxu1 %v10069_v38 }
 0x3be   :  { %8760 = vmatpush1.bf16.msra.mxu0 %v10072_v39  ;;  %8613 = vmatprep.subr.bf16.mxu1 %v10077_v17 }
 0x3bf   :  { %8761 = vmatprep.subr.bf16.mxu0 %v10080_v47 }
 0x3c1   :  { %8614 = vmatpush1.bf16.msra.mxu1 %v10075_v42 }
 0x3c2   :  { %8762 = vmatpush1.bf16.msra.mxu0 %v10078_v43 }
 0x3c3   :  { %8763 = vmatprep.subr.bf16.mxu0 %v10083_v53 }
 0x3c4   :  { %8616 = vmatmul.mubr.bf16.vlgmr.msra.gmra.mrb[128].mxu1 %v6902_v44 }
 0x3c6   :  { %8764 = vmatpush1.bf16.msra.mxu0 %v10081_v46 }
 0x3c7   :  { %8765 = vmatprep.subr.bf16.mxu0 %v10086_v15 }
 0x3ca   :  { %8766 = vmatpush1.bf16.msra.mxu0 %v10084_v50 }
 0x3cb   :  { %8767 = vmatprep.subr.bf16.mxu0 %v10089_v18 }
 0x3ce   :  { %8768 = vmatpush1.bf16.msra.mxu0 %v10087_v22 }
 0x3cf   :  { %8769 = vmatprep.subr.bf16.mxu0 %v10092_v25 }
 0x3d2   :  { %8770 = vmatpush1.bf16.msra.mxu0 %v10090_v13 }
 0x3d3   :  { %8771 = vmatprep.subr.bf16.mxu0 %v10095_v30 }
 0x3d6   :  { %8772 = vmatpush1.bf16.msra.mxu0 %v10093_v21 }
 0x3d7   :  { %8773 = vmatprep.subr.bf16.mxu0 %v10098_v33 }
 0x3da   :  { %8774 = vmatpush1.bf16.msra.mxu0 %v10096_v62 }
 0x3db   :  { %8775 = vmatprep.subr.bf16.mxu0 %v10101_v24 }
 0x3de   :  { %8776 = vmatpush1.bf16.msra.mxu0 %v10099_v1 }
 0x3df   :  { %8777 = vmatprep.subr.bf16.mxu0 %v10104_v58 }
 0x3e2   :  { %8778 = vmatpush1.bf16.msra.mxu0 %v10102_v63 }
 0x3e5   :  { %8780 = vmatmul.mubr.bf16.vlgmr.msra.gmra.mrb[128].mxu0 %v6910_v12 }
 0x497   :  { %v8617_v8 = vpop.f32.mrb[128].mxu1 }
 0x498   :  { %v8619_v29 = vpop.f32.mrb[129].mxu1  ;;  %v9666_v11 = vadd.f32 %v8617_v8, %v7173_v49 }
 0x499   :  { %v8621_v9 = vpop.f32.mrb[130].mxu1  ;;  %v9668_v61 = vadd.f32 %v8619_v29, %v7177_v3 }
 0x49a   :  { %v8622_v45 = vpop.f32.mrb[131].mxu1 }
 0x4b8   :  { %v8781_v23 = vpop.f32.mrb[128].mxu0 }
 0x4b9   :  { %v9667_v52 = vadd.f32 %v9666_v11, %v8781_v23  ;;  %v8783_v16 = vpop.f32.mrb[129].mxu0 }
 0x4ba   :  { %v9669_v41 = vadd.f32 %v9668_v61, %v8783_v16  ;;  %v8785_v4 = vpop.f32.mrb[130].mxu0 }
 0x4bb   :  { %v8786_v7 = vpop.f32.mrb[131].mxu0 }
 0x4bc   :  { %v8790_v14 = vcombine.low %v9667_v52, %v9669_v41 }
 0x4be   :  { %9665 = vst.sshfl [vmem:[#allocation11] sm:$0x33 pattern:$0x76325410] %v8790_v14 }
 0x4bf   :  { %10204 = shalt.err (!%p10201_p8)
}
 0x4c0   :  { %s10205_s23 = scalar_lea.hbm %s10878_s5, 64 }
 0x4c1   :  { %p10206_p9 = scmp.ne.s32.totalorder %s10878_s5, %s10205_s23  ;;  %p10209_p10 = scmp.lt.u32.totalorder %s10205_s23, %s10878_s5 }
 0x4c3   :  { %p10211_p11 = pnand %p10209_p10, %p10206_p9 }
 0x4c5   :  { %10214 = shalt.err (!%p10211_p11)
}
 0x4c6   :  { %8809 = dma.vmem_to_hbm [thread:$0]  %s8807_s18, 64, %s10878_s5, [#allocation5]  }
 0x4c7   :  { %10221 = dma.done.wait [#allocation5], 64  }
 0x4c8   :  { %10222 = vsyncadd [#allocation5], 4294967232 }
 0x4c9   :  { %8813 = vsyncpa [#allocation4], 1 }
 0x4ca   :  { %8814 = vsyncpa [#allocation7], 1 }
 0x4cb   :  { %8815 = vsyncpa [#allocation10], 1 }
 0x4cc   :  { %8816 = vsyncpa [#allocation5], 1 }

</bundles_post_ra>
